<compile_context>
chip_gen: v5e
topology: v5e:2x2
jax: 0.10.0
libtpu: 0.0.40
codegen_flags: <defaults>
</compile_context>

<pallas_src>
import functools

import jax
import jax.numpy as jnp
from jax import lax
from jax.experimental import pallas as pl
from jax.experimental.pallas import tpu as pltpu


_VMEM_FRACTION = 0.75  # fraction of physical VMEM handed to the scoped limit


@functools.lru_cache(maxsize=None)
def _vmem_limit_bytes():
    """Scoped VMEM limit derived from the actual chip (v5e/v6e 128 MiB, v7x 64 MiB)."""
    cap = 64 * 1024 * 1024
    try:
        cap = int(getattr(pltpu.get_tpu_info(), "vmem_capacity_bytes", cap))
    except Exception:
        pass
    return max(32 * 1024 * 1024, int(cap * _VMEM_FRACTION))


def _gelu_exact(x):
    # PyTorch nn.GELU() default = exact erf formulation (kept in f32).
    # TODO(synk): tanh-approx GELU is cheaper on v5e (EUP) but changes numerics.
    return 0.5 * x * (1.0 + lax.erf(x / jnp.sqrt(2.0).astype(x.dtype)))


def _layernorm(x, gamma, beta, eps=1e-5):
    mu = jnp.mean(x, axis=-1, keepdims=True)
    var = jnp.mean((x - mu) ** 2, axis=-1, keepdims=True)
    return (x - mu) * lax.rsqrt(var + eps) * gamma + beta


def _round_up(n, m):
    return ((n + m - 1) // m) * m


def _pick_divisor(n, target, mult):
    """Largest divisor of n that is a multiple of `mult` and <= target (else n)."""
    best = None
    cand = mult
    while cand <= min(n, target):
        if n % cand == 0:
            best = cand
        cand += mult
    return best if best is not None else n


def _const_spec(shape, grid_rank, single_buffer):
    """Block index never changes -> fetched once, stays resident in VMEM."""
    zeros = (0,) * len(shape)
    idx = {1: (lambda i: zeros),
           2: (lambda i, j: zeros),
           3: (lambda i, j, k: zeros)}[grid_rank]
    if single_buffer:
        # Constant-index blocks never re-fetch; the default second pipeline
        # buffer is pure VMEM waste (matters most under v7x's 64 MiB budget).
        return pl.BlockSpec(shape, idx, pipeline_mode=pl.Buffered(1))
    return pl.BlockSpec(shape, idx)


# --------------------------- attention + residual ---------------------------

def _attn_block_kernel(x_ref, g1_ref, b1_ref, wqkv_ref, wproj_ref, bproj_ref,
                       o_ref, qkv_ref, kt_ref, cat_ref,
                       *, num_heads, head_dim, seq_len):
    cdt = qkv_ref.dtype                       # compute dtype for matmul inputs
    C = num_heads * head_dim
    Np = qkv_ref.shape[0]                     # padded sequence length

    x = x_ref[...].astype(jnp.float32)                          # (Np, C)
    xn = _layernorm(x, g1_ref[...], b1_ref[...]).astype(cdt)    # (Np, C)

    # q | k | v for all heads in one MXU matmul, token-major layout.
    # Softmax scale is pre-folded into the Q columns of the packed weight.
    qkv_ref[...] = jnp.dot(xn, wqkv_ref[...],
                           preferred_element_type=jnp.float32).astype(cdt)  # (Np, 3C)

    # One (Np, C) -> (C, Np) transpose so every per-head score matmul is a
    # plain (M,K)x(K,N) MXU shape (no per-head XLU transposes inside the loop).
    kt_ref[...] = qkv_ref[:, C:2 * C].T                          # (C, Np)

    if seq_len < Np:
        key_mask = lax.broadcasted_iota(jnp.int32, (Np, Np), 1) < seq_len
    else:
        key_mask = None

    # Static Python loop -> all head slices are static lane/sublane slices.
    for h in range(num_heads):
        lo = h * head_dim
        qh = qkv_ref[:, lo:lo + head_dim]                        # (Np, D)
        kh = kt_ref[lo:lo + head_dim, :]                         # (D, Np)
        vh = qkv_ref[:, 2 * C + lo:2 * C + lo + head_dim]        # (Np, D)

        s = jnp.dot(qh, kh, preferred_element_type=jnp.float32)  # (Np, Np)
        if key_mask is not None:
            s = jnp.where(key_mask, s, -1e30)                    # mask padded keys
        s = s - jnp.max(s, axis=-1, keepdims=True)
        p = jnp.exp(s)
        p = p * pl.reciprocal(jnp.sum(p, axis=-1, keepdims=True), approx=True)

        oh = jnp.dot(p.astype(cdt), vh,
                     preferred_element_type=jnp.float32)          # (Np, D)
        cat_ref[:, lo:lo + head_dim] = oh.astype(cdt)

    # Single output projection with full contraction depth C + residual + bias.
    o_ref[...] = (x + bproj_ref[...]
                  + jnp.dot(cat_ref[...], wproj_ref[...],
                            preferred_element_type=jnp.float32)).astype(o_ref.dtype)


# ------------------------------ MLP + residual ------------------------------

def _mlp_block_kernel(x_ref, g2_ref, b2_ref, w1_ref, b1_ref, w2_ref, bfc2_ref,
                      o_ref, *, hidden_chunk):
    cdt = w1_ref.dtype
    Hm = w1_ref.shape[1]

    x = x_ref[...].astype(jnp.float32)                            # (tn, C)
    xn = _layernorm(x, g2_ref[...], b2_ref[...]).astype(cdt)      # (tn, C)
    acc = x + bfc2_ref[...]                                       # residual + fc2 bias

    # fc1/fc2 are fully resident in VMEM; chunk the hidden dim with static,
    # 128-aligned slices just to bound the f32 intermediate.
    for k in range(Hm // hidden_chunk):
        lo = k * hidden_chunk
        h = jnp.dot(xn, w1_ref[:, lo:lo + hidden_chunk],
                    preferred_element_type=jnp.float32) + b1_ref[:, lo:lo + hidden_chunk]
        h = _gelu_exact(h)
        acc = acc + jnp.dot(h.astype(cdt), w2_ref[lo:lo + hidden_chunk, :],
                            preferred_element_type=jnp.float32)

    o_ref[...] = acc.astype(o_ref.dtype)


# --------------------------------- wrapper ----------------------------------

def prepare_block_params(params, *, num_heads, compute_dtype=jnp.bfloat16):
    """One-time weight packing: bf16 cast, softmax scale folded into Q columns."""
    C = params["wproj"].shape[0]
    D = C // num_heads
    scale = jnp.float32(D ** -0.5)
    wqkv = params["wqkv"].astype(jnp.float32)          # (C, 3C), columns = [q | k | v]
    wqkv = wqkv.at[:, :C].multiply(scale)              # fold softmax scale into Q
    f32 = jnp.float32
    return dict(
        g1=params["g1"].astype(f32), b1=params["b1"].astype(f32),
        wqkv=wqkv.astype(compute_dtype),
        wproj=params["wproj"].astype(compute_dtype),
        bproj=params["bproj"].astype(f32),
        g2=params["g2"].astype(f32), b2=params["b2"].astype(f32),
        w1=params["w1"].astype(compute_dtype), bb1=params["bb1"].astype(f32),
        w2=params["w2"].astype(compute_dtype), bb2=params["bb2"].astype(f32),
    )


def block_forward(x, kp, *, num_heads, token_tile=None, hidden_tile=None):
    B, N, C = x.shape
    D = C // num_heads
    Hm = kp["w1"].shape[1]
    cdt = kp["wqkv"].dtype
    vmem_limit = _vmem_limit_bytes()

    # Pad the sequence to a multiple of 128 so every lane dim is 128-aligned;
    # the softmax masks the padded keys and padded rows are sliced off at the end.
    Np = _round_up(N, 128)
    xp = x if Np == N else jnp.pad(x, ((0, 0), (0, Np - N), (0, 0)))

    # ------------- attention + residual -------------
    attn_kernel = functools.partial(_attn_block_kernel,
                                    num_heads=num_heads, head_dim=D, seq_len=N)

    def _attn_call(single_buffer):
        return pl.pallas_call(
            attn_kernel,
            out_shape=jax.ShapeDtypeStruct((B, Np, C), x.dtype),
            grid_spec=pltpu.PrefetchScalarGridSpec(
                num_scalar_prefetch=0,
                grid=(B,),
                in_specs=[
                    pl.BlockSpec((None, Np, C), lambda b: (b, 0, 0)),       # x (padded)
                    _const_spec((1, C), 1, single_buffer),                  # ln1 gamma
                    _const_spec((1, C), 1, single_buffer),                  # ln1 beta
                    _const_spec((C, 3 * C), 1, single_buffer),              # packed qkv W
                    _const_spec((C, C), 1, single_buffer),                  # proj W
                    _const_spec((1, C), 1, single_buffer),                  # proj b
                ],
                out_specs=pl.BlockSpec((None, Np, C), lambda b: (b, 0, 0)),
                scratch_shapes=[
                    pltpu.VMEM((Np, 3 * C), cdt),     # q|k|v token-major
                    pltpu.VMEM((C, Np), cdt),         # K channel-major
                    pltpu.VMEM((Np, C), cdt),         # concatenated head outputs
                ],
            ),
            compiler_params=pltpu.CompilerParams(
                dimension_semantics=("parallel",),
                vmem_limit_bytes=vmem_limit),
        )(xp, kp["g1"], kp["b1"], kp["wqkv"], kp["wproj"], kp["bproj"])

    try:
        x1 = _attn_call(True)
    except Exception:   # pipeline_mode=pl.Buffered(1) unsupported in this build
        x1 = _attn_call(False)

    # ------------- MLP + residual -------------
    T = B * Np                                          # multiple of 128 by construction
    x1_2d = x1.reshape(T, C)
    tn = token_tile or _pick_divisor(T, 512, 128)       # token tile, 128-multiple
    hc = hidden_tile or _pick_divisor(Hm, 2048, 128)    # in-kernel hidden chunk
    mlp_kernel = functools.partial(_mlp_block_kernel, hidden_chunk=hc)

    def _mlp_call(single_buffer):
        return pl.pallas_call(
            mlp_kernel,
            out_shape=jax.ShapeDtypeStruct((T, C), x.dtype),
            grid_spec=pltpu.PrefetchScalarGridSpec(
                num_scalar_prefetch=0,
                grid=(T // tn,),
                in_specs=[
                    pl.BlockSpec((tn, C), lambda t: (t, 0)),                # x1 tokens
                    _const_spec((1, C), 1, single_buffer),                  # ln2 gamma
                    _const_spec((1, C), 1, single_buffer),                  # ln2 beta
                    _const_spec((C, Hm), 1, single_buffer),                 # fc1 W (resident)
                    _const_spec((1, Hm), 1, single_buffer),                 # fc1 b
                    _const_spec((Hm, C), 1, single_buffer),                 # fc2 W (resident)
                    _const_spec((1, C), 1, single_buffer),                  # fc2 b
                ],
                out_specs=pl.BlockSpec((tn, C), lambda t: (t, 0)),
            ),
            compiler_params=pltpu.CompilerParams(
                dimension_semantics=("parallel",),
                vmem_limit_bytes=vmem_limit),
        )(x1_2d, kp["g2"], kp["b2"], kp["w1"], kp["bb1"], kp["w2"], kp["bb2"])

    try:
        out2d = _mlp_call(True)
    except Exception:
        out2d = _mlp_call(False)

    out = out2d.reshape(B, Np, C)
    if Np != N:
        out = out[:, :N, :]
    return out


# ------------------------- reference & init (f32) ---------------------------

def block_reference(x, params, *, num_heads):
    """Pure-JAX f32 reference mirroring the PyTorch forward."""
    B, N, C = x.shape
    D = C // num_heads
    scale = D ** -0.5

    def ln(v, g, b):
        mu = jnp.mean(v, -1, keepdims=True)
        var = jnp.mean((v - mu) ** 2, -1, keepdims=True)
        return (v - mu) / jnp.sqrt(var + 1e-5) * g + b

    xn = ln(x, params["g1"][0], params["b1"][0])
    qkv = xn @ params["wqkv"]
    qkv = qkv.reshape(B, N, 3, num_heads, D).transpose(2, 0, 3, 1, 4)
    q, k, v = qkv[0], qkv[1], qkv[2]
    attn = jnp.einsum("bhnd,bhmd->bhnm", q, k) * scale
    attn = jax.nn.softmax(attn, axis=-1)
    o = jnp.einsum("bhnm,bhmd->bhnd", attn, v)
    o = o.transpose(0, 2, 1, 3).reshape(B, N, C)
    o = o @ params["wproj"] + params["bproj"][0]
    x = x + o
    xn = ln(x, params["g2"][0], params["b2"][0])
    h = xn @ params["w1"] + params["bb1"][0]
    h = 0.5 * h * (1.0 + lax.erf(h / jnp.sqrt(2.0)))
    h = h @ params["w2"] + params["bb2"][0]
    return x + h


def init_params(key, dim, num_heads, mlp_ratio=4.0):
    H = int(dim * mlp_ratio)
    ks = jax.random.split(key, 4)
    s = 0.02
    return {
        "g1": jnp.ones((1, dim), jnp.float32),
        "b1": jnp.zeros((1, dim), jnp.float32),
        "wqkv": s * jax.random.normal(ks[0], (dim, 3 * dim), jnp.float32),
        "wproj": s * jax.random.normal(ks[1], (dim, dim), jnp.float32),
        "bproj": jnp.zeros((1, dim), jnp.float32),
        "g2": jnp.ones((1, dim), jnp.float32),
        "b2": jnp.zeros((1, dim), jnp.float32),
        "w1": s * jax.random.normal(ks[2], (dim, H), jnp.float32),
        "bb1": jnp.zeros((1, H), jnp.float32),
        "w2": s * jax.random.normal(ks[3], (H, dim), jnp.float32),
        "bb2": jnp.zeros((1, dim), jnp.float32),
    }


if __name__ == "__main__":
    def _check(B, N, dim, num_heads):
        key = jax.random.PRNGKey(0)
        kx, kparam = jax.random.split(key)
        x = jax.random.normal(kx, (B, N, dim), jnp.float32)
        params = init_params(kparam, dim, num_heads)
        kparams = prepare_block_params(params, num_heads=num_heads)

        out = jax.block_until_ready(block_forward(x, kparams, num_heads=num_heads))
        ref = block_reference(x, params, num_heads=num_heads)
        assert out.shape == (B, N, dim)
        err = float(jnp.max(jnp.abs(out - ref)))
        # bf16 matmul inputs vs f32 reference -> small deviation is expected.
        assert jnp.allclose(out, ref, atol=2e-2, rtol=2e-2), f"max err {err}"
        return err

    _check(2, 8, 32, 4)      # tiny smoke shape (pads N 8 -> 128, exercises key masking)
    _check(4, 130, 64, 8)    # non-128-multiple N, 8 heads, multi-tile MLP token grid
    print("KERNEL_OK")
</pallas_src>

<mosaic_0001>
module attributes {stable_mosaic.version = 11 : i64} {
  func.func @_attn_block_kernel(%arg0: i32, %arg1: memref<1x128x32xf32, #tpu.memory_space<vmem>>, %arg2: memref<1x32xf32, #tpu.memory_space<vmem>>, %arg3: memref<1x32xf32, #tpu.memory_space<vmem>>, %arg4: memref<32x96xbf16, #tpu.memory_space<vmem>>, %arg5: memref<32x32xbf16, #tpu.memory_space<vmem>>, %arg6: memref<1x32xf32, #tpu.memory_space<vmem>>, %arg7: memref<1x128x32xf32, #tpu.memory_space<vmem>>, %arg8: memref<128x96xbf16, #tpu.memory_space<vmem>>, %arg9: memref<32x128xbf16, #tpu.memory_space<vmem>>, %arg10: memref<128x32xbf16, #tpu.memory_space<vmem>>) attributes {dimension_semantics = [#tpu.dimension_semantics<parallel>], iteration_bounds = array<i64: 2>, scalar_prefetch = 0 : i64, scratch_operands = 3 : i64, tpu.core_type = #tpu.core_type<tc>, window_params = [{transform_indices = @transform_0, window_bounds = array<i64: 1, 128, 32>}, {pipeline_mode = #tpu.pipeline_mode<synchronous>, transform_indices = @transform_1, window_bounds = array<i64: 1, 32>}, {pipeline_mode = #tpu.pipeline_mode<synchronous>, transform_indices = @transform_2, window_bounds = array<i64: 1, 32>}, {pipeline_mode = #tpu.pipeline_mode<synchronous>, transform_indices = @transform_3, window_bounds = array<i64: 32, 96>}, {pipeline_mode = #tpu.pipeline_mode<synchronous>, transform_indices = @transform_4, window_bounds = array<i64: 32, 32>}, {pipeline_mode = #tpu.pipeline_mode<synchronous>, transform_indices = @transform_5, window_bounds = array<i64: 1, 32>}, {transform_indices = @transform_6, window_bounds = array<i64: 1, 128, 32>}]} {
    %c0 = arith.constant 0 : index
    %c0_0 = arith.constant 0 : index
    %c0_1 = arith.constant 0 : index
    %0 = vector.load %arg1[%c0, %c0_0, %c0_1] : memref<1x128x32xf32, #tpu.memory_space<vmem>>, vector<1x128x32xf32>
    %1 = vector.shape_cast %0 : vector<1x128x32xf32> to vector<128x32xf32>
    %c0_2 = arith.constant 0 : index
    %c0_3 = arith.constant 0 : index
    %2 = vector.load %arg2[%c0_2, %c0_3] : memref<1x32xf32, #tpu.memory_space<vmem>>, vector<1x32xf32>
    %c0_4 = arith.constant 0 : index
    %c0_5 = arith.constant 0 : index
    %3 = vector.load %arg3[%c0_4, %c0_5] : memref<1x32xf32, #tpu.memory_space<vmem>>, vector<1x32xf32>
    %cst = arith.constant dense<0.000000e+00> : vector<128xf32>
    %4 = vector.multi_reduction <add>, %1, %cst [1] : vector<128x32xf32> to vector<128xf32>
    %5 = vector.shape_cast %4 : vector<128xf32> to vector<128x1xf32>
    %cst_6 = arith.constant 3.200000e+01 : f32
    %6 = vector.broadcast %cst_6 : f32 to vector<128x1xf32>
    %7 = arith.divf %5, %6 : vector<128x1xf32>
    %8 = vector.broadcast %7 : vector<128x1xf32> to vector<128x32xf32>
    %9 = arith.subf %1, %8 : vector<128x32xf32>
    %10 = arith.mulf %9, %9 : vector<128x32xf32>
    %cst_7 = arith.constant dense<0.000000e+00> : vector<128xf32>
    %11 = vector.multi_reduction <add>, %10, %cst_7 [1] : vector<128x32xf32> to vector<128xf32>
    %12 = vector.shape_cast %11 : vector<128xf32> to vector<128x1xf32>
    %cst_8 = arith.constant 3.200000e+01 : f32
    %13 = vector.broadcast %cst_8 : f32 to vector<128x1xf32>
    %14 = arith.divf %12, %13 : vector<128x1xf32>
    %15 = vector.broadcast %7 : vector<128x1xf32> to vector<128x32xf32>
    %16 = arith.subf %1, %15 : vector<128x32xf32>
    %cst_9 = arith.constant 9.99999974E-6 : f32
    %17 = vector.broadcast %cst_9 : f32 to vector<128x1xf32>
    %18 = arith.addf %14, %17 : vector<128x1xf32>
    %19 = math.rsqrt %18 : vector<128x1xf32>
    %20 = vector.broadcast %19 : vector<128x1xf32> to vector<128x32xf32>
    %21 = arith.mulf %16, %20 : vector<128x32xf32>
    %22 = vector.broadcast %2 : vector<1x32xf32> to vector<128x32xf32>
    %23 = arith.mulf %21, %22 : vector<128x32xf32>
    %24 = vector.broadcast %3 : vector<1x32xf32> to vector<128x32xf32>
    %25 = arith.addf %23, %24 : vector<128x32xf32>
    %26 = arith.truncf %25 : vector<128x32xf32> to vector<128x32xbf16>
    %c0_10 = arith.constant 0 : index
    %c0_11 = arith.constant 0 : index
    %27 = vector.load %arg4[%c0_10, %c0_11] : memref<32x96xbf16, #tpu.memory_space<vmem>>, vector<32x96xbf16>
    %cst_12 = arith.constant dense<0.000000e+00> : vector<128x96xf32>
    %28 = tpu.matmul %26, %27, %cst_12 {dimension_numbers = #tpu.dot_dimension_numbers<[1], [0], [0], [1], [0, 0, 1, 1], [], []>} : vector<128x32xbf16>, vector<32x96xbf16>, vector<128x96xf32> -> vector<128x96xf32>
    %29 = arith.truncf %28 : vector<128x96xf32> to vector<128x96xbf16>
    %c0_13 = arith.constant 0 : index
    %c0_14 = arith.constant 0 : index
    %30 = vector.load %arg8[%c0_13, %c0_14] : memref<128x96xbf16, #tpu.memory_space<vmem>>, vector<128x96xbf16>
    tpu.vector_store %arg8[%c0_13, %c0_14], %29 {strides = array<i32>} : memref<128x96xbf16, #tpu.memory_space<vmem>>, vector<128x96xbf16>,
    %c0_15 = arith.constant 0 : index
    %c32 = arith.constant 32 : index
    %31 = vector.load %arg8[%c0_15, %c32] : memref<128x96xbf16, #tpu.memory_space<vmem>>, vector<128x32xbf16>
    %32 = tpu.transpose %31, [1, 0] : vector<128x32xbf16> -> vector<32x128xbf16>
    %c0_16 = arith.constant 0 : index
    %c0_17 = arith.constant 0 : index
    %33 = vector.load %arg9[%c0_16, %c0_17] : memref<32x128xbf16, #tpu.memory_space<vmem>>, vector<32x128xbf16>
    tpu.vector_store %arg9[%c0_16, %c0_17], %32 {strides = array<i32>} : memref<32x128xbf16, #tpu.memory_space<vmem>>, vector<32x128xbf16>,
    %34 = tpu.iota {dimensions = array<i32: 1>} : vector<128x128xi32>
    %c8_i32 = arith.constant 8 : i32
    %35 = vector.broadcast %c8_i32 : i32 to vector<128x128xi32>
    %36 = arith.cmpi slt, %34, %35 : vector<128x128xi32>
    %c0_18 = arith.constant 0 : index
    %c0_19 = arith.constant 0 : index
    %37 = vector.load %arg8[%c0_18, %c0_19] : memref<128x96xbf16, #tpu.memory_space<vmem>>, vector<128x8xbf16>
    %c0_20 = arith.constant 0 : index
    %c0_21 = arith.constant 0 : index
    %38 = vector.load %arg9[%c0_20, %c0_21] : memref<32x128xbf16, #tpu.memory_space<vmem>>, vector<8x128xbf16>
    %c0_22 = arith.constant 0 : index
    %c64 = arith.constant 64 : index
    %39 = vector.load %arg8[%c0_22, %c64] : memref<128x96xbf16, #tpu.memory_space<vmem>>, vector<128x8xbf16>
    %cst_23 = arith.constant dense<0.000000e+00> : vector<128x128xf32>
    %40 = tpu.matmul %37, %38, %cst_23 {dimension_numbers = #tpu.dot_dimension_numbers<[1], [0], [0], [1], [0, 0, 1, 1], [], []>} : vector<128x8xbf16>, vector<8x128xbf16>, vector<128x128xf32> -> vector<128x128xf32>
    %cst_24 = arith.constant -1.000000e+30 : f32
    %41 = vector.broadcast %cst_24 : f32 to vector<128x128xf32>
    %42 = arith.select %36, %40, %41 : vector<128x128xi1>, vector<128x128xf32>
    %cst_25 = arith.constant dense<0xFF800000> : vector<128xf32>
    %43 = vector.multi_reduction <maximumf>, %42, %cst_25 [1] : vector<128x128xf32> to vector<128xf32>
    %44 = vector.shape_cast %43 : vector<128xf32> to vector<128x1xf32>
    %45 = vector.broadcast %44 : vector<128x1xf32> to vector<128x128xf32>
    %46 = arith.subf %42, %45 : vector<128x128xf32>
    %47 = math.exp %46 : vector<128x128xf32>
    %cst_26 = arith.constant dense<0.000000e+00> : vector<128xf32>
    %48 = vector.multi_reduction <add>, %47, %cst_26 [1] : vector<128x128xf32> to vector<128xf32>
    %49 = vector.shape_cast %48 : vector<128xf32> to vector<128x1xf32>
    %50 = tpu.reciprocal %49 {approx = true} : vector<128x1xf32> -> vector<128x1xf32>
    %51 = vector.broadcast %50 : vector<128x1xf32> to vector<128x128xf32>
    %52 = arith.mulf %47, %51 : vector<128x128xf32>
    %53 = arith.truncf %52 : vector<128x128xf32> to vector<128x128xbf16>
    %cst_27 = arith.constant dense<0.000000e+00> : vector<128x8xf32>
    %54 = tpu.matmul %53, %39, %cst_27 {dimension_numbers = #tpu.dot_dimension_numbers<[1], [0], [0], [1], [0, 0, 1, 1], [], []>} : vector<128x128xbf16>, vector<128x8xbf16>, vector<128x8xf32> -> vector<128x8xf32>
    %55 = arith.truncf %54 : vector<128x8xf32> to vector<128x8xbf16>
    %c0_28 = arith.constant 0 : index
    %c0_29 = arith.constant 0 : index
    %56 = vector.load %arg10[%c0_28, %c0_29] : memref<128x32xbf16, #tpu.memory_space<vmem>>, vector<128x8xbf16>
    tpu.vector_store %arg10[%c0_28, %c0_29], %55 {strides = array<i32>} : memref<128x32xbf16, #tpu.memory_space<vmem>>, vector<128x8xbf16>,
    %c0_30 = arith.constant 0 : index
    %c8 = arith.constant 8 : index
    %57 = vector.load %arg8[%c0_30, %c8] : memref<128x96xbf16, #tpu.memory_space<vmem>>, vector<128x8xbf16>
    %c8_31 = arith.constant 8 : index
    %c0_32 = arith.constant 0 : index
    %58 = vector.load %arg9[%c8_31, %c0_32] : memref<32x128xbf16, #tpu.memory_space<vmem>>, vector<8x128xbf16>
    %c0_33 = arith.constant 0 : index
    %c72 = arith.constant 72 : index
    %59 = vector.load %arg8[%c0_33, %c72] : memref<128x96xbf16, #tpu.memory_space<vmem>>, vector<128x8xbf16>
    %cst_34 = arith.constant dense<0.000000e+00> : vector<128x128xf32>
    %60 = tpu.matmul %57, %58, %cst_34 {dimension_numbers = #tpu.dot_dimension_numbers<[1], [0], [0], [1], [0, 0, 1, 1], [], []>} : vector<128x8xbf16>, vector<8x128xbf16>, vector<128x128xf32> -> vector<128x128xf32>
    %cst_35 = arith.constant -1.000000e+30 : f32
    %61 = vector.broadcast %cst_35 : f32 to vector<128x128xf32>
    %62 = arith.select %36, %60, %61 : vector<128x128xi1>, vector<128x128xf32>
    %cst_36 = arith.constant dense<0xFF800000> : vector<128xf32>
    %63 = vector.multi_reduction <maximumf>, %62, %cst_36 [1] : vector<128x128xf32> to vector<128xf32>
    %64 = vector.shape_cast %63 : vector<128xf32> to vector<128x1xf32>
    %65 = vector.broadcast %64 : vector<128x1xf32> to vector<128x128xf32>
    %66 = arith.subf %62, %65 : vector<128x128xf32>
    %67 = math.exp %66 : vector<128x128xf32>
    %cst_37 = arith.constant dense<0.000000e+00> : vector<128xf32>
    %68 = vector.multi_reduction <add>, %67, %cst_37 [1] : vector<128x128xf32> to vector<128xf32>
    %69 = vector.shape_cast %68 : vector<128xf32> to vector<128x1xf32>
    %70 = tpu.reciprocal %69 {approx = true} : vector<128x1xf32> -> vector<128x1xf32>
    %71 = vector.broadcast %70 : vector<128x1xf32> to vector<128x128xf32>
    %72 = arith.mulf %67, %71 : vector<128x128xf32>
    %73 = arith.truncf %72 : vector<128x128xf32> to vector<128x128xbf16>
    %cst_38 = arith.constant dense<0.000000e+00> : vector<128x8xf32>
    %74 = tpu.matmul %73, %59, %cst_38 {dimension_numbers = #tpu.dot_dimension_numbers<[1], [0], [0], [1], [0, 0, 1, 1], [], []>} : vector<128x128xbf16>, vector<128x8xbf16>, vector<128x8xf32> -> vector<128x8xf32>
    %75 = arith.truncf %74 : vector<128x8xf32> to vector<128x8xbf16>
    %c0_39 = arith.constant 0 : index
    %c8_40 = arith.constant 8 : index
    %76 = vector.load %arg10[%c0_39, %c8_40] : memref<128x32xbf16, #tpu.memory_space<vmem>>, vector<128x8xbf16>
    tpu.vector_store %arg10[%c0_39, %c8_40], %75 {strides = array<i32>} : memref<128x32xbf16, #tpu.memory_space<vmem>>, vector<128x8xbf16>,
    %c0_41 = arith.constant 0 : index
    %c16 = arith.constant 16 : index
    %77 = vector.load %arg8[%c0_41, %c16] : memref<128x96xbf16, #tpu.memory_space<vmem>>, vector<128x8xbf16>
    %c16_42 = arith.constant 16 : index
    %c0_43 = arith.constant 0 : index
    %78 = vector.load %arg9[%c16_42, %c0_43] : memref<32x128xbf16, #tpu.memory_space<vmem>>, vector<8x128xbf16>
    %c0_44 = arith.constant 0 : index
    %c80 = arith.constant 80 : index
    %79 = vector.load %arg8[%c0_44, %c80] : memref<128x96xbf16, #tpu.memory_space<vmem>>, vector<128x8xbf16>
    %cst_45 = arith.constant dense<0.000000e+00> : vector<128x128xf32>
    %80 = tpu.matmul %77, %78, %cst_45 {dimension_numbers = #tpu.dot_dimension_numbers<[1], [0], [0], [1], [0, 0, 1, 1], [], []>} : vector<128x8xbf16>, vector<8x128xbf16>, vector<128x128xf32> -> vector<128x128xf32>
    %cst_46 = arith.constant -1.000000e+30 : f32
    %81 = vector.broadcast %cst_46 : f32 to vector<128x128xf32>
    %82 = arith.select %36, %80, %81 : vector<128x128xi1>, vector<128x128xf32>
    %cst_47 = arith.constant dense<0xFF800000> : vector<128xf32>
    %83 = vector.multi_reduction <maximumf>, %82, %cst_47 [1] : vector<128x128xf32> to vector<128xf32>
    %84 = vector.shape_cast %83 : vector<128xf32> to vector<128x1xf32>
    %85 = vector.broadcast %84 : vector<128x1xf32> to vector<128x128xf32>
    %86 = arith.subf %82, %85 : vector<128x128xf32>
    %87 = math.exp %86 : vector<128x128xf32>
    %cst_48 = arith.constant dense<0.000000e+00> : vector<128xf32>
    %88 = vector.multi_reduction <add>, %87, %cst_48 [1] : vector<128x128xf32> to vector<128xf32>
    %89 = vector.shape_cast %88 : vector<128xf32> to vector<128x1xf32>
    %90 = tpu.reciprocal %89 {approx = true} : vector<128x1xf32> -> vector<128x1xf32>
    %91 = vector.broadcast %90 : vector<128x1xf32> to vector<128x128xf32>
    %92 = arith.mulf %87, %91 : vector<128x128xf32>
    %93 = arith.truncf %92 : vector<128x128xf32> to vector<128x128xbf16>
    %cst_49 = arith.constant dense<0.000000e+00> : vector<128x8xf32>
    %94 = tpu.matmul %93, %79, %cst_49 {dimension_numbers = #tpu.dot_dimension_numbers<[1], [0], [0], [1], [0, 0, 1, 1], [], []>} : vector<128x128xbf16>, vector<128x8xbf16>, vector<128x8xf32> -> vector<128x8xf32>
    %95 = arith.truncf %94 : vector<128x8xf32> to vector<128x8xbf16>
    %c0_50 = arith.constant 0 : index
    %c16_51 = arith.constant 16 : index
    %96 = vector.load %arg10[%c0_50, %c16_51] : memref<128x32xbf16, #tpu.memory_space<vmem>>, vector<128x8xbf16>
    tpu.vector_store %arg10[%c0_50, %c16_51], %95 {strides = array<i32>} : memref<128x32xbf16, #tpu.memory_space<vmem>>, vector<128x8xbf16>,
    %c0_52 = arith.constant 0 : index
    %c24 = arith.constant 24 : index
    %97 = vector.load %arg8[%c0_52, %c24] : memref<128x96xbf16, #tpu.memory_space<vmem>>, vector<128x8xbf16>
    %c24_53 = arith.constant 24 : index
    %c0_54 = arith.constant 0 : index
    %98 = vector.load %arg9[%c24_53, %c0_54] : memref<32x128xbf16, #tpu.memory_space<vmem>>, vector<8x128xbf16>
    %c0_55 = arith.constant 0 : index
    %c88 = arith.constant 88 : index
    %99 = vector.load %arg8[%c0_55, %c88] : memref<128x96xbf16, #tpu.memory_space<vmem>>, vector<128x8xbf16>
    %cst_56 = arith.constant dense<0.000000e+00> : vector<128x128xf32>
    %100 = tpu.matmul %97, %98, %cst_56 {dimension_numbers = #tpu.dot_dimension_numbers<[1], [0], [0], [1], [0, 0, 1, 1], [], []>} : vector<128x8xbf16>, vector<8x128xbf16>, vector<128x128xf32> -> vector<128x128xf32>
    %cst_57 = arith.constant -1.000000e+30 : f32
    %101 = vector.broadcast %cst_57 : f32 to vector<128x128xf32>
    %102 = arith.select %36, %100, %101 : vector<128x128xi1>, vector<128x128xf32>
    %cst_58 = arith.constant dense<0xFF800000> : vector<128xf32>
    %103 = vector.multi_reduction <maximumf>, %102, %cst_58 [1] : vector<128x128xf32> to vector<128xf32>
    %104 = vector.shape_cast %103 : vector<128xf32> to vector<128x1xf32>
    %105 = vector.broadcast %104 : vector<128x1xf32> to vector<128x128xf32>
    %106 = arith.subf %102, %105 : vector<128x128xf32>
    %107 = math.exp %106 : vector<128x128xf32>
    %cst_59 = arith.constant dense<0.000000e+00> : vector<128xf32>
    %108 = vector.multi_reduction <add>, %107, %cst_59 [1] : vector<128x128xf32> to vector<128xf32>
    %109 = vector.shape_cast %108 : vector<128xf32> to vector<128x1xf32>
    %110 = tpu.reciprocal %109 {approx = true} : vector<128x1xf32> -> vector<128x1xf32>
    %111 = vector.broadcast %110 : vector<128x1xf32> to vector<128x128xf32>
    %112 = arith.mulf %107, %111 : vector<128x128xf32>
    %113 = arith.truncf %112 : vector<128x128xf32> to vector<128x128xbf16>
    %cst_60 = arith.constant dense<0.000000e+00> : vector<128x8xf32>
    %114 = tpu.matmul %113, %99, %cst_60 {dimension_numbers = #tpu.dot_dimension_numbers<[1], [0], [0], [1], [0, 0, 1, 1], [], []>} : vector<128x128xbf16>, vector<128x8xbf16>, vector<128x8xf32> -> vector<128x8xf32>
    %115 = arith.truncf %114 : vector<128x8xf32> to vector<128x8xbf16>
    %c0_61 = arith.constant 0 : index
    %c24_62 = arith.constant 24 : index
    %116 = vector.load %arg10[%c0_61, %c24_62] : memref<128x32xbf16, #tpu.memory_space<vmem>>, vector<128x8xbf16>
    tpu.vector_store %arg10[%c0_61, %c24_62], %115 {strides = array<i32>} : memref<128x32xbf16, #tpu.memory_space<vmem>>, vector<128x8xbf16>,
    %c0_63 = arith.constant 0 : index
    %c0_64 = arith.constant 0 : index
    %117 = vector.load %arg6[%c0_63, %c0_64] : memref<1x32xf32, #tpu.memory_space<vmem>>, vector<1x32xf32>
    %118 = vector.broadcast %117 : vector<1x32xf32> to vector<128x32xf32>
    %119 = arith.addf %1, %118 : vector<128x32xf32>
    %c0_65 = arith.constant 0 : index
    %c0_66 = arith.constant 0 : index
    %120 = vector.load %arg10[%c0_65, %c0_66] : memref<128x32xbf16, #tpu.memory_space<vmem>>, vector<128x32xbf16>
    %c0_67 = arith.constant 0 : index
    %c0_68 = arith.constant 0 : index
    %121 = vector.load %arg5[%c0_67, %c0_68] : memref<32x32xbf16, #tpu.memory_space<vmem>>, vector<32x32xbf16>
    %cst_69 = arith.constant dense<0.000000e+00> : vector<128x32xf32>
    %122 = tpu.matmul %120, %121, %cst_69 {dimension_numbers = #tpu.dot_dimension_numbers<[1], [0], [0], [1], [0, 0, 1, 1], [], []>} : vector<128x32xbf16>, vector<32x32xbf16>, vector<128x32xf32> -> vector<128x32xf32>
    %123 = arith.addf %119, %122 : vector<128x32xf32>
    %c0_70 = arith.constant 0 : index
    %c0_71 = arith.constant 0 : index
    %c0_72 = arith.constant 0 : index
    %124 = vector.load %arg7[%c0_70, %c0_71, %c0_72] : memref<1x128x32xf32, #tpu.memory_space<vmem>>, vector<1x128x32xf32>
    %125 = vector.shape_cast %124 : vector<1x128x32xf32> to vector<128x32xf32>
    %126 = vector.shape_cast %123 : vector<128x32xf32> to vector<1x128x32xf32>
    tpu.vector_store %arg7[%c0_70, %c0_71, %c0_72], %126 {strides = array<i32>} : memref<1x128x32xf32, #tpu.memory_space<vmem>>, vector<1x128x32xf32>,
    return
  }
  func.func @transform_0(%arg0: i32) -> (i32, i32, i32) {
    %c0_i32 = arith.constant 0 : i32
    %c0_i32_0 = arith.constant 0 : i32
    %c0_i32_1 = arith.constant 0 : i32
    return %arg0, %c0_i32, %c0_i32_0 : i32, i32, i32
  }
  func.func @transform_1(%arg0: i32) -> (i32, i32) {
    %c0_i32 = arith.constant 0 : i32
    %c0_i32_0 = arith.constant 0 : i32
    %c0_i32_1 = arith.constant 0 : i32
    return %c0_i32, %c0_i32_0 : i32, i32
  }
  func.func @transform_2(%arg0: i32) -> (i32, i32) {
    %c0_i32 = arith.constant 0 : i32
    %c0_i32_0 = arith.constant 0 : i32
    %c0_i32_1 = arith.constant 0 : i32
    return %c0_i32, %c0_i32_0 : i32, i32
  }
  func.func @transform_3(%arg0: i32) -> (i32, i32) {
    %c0_i32 = arith.constant 0 : i32
    %c0_i32_0 = arith.constant 0 : i32
    %c0_i32_1 = arith.constant 0 : i32
    return %c0_i32, %c0_i32_0 : i32, i32
  }
  func.func @transform_4(%arg0: i32) -> (i32, i32) {
    %c0_i32 = arith.constant 0 : i32
    %c0_i32_0 = arith.constant 0 : i32
    %c0_i32_1 = arith.constant 0 : i32
    return %c0_i32, %c0_i32_0 : i32, i32
  }
  func.func @transform_5(%arg0: i32) -> (i32, i32) {
    %c0_i32 = arith.constant 0 : i32
    %c0_i32_0 = arith.constant 0 : i32
    %c0_i32_1 = arith.constant 0 : i32
    return %c0_i32, %c0_i32_0 : i32, i32
  }
  func.func @transform_6(%arg0: i32) -> (i32, i32, i32) {
    %c0_i32 = arith.constant 0 : i32
    %c0_i32_0 = arith.constant 0 : i32
    %c0_i32_1 = arith.constant 0 : i32
    return %arg0, %c0_i32, %c0_i32_0 : i32, i32, i32
  }
}

module attributes {stable_mosaic.version = 11 : i64} {
  func.func @_attn_block_kernel(%arg0: i32, %arg1: memref<1x128x32xf32, #tpu.memory_space<vmem>>, %arg2: memref<1x32xf32, #tpu.memory_space<vmem>>, %arg3: memref<1x32xf32, #tpu.memory_space<vmem>>, %arg4: memref<32x96xbf16, #tpu.memory_space<vmem>>, %arg5: memref<32x32xbf16, #tpu.memory_space<vmem>>, %arg6: memref<1x32xf32, #tpu.memory_space<vmem>>, %arg7: memref<1x128x32xf32, #tpu.memory_space<vmem>>, %arg8: memref<128x96xbf16, #tpu.memory_space<vmem>>, %arg9: memref<32x128xbf16, #tpu.memory_space<vmem>>, %arg10: memref<128x32xbf16, #tpu.memory_space<vmem>>) attributes {dimension_semantics = [#tpu.dimension_semantics<parallel>], iteration_bounds = array<i64: 2>, scalar_prefetch = 0 : i64, scratch_operands = 3 : i64, tpu.core_type = #tpu.core_type<tc>, window_params = [{transform_indices = @transform_0, window_bounds = array<i64: 1, 128, 32>}, {pipeline_mode = #tpu.pipeline_mode<synchronous>, transform_indices = @transform_1, window_bounds = array<i64: 1, 32>}, {pipeline_mode = #tpu.pipeline_mode<synchronous>, transform_indices = @transform_2, window_bounds = array<i64: 1, 32>}, {pipeline_mode = #tpu.pipeline_mode<synchronous>, transform_indices = @transform_3, window_bounds = array<i64: 32, 96>}, {pipeline_mode = #tpu.pipeline_mode<synchronous>, transform_indices = @transform_4, window_bounds = array<i64: 32, 32>}, {pipeline_mode = #tpu.pipeline_mode<synchronous>, transform_indices = @transform_5, window_bounds = array<i64: 1, 32>}, {transform_indices = @transform_6, window_bounds = array<i64: 1, 128, 32>}]} {
    %c0 = arith.constant 0 : index
    %c0_0 = arith.constant 0 : index
    %c0_1 = arith.constant 0 : index
    %0 = vector.load %arg1[%c0, %c0_0, %c0_1] : memref<1x128x32xf32, #tpu.memory_space<vmem>>, vector<1x128x32xf32>
    %1 = vector.shape_cast %0 : vector<1x128x32xf32> to vector<128x32xf32>
    %c0_2 = arith.constant 0 : index
    %c0_3 = arith.constant 0 : index
    %2 = vector.load %arg2[%c0_2, %c0_3] : memref<1x32xf32, #tpu.memory_space<vmem>>, vector<1x32xf32>
    %c0_4 = arith.constant 0 : index
    %c0_5 = arith.constant 0 : index
    %3 = vector.load %arg3[%c0_4, %c0_5] : memref<1x32xf32, #tpu.memory_space<vmem>>, vector<1x32xf32>
    %cst = arith.constant dense<0.000000e+00> : vector<128xf32>
    %4 = vector.multi_reduction <add>, %1, %cst [1] : vector<128x32xf32> to vector<128xf32>
    %5 = vector.shape_cast %4 : vector<128xf32> to vector<128x1xf32>
    %cst_6 = arith.constant 3.200000e+01 : f32
    %6 = vector.broadcast %cst_6 : f32 to vector<128x1xf32>
    %7 = arith.divf %5, %6 : vector<128x1xf32>
    %8 = vector.broadcast %7 : vector<128x1xf32> to vector<128x32xf32>
    %9 = arith.subf %1, %8 : vector<128x32xf32>
    %10 = arith.mulf %9, %9 : vector<128x32xf32>
    %cst_7 = arith.constant dense<0.000000e+00> : vector<128xf32>
    %11 = vector.multi_reduction <add>, %10, %cst_7 [1] : vector<128x32xf32> to vector<128xf32>
    %12 = vector.shape_cast %11 : vector<128xf32> to vector<128x1xf32>
    %cst_8 = arith.constant 3.200000e+01 : f32
    %13 = vector.broadcast %cst_8 : f32 to vector<128x1xf32>
    %14 = arith.divf %12, %13 : vector<128x1xf32>
    %15 = vector.broadcast %7 : vector<128x1xf32> to vector<128x32xf32>
    %16 = arith.subf %1, %15 : vector<128x32xf32>
    %cst_9 = arith.constant 9.99999974E-6 : f32
    %17 = vector.broadcast %cst_9 : f32 to vector<128x1xf32>
    %18 = arith.addf %14, %17 : vector<128x1xf32>
    %19 = math.rsqrt %18 : vector<128x1xf32>
    %20 = vector.broadcast %19 : vector<128x1xf32> to vector<128x32xf32>
    %21 = arith.mulf %16, %20 : vector<128x32xf32>
    %22 = vector.broadcast %2 : vector<1x32xf32> to vector<128x32xf32>
    %23 = arith.mulf %21, %22 : vector<128x32xf32>
    %24 = vector.broadcast %3 : vector<1x32xf32> to vector<128x32xf32>
    %25 = arith.addf %23, %24 : vector<128x32xf32>
    %26 = arith.truncf %25 : vector<128x32xf32> to vector<128x32xbf16>
    %c0_10 = arith.constant 0 : index
    %c0_11 = arith.constant 0 : index
    %27 = vector.load %arg4[%c0_10, %c0_11] : memref<32x96xbf16, #tpu.memory_space<vmem>>, vector<32x96xbf16>
    %cst_12 = arith.constant dense<0.000000e+00> : vector<128x96xf32>
    %28 = tpu.matmul %26, %27, %cst_12 {dimension_numbers = #tpu.dot_dimension_numbers<[1], [0], [0], [1], [0, 0, 1, 1], [], []>} : vector<128x32xbf16>, vector<32x96xbf16>, vector<128x96xf32> -> vector<128x96xf32>
    %29 = arith.truncf %28 : vector<128x96xf32> to vector<128x96xbf16>
    %c0_13 = arith.constant 0 : index
    %c0_14 = arith.constant 0 : index
    %30 = vector.load %arg8[%c0_13, %c0_14] : memref<128x96xbf16, #tpu.memory_space<vmem>>, vector<128x96xbf16>
    tpu.vector_store %arg8[%c0_13, %c0_14], %29 {strides = array<i32>} : memref<128x96xbf16, #tpu.memory_space<vmem>>, vector<128x96xbf16>,
    %c0_15 = arith.constant 0 : index
    %c32 = arith.constant 32 : index
    %31 = vector.load %arg8[%c0_15, %c32] : memref<128x96xbf16, #tpu.memory_space<vmem>>, vector<128x32xbf16>
    %32 = tpu.transpose %31, [1, 0] : vector<128x32xbf16> -> vector<32x128xbf16>
    %c0_16 = arith.constant 0 : index
    %c0_17 = arith.constant 0 : index
    %33 = vector.load %arg9[%c0_16, %c0_17] : memref<32x128xbf16, #tpu.memory_space<vmem>>, vector<32x128xbf16>
    tpu.vector_store %arg9[%c0_16, %c0_17], %32 {strides = array<i32>} : memref<32x128xbf16, #tpu.memory_space<vmem>>, vector<32x128xbf16>,
    %34 = tpu.iota {dimensions = array<i32: 1>} : vector<128x128xi32>
    %c8_i32 = arith.constant 8 : i32
    %35 = vector.broadcast %c8_i32 : i32 to vector<128x128xi32>
    %36 = arith.cmpi slt, %34, %35 : vector<128x128xi32>
    %c0_18 = arith.constant 0 : index
    %c0_19 = arith.constant 0 : index
    %37 = vector.load %arg8[%c0_18, %c0_19] : memref<128x96xbf16, #tpu.memory_space<vmem>>, vector<128x8xbf16>
    %c0_20 = arith.constant 0 : index
    %c0_21 = arith.constant 0 : index
    %38 = vector.load %arg9[%c0_20, %c0_21] : memref<32x128xbf16, #tpu.memory_space<vmem>>, vector<8x128xbf16>
    %c0_22 = arith.constant 0 : index
    %c64 = arith.constant 64 : index
    %39 = vector.load %arg8[%c0_22, %c64] : memref<128x96xbf16, #tpu.memory_space<vmem>>, vector<128x8xbf16>
    %cst_23 = arith.constant dense<0.000000e+00> : vector<128x128xf32>
    %40 = tpu.matmul %37, %38, %cst_23 {dimension_numbers = #tpu.dot_dimension_numbers<[1], [0], [0], [1], [0, 0, 1, 1], [], []>} : vector<128x8xbf16>, vector<8x128xbf16>, vector<128x128xf32> -> vector<128x128xf32>
    %cst_24 = arith.constant -1.000000e+30 : f32
    %41 = vector.broadcast %cst_24 : f32 to vector<128x128xf32>
    %42 = arith.select %36, %40, %41 : vector<128x128xi1>, vector<128x128xf32>
    %cst_25 = arith.constant dense<0xFF800000> : vector<128xf32>
    %43 = vector.multi_reduction <maximumf>, %42, %cst_25 [1] : vector<128x128xf32> to vector<128xf32>
    %44 = vector.shape_cast %43 : vector<128xf32> to vector<128x1xf32>
    %45 = vector.broadcast %44 : vector<128x1xf32> to vector<128x128xf32>
    %46 = arith.subf %42, %45 : vector<128x128xf32>
    %47 = math.exp %46 : vector<128x128xf32>
    %cst_26 = arith.constant dense<0.000000e+00> : vector<128xf32>
    %48 = vector.multi_reduction <add>, %47, %cst_26 [1] : vector<128x128xf32> to vector<128xf32>
    %49 = vector.shape_cast %48 : vector<128xf32> to vector<128x1xf32>
    %50 = tpu.reciprocal %49 {approx = true} : vector<128x1xf32> -> vector<128x1xf32>
    %51 = vector.broadcast %50 : vector<128x1xf32> to vector<128x128xf32>
    %52 = arith.mulf %47, %51 : vector<128x128xf32>
    %53 = arith.truncf %52 : vector<128x128xf32> to vector<128x128xbf16>
    %cst_27 = arith.constant dense<0.000000e+00> : vector<128x8xf32>
    %54 = tpu.matmul %53, %39, %cst_27 {dimension_numbers = #tpu.dot_dimension_numbers<[1], [0], [0], [1], [0, 0, 1, 1], [], []>} : vector<128x128xbf16>, vector<128x8xbf16>, vector<128x8xf32> -> vector<128x8xf32>
    %55 = arith.truncf %54 : vector<128x8xf32> to vector<128x8xbf16>
    %c0_28 = arith.constant 0 : index
    %c0_29 = arith.constant 0 : index
    %56 = vector.load %arg10[%c0_28, %c0_29] : memref<128x32xbf16, #tpu.memory_space<vmem>>, vector<128x8xbf16>
    tpu.vector_store %arg10[%c0_28, %c0_29], %55 {strides = array<i32>} : memref<128x32xbf16, #tpu.memory_space<vmem>>, vector<128x8xbf16>,
    %c0_30 = arith.constant 0 : index
    %c8 = arith.constant 8 : index
    %57 = vector.load %arg8[%c0_30, %c8] : memref<128x96xbf16, #tpu.memory_space<vmem>>, vector<128x8xbf16>
    %c8_31 = arith.constant 8 : index
    %c0_32 = arith.constant 0 : index
    %58 = vector.load %arg9[%c8_31, %c0_32] : memref<32x128xbf16, #tpu.memory_space<vmem>>, vector<8x128xbf16>
    %c0_33 = arith.constant 0 : index
    %c72 = arith.constant 72 : index
    %59 = vector.load %arg8[%c0_33, %c72] : memref<128x96xbf16, #tpu.memory_space<vmem>>, vector<128x8xbf16>
    %cst_34 = arith.constant dense<0.000000e+00> : vector<128x128xf32>
    %60 = tpu.matmul %57, %58, %cst_34 {dimension_numbers = #tpu.dot_dimension_numbers<[1], [0], [0], [1], [0, 0, 1, 1], [], []>} : vector<128x8xbf16>, vector<8x128xbf16>, vector<128x128xf32> -> vector<128x128xf32>
    %cst_35 = arith.constant -1.000000e+30 : f32
    %61 = vector.broadcast %cst_35 : f32 to vector<128x128xf32>
    %62 = arith.select %36, %60, %61 : vector<128x128xi1>, vector<128x128xf32>
    %cst_36 = arith.constant dense<0xFF800000> : vector<128xf32>
    %63 = vector.multi_reduction <maximumf>, %62, %cst_36 [1] : vector<128x128xf32> to vector<128xf32>
    %64 = vector.shape_cast %63 : vector<128xf32> to vector<128x1xf32>
    %65 = vector.broadcast %64 : vector<128x1xf32> to vector<128x128xf32>
    %66 = arith.subf %62, %65 : vector<128x128xf32>
    %67 = math.exp %66 : vector<128x128xf32>
    %cst_37 = arith.constant dense<0.000000e+00> : vector<128xf32>
    %68 = vector.multi_reduction <add>, %67, %cst_37 [1] : vector<128x128xf32> to vector<128xf32>
    %69 = vector.shape_cast %68 : vector<128xf32> to vector<128x1xf32>
    %70 = tpu.reciprocal %69 {approx = true} : vector<128x1xf32> -> vector<128x1xf32>
    %71 = vector.broadcast %70 : vector<128x1xf32> to vector<128x128xf32>
    %72 = arith.mulf %67, %71 : vector<128x128xf32>
    %73 = arith.truncf %72 : vector<128x128xf32> to vector<128x128xbf16>
    %cst_38 = arith.constant dense<0.000000e+00> : vector<128x8xf32>
    %74 = tpu.matmul %73, %59, %cst_38 {dimension_numbers = #tpu.dot_dimension_numbers<[1], [0], [0], [1], [0, 0, 1, 1], [], []>} : vector<128x128xbf16>, vector<128x8xbf16>, vector<128x8xf32> -> vector<128x8xf32>
    %75 = arith.truncf %74 : vector<128x8xf32> to vector<128x8xbf16>
    %c0_39 = arith.constant 0 : index
    %c8_40 = arith.constant 8 : index
    %76 = vector.load %arg10[%c0_39, %c8_40] : memref<128x32xbf16, #tpu.memory_space<vmem>>, vector<128x8xbf16>
    tpu.vector_store %arg10[%c0_39, %c8_40], %75 {strides = array<i32>} : memref<128x32xbf16, #tpu.memory_space<vmem>>, vector<128x8xbf16>,
    %c0_41 = arith.constant 0 : index
    %c16 = arith.constant 16 : index
    %77 = vector.load %arg8[%c0_41, %c16] : memref<128x96xbf16, #tpu.memory_space<vmem>>, vector<128x8xbf16>
    %c16_42 = arith.constant 16 : index
    %c0_43 = arith.constant 0 : index
    %78 = vector.load %arg9[%c16_42, %c0_43] : memref<32x128xbf16, #tpu.memory_space<vmem>>, vector<8x128xbf16>
    %c0_44 = arith.constant 0 : index
    %c80 = arith.constant 80 : index
    %79 = vector.load %arg8[%c0_44, %c80] : memref<128x96xbf16, #tpu.memory_space<vmem>>, vector<128x8xbf16>
    %cst_45 = arith.constant dense<0.000000e+00> : vector<128x128xf32>
    %80 = tpu.matmul %77, %78, %cst_45 {dimension_numbers = #tpu.dot_dimension_numbers<[1], [0], [0], [1], [0, 0, 1, 1], [], []>} : vector<128x8xbf16>, vector<8x128xbf16>, vector<128x128xf32> -> vector<128x128xf32>
    %cst_46 = arith.constant -1.000000e+30 : f32
    %81 = vector.broadcast %cst_46 : f32 to vector<128x128xf32>
    %82 = arith.select %36, %80, %81 : vector<128x128xi1>, vector<128x128xf32>
    %cst_47 = arith.constant dense<0xFF800000> : vector<128xf32>
    %83 = vector.multi_reduction <maximumf>, %82, %cst_47 [1] : vector<128x128xf32> to vector<128xf32>
    %84 = vector.shape_cast %83 : vector<128xf32> to vector<128x1xf32>
    %85 = vector.broadcast %84 : vector<128x1xf32> to vector<128x128xf32>
    %86 = arith.subf %82, %85 : vector<128x128xf32>
    %87 = math.exp %86 : vector<128x128xf32>
    %cst_48 = arith.constant dense<0.000000e+00> : vector<128xf32>
    %88 = vector.multi_reduction <add>, %87, %cst_48 [1] : vector<128x128xf32> to vector<128xf32>
    %89 = vector.shape_cast %88 : vector<128xf32> to vector<128x1xf32>
    %90 = tpu.reciprocal %89 {approx = true} : vector<128x1xf32> -> vector<128x1xf32>
    %91 = vector.broadcast %90 : vector<128x1xf32> to vector<128x128xf32>
    %92 = arith.mulf %87, %91 : vector<128x128xf32>
    %93 = arith.truncf %92 : vector<128x128xf32> to vector<128x128xbf16>
    %cst_49 = arith.constant dense<0.000000e+00> : vector<128x8xf32>
    %94 = tpu.matmul %93, %79, %cst_49 {dimension_numbers = #tpu.dot_dimension_numbers<[1], [0], [0], [1], [0, 0, 1, 1], [], []>} : vector<128x128xbf16>, vector<128x8xbf16>, vector<128x8xf32> -> vector<128x8xf32>
    %95 = arith.truncf %94 : vector<128x8xf32> to vector<128x8xbf16>
    %c0_50 = arith.constant 0 : index
    %c16_51 = arith.constant 16 : index
    %96 = vector.load %arg10[%c0_50, %c16_51] : memref<128x32xbf16, #tpu.memory_space<vmem>>, vector<128x8xbf16>
    tpu.vector_store %arg10[%c0_50, %c16_51], %95 {strides = array<i32>} : memref<128x32xbf16, #tpu.memory_space<vmem>>, vector<128x8xbf16>,
    %c0_52 = arith.constant 0 : index
    %c24 = arith.constant 24 : index
    %97 = vector.load %arg8[%c0_52, %c24] : memref<128x96xbf16, #tpu.memory_space<vmem>>, vector<128x8xbf16>
    %c24_53 = arith.constant 24 : index
    %c0_54 = arith.constant 0 : index
    %98 = vector.load %arg9[%c24_53, %c0_54] : memref<32x128xbf16, #tpu.memory_space<vmem>>, vector<8x128xbf16>
    %c0_55 = arith.constant 0 : index
    %c88 = arith.constant 88 : index
    %99 = vector.load %arg8[%c0_55, %c88] : memref<128x96xbf16, #tpu.memory_space<vmem>>, vector<128x8xbf16>
    %cst_56 = arith.constant dense<0.000000e+00> : vector<128x128xf32>
    %100 = tpu.matmul %97, %98, %cst_56 {dimension_numbers = #tpu.dot_dimension_numbers<[1], [0], [0], [1], [0, 0, 1, 1], [], []>} : vector<128x8xbf16>, vector<8x128xbf16>, vector<128x128xf32> -> vector<128x128xf32>
    %cst_57 = arith.constant -1.000000e+30 : f32
    %101 = vector.broadcast %cst_57 : f32 to vector<128x128xf32>
    %102 = arith.select %36, %100, %101 : vector<128x128xi1>, vector<128x128xf32>
    %cst_58 = arith.constant dense<0xFF800000> : vector<128xf32>
    %103 = vector.multi_reduction <maximumf>, %102, %cst_58 [1] : vector<128x128xf32> to vector<128xf32>
    %104 = vector.shape_cast %103 : vector<128xf32> to vector<128x1xf32>
    %105 = vector.broadcast %104 : vector<128x1xf32> to vector<128x128xf32>
    %106 = arith.subf %102, %105 : vector<128x128xf32>
    %107 = math.exp %106 : vector<128x128xf32>
    %cst_59 = arith.constant dense<0.000000e+00> : vector<128xf32>
    %108 = vector.multi_reduction <add>, %107, %cst_59 [1] : vector<128x128xf32> to vector<128xf32>
    %109 = vector.shape_cast %108 : vector<128xf32> to vector<128x1xf32>
    %110 = tpu.reciprocal %109 {approx = true} : vector<128x1xf32> -> vector<128x1xf32>
    %111 = vector.broadcast %110 : vector<128x1xf32> to vector<128x128xf32>
    %112 = arith.mulf %107, %111 : vector<128x128xf32>
    %113 = arith.truncf %112 : vector<128x128xf32> to vector<128x128xbf16>
    %cst_60 = arith.constant dense<0.000000e+00> : vector<128x8xf32>
    %114 = tpu.matmul %113, %99, %cst_60 {dimension_numbers = #tpu.dot_dimension_numbers<[1], [0], [0], [1], [0, 0, 1, 1], [], []>} : vector<128x128xbf16>, vector<128x8xbf16>, vector<128x8xf32> -> vector<128x8xf32>
    %115 = arith.truncf %114 : vector<128x8xf32> to vector<128x8xbf16>
    %c0_61 = arith.constant 0 : index
    %c24_62 = arith.constant 24 : index
    %116 = vector.load %arg10[%c0_61, %c24_62] : memref<128x32xbf16, #tpu.memory_space<vmem>>, vector<128x8xbf16>
    tpu.vector_store %arg10[%c0_61, %c24_62], %115 {strides = array<i32>} : memref<128x32xbf16, #tpu.memory_space<vmem>>, vector<128x8xbf16>,
    %c0_63 = arith.constant 0 : index
    %c0_64 = arith.constant 0 : index
    %117 = vector.load %arg6[%c0_63, %c0_64] : memref<1x32xf32, #tpu.memory_space<vmem>>, vector<1x32xf32>
    %118 = vector.broadcast %117 : vector<1x32xf32> to vector<128x32xf32>
    %119 = arith.addf %1, %118 : vector<128x32xf32>
    %c0_65 = arith.constant 0 : index
    %c0_66 = arith.constant 0 : index
    %120 = vector.load %arg10[%c0_65, %c0_66] : memref<128x32xbf16, #tpu.memory_space<vmem>>, vector<128x32xbf16>
    %c0_67 = arith.constant 0 : index
    %c0_68 = arith.constant 0 : index
    %121 = vector.load %arg5[%c0_67, %c0_68] : memref<32x32xbf16, #tpu.memory_space<vmem>>, vector<32x32xbf16>
    %cst_69 = arith.constant dense<0.000000e+00> : vector<128x32xf32>
    %122 = tpu.matmul %120, %121, %cst_69 {dimension_numbers = #tpu.dot_dimension_numbers<[1], [0], [0], [1], [0, 0, 1, 1], [], []>} : vector<128x32xbf16>, vector<32x32xbf16>, vector<128x32xf32> -> vector<128x32xf32>
    %123 = arith.addf %119, %122 : vector<128x32xf32>
    %c0_70 = arith.constant 0 : index
    %c0_71 = arith.constant 0 : index
    %c0_72 = arith.constant 0 : index
    %124 = vector.load %arg7[%c0_70, %c0_71, %c0_72] : memref<1x128x32xf32, #tpu.memory_space<vmem>>, vector<1x128x32xf32>
    %125 = vector.shape_cast %124 : vector<1x128x32xf32> to vector<128x32xf32>
    %126 = vector.shape_cast %123 : vector<128x32xf32> to vector<1x128x32xf32>
    tpu.vector_store %arg7[%c0_70, %c0_71, %c0_72], %126 {strides = array<i32>} : memref<1x128x32xf32, #tpu.memory_space<vmem>>, vector<1x128x32xf32>,
    return
  }
  func.func @transform_0(%arg0: i32) -> (i32, i32, i32) {
    %c0_i32 = arith.constant 0 : i32
    %c0_i32_0 = arith.constant 0 : i32
    %c0_i32_1 = arith.constant 0 : i32
    return %arg0, %c0_i32, %c0_i32_0 : i32, i32, i32
  }
  func.func @transform_1(%arg0: i32) -> (i32, i32) {
    %c0_i32 = arith.constant 0 : i32
    %c0_i32_0 = arith.constant 0 : i32
    %c0_i32_1 = arith.constant 0 : i32
    return %c0_i32, %c0_i32_0 : i32, i32
  }
  func.func @transform_2(%arg0: i32) -> (i32, i32) {
    %c0_i32 = arith.constant 0 : i32
    %c0_i32_0 = arith.constant 0 : i32
    %c0_i32_1 = arith.constant 0 : i32
    return %c0_i32, %c0_i32_0 : i32, i32
  }
  func.func @transform_3(%arg0: i32) -> (i32, i32) {
    %c0_i32 = arith.constant 0 : i32
    %c0_i32_0 = arith.constant 0 : i32
    %c0_i32_1 = arith.constant 0 : i32
    return %c0_i32, %c0_i32_0 : i32, i32
  }
  func.func @transform_4(%arg0: i32) -> (i32, i32) {
    %c0_i32 = arith.constant 0 : i32
    %c0_i32_0 = arith.constant 0 : i32
    %c0_i32_1 = arith.constant 0 : i32
    return %c0_i32, %c0_i32_0 : i32, i32
  }
  func.func @transform_5(%arg0: i32) -> (i32, i32) {
    %c0_i32 = arith.constant 0 : i32
    %c0_i32_0 = arith.constant 0 : i32
    %c0_i32_1 = arith.constant 0 : i32
    return %c0_i32, %c0_i32_0 : i32, i32
  }
  func.func @transform_6(%arg0: i32) -> (i32, i32, i32) {
    %c0_i32 = arith.constant 0 : i32
    %c0_i32_0 = arith.constant 0 : i32
    %c0_i32_1 = arith.constant 0 : i32
    return %arg0, %c0_i32, %c0_i32_0 : i32, i32, i32
  }
}

</mosaic_0001>

<bundles_post_ra>
// kernel: tpu_custom_call.1
= control target key start
LH: loop header
LB: loop body
LE: loop exit
PB: predicated region body
PF: predicated region fallthrough
CT: control target
= control target key end

     0   :  { %s3755_s21 = smov 0   ;;  %s5365_s0 = inlined_call_operand.vmem [shape: f32[2,128,32], index: 0, kind: input, shape index: {}]   ;;  %s5366_s1 = inlined_call_operand.vmem [shape: f32[1,32], index: 1, kind: input, shape index: {}]   ;;  %s5367_s2 = inlined_call_operand.vmem [shape: f32[1,32], index: 2, kind: input, shape index: {}]   ;;  %s5368_s3 = inlined_call_operand.vmem [shape: bf16[32,96], index: 3, kind: input, shape index: {}]   ;;  %s5369_s4 = inlined_call_operand.vmem [shape: bf16[32,32], index: 4, kind: input, shape index: {}]   ;;  %s5370_s5 = inlined_call_operand.vmem [shape: f32[1,32], index: 5, kind: input, shape index: {}]   ;;  %s5371_s6 = inlined_call_operand.vmem [shape: f32[2,128,32], index: 6, kind: output, shape index: {}]  }
   0x1 LB: > { %s3038_s22 = sadd.s32 4294967295, %s3706_s21   ;;  %p3042_p0 = scmp.ge.s32.totalorder %s3706_s21, 1  ;;  %s3706_s21 = sphi %s3755_s21, %s16_s21  }
   0x2   : > { %p212_p1 = scmp.lt.s32.totalorder %s3706_s21, 3 }
   0x4   : > { %p213_p2 = pnand %p3042_p0, %p212_p1 }
   0x6   : > { %216 = sbr.rel (%p213_p2) target bundleno = 2574 (0xa0e), region = 44 }
   0xb   : > { %p242_p3 = scmp.lt.s32.totalorder %s3038_s22, 1  ;;  %vm271_vm0 = vcmask 261120   ;;  %v3708_v14 = vmov 32.0   ;;  %s3709_s11 = smov 96  }
   0xc   : > { %3384 = vrcp.f32 %v3708_v14  ;;  %s3710_s12 = smov 64   ;;  %s3711_s13 = smov 120  }
   0xd   : > { %s5404_s22 = smov (!%p242_p3, %s3038_s22), 1  ;;  %s3712_s14 = smov 112  }
   0xe   : > { %s3305_s23 = sshll.u32 %s5404_s22, 7  ;;  %s3713_s15 = smov 104  }
   0xf   : > { %s3771_s26 = scalar_lea.vmem %s5365_s0, %s3305_s23  ;;  %s3714_s16 = smov 56  }
  0x10   : > { %v255_v0 = vld [vmem:[%s3771_s26 + $0x10] sm:$0xff]  ;;  %v253_v1 = vld [vmem:[%s3771_s26] sm:$0xff]  ;;  %v256_v6 = vld [vmem:[%s3771_s26 + $0x18] sm:$0xff]  ;;  %s3715_s17 = smov 48   ;;  %s3716_s18 = smov 40  }
  0x11   : > { %v278_v2 = vsel %vm271_vm0, %v255_v0, 0.0  ;;  %v272_v3 = vsel %vm271_vm0, %v253_v1, 0.0  ;;  %v257_v4 = vld [vmem:[%s3771_s26 + $0x20] sm:$0xff]  ;;  %v254_v7 = vld [vmem:[%s3771_s26 + $0x8] sm:$0xff]  ;;  %v281_v9 = vsel %vm271_vm0, %v256_v6, 0.0  ;;  %v259_v12 = vld [vmem:[%s3771_s26 + $0x30] sm:$0xff]  ;;  %s5280_s10 = scalar_lea.vmem %s5371_s6, %s3305_s23 }
  0x12   : > { %279 = vadd.xlane.f32.xlu1 %v278_v2  ;;  %273 = vadd.xlane.f32.xlu0 %v272_v3  ;;  %v284_v5 = vsel %vm271_vm0, %v257_v4, 0.0  ;;  %v258_v8 = vld [vmem:[%s3771_s26 + $0x28] sm:$0xff]  ;;  %v275_v10 = vsel %vm271_vm0, %v254_v7, 0.0  ;;  %v290_v13 = vsel %vm271_vm0, %v259_v12, 0.0  ;;  %v3385_v15 = vpop.eup %3384  ;;  %v3800_v34 = vld [vmem:[%s3771_s26 + $0x38] sm:$0xff]  ;;  %v3822_v47 = vld [vmem:[%s3771_s26 + $0x40] sm:$0xff] }
  0x13   : > { %285 = vadd.xlane.f32.xlu2 %v284_v5  ;;  %v287_v11 = vsel %vm271_vm0, %v258_v8, 0.0  ;;  %v321_v16 = vmul.f32 32.0, %v3385_v15  ;;  %vm325_vm1 = vweird.f32 %v3385_v15  ;;  %v293_v40 = vsel %vm271_vm0, %v3800_v34, 0.0  ;;  %v3836_v56 = vld [vmem:[%s3771_s26 + $0x58] sm:$0xff]  ;;  %v3839_v57 = vld [vmem:[%s3771_s26 + $0x48] sm:$0xff]  ;;  %v3851_v63 = vld [vmem:[%s3771_s26 + $0x60] sm:$0xff] }
  0x14   : > { %v296_v51 = vsel %vm271_vm0, %v3822_v47, 0.0  ;;  %v305_v59 = vsel %vm271_vm0, %v3836_v56, 0.0  ;;  %v299_v61 = vsel %vm271_vm0, %v3839_v57, 0.0  ;;  %s3717_s19 = smov 8   ;;  %s3718_s20 = smov 16  }
  0x15   : > { %v322_v17 = vsub.f32 1.0, %v321_v16  ;;  %s3719_s24 = smov 24  }
  0x17   : > { %v323_v18 = vmul.f32 %v3385_v15, %v322_v17 }
  0x19   : > { %v324_v19 = vadd.f32 %v3385_v15, %v323_v18 }
  0x1a   : > { %282 = vadd.xlane.f32.xlu1 %v281_v9  ;;  %276 = vadd.xlane.f32.xlu0 %v275_v10  ;;  %v3308_v9 = vld [vmem:[%s5368_s3 + $0x8] sm:$0xff] }
  0x1b   : > { %288 = vadd.xlane.f32.xlu2 %v287_v11  ;;  %v3787_v20 = vsel %vm325_vm1, %v3385_v15, %v324_v19  ;;  %723 = vmatpush.bf16.msra.mxu0 %v3308_v9 }
  0x23   : > { %291 = vadd.xlane.f32.xlu2 %v290_v13 }
  0x85   : > { %v280_v21 = vpop.xlane.xlu1 %279  ;;  %v274_v22 = vpop.xlane.xlu0 %273 }
  0x86   : > { %v327_v23 = vmul.f32 %v3787_v20, %v274_v22  ;;  %v286_v24 = vpop.xlane.xlu2 %285  ;;  %v329_v33 = vmul.f32 %v3787_v20, %v280_v21 }
  0x87   : > { %v331_v32 = vmul.f32 %v3787_v20, %v286_v24 }
  0x88   : > { %v3790_v25 = vsub.f32 %v253_v1, %v327_v23  ;;  %v3814_v42 = vsub.f32 %v255_v0, %v329_v33  ;;  %v3854_v0 = vld [vmem:[%s3771_s26 + $0x50] sm:$0xff]  ;;  %v308_v1 = vsel %vm271_vm0, %v3851_v63, 0.0 }
  0x89   : > { %v3806_v38 = vsub.f32 %v257_v4, %v331_v32  ;;  %v302_v3 = vsel %vm271_vm0, %v3854_v0, 0.0  ;;  %v3862_v4 = vld [vmem:[%s3771_s26 + $0x68] sm:$0xff] }
  0x8a   : > { %v359_v26 = vmul.f32 %v3790_v25, %v3790_v25  ;;  %v361_v48 = vmul.f32 %v3814_v42, %v3814_v42  ;;  %v311_v5 = vsel %vm271_vm0, %v3862_v4, 0.0 }
  0x8b   : > { %v363_v46 = vmul.f32 %v3806_v38, %v3806_v38 }
  0x8c   : > { %v375_v27 = vsel %vm271_vm0, %v359_v26, 0.0  ;;  %v381_v52 = vsel %vm271_vm0, %v361_v48, 0.0 }
  0x8d   : > { %v283_v28 = vpop.xlane.xlu1 %282  ;;  %376 = vadd.xlane.f32.xlu0 %v375_v27  ;;  %v277_v29 = vpop.xlane.xlu0 %276  ;;  %v387_v50 = vsel %vm271_vm0, %v363_v46, 0.0 }
  0x8e   : > { %v330_v30 = vmul.f32 %v3787_v20, %v283_v28  ;;  %v328_v31 = vmul.f32 %v3787_v20, %v277_v29  ;;  %v289_v37 = vpop.xlane.xlu2 %288 }
  0x8f   : > { %v332_v45 = vmul.f32 %v3787_v20, %v289_v37 }
  0x90   : > { %v3802_v35 = vsub.f32 %v256_v6, %v330_v30  ;;  %v3804_v36 = vsub.f32 %v254_v7, %v328_v31  ;;  %v3867_v6 = vld [vmem:[%s3771_s26 + $0x70] sm:$0xff] }
  0x91   : > { %v3826_v49 = vsub.f32 %v258_v8, %v332_v45  ;;  %v314_v7 = vsel %vm271_vm0, %v3867_v6, 0.0 }
  0x92   : > { %v362_v39 = vmul.f32 %v3802_v35, %v3802_v35  ;;  %v360_v41 = vmul.f32 %v3804_v36, %v3804_v36 }
  0x93   : > { %v364_v55 = vmul.f32 %v3826_v49, %v3826_v49 }
  0x94   : > { %v384_v43 = vsel %vm271_vm0, %v362_v39, 0.0  ;;  %v378_v44 = vsel %vm271_vm0, %v360_v41, 0.0 }
  0x95   : > { %385 = vadd.xlane.f32.xlu2 %v384_v43  ;;  %294 = vadd.xlane.f32.xlu0 %v293_v40  ;;  %v390_v60 = vsel %vm271_vm0, %v364_v55, 0.0 }
  0x96   : > { %379 = vadd.xlane.f32.xlu1 %v378_v44  ;;  %v292_v53 = vpop.xlane.xlu2 %291 }
  0x97   : > { %v333_v54 = vmul.f32 %v3787_v20, %v292_v53 }
  0x99   : > { %v3841_v58 = vsub.f32 %v259_v12, %v333_v54  ;;  %v3307_v12 = vld [vmem:[%s5368_s3] sm:$0xff] }
  0x9a   : > { %724 = vmatpush.bf16.msra.mxu0 %v3307_v12  ;;  %v3936_v12 = vld [vmem:[%s3771_s26 + $0x78] sm:$0xff] }
  0x9b   : > { %v365_v62 = vmul.f32 %v3841_v58, %v3841_v58 }
  0x9d   : > { %388 = vadd.xlane.f32.xlu2 %v387_v50  ;;  %297 = vadd.xlane.f32.xlu0 %v296_v51  ;;  %v393_v2 = vsel %vm271_vm0, %v365_v62, 0.0 }
  0x9e   : > { %382 = vadd.xlane.f32.xlu1 %v381_v52 }
  0xa5   : > { %306 = vadd.xlane.f32.xlu2 %v305_v59  ;;  %391 = vadd.xlane.f32.xlu0 %v390_v60 }
  0xa6   : > { %300 = vadd.xlane.f32.xlu1 %v299_v61 }
  0xad   : > { %309 = vadd.xlane.f32.xlu2 %v308_v1  ;;  %394 = vadd.xlane.f32.xlu0 %v393_v2 }
  0xae   : > { %303 = vadd.xlane.f32.xlu1 %v302_v3 }
  0xb5   : > { %312 = vadd.xlane.f32.xlu0 %v311_v5 }
  0xbd   : > { %315 = vadd.xlane.f32.xlu0 %v314_v7 }
 0x100   : > { %v377_v8 = vpop.xlane.xlu0 %376 }
 0x101   : > { %v423_v10 = vmul.f32 %v377_v8, %v3787_v20 }
 0x103   : > { %v439_v11 = vadd.f32 1e-05, %v423_v10 }
 0x105   : > { %3386 = vrsqrt.f32 %v439_v11  ;;  %vm461_vm3 = vweird.f32 %v439_v11 }
 0x108   : > { %v386_v13 = vpop.xlane.xlu2 %385  ;;  %v295_v14 = vpop.xlane.xlu0 %294 }
 0x109   : > { %v426_v15 = vmul.f32 %v386_v13, %v3787_v20  ;;  %v380_v16 = vpop.xlane.xlu1 %379  ;;  %v334_v17 = vmul.f32 %v3787_v20, %v295_v14 }
 0x10a   : > { %v424_v18 = vmul.f32 %v380_v16, %v3787_v20 }
 0x10b   : > { %v3387_v19 = vpop.eup %3386  ;;  %v3881_v21 = vadd.f32 1e-05, %v426_v15  ;;  %v3884_v22 = vsub.f32 %v3800_v34, %v334_v17  ;;  %v3945_v15 = vld [vmem:[%s5366_s1] ss:$0 sm:$0xff] }
 0x10c   : > { %v456_v23 = vmul.f32 %v3387_v19, %v439_v11  ;;  %v440_v24 = vadd.f32 1e-05, %v424_v18  ;;  %vm462_vm2 = vweird.f32 %v3387_v19 }
 0x10d   : > { %3388 = vrsqrt.f32 %v3881_v21  ;;  %v366_v26 = vmul.f32 %v3884_v22, %v3884_v22  ;;  %vm3907_vm6 = vmor %vm461_vm3, %vm462_vm2  ;;  %vm491_vm10 = vweird.f32 %v3881_v21 }
 0x10e   : > { %v457_v27 = vmul.f32 %v3387_v19, %v456_v23  ;;  %3390 = vrsqrt.f32 %v440_v24  ;;  %vm471_vm4 = vweird.f32 %v440_v24 }
 0x10f   : > { %v396_v28 = vsel %vm271_vm0, %v366_v26, 0.0 }
 0x110   : > { %v458_v29 = vmul.f32 0.5, %v457_v27  ;;  %v389_v30 = vpop.xlane.xlu2 %388  ;;  %397 = vadd.xlane.f32.xlu1 %v396_v28  ;;  %v298_v31 = vpop.xlane.xlu0 %297 }
 0x111   : > { %v383_v32 = vpop.xlane.xlu1 %382  ;;  %v335_v33 = vmul.f32 %v3787_v20, %v298_v31  ;;  %v427_v43 = vmul.f32 %v389_v30, %v3787_v20 }
 0x112   : > { %v459_v34 = vsub.f32 1.5, %v458_v29  ;;  %v425_v37 = vmul.f32 %v383_v32, %v3787_v20 }
 0x113   : > { %v3892_v39 = vpop.eup %3388  ;;  %v3895_v40 = vsub.f32 %v3822_v47, %v335_v33  ;;  %v3905_v47 = vadd.f32 1e-05, %v427_v43  ;;  %v3967_v33 = vld [vmem:[%s5367_s2] ss:$0 sm:$0xff] }
 0x114   : > { %v3391_v41 = vpop.eup %3390  ;;  %v3898_v44 = vadd.f32 1e-05, %v425_v37  ;;  %v460_v46 = vmul.f32 %v3387_v19, %v459_v34  ;;  %v486_v48 = vmul.f32 %v3892_v39, %v3881_v21  ;;  %vm492_vm11 = vweird.f32 %v3892_v39 }
 0x115   : > { %v466_v45 = vmul.f32 %v3391_v41, %v440_v24  ;;  %v367_v51 = vmul.f32 %v3895_v40, %v3895_v40  ;;  %vm472_vm5 = vweird.f32 %v3391_v41  ;;  %vm3999_vm13 = vmor %vm491_vm10, %vm492_vm11  ;;  %vm501_vm1 = vweird.f32 %v3905_v47 }
 0x116   : > { %3392 = vrsqrt.f32 %v3898_v44  ;;  %v464_v1 = vsel %vm3907_vm6, %v3387_v19, %v460_v46  ;;  %v487_v2 = vmul.f32 %v3892_v39, %v486_v48  ;;  %vm3927_vm7 = vmor %vm471_vm4, %vm472_vm5  ;;  %vm481_vm8 = vweird.f32 %v3898_v44 }
 0x117   : > { %v467_v50 = vmul.f32 %v3391_v41, %v466_v45  ;;  %v399_v61 = vsel %vm271_vm0, %v367_v51, 0.0  ;;  %3394 = vrsqrt.f32 %v3905_v47  ;;  %v615_v14 = vmul.f32 %v464_v1, %v3790_v25 }
 0x118   : > { %v307_v52 = vpop.xlane.xlu2 %306  ;;  %v392_v53 = vpop.xlane.xlu0 %391  ;;  %400 = vadd.xlane.f32.xlu1 %v399_v61  ;;  %v488_v16 = vmul.f32 0.5, %v487_v2  ;;  %v317_v25 = vsel %vm271_vm0, %v3936_v12, 0.0 }
 0x119   : > { %v468_v55 = vmul.f32 0.5, %v467_v50  ;;  %v338_v59 = vmul.f32 %v3787_v20, %v307_v52  ;;  %v301_v60 = vpop.xlane.xlu1 %300  ;;  %v428_v62 = vmul.f32 %v392_v53, %v3787_v20  ;;  %v634_v32 = vmul.f32 %v3945_v15, %v615_v14 }
 0x11a   : > { %v336_v3 = vmul.f32 %v3787_v20, %v301_v60  ;;  %v489_v37 = vsub.f32 1.5, %v488_v16 }
 0x11b   : > { %v469_v5 = vsub.f32 1.5, %v468_v55  ;;  %v3919_v7 = vsub.f32 %v3836_v56, %v338_v59  ;;  %v3921_v8 = vadd.f32 1e-05, %v428_v62 }
 0x11c   : > { %v3923_v9 = vpop.eup %3392  ;;  %v3933_v11 = vsub.f32 %v3839_v57, %v336_v3  ;;  %v490_v21 = vmul.f32 %v3892_v39, %v489_v37 }
 0x11d   : > { %v470_v13 = vmul.f32 %v3391_v41, %v469_v5  ;;  %v476_v56 = vmul.f32 %v3923_v9, %v3898_v44  ;;  %3396 = vrsqrt.f32 %v3921_v8  ;;  %v370_v57 = vmul.f32 %v3919_v7, %v3919_v7  ;;  %v3969_v34 = vpop.eup %3394 }
 0x11e   : > { %v368_v19 = vmul.f32 %v3933_v11, %v3933_v11  ;;  %vm482_vm9 = vweird.f32 %v3923_v9  ;;  %v496_v54 = vmul.f32 %v3969_v34, %v3905_v47  ;;  %v494_v5 = vsel %vm3999_vm13, %v3892_v39, %v490_v21 }
 0x11f   : > { %v474_v17 = vsel %vm3927_vm7, %v3391_v41, %v470_v13  ;;  %v477_v18 = vmul.f32 %v3923_v9, %v476_v56  ;;  %v408_v24 = vsel %vm271_vm0, %v370_v57, 0.0  ;;  %vm3986_vm12 = vmor %vm481_vm8, %vm482_vm9  ;;  %v618_v16 = vmul.f32 %v494_v5, %v3802_v35 }
 0x120   : > { %v310_v23 = vpop.xlane.xlu2 %309  ;;  %v3958_v26 = vpop.xlane.xlu0 %394  ;;  %v616_v27 = vmul.f32 %v474_v17, %v3804_v36  ;;  %409 = vadd.xlane.f32.xlu0 %v408_v24  ;;  %v402_v30 = vsel %vm271_vm0, %v368_v19, 0.0  ;;  %318 = vadd.xlane.f32.xlu1 %v317_v25  ;;  %v497_v10 = vmul.f32 %v3969_v34, %v496_v54  ;;  %vm511_vm14 = vweird.f32 %v3921_v8 }
 0x121   : > { %v478_v28 = vmul.f32 0.5, %v477_v18  ;;  %v339_v29 = vmul.f32 %v3787_v20, %v310_v23  ;;  %v304_v31 = vpop.xlane.xlu1 %303  ;;  %403 = vadd.xlane.f32.xlu2 %v402_v30  ;;  %vm502_vm2 = vweird.f32 %v3969_v34 }
 0x122   : > { %v337_v36 = vmul.f32 %v3787_v20, %v304_v31  ;;  %v635_v41 = vmul.f32 %v3945_v15, %v616_v27  ;;  %v498_v57 = vmul.f32 0.5, %v497_v10  ;;  %vm503_vm4 = vmor %vm501_vm1, %vm502_vm2  ;;  %vm782_vm1 = vcmask 781312  }
 0x123   : > { %v3397_v43 = vpop.eup %3396  ;;  %v479_v45 = vsub.f32 1.5, %v478_v28  ;;  %v3975_v46 = vsub.f32 %v3851_v63, %v339_v29  ;;  %v653_v63 = vadd.f32 %v3967_v33, %v634_v32 }
 0x124   : > { %v506_v48 = vmul.f32 %v3397_v43, %v3921_v8  ;;  %v3981_v50 = vsub.f32 %v3854_v0, %v337_v36  ;;  %v654_v53 = vadd.f32 %v3967_v33, %v635_v41  ;;  %v499_v23 = vsub.f32 1.5, %v498_v57 }
 0x125   : > { %v480_v51 = vmul.f32 %v3923_v9, %v479_v45  ;;  %v371_v55 = vmul.f32 %v3975_v46, %v3975_v46  ;;  %vm512_vm15 = vweird.f32 %v3397_v43 }
 0x126   : > { %v369_v0 = vmul.f32 %v3981_v50, %v3981_v50  ;;  %v669_v59 = vpack.c.bf16 %v654_v53, %v653_v63  ;;  %v507_v61 = vmul.f32 %v3397_v43, %v506_v48  ;;  %vm513_vm3 = vmor %vm511_vm14, %vm512_vm15  ;;  %v500_v8 = vmul.f32 %v3969_v34, %v499_v23 }
 0x127   : > { %v484_v60 = vsel %vm3986_vm12, %v3923_v9, %v480_v51  ;;  %v411_v1 = vsel %vm271_vm0, %v371_v55, 0.0 }
 0x128   : > { %v405_v62 = vsel %vm271_vm0, %v369_v0, 0.0  ;;  %v313_v2 = vpop.xlane.xlu0 %312  ;;  %3055 = vmatmul.msk.bf16.vlgmr.msra.gmra.mxu0 %vm271_vm0, %v669_v59  ;;  %412 = vadd.xlane.f32.xlu1 %v411_v1  ;;  %v617_v13 = vmul.f32 %v484_v60, %v3814_v42  ;;  %v508_v56 = vmul.f32 0.5, %v507_v61  ;;  %v504_v47 = vsel %vm503_vm4, %v3969_v34, %v500_v8 }
 0x129   : > { %v340_v3 = vmul.f32 %v3787_v20, %v313_v2  ;;  %406 = vadd.xlane.f32.xlu2 %v405_v62  ;;  %v619_v32 = vmul.f32 %v504_v47, %v3806_v38 }
 0x12a   : > { %v636_v39 = vmul.f32 %v3945_v15, %v617_v13  ;;  %v509_v18 = vsub.f32 1.5, %v508_v56 }
 0x12b   : > { %v4015_v9 = vsub.f32 %v3862_v4, %v340_v3  ;;  %v637_v4 = vmul.f32 %v3945_v15, %v618_v16  ;;  %v638_v36 = vmul.f32 %v3945_v15, %v619_v32 }
 0x12c   : > { %v655_v35 = vadd.f32 %v3967_v33, %v636_v39  ;;  %v510_v24 = vmul.f32 %v3397_v43, %v509_v18 }
 0x12d   : > { %v372_v14 = vmul.f32 %v4015_v9, %v4015_v9  ;;  %v656_v27 = vadd.f32 %v3967_v33, %v637_v4  ;;  %v657_v45 = vadd.f32 %v3967_v33, %v638_v36 }
 0x12e   : > { %v514_v30 = vsel %vm513_vm3, %v3397_v43, %v510_v24  ;;  %v429_v43 = vmul.f32 %v3958_v26, %v3787_v20 }
 0x12f   : > { %v414_v17 = vsel %vm271_vm0, %v372_v14, 0.0  ;;  %v670_v29 = vpack.c.bf16 %v656_v27, %v655_v35  ;;  %v620_v31 = vmul.f32 %v514_v30, %v3826_v49 }
 0x130   : > { %v316_v19 = vpop.xlane.xlu0 %315  ;;  %v445_v51 = vadd.f32 1e-05, %v429_v43 }
 0x131   : > { %v341_v25 = vmul.f32 %v3787_v20, %v316_v19  ;;  %415 = vadd.xlane.f32.xlu2 %v414_v17  ;;  %v639_v37 = vmul.f32 %v3945_v15, %v620_v31 }
 0x132   : > { %3398 = vrsqrt.f32 %v445_v51  ;;  %vm521_vm5 = vweird.f32 %v445_v51 }
 0x133   : > { %v4027_v42 = vsub.f32 %v3867_v6, %v341_v25  ;;  %v658_v41 = vadd.f32 %v3967_v33, %v639_v37 }
 0x135   : > { %v373_v28 = vmul.f32 %v4027_v42, %v4027_v42  ;;  %v671_v48 = vpack.c.bf16 %v658_v41, %v657_v45 }
 0x137   : > { %v417_v6 = vsel %vm271_vm0, %v373_v28, 0.0 }
 0x138   : > { %418 = vadd.xlane.f32.xlu0 %v417_v6  ;;  %3056 = vmatmul.msk.bf16.gmra.mxu0 %vm271_vm0, %v670_v29  ;;  %v3399_v34 = vpop.eup %3398 }
 0x139   : > { %v516_v49 = vmul.f32 %v3399_v34, %v445_v51  ;;  %vm522_vm6 = vweird.f32 %v3399_v34 }
 0x13a   : > { %vm4050_vm7 = vmor %vm521_vm5, %vm522_vm6 }
 0x13b   : > { %v517_v38 = vmul.f32 %v3399_v34, %v516_v49 }
 0x13d   : > { %v518_v21 = vmul.f32 0.5, %v517_v38 }
 0x13f   : > { %v519_v54 = vsub.f32 1.5, %v518_v21 }
 0x141   : > { %v520_v26 = vmul.f32 %v3399_v34, %v519_v54 }
 0x143   : > { %v524_v2 = vsel %vm4050_vm7, %v3399_v34, %v520_v26 }
 0x144   : > { %v621_v39 = vmul.f32 %v524_v2, %v3841_v58 }
 0x146   : > { %v640_v28 = vmul.f32 %v3945_v15, %v621_v39 }
 0x148   : > { %3057 = vmatmul.msk.bf16.gmra.mxu0 %vm271_vm0, %v671_v48  ;;  %v659_v32 = vadd.f32 %v3967_v33, %v640_v28 }
 0x183   : > { %v398_v52 = vpop.xlane.xlu1 %397 }
 0x184   : > { %v430_v63 = vmul.f32 %v398_v52, %v3787_v20 }
 0x186   : > { %v446_v53 = vadd.f32 1e-05, %v430_v63 }
 0x188   : > { %3400 = vrsqrt.f32 %v446_v53  ;;  %vm531_vm9 = vweird.f32 %v446_v53 }
 0x18b   : > { %v401_v0 = vpop.xlane.xlu1 %400 }
 0x18c   : > { %v431_v44 = vmul.f32 %v401_v0, %v3787_v20 }
 0x18e   : > { %v3401_v55 = vpop.eup %3400  ;;  %v447_v60 = vadd.f32 1e-05, %v431_v44 }
 0x18f   : > { %v526_v59 = vmul.f32 %v3401_v55, %v446_v53  ;;  %vm532_vm8 = vweird.f32 %v3401_v55 }
 0x190   : > { %3402 = vrsqrt.f32 %v447_v60  ;;  %vm533_vm10 = vmor %vm531_vm9, %vm532_vm8  ;;  %vm541_vm12 = vweird.f32 %v447_v60 }
 0x191   : > { %v527_v62 = vmul.f32 %v3401_v55, %v526_v59 }
 0x193   : > { %v528_v1 = vmul.f32 0.5, %v527_v62  ;;  %v410_v3 = vpop.xlane.xlu0 %409  ;;  %v319_v13 = vpop.xlane.xlu1 %318 }
 0x194   : > { %v404_v10 = vpop.xlane.xlu2 %403  ;;  %v434_v56 = vmul.f32 %v410_v3, %v3787_v20  ;;  %v342_v16 = vmul.f32 %v3787_v20, %v319_v13 }
 0x195   : > { %v529_v5 = vsub.f32 1.5, %v528_v1  ;;  %v432_v14 = vmul.f32 %v404_v10, %v3787_v20 }
 0x196   : > { %v4059_v17 = vadd.f32 1e-05, %v434_v56  ;;  %v3403_v18 = vpop.eup %3402  ;;  %v4063_v25 = vsub.f32 %v3936_v12, %v342_v16 }
 0x197   : > { %v530_v57 = vmul.f32 %v3401_v55, %v529_v5  ;;  %v448_v19 = vadd.f32 1e-05, %v432_v14  ;;  %v536_v23 = vmul.f32 %v3403_v18, %v447_v60  ;;  %vm542_vm11 = vweird.f32 %v3403_v18 }
 0x198   : > { %3404 = vrsqrt.f32 %v4059_v17  ;;  %v374_v35 = vmul.f32 %v4063_v25, %v4063_v25  ;;  %vm4081_vm13 = vmor %vm541_vm12, %vm542_vm11  ;;  %vm571_vm5 = vweird.f32 %v4059_v17 }
 0x199   : > { %v534_v4 = vsel %vm533_vm10, %v3401_v55, %v530_v57  ;;  %3406 = vrsqrt.f32 %v448_v19  ;;  %v537_v24 = vmul.f32 %v3403_v18, %v536_v23  ;;  %vm551_vm14 = vweird.f32 %v448_v19 }
 0x19a   : > { %v622_v27 = vmul.f32 %v534_v4, %v3884_v22  ;;  %v420_v58 = vsel %vm271_vm0, %v374_v35, 0.0 }
 0x19b   : > { %v538_v8 = vmul.f32 0.5, %v537_v24  ;;  %421 = vadd.xlane.f32.xlu1 %v420_v58  ;;  %v413_v12 = vpop.xlane.xlu1 %412 }
 0x19c   : > { %v407_v29 = vpop.xlane.xlu2 %406  ;;  %v641_v6 = vmul.f32 %v3945_v15, %v622_v27  ;;  %v435_v41 = vmul.f32 %v413_v12, %v3787_v20 }
 0x19d   : > { %v433_v30 = vmul.f32 %v407_v29, %v3787_v20  ;;  %v539_v31 = vsub.f32 1.5, %v538_v8 }
 0x19e   : > { %v4073_v47 = vpop.eup %3404  ;;  %v660_v37 = vadd.f32 %v3967_v33, %v641_v6  ;;  %v4085_v52 = vadd.f32 1e-05, %v435_v41 }
 0x19f   : > { %v3407_v22 = vpop.eup %3406  ;;  %v449_v36 = vadd.f32 1e-05, %v433_v30  ;;  %v540_v45 = vmul.f32 %v3403_v18, %v539_v31  ;;  %v566_v43 = vmul.f32 %v4073_v47, %v4059_v17  ;;  %vm572_vm6 = vweird.f32 %v4073_v47 }
 0x1a0   : > { %v546_v48 = vmul.f32 %v3407_v22, %v448_v19  ;;  %v672_v51 = vpack.c.bf16 %v660_v37, %v659_v32  ;;  %vm552_vm15 = vweird.f32 %v3407_v22  ;;  %vm573_vm8 = vmor %vm571_vm5, %vm572_vm6  ;;  %vm581_vm11 = vweird.f32 %v4085_v52 }
 0x1a1   : > { %3408 = vrsqrt.f32 %v449_v36  ;;  %v544_v38 = vsel %vm4081_vm13, %v3403_v18, %v540_v45  ;;  %v567_v53 = vmul.f32 %v4073_v47, %v566_v43  ;;  %vm553_vm2 = vmor %vm551_vm14, %vm552_vm15  ;;  %vm561_vm3 = vweird.f32 %v449_v36 }
 0x1a2   : > { %v547_v34 = vmul.f32 %v3407_v22, %v546_v48  ;;  %3058 = vmatmul.msk.bf16.gmra.mxu0 %vm271_vm0, %v672_v51  ;;  %3410 = vrsqrt.f32 %v4085_v52  ;;  %v623_v60 = vmul.f32 %v544_v38, %v3895_v40 }
 0x1a3   : > { %v568_v62 = vmul.f32 0.5, %v567_v53 }
 0x1a4   : > { %v548_v63 = vmul.f32 0.5, %v547_v34  ;;  %v416_v21 = vpop.xlane.xlu2 %415  ;;  %v642_v10 = vmul.f32 %v3945_v15, %v623_v60 }
 0x1a5   : > { %v436_v54 = vmul.f32 %v416_v21, %v3787_v20  ;;  %v726_v0 = vpop.f32.mrf.mxu0  ;;  %v569_v13 = vsub.f32 1.5, %v568_v62 }
 0x1a6   : > { %v549_v55 = vsub.f32 1.5, %v548_v63  ;;  %v766_v44 = vpack.c.bf16 %v726_v0, %v726_v0 }
 0x1a7   : > { %v3409_v59 = vpop.eup %3408  ;;  %v452_v26 = vadd.f32 1e-05, %v436_v54  ;;  %v570_v23 = vmul.f32 %v4073_v47, %v569_v13 }
 0x1a8   : > { %v550_v61 = vmul.f32 %v3407_v22, %v549_v55  ;;  %v556_v1 = vmul.f32 %v3409_v59, %v449_v36  ;;  %783 = vst.msk [vmem:[#allocation2] sm:$0xf] %vm782_vm1, %v766_v44  ;;  %vm562_vm4 = vweird.f32 %v3409_v59  ;;  %v3411_v14 = vpop.eup %3410 }
 0x1a9   : > { %3412 = vrsqrt.f32 %v452_v26  ;;  %vm4099_vm7 = vmor %vm561_vm3, %vm562_vm4  ;;  %v576_v24 = vmul.f32 %v3411_v14, %v4085_v52  ;;  %v574_v8 = vsel %vm573_vm8, %v4073_v47, %v570_v23  ;;  %vm591_vm9 = vweird.f32 %v452_v26 }
 0x1aa   : > { %v554_v2 = vsel %vm553_vm2, %v3407_v22, %v550_v61  ;;  %v557_v3 = vmul.f32 %v3409_v59, %v556_v1  ;;  %v626_v37 = vmul.f32 %v574_v8, %v3919_v7  ;;  %vm582_vm12 = vweird.f32 %v3411_v14 }
 0x1ab   : > { %v624_v5 = vmul.f32 %v554_v2, %v3933_v11  ;;  %v661_v11 = vadd.f32 %v3967_v33, %v642_v10  ;;  %v577_v29 = vmul.f32 %v3411_v14, %v576_v24  ;;  %vm583_vm14 = vmor %vm581_vm11, %vm582_vm12  ;;  %v419_v62 = vpop.xlane.xlu0 %418  ;;  %vm2282_vm11 = vcmask 191616  }
 0x1ac   : > { %v558_v56 = vmul.f32 0.5, %v557_v3  ;;  %v645_v47 = vmul.f32 %v3945_v15, %v626_v37  ;;  %v437_v1 = vmul.f32 %v419_v62, %v3787_v20  ;;  %vm2769_vm12 = vcmask 257216  }
 0x1ad   : > { %v728_v16 = vpop.f32.mrf.mxu0  ;;  %v643_v40 = vmul.f32 %v3945_v15, %v624_v5  ;;  %v578_v22 = vmul.f32 0.5, %v577_v29 }
 0x1ae   : > { %v559_v57 = vsub.f32 1.5, %v558_v56  ;;  %v767_v39 = vpack.c.bf16 %v728_v16, %v728_v16  ;;  %v664_v51 = vadd.f32 %v3967_v33, %v645_v47  ;;  %v453_v2 = vadd.f32 1e-05, %v437_v1 }
 0x1af   : > { %v3413_v18 = vpop.eup %3412  ;;  %v662_v4 = vadd.f32 %v3967_v33, %v643_v40  ;;  %v579_v45 = vsub.f32 1.5, %v578_v22 }
 0x1b0   : > { %v560_v35 = vmul.f32 %v3409_v59, %v559_v57  ;;  %v586_v27 = vmul.f32 %v3413_v18, %v452_v26  ;;  %784 = vst.msk [vmem:[#allocation2 + $0x4] sm:$0xf] %vm782_vm1, %v767_v39  ;;  %vm592_vm10 = vweird.f32 %v3413_v18  ;;  %3414 = vrsqrt.f32 %v453_v2 }
 0x1b1   : > { %v673_v17 = vpack.c.bf16 %v662_v4, %v661_v11  ;;  %vm593_vm13 = vmor %vm591_vm9, %vm592_vm10  ;;  %v580_v34 = vmul.f32 %v3411_v14, %v579_v45  ;;  %vm601_vm15 = vweird.f32 %v453_v2  ;;  %vm1308_vm9 = vcmask 60416  }
 0x1b2   : > { %v564_v28 = vsel %vm4099_vm7, %v3409_v59, %v560_v35  ;;  %v587_v58 = vmul.f32 %v3413_v18, %v586_v27  ;;  %vm973_vm7 = vcmask 64512   ;;  %vm1795_vm10 = vcmask 126016  }
 0x1b3   : > { %3059 = vmatmul.msk.bf16.gmra.mxu0 %vm271_vm0, %v673_v17  ;;  %v625_v6 = vmul.f32 %v564_v28, %v3981_v50  ;;  %v584_v63 = vsel %vm583_vm14, %v3411_v14, %v580_v34 }
 0x1b4   : > { %v588_v30 = vmul.f32 0.5, %v587_v58  ;;  %v627_v0 = vmul.f32 %v584_v63, %v3975_v46 }
 0x1b5   : > { %v731_v12 = vpop.f32.mrf.mxu0  ;;  %v644_v36 = vmul.f32 %v3945_v15, %v625_v6 }
 0x1b6   : > { %v768_v31 = vpack.c.bf16 %v731_v12, %v731_v12  ;;  %v589_v41 = vsub.f32 1.5, %v588_v30  ;;  %v646_v44 = vmul.f32 %v3945_v15, %v627_v0  ;;  %v3415_v3 = vpop.eup %3414 }
 0x1b7   : > { %v3309_v32 = vld [vmem:[#allocation2] sm:$0xff]  ;;  %v663_v48 = vadd.f32 %v3967_v33, %v644_v36  ;;  %v596_v5 = vmul.f32 %v3415_v3, %v453_v2  ;;  %vm602_vm2 = vweird.f32 %v3415_v3 }
 0x1b8   : > { %785 = vst.msk [vmem:[#allocation2 + $0x8] sm:$0xf] %vm782_vm1, %v768_v31  ;;  %855 = vrot.lane.b32.xlu2 %v3309_v32, %s3709_s11  ;;  %v590_v7 = vmul.f32 %v3413_v18, %v589_v41  ;;  %v665_v61 = vadd.f32 %v3967_v33, %v646_v44  ;;  %vm603_vm3 = vmor %vm601_vm15, %vm602_vm2 }
 0x1b9   : > { %v674_v49 = vpack.c.bf16 %v664_v51, %v663_v48  ;;  %v597_v10 = vmul.f32 %v3415_v3, %v596_v5  ;;  %v3333_v5 = vld [vmem:[#allocation2] sm:$0xff] }
 0x1ba   : > { %v594_v38 = vsel %vm593_vm13, %v3413_v18, %v590_v7 }
 0x1bb   : > { %v628_v21 = vmul.f32 %v594_v38, %v4015_v9  ;;  %v598_v16 = vmul.f32 0.5, %v597_v10  ;;  %v4191_v10 = vld [vmem:[#allocation2] sm:$0xff] }
 0x1bd   : > { %v733_v50 = vpop.f32.mrf.mxu0  ;;  %v647_v55 = vmul.f32 %v3945_v15, %v628_v21  ;;  %v599_v40 = vsub.f32 1.5, %v598_v16 }
 0x1be   : > { %v769_v43 = vpack.c.bf16 %v733_v50, %v733_v50 }
 0x1bf   : > { %v666_v26 = vadd.f32 %v3967_v33, %v647_v55  ;;  %v600_v39 = vmul.f32 %v3415_v3, %v599_v40 }
 0x1c0   : > { %786 = vst.msk [vmem:[#allocation2 + $0xc] sm:$0xf] %vm782_vm1, %v769_v43 }
 0x1c1   : > { %v675_v9 = vpack.c.bf16 %v666_v26, %v665_v61  ;;  %v604_v11 = vsel %vm603_vm3, %v3415_v3, %v600_v39  ;;  %v3317_v3 = vld [vmem:[#allocation2] sm:$0xff] }
 0x1c3   : > { %3060 = vmatmul.msk.bf16.gmra.mxu0 %vm271_vm0, %v674_v49 }
 0x1c5   : > { %v736_v53 = vpop.f32.mrf.mxu0 }
 0x1c6   : > { %v770_v54 = vpack.c.bf16 %v736_v53, %v736_v53 }
 0x1c7   : > { %v3310_v52 = vld [vmem:[#allocation2 + $0x8] sm:$0xff] }
 0x1c8   : > { %787 = vst.msk [vmem:[#allocation2 + $0x10] sm:$0xf] %vm782_vm1, %v770_v54  ;;  %857 = vrot.lane.b32.xlu0 %v3310_v52, %s3709_s11 }
 0x1cd   : > { %v738_v59 = vpop.f32.mrf.mxu0 }
 0x1ce   : > { %v771_v60 = vpack.c.bf16 %v738_v59, %v738_v59 }
 0x1d0   : > { %788 = vst.msk [vmem:[#allocation2 + $0x14] sm:$0xf] %vm782_vm1, %v771_v60 }
 0x1d3   : > { %3061 = vmatmul.msk.bf16.gmra.mxu0 %vm271_vm0, %v675_v9 }
 0x1d7   : > { %v3311_v46 = vld [vmem:[#allocation2 + $0x10] sm:$0xff] }
 0x1d8   : > { %859 = vrot.lane.b32.xlu1 %v3311_v46, %s3709_s11  ;;  %v4170_v61 = vld [vmem:[#allocation2 + $0x10] sm:$0xff]  ;;  %v4178_v46 = vld [vmem:[#allocation2 + $0x8] sm:$0xff] }
 0x1d9   : > { %v3335_v39 = vld [vmem:[#allocation2 + $0x10] sm:$0xff] }
 0x20e   : > { %v422_v13 = vpop.xlane.xlu1 %421 }
 0x20f   : > { %v438_v56 = vmul.f32 %v422_v13, %v3787_v20  ;;  %v629_v20 = vmul.f32 %v604_v11, %v4027_v42  ;;  %v3342_v13 = vld [vmem:[#allocation2 + $0x8] sm:$0xff] }
 0x211   : > { %v454_v14 = vadd.f32 1e-05, %v438_v56  ;;  %v648_v58 = vmul.f32 %v3945_v15, %v629_v20 }
 0x212   : > { %v856_v34 = vpop.permute.xlu2 %855 }
 0x213   : > { %3416 = vrsqrt.f32 %v454_v14  ;;  %vm611_vm5 = vweird.f32 %v454_v14  ;;  %v667_v6 = vadd.f32 %v3967_v33, %v648_v58 }
 0x219   : > { %v3417_v57 = vpop.eup %3416 }
 0x21a   : > { %v606_v18 = vmul.f32 %v3417_v57, %v454_v14  ;;  %vm612_vm4 = vweird.f32 %v3417_v57 }
 0x21b   : > { %vm613_vm6 = vmor %vm611_vm5, %vm612_vm4 }
 0x21c   : > { %v607_v19 = vmul.f32 %v3417_v57, %v606_v18 }
 0x21e   : > { %v608_v4 = vmul.f32 0.5, %v607_v19 }
 0x21f   : > { %v741_v23 = vpop.f32.mrf.mxu0 }
 0x220   : > { %v772_v35 = vpack.c.bf16 %v741_v23, %v741_v23  ;;  %v609_v24 = vsub.f32 1.5, %v608_v4 }
 0x222   : > { %789 = vst.msk [vmem:[#allocation2 + $0x18] sm:$0xf] %vm782_vm1, %v772_v35  ;;  %v610_v27 = vmul.f32 %v3417_v57, %v609_v24 }
 0x224   : > { %v614_v17 = vsel %vm613_vm6, %v3417_v57, %v610_v27  ;;  %v3341_v57 = vld [vmem:[#allocation2] sm:$0xff] }
 0x225   : > { %v630_v28 = vmul.f32 %v614_v17, %v4063_v25 }
 0x227   : > { %v743_v8 = vpop.f32.mrf.mxu0  ;;  %v649_v12 = vmul.f32 %v3945_v15, %v630_v28 }
 0x228   : > { %v773_v29 = vpack.c.bf16 %v743_v8, %v743_v8 }
 0x229   : > { %v668_v30 = vadd.f32 %v3967_v33, %v649_v12 }
 0x22a   : > { %790 = vst.msk [vmem:[#allocation2 + $0x1c] sm:$0xf] %vm782_vm1, %v773_v29 }
 0x22b   : > { %v676_v31 = vpack.c.bf16 %v668_v30, %v667_v6 }
 0x22d   : > { %3062 = vmatmul.msk.bf16.gmra.mxu0 %vm271_vm0, %v676_v31 }
 0x230   : > { %v746_v42 = vpop.f32.mrf.mxu0 }
 0x231   : > { %v774_v32 = vpack.c.bf16 %v746_v42, %v746_v42  ;;  %v3312_v37 = vld [vmem:[#allocation2 + $0x18] sm:$0xff] }
 0x232   : > { %861 = vrot.lane.b32.xlu2 %v3312_v37, %s3709_s11  ;;  %v4180_v62 = vld [vmem:[#allocation2 + $0x18] sm:$0xff] }
 0x233   : > { %791 = vst.msk [vmem:[#allocation2 + $0x20] sm:$0xf] %vm782_vm1, %v774_v32  ;;  %v4196_v56 = vld [vmem:[#allocation2 + $0x18] sm:$0xff] }
 0x234   : > { %v3336_v14 = vld [vmem:[#allocation2 + $0x18] sm:$0xff] }
 0x235   : > { %v3344_v18 = vld [vmem:[#allocation2 + $0x18] sm:$0xff] }
 0x238   : > { %v748_v25 = vpop.f32.mrf.mxu0 }
 0x239   : > { %v775_v22 = vpack.c.bf16 %v748_v25, %v748_v25 }
 0x23a   : > { %v858_v49 = vpop.permute.xlu0 %857 }
 0x23b   : > { %792 = vst.msk [vmem:[#allocation2 + $0x24] sm:$0xf] %vm782_vm1, %v775_v22  ;;  %v3318_v22 = vld [vmem:[#allocation2 + $0x8] sm:$0xff] }
 0x240   : > { %v751_v15 = vpop.f32.mrf.mxu0 }
 0x241   : > { %v776_v36 = vpack.c.bf16 %v751_v15, %v751_v15 }
 0x242   : > { %v3313_v41 = vld [vmem:[#allocation2 + $0x20] sm:$0xff] }
 0x243   : > { %793 = vst.msk [vmem:[#allocation2 + $0x28] sm:$0xf] %vm782_vm1, %v776_v36  ;;  %863 = vrot.lane.b32.xlu0 %v3313_v41, %s3709_s11  ;;  %v4162_v59 = vld [vmem:[#allocation2 + $0x20] sm:$0xff] }
 0x244   : > { %v4201_v16 = vld [vmem:[#allocation2 + $0x20] sm:$0xff] }
 0x245   : > { %v3337_v19 = vld [vmem:[#allocation2 + $0x20] sm:$0xff] }
 0x246   : > { %v3345_v11 = vld [vmem:[#allocation2 + $0x20] sm:$0xff] }
 0x248   : > { %v753_v33 = vpop.f32.mrf.mxu0 }
 0x249   : > { %v777_v47 = vpack.c.bf16 %v753_v33, %v753_v33 }
 0x24a   : > { %v860_v38 = vpop.permute.xlu1 %859 }
 0x24b   : > { %794 = vst.msk [vmem:[#allocation2 + $0x2c] sm:$0xf] %vm782_vm1, %v777_v47 }
 0x250   : > { %v756_v45 = vpop.f32.mrf.mxu0 }
 0x251   : > { %v778_v50 = vpack.c.bf16 %v756_v45, %v756_v45 }
 0x252   : > { %v3314_v48 = vld [vmem:[#allocation2 + $0x28] sm:$0xff] }
 0x253   : > { %795 = vst.msk [vmem:[#allocation2 + $0x30] sm:$0xf] %vm782_vm1, %v778_v50  ;;  %865 = vrot.lane.b32.xlu2 %v3314_v48, %s3709_s11  ;;  %v4172_v9 = vld [vmem:[#allocation2 + $0x28] sm:$0xff] }
 0x254   : > { %v4186_v2 = vld [vmem:[#allocation2 + $0x28] sm:$0xff] }
 0x258   : > { %v758_v7 = vpop.f32.mrf.mxu0 }
 0x259   : > { %v779_v43 = vpack.c.bf16 %v758_v7, %v758_v7  ;;  %v4237_v7 = vld [vmem:[#allocation2 + $0x10] sm:$0xff] }
 0x25b   : > { %796 = vst.msk [vmem:[#allocation2 + $0x34] sm:$0xf] %vm782_vm1, %v779_v43 }
 0x262   : > { %v3315_v51 = vld [vmem:[#allocation2 + $0x30] sm:$0xff] }
 0x263   : > { %867 = vrot.lane.b32.xlu1 %v3315_v51, %s3709_s11  ;;  %v4164_v26 = vld [vmem:[#allocation2 + $0x30] sm:$0xff] }
 0x264   : > { %v4206_v40 = vld [vmem:[#allocation2 + $0x30] sm:$0xff] }
 0x279   : > { %879 = vxpose.xlu2.c.b16.start [1/8] (narrow) %v856_v34, 32  ;;  %v3334_v34 = vld [vmem:[#allocation2 + $0x8] sm:$0xff] }
 0x289   : > { %880 = vxpose.xlu2.c.b16.cont [2/8] (narrow) %v858_v49, 32  ;;  %v3343_v49 = vld [vmem:[#allocation2 + $0x10] sm:$0xff] }
 0x28c   : > { %v862_v63 = vpop.permute.xlu2 %861 }
 0x299   : > { %881 = vxpose.xlu2.c.b16.cont [3/8] (narrow) %v860_v38, 32  ;;  %v913_v38 = vlaneseq }
 0x2a9   : > { %882 = vxpose.xlu2.c.b16.cont [4/8] (narrow) %v862_v63, 32  ;;  %v4252_v63 = vand.u32 127, %v913_v38 }
 0x2aa   : > { %v761_v53 = vpop.f32.mrf.mxu0 }
 0x2ab   : > { %v780_v21 = vpack.c.bf16 %v761_v53, %v761_v53  ;;  %vm915_vm8 = vcmp.lt.s32.totalorder %v4252_v63, 8 }
 0x2ad   : > { %797 = vst.msk [vmem:[#allocation2 + $0x38] sm:$0xf] %vm782_vm1, %v780_v21  ;;  %v866_v60 = vpop.permute.xlu2 %865 }
 0x2b2   : > { %v763_v54 = vpop.f32.mrf.mxu0 }
 0x2b3   : > { %v781_v52 = vpack.c.bf16 %v763_v54, %v763_v54 }
 0x2b5   : > { %798 = vst.msk [vmem:[#allocation2 + $0x3c] sm:$0xf] %vm782_vm1, %v781_v52  ;;  %v864_v0 = vpop.permute.xlu0 %863  ;;  %vm998_vm1 = vcmask 1043456  }
 0x2b9   : > { %883 = vxpose.xlu2.c.b16.cont [5/8] (narrow) %v864_v0, 32 }
 0x2bc   : > { %v4157_v55 = vld [vmem:[#allocation2 + $0x38] sm:$0xff] }
 0x2bd   : > { %v3316_v44 = vld [vmem:[#allocation2 + $0x38] sm:$0xff]  ;;  %1233 = vrot.lane.b32.xlu1 %v4157_v55, %s3710_s12 }
 0x2be   : > { %869 = vrot.lane.b32.xlu0 %v3316_v44, %s3709_s11  ;;  %v4244_v51 = vld [vmem:[#allocation2 + $0x38] sm:$0xff] }
 0x2c5   : > { %1227 = vrot.lane.b32.xlu1 %v4162_v59, %s3710_s12 }
 0x2c6   : > { %1231 = vrot.lane.b32.xlu0 %v4164_v26, %s3710_s12 }
 0x2c9   : > { %884 = vxpose.xlu2.c.b16.cont [6/8] (narrow) %v866_v60, 32 }
 0x2cd   : > { %1223 = vrot.lane.b32.xlu1 %v4170_v61, %s3710_s12 }
 0x2ce   : > { %1229 = vrot.lane.b32.xlu0 %v4172_v9, %s3710_s12 }
 0x2d5   : > { %1384 = vrot.lane.b32.xlu1 %v4178_v46, %s3711_s13  ;;  %v868_v1 = vpop.permute.xlu1 %867 }
 0x2d6   : > { %1225 = vrot.lane.b32.xlu0 %v4180_v62, %s3710_s12 }
 0x2d9   : > { %885 = vxpose.xlu2.c.b16.cont [7/8] (narrow) %v868_v1, 32 }
 0x2dd   : > { %1392 = vrot.lane.b32.xlu1 %v4186_v2, %s3711_s13 }
 0x2de   : > { %1219 = vrot.lane.b32.xlu0 %v3317_v3, %s3710_s12 }
 0x2e5   : > { %1869 = vrot.lane.b32.xlu1 %v3333_v5, %s3712_s14 }
 0x2e6   : > { %1382 = vrot.lane.b32.xlu0 %v4191_v10, %s3711_s13 }
 0x2ed   : > { %2358 = vrot.lane.b32.xlu1 %v3342_v13, %s3713_s15 }
 0x2ee   : > { %1388 = vrot.lane.b32.xlu0 %v4196_v56, %s3711_s13 }
 0x2f5   : > { %1875 = vrot.lane.b32.xlu1 %v3336_v14, %s3712_s14 }
 0x2f6   : > { %1390 = vrot.lane.b32.xlu0 %v4201_v16, %s3711_s13 }
 0x2fe   : > { %1394 = vrot.lane.b32.xlu0 %v4206_v40, %s3711_s13 }
 0x306   : > { %2356 = vrot.lane.b32.xlu0 %v3341_v57, %s3713_s15 }
 0x30e   : > { %1873 = vrot.lane.b32.xlu0 %v3335_v39, %s3712_s14 }
 0x316   : > { %2362 = vrot.lane.b32.xlu0 %v3344_v18, %s3713_s15 }
 0x31e   : > { %1877 = vrot.lane.b32.xlu0 %v3337_v19, %s3712_s14 }
 0x326   : > { %2364 = vrot.lane.b32.xlu0 %v3345_v11, %s3713_s15 }
 0x32f   : > { %v1234_v4 = vpop.permute.xlu1 %1233 }
 0x330   : > { %v870_v23 = vpop.permute.xlu0 %869  ;;  %1243 = vmatpush.bf16.msra.mxu2 %v1234_v4 }
 0x331   : > { %886 = vxpose.xlu2.c.b16.end [8/8] (narrow) %v870_v23, 32 }
 0x337   : > { %v1228_v20 = vpop.permute.xlu1 %1227 }
 0x338   : > { %v1232_v35 = vpop.permute.xlu0 %1231 }
 0x339   : > { %1244 = vmatpush.bf16.msra.mxu2 %v1232_v35 }
 0x33f   : > { %v1224_v17 = vpop.permute.xlu1 %1223 }
 0x340   : > { %v1230_v24 = vpop.permute.xlu0 %1229 }
 0x341   : > { %1245 = vmatpush.bf16.msra.mxu2 %v1230_v24 }
 0x345   : > { %1246 = vmatpush.bf16.msra.mxu2 %v1228_v20 }
 0x347   : > { %v4229_v36 = vpop.permute.xlu1 %1384 }
 0x348   : > { %v1226_v27 = vpop.permute.xlu0 %1225 }
 0x349   : > { %1247 = vmatpush.bf16.msra.mxu2 %v1226_v27 }
 0x34d   : > { %1248 = vmatpush.bf16.msra.mxu2 %v1224_v17 }
 0x34f   : > { %v1393_v41 = vpop.permute.xlu1 %1392 }
 0x350   : > { %v4215_v28 = vpop.permute.xlu0 %1219 }
 0x357   : > { %v1870_v23 = vpop.permute.xlu1 %1869 }
 0x358   : > { %v4217_v30 = vpop.permute.xlu0 %1382 }
 0x360   : > { %v1389_v25 = vpop.permute.xlu0 %1388 }
 0x362   : > { %v887_v58 = vpop.trf.xlu2 }
 0x363   : > { %v897_v8 = vunpack.c.l.b16 %v887_v58  ;;  %v898_v29 = vunpack.c.h.b16 %v887_v58 }
 0x365   : > { %v901_v12 = vpack.c.b16 %v897_v8, %v897_v8  ;;  %v902_v6 = vpack.c.b16 %v898_v29, %v898_v29 }
 0x367   : > { %909 = vst [vmem:[#allocation3] sm:$0xf] %v901_v12 }
 0x368   : > { %910 = vst [vmem:[#allocation3 + $0x4] sm:$0xf] %v902_v6  ;;  %v1391_v15 = vpop.permute.xlu0 %1390 }
 0x36e   : > { %v932_v31 = vld [vmem:[#allocation3] sm:$0xf] }
 0x36f   : > { %v1000_v42 = vsel %vm998_vm1, %v932_v31, 0  ;;  %v1341_v32 = vld [vmem:[#allocation3 + $0x4] sm:$0xf] }
 0x370   : > { %1009 = vmatpush.bf16.msrb.mxu0 %v1000_v42  ;;  %3359 = vmatpush.bf16.msra.mxu1 %v1000_v42  ;;  %v1423_v37 = vsel %vm998_vm1, %v1341_v32, 0  ;;  %v1395_v43 = vpop.permute.xlu0 %1394 }
 0x371   : > { %3360 = vmatpush.bf16.msra.mxu3 %v1423_v37 }
 0x372   : > { %v888_v33 = vpop.trf.xlu2 }
 0x373   : > { %3127 = vmatmul.msk.bf16.vlgmr.msrb.gmra.mxu0 %vm973_vm7, %v3317_v3  ;;  %3130 = vmatmul.msk.bf16.vlgmr.msra.gmra.mxu1 %vm973_vm7, %v4180_v62  ;;  %v899_v47 = vunpack.c.l.b16 %v888_v33  ;;  %v900_v45 = vunpack.c.h.b16 %v888_v33 }
 0x374   : > { %3170 = vmatmul.msk.bf16.vlgmr.msra.gmra.mxu3 %vm973_vm7, %v1389_v25 }
 0x375   : > { %v903_v50 = vpack.c.b16 %v899_v47, %v899_v47  ;;  %v904_v48 = vpack.c.b16 %v900_v45, %v900_v45 }
 0x377   : > { %911 = vst [vmem:[#allocation3 + $0x8] sm:$0xf] %v903_v50 }
 0x378   : > { %912 = vst [vmem:[#allocation3 + $0xc] sm:$0xf] %v904_v48  ;;  %v4331_v6 = vpop.permute.xlu0 %2356 }
 0x37e   : > { %v1828_v0 = vld [vmem:[#allocation3 + $0x8] sm:$0xf] }
 0x380   : > { %v1874_v32 = vpop.permute.xlu0 %1873 }
 0x383   : > { %3128 = vmatmul.msk.bf16.gmra.mxu0 %vm973_vm7, %v3318_v22  ;;  %3131 = vmatmul.msk.bf16.gmra.mxu1 %vm973_vm7, %v4162_v59 }
 0x384   : > { %3171 = vmatmul.msk.bf16.gmra.mxu3 %vm973_vm7, %v1391_v15 }
 0x393   : > { %3129 = vmatmul.msk.bf16.gmra.mxu0 %vm973_vm7, %v4170_v61  ;;  %3132 = vmatmul.msk.bf16.gmra.mxu1 %vm973_vm7, %v4172_v9 }
 0x394   : > { %3172 = vmatmul.msk.bf16.gmra.mxu3 %vm973_vm7, %v1393_v41  ;;  %v4348_v41 = vpop.permute.xlu0 %2362 }
 0x39a   : > { %1221 = vrot.lane.b32.xlu2 %v3318_v22, %s3710_s12  ;;  %v4344_v22 = vpop.permute.xlu1 %2358 }
 0x39c   : > { %v1878_v33 = vpop.permute.xlu0 %1877 }
 0x3a2   : > { %1386 = vrot.lane.b32.xlu2 %v4237_v7, %s3711_s13  ;;  %v1876_v15 = vpop.permute.xlu1 %1875 }
 0x3a3   : > { %3133 = vmatmul.msk.bf16.gmra.mxu1 %vm973_vm7, %v4164_v26 }
 0x3a4   : > { %3173 = vmatmul.msk.bf16.gmra.mxu3 %vm973_vm7, %v1395_v43  ;;  %v4351_v47 = vpop.permute.xlu0 %2364 }
 0x3aa   : > { %1396 = vrot.lane.b32.xlu2 %v4244_v51, %s3711_s13 }
 0x3b2   : > { %1871 = vrot.lane.b32.xlu2 %v3334_v34, %s3712_s14 }
 0x3b3   : > { %3134 = vmatmul.msk.bf16.gmra.mxu1 %vm973_vm7, %v4157_v55  ;;  %v1910_v55 = vsel %vm998_vm1, %v1828_v0, 0 }
 0x3b4   : > { %1919 = vmatpush.bf16.msrb.mxu3 %v1910_v55 }
 0x3ba   : > { %2360 = vrot.lane.b32.xlu2 %v3343_v49, %s3713_s15 }
 0x3f0   : > { %v1011_v53 = vpop.f32.mrf.mxu0  ;;  %v1026_v21 = vpop.f32.mrf.mxu1 }
 0x3f1   : > { %v4257_v54 = vsel %vm915_vm8, %v1026_v21, -1e+30  ;;  %v4261_v52 = vsel %vm915_vm8, %v1011_v53, -1e+30 }
 0x3f2   : > { %1079 = vmax.xlane.f32.xlu0 %v4257_v54  ;;  %1067 = vmax.xlane.f32.xlu1 %v4261_v52 }
 0x3f4   : > { %v1222_v44 = vpop.permute.xlu2 %1221 }
 0x3f5   : > { %1249 = vmatpush.bf16.msra.mxu2 %v1222_v44 }
 0x3f8   : > { %v1013_v59 = vpop.f32.mrf.mxu0  ;;  %v1028_v26 = vpop.f32.mrf.mxu1 }
 0x3f9   : > { %1250 = vmatpush.bf16.msra.mxu2 %v4215_v28  ;;  %v4269_v60 = vsel %vm915_vm8, %v1028_v26, -1e+30  ;;  %v4273_v61 = vsel %vm915_vm8, %v1013_v59, -1e+30 }
 0x3fa   : > { %1081 = vmax.xlane.f32.xlu1 %v4269_v60  ;;  %1069 = vmax.xlane.f32.xlu0 %v4273_v61 }
 0x3fc   : > { %v4277_v9 = vpop.permute.xlu2 %1386 }
 0x3fd   : > { %1432 = vmatpush.bf16.msrb.mxu2 %v1423_v37 }
 0x400   : > { %v1016_v62 = vpop.f32.mrf.mxu0  ;;  %v1031_v1 = vpop.f32.mrf.mxu1 }
 0x401   : > { %v4281_v3 = vsel %vm915_vm8, %v1031_v1, -1e+30  ;;  %v4285_v5 = vsel %vm915_vm8, %v1016_v62, -1e+30 }
 0x402   : > { %1083 = vmax.xlane.f32.xlu0 %v4281_v3  ;;  %1071 = vmax.xlane.f32.xlu1 %v4285_v5 }
 0x404   : > { %v1397_v13 = vpop.permute.xlu2 %1396 }
 0x405   : > { %3174 = vmatmul.msk.bf16.gmra.mxu3 %vm973_vm7, %v1397_v13 }
 0x408   : > { %v1018_v14 = vpop.f32.mrf.mxu0  ;;  %v1033_v57 = vpop.f32.mrf.mxu1 }
 0x409   : > { %v4292_v39 = vsel %vm915_vm8, %v1033_v57, -1e+30  ;;  %v4296_v18 = vsel %vm915_vm8, %v1018_v14, -1e+30 }
 0x40a   : > { %1085 = vmax.xlane.f32.xlu1 %v4292_v39  ;;  %1073 = vmax.xlane.f32.xlu0 %v4296_v18 }
 0x40c   : > { %v1872_v8 = vpop.permute.xlu2 %1871 }
 0x410   : > { %v1021_v19 = vpop.f32.mrf.mxu0  ;;  %v1036_v11 = vpop.f32.mrf.mxu1 }
 0x411   : > { %v4302_v4 = vsel %vm915_vm8, %v1021_v19, -1e+30  ;;  %v4308_v20 = vsel %vm915_vm8, %v1036_v11, -1e+30 }
 0x412   : > { %1075 = vmax.xlane.f32.xlu1 %v4302_v4 }
 0x415   : > { %3207 = vmatmul.msk.bf16.vlgmr.msrb.gmra.mxu3 %vm973_vm7, %v1870_v23 }
 0x418   : > { %v1023_v35 = vpop.f32.mrf.mxu0  ;;  %v1038_v24 = vpop.f32.mrf.mxu1 }
 0x419   : > { %v4312_v27 = vsel %vm915_vm8, %v1023_v35, -1e+30  ;;  %v4322_v58 = vsel %vm915_vm8, %v1038_v24, -1e+30 }
 0x41a   : > { %1087 = vmax.xlane.f32.xlu1 %v4308_v20  ;;  %1077 = vmax.xlane.f32.xlu0 %v4312_v27 }
 0x420   : > { %v1041_v17 = vpop.f32.mrf.mxu1 }
 0x421   : > { %v4318_v28 = vsel %vm915_vm8, %v1041_v17, -1e+30 }
 0x422   : > { %1091 = vmax.xlane.f32.xlu1 %v4318_v28  ;;  %1089 = vmax.xlane.f32.xlu0 %v4322_v58 }
 0x425   : > { %3208 = vmatmul.msk.bf16.gmra.mxu3 %vm973_vm7, %v1872_v8 }
 0x428   : > { %v1043_v29 = vpop.f32.mrf.mxu1 }
 0x429   : > { %v4329_v12 = vsel %vm915_vm8, %v1043_v29, -1e+30 }
 0x42a   : > { %1093 = vmax.xlane.f32.xlu0 %v4329_v12 }
 0x430   : > { %v1046_v31 = vpop.f32.mrf.mxu1 }
 0x431   : > { %v4336_v42 = vsel %vm915_vm8, %v1046_v31, -1e+30 }
 0x432   : > { %1095 = vmax.xlane.f32.xlu1 %v4336_v42 }
 0x435   : > { %3209 = vmatmul.msk.bf16.gmra.mxu3 %vm973_vm7, %v1874_v32 }
 0x438   : > { %v1048_v37 = vpop.f32.mrf.mxu1 }
 0x439   : > { %v4342_v25 = vsel %vm915_vm8, %v1048_v37, -1e+30 }
 0x43a   : > { %1097 = vmax.xlane.f32.xlu0 %v4342_v25 }
 0x445   : > { %3210 = vmatmul.msk.bf16.gmra.mxu3 %vm973_vm7, %v1876_v15 }
 0x455   : > { %3211 = vmatmul.msk.bf16.gmra.mxu3 %vm973_vm7, %v1878_v33 }
 0x465   : > { %v1080_v45 = vpop.xlane.xlu0 %1079  ;;  %v1068_v50 = vpop.xlane.xlu1 %1067 }
 0x466   : > { %v1099_v48 = vsub.f32 %v4261_v52, %v1068_v50  ;;  %v1105_v34 = vsub.f32 %v4257_v54, %v1080_v45  ;;  %v4391_v50 = vld [vmem:[#allocation2 + $0x28] sm:$0xff] }
 0x468   : > { %v1115_v43 = vmul.f32 1.442695, %v1099_v48  ;;  %v1127_v21 = vmul.f32 1.442695, %v1105_v34  ;;  %v4415_v34 = vld [vmem:[#allocation2 + $0x30] sm:$0xff] }
 0x46a   : > { %3418 = vpow2.f32 %v1115_v43  ;;  %v4409_v43 = vld [vmem:[#allocation2 + $0x30] sm:$0xff] }
 0x46d   : > { %v1082_v49 = vpop.xlane.xlu1 %1081  ;;  %v1070_v38 = vpop.xlane.xlu0 %1069 }
 0x46e   : > { %v1106_v53 = vsub.f32 %v4269_v60, %v1082_v49  ;;  %v1100_v44 = vsub.f32 %v4273_v61, %v1070_v38 }
 0x470   : > { %v1129_v0 = vmul.f32 1.442695, %v1106_v53  ;;  %v4356_v55 = vpop.eup %3418  ;;  %v1117_v59 = vmul.f32 1.442695, %v1100_v44 }
 0x471   : > { %1147 = vadd.xlane.f32.xlu1 %v4356_v55 }
 0x472   : > { %3420 = vpow2.f32 %v1129_v0 }
 0x473   : > { %3422 = vpow2.f32 %v1127_v21 }
 0x474   : > { %3424 = vpow2.f32 %v1117_v59 }
 0x475   : > { %v1084_v52 = vpop.xlane.xlu0 %1083  ;;  %v1072_v26 = vpop.xlane.xlu1 %1071 }
 0x476   : > { %v1107_v54 = vsub.f32 %v4281_v3, %v1084_v52  ;;  %v1101_v62 = vsub.f32 %v4285_v5, %v1072_v26 }
 0x478   : > { %v4362_v1 = vpop.eup %3420  ;;  %v1131_v60 = vmul.f32 1.442695, %v1107_v54  ;;  %v1119_v13 = vmul.f32 1.442695, %v1101_v62 }
 0x479   : > { %v4364_v14 = vpop.eup %3422  ;;  %1161 = vadd.xlane.f32.xlu0 %v4362_v1 }
 0x47a   : > { %3426 = vpow2.f32 %v1131_v60  ;;  %1159 = vadd.xlane.f32.xlu1 %v4364_v14  ;;  %v4370_v5 = vpop.eup %3424 }
 0x47b   : > { %3428 = vpow2.f32 %v1119_v13 }
 0x47d   : > { %v1086_v61 = vpop.xlane.xlu1 %1085  ;;  %v1074_v57 = vpop.xlane.xlu0 %1073 }
 0x47e   : > { %v1108_v19 = vsub.f32 %v4292_v39, %v1086_v61  ;;  %v1102_v3 = vsub.f32 %v4296_v18, %v1074_v57 }
 0x480   : > { %v4372_v11 = vpop.eup %3426  ;;  %v1133_v23 = vmul.f32 1.442695, %v1108_v19  ;;  %v1121_v35 = vmul.f32 1.442695, %v1102_v3 }
 0x481   : > { %v4374_v24 = vpop.eup %3428  ;;  %1163 = vadd.xlane.f32.xlu2 %v4372_v11 }
 0x482   : > { %3430 = vpow2.f32 %v1133_v23  ;;  %1149 = vadd.xlane.f32.xlu1 %v4370_v5  ;;  %1151 = vadd.xlane.f32.xlu0 %v4374_v24 }
 0x483   : > { %3432 = vpow2.f32 %v1121_v35 }
 0x485   : > { %v1076_v17 = vpop.xlane.xlu1 %1075 }
 0x486   : > { %v1103_v39 = vsub.f32 %v4302_v4, %v1076_v17 }
 0x488   : > { %v4380_v18 = vpop.eup %3430  ;;  %v1123_v8 = vmul.f32 1.442695, %v1103_v39 }
 0x489   : > { %v4382_v29 = vpop.eup %3432 }
 0x48a   : > { %3434 = vpow2.f32 %v1123_v8  ;;  %1165 = vadd.xlane.f32.xlu1 %v4380_v18  ;;  %1153 = vadd.xlane.f32.xlu0 %v4382_v29 }
 0x48d   : > { %v1088_v31 = vpop.xlane.xlu1 %1087  ;;  %v1078_v37 = vpop.xlane.xlu0 %1077 }
 0x48e   : > { %v1109_v32 = vsub.f32 %v4308_v20, %v1088_v31  ;;  %v1104_v4 = vsub.f32 %v4312_v27, %v1078_v37  ;;  %v4405_v27 = vld [vmem:[#allocation2 + $0x28] sm:$0xff] }
 0x48f   : > { %v2315_v31 = vld [vmem:[#allocation3 + $0xc] sm:$0xf] }
 0x490   : > { %v4387_v15 = vpop.eup %3434  ;;  %v1135_v33 = vmul.f32 1.442695, %v1109_v32  ;;  %v1125_v45 = vmul.f32 1.442695, %v1104_v4  ;;  %v4450_v32 = vpop.permute.xlu2 %2360 }
 0x492   : > { %3436 = vpow2.f32 %v1135_v33  ;;  %1155 = vadd.xlane.f32.xlu1 %v4387_v15 }
 0x493   : > { %3438 = vpow2.f32 %v1125_v45 }
 0x495   : > { %v1092_v53 = vpop.xlane.xlu1 %1091 }
 0x496   : > { %v1111_v0 = vsub.f32 %v4318_v28, %v1092_v53 }
 0x498   : > { %v4393_v48 = vpop.eup %3436  ;;  %v1139_v26 = vmul.f32 1.442695, %v1111_v0 }
 0x499   : > { %2366 = vrot.lane.b32.xlu2 %v4391_v50, %s3713_s15  ;;  %1167 = vadd.xlane.f32.xlu0 %v4393_v48  ;;  %v4398_v20 = vpop.eup %3438 }
 0x4a1   : > { %1654 = vrot.lane.b32.xlu2 %v4206_v40, %s3714_s16  ;;  %1157 = vadd.xlane.f32.xlu0 %v4398_v20  ;;  %v1090_v40 = vpop.xlane.xlu0 %1089 }
 0x4a5   : > { %v1096_v54 = vpop.xlane.xlu1 %1095 }
 0x4a6   : > { %v1113_v62 = vsub.f32 %v4336_v42, %v1096_v54 }
 0x4a8   : > { %v1143_v28 = vmul.f32 1.442695, %v1113_v62 }
 0x4a9   : > { %1652 = vrot.lane.b32.xlu2 %v4186_v2, %s3714_s16  ;;  %v1110_v2 = vsub.f32 %v4322_v58, %v1090_v40  ;;  %v1094_v38 = vpop.xlane.xlu0 %1093  ;;  %v2397_v40 = vsel %vm998_vm1, %v2315_v31, 0 }
 0x4aa   : > { %v1112_v21 = vsub.f32 %v4329_v12, %v1094_v38 }
 0x4ab   : > { %1879 = vrot.lane.b32.xlu1 %v4405_v27, %s3712_s14  ;;  %v1137_v49 = vmul.f32 1.442695, %v1110_v2 }
 0x4ac   : > { %v1141_v44 = vmul.f32 1.442695, %v1112_v21 }
 0x4ad   : > { %3440 = vpow2.f32 %v1137_v49 }
 0x4ae   : > { %3442 = vpow2.f32 %v1141_v44 }
 0x4af   : > { %3444 = vpow2.f32 %v1139_v26 }
 0x4b1   : > { %1881 = vrot.lane.b32.xlu2 %v4409_v43, %s3712_s14  ;;  %v1098_v59 = vpop.xlane.xlu0 %1097 }
 0x4b2   : > { %v1114_v58 = vsub.f32 %v4342_v25, %v1098_v59 }
 0x4b3   : > { %v4422_v52 = vpop.eup %3440 }
 0x4b4   : > { %v1145_v60 = vmul.f32 1.442695, %v1114_v58  ;;  %v4429_v12 = vpop.eup %3442 }
 0x4b5   : > { %1656 = vrot.lane.b32.xlu0 %v4244_v51, %s3714_s16  ;;  %v4424_v51 = vpop.f32.mrf.mxu3  ;;  %v4432_v13 = vpop.eup %3444 }
 0x4b6   : > { %3446 = vpow2.f32 %v1145_v60 }
 0x4b7   : > { %3448 = vpow2.f32 %v1143_v28 }
 0x4b9   : > { %2368 = vrot.lane.b32.xlu2 %v4415_v34, %s3713_s15 }
 0x4bc   : > { %v4440_v42 = vpop.eup %3446 }
 0x4bd   : > { %v1451_v61 = vpop.f32.mrf.mxu3  ;;  %v4443_v19 = vpop.eup %3448 }
 0x4be   : > { %v4437_v57 = vsel %vm915_vm8, %v1451_v61, -1e+30  ;;  %v4471_v61 = vsel %vm915_vm8, %v4424_v51, -1e+30 }
 0x4c5   : > { %v1454_v2 = vpop.f32.mrf.mxu3 }
 0x4cd   : > { %v1456_v44 = vpop.f32.mrf.mxu3 }
 0x4d5   : > { %1169 = vadd.xlane.f32.xlu1 %v4422_v52  ;;  %v1459_v58 = vpop.f32.mrf.mxu3 }
 0x4d6   : > { %v4489_v31 = vsel %vm915_vm8, %v1459_v58, -1e+30 }
 0x4dd   : > { %1173 = vadd.xlane.f32.xlu1 %v4429_v12 }
 0x4df   : > { %1171 = vadd.xlane.f32.xlu0 %v4432_v13 }
 0x4e2   : > { %1504 = vmax.xlane.f32.xlu2 %v4437_v57 }
 0x4e4   : > { %v1148_v25 = vpop.xlane.xlu1 %1147 }
 0x4e5   : > { %1177 = vadd.xlane.f32.xlu1 %v4440_v42  ;;  %3450 = vrcp.f32 %v1148_v25  ;;  %v1461_v25 = vpop.f32.mrf.mxu3 }
 0x4e7   : > { %1175 = vadd.xlane.f32.xlu0 %v4443_v19 }
 0x4eb   : > { %v3451_v39 = vpop.eup %3450 }
 0x4ec   : > { %v1162_v3 = vpop.xlane.xlu0 %1161  ;;  %v1195_v37 = vmul.f32 %v3451_v39, %v4356_v55 }
 0x4ed   : > { %v1160_v23 = vpop.xlane.xlu1 %1159 }
 0x4f5   : > { %v1150_v35 = vpop.xlane.xlu1 %1149  ;;  %v1152_v17 = vpop.xlane.xlu0 %1151 }
 0x4f6   : > { %3452 = vrcp.f32 %v1150_v35 }
 0x4fa   : > { %1646 = vrot.lane.b32.xlu2 %v4237_v7, %s3714_s16 }
 0x4fb   : > { %1650 = vrot.lane.b32.xlu0 %v4201_v16, %s3714_s16  ;;  %v1164_v16 = vpop.xlane.xlu2 %1163 }
 0x4fc   : > { %v3453_v8 = vpop.eup %3452 }
 0x4fd   : > { %v1196_v33 = vmul.f32 %v3453_v8, %v4370_v5  ;;  %v1154_v4 = vpop.xlane.xlu0 %1153  ;;  %v1166_v7 = vpop.xlane.xlu1 %1165 }
 0x4fe   : > { %1648 = vrot.lane.b32.xlu1 %v4196_v56, %s3714_s16  ;;  %3454 = vrcp.f32 %v1154_v4  ;;  %v1464_v8 = vpop.f32.mrf.mxu3 }
 0x4ff   : > { %v1211_v45 = vpack.c.bf16 %v1196_v33, %v1195_v37  ;;  %3456 = vrcp.f32 %v1152_v17 }
 0x501   : > { %1251 = vmatmul.bf16.vlgmr.msra.gmra.mxu2 %v1211_v45 }
 0x502   : > { %1642 = vrot.lane.b32.xlu2 %v4191_v10, %s3714_s16  ;;  %2406 = vmatpush.bf16.msra.mxu2 %v2397_v40 }
 0x503   : > { %v4463_v53 = vpop.permute.xlu2 %2366 }
 0x504   : > { %v3455_v55 = vpop.eup %3454 }
 0x505   : > { %v3457_v49 = vpop.eup %3456  ;;  %v1198_v5 = vmul.f32 %v3455_v55, %v4382_v29  ;;  %v1156_v0 = vpop.xlane.xlu1 %1155  ;;  %v4510_v55 = vld [vmem:[#allocation2 + $0x38] sm:$0xff] }
 0x506   : > { %v1197_v56 = vmul.f32 %v3457_v49, %v4374_v24  ;;  %3458 = vrcp.f32 %v1156_v0  ;;  %v1466_v40 = vpop.f32.mrf.mxu3 }
 0x508   : > { %v1212_v21 = vpack.c.bf16 %v1198_v5, %v1197_v56 }
 0x50b   : > { %v1655_v26 = vpop.permute.xlu2 %1654 }
 0x50c   : > { %v4460_v38 = vpop.xlane.xlu0 %1167  ;;  %v3459_v59 = vpop.eup %3458 }
 0x50d   : > { %v1199_v62 = vmul.f32 %v3459_v59, %v4387_v15  ;;  %v4476_v15 = vsel %vm915_vm8, %v1454_v2, -1e+30  ;;  %v4508_v2 = vsel %vm915_vm8, %v1466_v40, -1e+30 }
 0x511   : > { %1256 = vmatmul.bf16.gmra.mxu2 %v1212_v21 }
 0x513   : > { %v1653_v28 = vpop.permute.xlu2 %1652 }
 0x514   : > { %v1158_v10 = vpop.xlane.xlu0 %1157 }
 0x515   : > { %3460 = vrcp.f32 %v1158_v10 }
 0x516   : > { %3462 = vrcp.f32 %v1162_v3  ;;  %v4481_v3 = vsel %vm915_vm8, %v1456_v44, -1e+30 }
 0x517   : > { %3464 = vrcp.f32 %v1160_v23 }
 0x518   : > { %3466 = vrcp.f32 %v1166_v7 }
 0x519   : > { %3468 = vrcp.f32 %v1164_v16 }
 0x51a   : > { %3470 = vrcp.f32 %v4460_v38 }
 0x51b   : > { %v3461_v54 = vpop.eup %3460  ;;  %v1882_v39 = vpop.permute.xlu2 %1881 }
 0x51c   : > { %v1200_v29 = vmul.f32 %v3461_v54, %v4398_v20  ;;  %v3463_v35 = vpop.eup %3462 }
 0x51d   : > { %v1880_v60 = vpop.permute.xlu1 %1879  ;;  %v3465_v17 = vpop.eup %3464  ;;  %v1202_v23 = vmul.f32 %v3463_v35, %v4362_v1  ;;  %v4499_v1 = vsel %vm915_vm8, %v1461_v25, -1e+30 }
 0x51e   : > { %3212 = vmatmul.msk.bf16.gmra.mxu3 %vm973_vm7, %v1880_v60  ;;  %v1213_v24 = vpack.c.bf16 %v1200_v29, %v1199_v62  ;;  %v1201_v51 = vmul.f32 %v3465_v17, %v4364_v14  ;;  %v4494_v14 = vsel %vm915_vm8, %v1464_v8, -1e+30  ;;  %v3467_v33 = vpop.eup %3466 }
 0x51f   : > { %v3469_v4 = vpop.eup %3468  ;;  %v1204_v45 = vmul.f32 %v3467_v33, %v4380_v18 }
 0x520   : > { %v1214_v37 = vpack.c.bf16 %v1202_v23, %v1201_v51  ;;  %v1203_v7 = vmul.f32 %v3469_v4, %v4372_v11  ;;  %v4520_v11 = vld [vmem:[#allocation2 + $0x38] sm:$0xff]  ;;  %v3471_v5 = vpop.eup %3470 }
 0x521   : > { %1261 = vmatmul.bf16.gmra.mxu2 %v1213_v24  ;;  %v1205_v21 = vmul.f32 %v3471_v5, %v4393_v48 }
 0x522   : > { %v1215_v16 = vpack.c.bf16 %v1204_v45, %v1203_v7 }
 0x523   : > { %v4527_v59 = vpop.permute.xlu2 %2368 }
 0x525   : > { %1502 = vmax.xlane.f32.xlu0 %v4471_v61 }
 0x527   : > { %v1657_v20 = vpop.permute.xlu0 %1656 }
 0x528   : > { %1506 = vmax.xlane.f32.xlu1 %v4476_v15  ;;  %1666 = vmatpush.bf16.msrb.mxu1 %v1657_v20 }
 0x52b   : > { %1508 = vmax.xlane.f32.xlu2 %v4481_v3 }
 0x52c   : > { %1667 = vmatpush.bf16.msrb.mxu1 %v1655_v26 }
 0x52e   : > { %3213 = vmatmul.msk.bf16.gmra.mxu3 %vm973_vm7, %v1882_v39 }
 0x530   : > { %1510 = vmax.xlane.f32.xlu1 %v4489_v31  ;;  %1668 = vmatpush.bf16.msrb.mxu1 %v1653_v28 }
 0x531   : > { %1266 = vmatmul.bf16.gmra.mxu2 %v1214_v37 }
 0x533   : > { %1514 = vmax.xlane.f32.xlu2 %v4494_v14 }
 0x538   : > { %1512 = vmax.xlane.f32.xlu1 %v4499_v1 }
 0x539   : > { %1644 = vrot.lane.b32.xlu0 %v4178_v46, %s3714_s16  ;;  %v1469_v46 = vpop.f32.mrf.mxu3 }
 0x53a   : > { %v4518_v18 = vsel %vm915_vm8, %v1469_v46, -1e+30 }
 0x540   : > { %1516 = vmax.xlane.f32.xlu1 %v4508_v2 }
 0x541   : > { %1271 = vmatmul.bf16.gmra.mxu2 %v1215_v16  ;;  %1883 = vrot.lane.b32.xlu0 %v4510_v55, %s3712_s14  ;;  %v1471_v37 = vpop.f32.mrf.mxu3 }
 0x548   : > { %v1170_v49 = vpop.xlane.xlu1 %1169  ;;  %1518 = vmax.xlane.f32.xlu1 %v4518_v18 }
 0x549   : > { %3472 = vrcp.f32 %v1170_v49  ;;  %2370 = vrot.lane.b32.xlu0 %v4520_v11, %s3713_s15  ;;  %v1921_v40 = vpop.f32.mrf.mxu3 }
 0x54f   : > { %v3473_v56 = vpop.eup %3472 }
 0x550   : > { %v1206_v0 = vmul.f32 %v3473_v56, %v4422_v52  ;;  %v1174_v10 = vpop.xlane.xlu1 %1173 }
 0x552   : > { %v1172_v38 = vpop.xlane.xlu0 %1171  ;;  %v1216_v44 = vpack.c.bf16 %v1206_v0, %v1205_v21 }
 0x553   : > { %3474 = vrcp.f32 %v1172_v38 }
 0x554   : > { %1276 = vmatmul.bf16.gmra.mxu2 %v1216_v44  ;;  %3476 = vrcp.f32 %v1174_v10  ;;  %v1923_v44 = vpop.f32.mrf.mxu3 }
 0x555   : > { %v1505_v29 = vpop.xlane.xlu2 %1504 }
 0x556   : > { %v1529_v48 = vsub.f32 %v4437_v57, %v1505_v29 }
 0x558   : > { %v1178_v52 = vpop.xlane.xlu1 %1177  ;;  %v1552_v28 = vmul.f32 1.442695, %v1529_v48 }
 0x559   : > { %v3475_v26 = vpop.eup %3474 }
 0x55a   : > { %v3477_v54 = vpop.eup %3476  ;;  %v1207_v58 = vmul.f32 %v3475_v26, %v4432_v13  ;;  %v1176_v60 = vpop.xlane.xlu0 %1175 }
 0x55b   : > { %v1208_v62 = vmul.f32 %v3477_v54, %v4429_v12  ;;  %3478 = vrcp.f32 %v1176_v60 }
 0x55c   : > { %3480 = vrcp.f32 %v1178_v52 }
 0x55d   : > { %v1217_v24 = vpack.c.bf16 %v1208_v62, %v1207_v58  ;;  %3482 = vpow2.f32 %v1552_v28  ;;  %v1647_v57 = vpop.permute.xlu2 %1646 }
 0x561   : > { %v3479_v25 = vpop.eup %3478 }
 0x562   : > { %v3481_v35 = vpop.eup %3480  ;;  %v1209_v17 = vmul.f32 %v3479_v25, %v4443_v19  ;;  %v4569_v25 = vsel %vm915_vm8, %v1923_v44, -1e+30 }
 0x563   : > { %v1210_v13 = vmul.f32 %v3481_v35, %v4440_v42  ;;  %v4534_v51 = vpop.eup %3482 }
 0x564   : > { %1281 = vmatmul.bf16.gmra.mxu2 %v1217_v24  ;;  %v1926_v24 = vpop.f32.mrf.mxu3 }
 0x565   : > { %v1218_v23 = vpack.c.bf16 %v1210_v13, %v1209_v17  ;;  %v1643_v45 = vpop.permute.xlu2 %1642 }
 0x56d   : > { %v1651_v20 = vpop.permute.xlu0 %1650 }
 0x56e   : > { %1669 = vmatpush.bf16.msrb.mxu1 %v1651_v20 }
 0x570   : > { %v1649_v12 = vpop.permute.xlu1 %1648 }
 0x572   : > { %1670 = vmatpush.bf16.msrb.mxu1 %v1649_v12 }
 0x573   : > { %1584 = vadd.xlane.f32.xlu0 %v4534_v51 }
 0x574   : > { %1286 = vmatmul.bf16.gmra.mxu2 %v1218_v23 }
 0x576   : > { %1671 = vmatpush.bf16.msrb.mxu1 %v1647_v57 }
 0x584   : > { %v1252_v39 = vpop.f32.mrf.mxu2  ;;  %3167 = vmatmul.msk.bf16.vlgmr.msrb.gmra.mxu2 %vm973_vm7, %v4217_v30 }
 0x585   : > { %v1292_v8 = vpack.c.bf16 %v1252_v39, %v1252_v39 }
 0x587   : > { %1309 = vst.msk [vmem:[#allocation4] sm:$0xf] %vm1308_vm9, %v1292_v8  ;;  %v1928_v8 = vpop.f32.mrf.mxu3 }
 0x58c   : > { %v1254_v19 = vpop.f32.mrf.mxu2 }
 0x58d   : > { %v1293_v42 = vpack.c.bf16 %v1254_v19, %v1254_v19 }
 0x58f   : > { %1310 = vst.msk [vmem:[#allocation4 + $0x4] sm:$0xf] %vm1308_vm9, %v1293_v42 }
 0x594   : > { %v1257_v33 = vpop.f32.mrf.mxu2  ;;  %3168 = vmatmul.msk.bf16.gmra.mxu2 %vm973_vm7, %v4229_v36 }
 0x595   : > { %v1294_v4 = vpack.c.bf16 %v1257_v33, %v1257_v33 }
 0x597   : > { %1311 = vst.msk [vmem:[#allocation4 + $0x8] sm:$0xf] %vm1308_vm9, %v1294_v4 }
 0x598   : > { %v1503_v7 = vpop.xlane.xlu0 %1502 }
 0x599   : > { %v1528_v30 = vsub.f32 %v4471_v61, %v1503_v7 }
 0x59b   : > { %v1550_v16 = vmul.f32 1.442695, %v1528_v30  ;;  %v1507_v46 = vpop.xlane.xlu1 %1506 }
 0x59c   : > { %v1530_v49 = vsub.f32 %v4476_v15, %v1507_v46  ;;  %v1259_v5 = vpop.f32.mrf.mxu2 }
 0x59d   : > { %3484 = vpow2.f32 %v1550_v16  ;;  %v1295_v56 = vpack.c.bf16 %v1259_v5, %v1259_v5 }
 0x59e   : > { %v1554_v21 = vmul.f32 1.442695, %v1530_v49  ;;  %v1509_v0 = vpop.xlane.xlu2 %1508 }
 0x59f   : > { %1312 = vst.msk [vmem:[#allocation4 + $0xc] sm:$0xf] %vm1308_vm9, %v1295_v56  ;;  %v1531_v36 = vsub.f32 %v4481_v3, %v1509_v0 }
 0x5a0   : > { %3486 = vpow2.f32 %v1554_v21 }
 0x5a1   : > { %v1556_v38 = vmul.f32 1.442695, %v1531_v36 }
 0x5a3   : > { %v4548_v10 = vpop.eup %3484  ;;  %3488 = vpow2.f32 %v1556_v38  ;;  %v1511_v61 = vpop.xlane.xlu1 %1510 }
 0x5a4   : > { %v1262_v26 = vpop.f32.mrf.mxu2  ;;  %3169 = vmatmul.msk.bf16.gmra.mxu2 %vm973_vm7, %v4277_v9  ;;  %1582 = vadd.xlane.f32.xlu2 %v4548_v10  ;;  %v1532_v58 = vsub.f32 %v4489_v31, %v1511_v61  ;;  %v4563_v9 = vsel %vm915_vm8, %v1471_v37, -1e+30 }
 0x5a5   : > { %v1296_v15 = vpack.c.bf16 %v1262_v26, %v1262_v26 }
 0x5a6   : > { %v4553_v54 = vpop.eup %3486  ;;  %v1558_v62 = vmul.f32 1.442695, %v1532_v58  ;;  %v1515_v23 = vpop.xlane.xlu2 %1514 }
 0x5a7   : > { %1313 = vst.msk [vmem:[#allocation4 + $0x10] sm:$0xf] %vm1308_vm9, %v1296_v15  ;;  %1586 = vadd.xlane.f32.xlu0 %v4553_v54 }
 0x5a8   : > { %3490 = vpow2.f32 %v1558_v62 }
 0x5a9   : > { %v4558_v3 = vpop.eup %3488 }
 0x5aa   : > { %1588 = vadd.xlane.f32.xlu1 %v4558_v3 }
 0x5ab   : > { %v1513_v29 = vpop.xlane.xlu1 %1512  ;;  %v1645_v60 = vpop.permute.xlu0 %1644 }
 0x5ac   : > { %v1533_v48 = vsub.f32 %v4499_v1, %v1513_v29  ;;  %v1264_v52 = vpop.f32.mrf.mxu2  ;;  %1520 = vmax.xlane.f32.xlu2 %v4563_v9  ;;  %1672 = vmatpush.bf16.msrb.mxu1 %v1645_v60  ;;  %v4575_v1 = vsel %vm915_vm8, %v1921_v40, -1e+30 }
 0x5ad   : > { %v1297_v31 = vpack.c.bf16 %v1264_v52, %v1264_v52 }
 0x5ae   : > { %v1560_v28 = vmul.f32 1.442695, %v1533_v48  ;;  %v4581_v12 = vpop.eup %3490 }
 0x5af   : > { %1314 = vst.msk [vmem:[#allocation4 + $0x14] sm:$0xf] %vm1308_vm9, %v1297_v31  ;;  %1979 = vmax.xlane.f32.xlu0 %v4569_v25 }
 0x5b0   : > { %3492 = vpow2.f32 %v1560_v28  ;;  %1673 = vmatpush.bf16.msrb.mxu1 %v1643_v45  ;;  %v4599_v45 = vsel %vm915_vm8, %v1928_v8, -1e+30 }
 0x5b3   : > { %v1517_v35 = vpop.xlane.xlu1 %1516  ;;  %v1884_v20 = vpop.permute.xlu0 %1883 }
 0x5b4   : > { %v1535_v17 = vsub.f32 %v4508_v2, %v1517_v35  ;;  %v1267_v13 = vpop.f32.mrf.mxu2  ;;  %3247 = vmatmul.msk.bf16.vlgmr.msra.gmra.mxu2 %vm973_vm7, %v4331_v6  ;;  %1977 = vmax.xlane.f32.xlu2 %v4575_v1  ;;  %v1534_v6 = vsub.f32 %v4494_v14, %v1515_v23  ;;  %v4592_v2 = vsel %vm915_vm8, %v1926_v24, -1e+30  ;;  %v1931_v14 = vpop.f32.mrf.mxu3 }
 0x5b5   : > { %v1298_v57 = vpack.c.bf16 %v1267_v13, %v1267_v13  ;;  %3214 = vmatmul.msk.bf16.gmra.mxu3 %vm973_vm7, %v1884_v20  ;;  %v4606_v40 = vsel %vm915_vm8, %v1931_v14, -1e+30 }
 0x5b6   : > { %v4584_v39 = vpop.eup %3492  ;;  %v1564_v19 = vmul.f32 1.442695, %v1535_v17  ;;  %v1562_v42 = vmul.f32 1.442695, %v1534_v6 }
 0x5b7   : > { %1315 = vst.msk [vmem:[#allocation4 + $0x18] sm:$0xf] %vm1308_vm9, %v1298_v57  ;;  %1590 = vadd.xlane.f32.xlu0 %v4581_v12  ;;  %1592 = vadd.xlane.f32.xlu1 %v4584_v39 }
 0x5b8   : > { %3494 = vpow2.f32 %v1564_v19 }
 0x5b9   : > { %3496 = vpow2.f32 %v1562_v42 }
 0x5bb   : > { %v1519_v30 = vpop.xlane.xlu1 %1518  ;;  %v2371_v60 = vpop.permute.xlu0 %2370 }
 0x5bc   : > { %v1269_v37 = vpop.f32.mrf.mxu2  ;;  %1981 = vmax.xlane.f32.xlu2 %v4592_v2  ;;  %v1536_v49 = vsub.f32 %v4518_v18, %v1519_v30  ;;  %v1933_v5 = vpop.f32.mrf.mxu3 }
 0x5bd   : > { %v1299_v33 = vpack.c.bf16 %v1269_v37, %v1269_v37  ;;  %v4618_v36 = vsel %vm915_vm8, %v1933_v5, -1e+30 }
 0x5be   : > { %v4595_v4 = vpop.eup %3494  ;;  %v1566_v56 = vmul.f32 1.442695, %v1536_v49 }
 0x5bf   : > { %1316 = vst.msk [vmem:[#allocation4 + $0x1c] sm:$0xf] %vm1308_vm9, %v1299_v33  ;;  %1983 = vmax.xlane.f32.xlu0 %v4599_v45  ;;  %1596 = vadd.xlane.f32.xlu1 %v4595_v4  ;;  %v4611_v46 = vpop.eup %3496 }
 0x5c0   : > { %3498 = vpow2.f32 %v1566_v56 }
 0x5c4   : > { %v1272_v7 = vpop.f32.mrf.mxu2  ;;  %3248 = vmatmul.msk.bf16.gmra.mxu2 %vm973_vm7, %v4344_v22  ;;  %1985 = vmax.xlane.f32.xlu2 %v4606_v40 }
 0x5c5   : > { %v1300_v16 = vpack.c.bf16 %v1272_v7, %v1272_v7 }
 0x5c6   : > { %v4624_v22 = vpop.eup %3498 }
 0x5c7   : > { %1317 = vst.msk [vmem:[#allocation4 + $0x20] sm:$0xf] %vm1308_vm9, %v1300_v16  ;;  %1594 = vadd.xlane.f32.xlu0 %v4611_v46 }
 0x5cc   : > { %v1274_v21 = vpop.f32.mrf.mxu2 }
 0x5cd   : > { %v1301_v0 = vpack.c.bf16 %v1274_v21, %v1274_v21 }
 0x5cf   : > { %1318 = vst.msk [vmem:[#allocation4 + $0x24] sm:$0xf] %vm1308_vm9, %v1301_v0  ;;  %1987 = vmax.xlane.f32.xlu0 %v4618_v36 }
 0x5d4   : > { %3249 = vmatmul.msk.bf16.gmra.mxu2 %vm973_vm7, %v4450_v32 }
 0x5d7   : > { %v1277_v38 = vpop.f32.mrf.mxu2  ;;  %1598 = vadd.xlane.f32.xlu0 %v4624_v22 }
 0x5d8   : > { %v1302_v18 = vpack.c.bf16 %v1277_v38, %v1277_v38  ;;  %2143 = vrot.lane.b32.xlu1 %v4510_v55, %s3715_s17 }
 0x5da   : > { %1319 = vst.msk [vmem:[#allocation4 + $0x28] sm:$0xf] %vm1308_vm9, %v1302_v18 }
 0x5dc   : > { %2630 = vrot.lane.b32.xlu2 %v4520_v11, %s3716_s18 }
 0x5df   : > { %v1279_v44 = vpop.f32.mrf.mxu2 }
 0x5e0   : > { %v1303_v61 = vpack.c.bf16 %v1279_v44, %v1279_v44  ;;  %2141 = vrot.lane.b32.xlu1 %v4409_v43, %s3715_s17 }
 0x5e2   : > { %1320 = vst.msk [vmem:[#allocation4 + $0x2c] sm:$0xf] %vm1308_vm9, %v1303_v61 }
 0x5e4   : > { %3250 = vmatmul.msk.bf16.gmra.mxu2 %vm973_vm7, %v4348_v41 }
 0x5e6   : > { %v4655_v48 = vpop.xlane.xlu0 %1584 }
 0x5e7   : > { %v1282_v32 = vpop.f32.mrf.mxu2 }
 0x5e8   : > { %v1304_v26 = vpack.c.bf16 %v1282_v32, %v1282_v32 }
 0x5ea   : > { %1321 = vst.msk [vmem:[#allocation4 + $0x30] sm:$0xf] %vm1308_vm9, %v1304_v26 }
 0x5ef   : > { %v1284_v55 = vpop.f32.mrf.mxu2 }
 0x5f0   : > { %v1305_v15 = vpack.c.bf16 %v1284_v55, %v1284_v55 }
 0x5f2   : > { %1322 = vst.msk [vmem:[#allocation4 + $0x34] sm:$0xf] %vm1308_vm9, %v1305_v15 }
 0x5f4   : > { %3251 = vmatmul.msk.bf16.gmra.mxu2 %vm973_vm7, %v4351_v47 }
 0x5f7   : > { %v1287_v11 = vpop.f32.mrf.mxu2 }
 0x5f8   : > { %v1306_v58 = vpack.c.bf16 %v1287_v11, %v1287_v11 }
 0x5fa   : > { %1323 = vst.msk [vmem:[#allocation4 + $0x38] sm:$0xf] %vm1308_vm9, %v1306_v58 }
 0x5ff   : > { %v1289_v43 = vpop.f32.mrf.mxu2 }
 0x600   : > { %v1307_v62 = vpack.c.bf16 %v1289_v43, %v1289_v43 }
 0x602   : > { %1324 = vst.msk [vmem:[#allocation4 + $0x3c] sm:$0xf] %vm1308_vm9, %v1307_v62 }
 0x604   : > { %3252 = vmatmul.msk.bf16.gmra.mxu2 %vm973_vm7, %v4463_v53 }
 0x607   : > { %v1434_v41 = vpop.f32.mrf.mxu2 }
 0x608   : > { %v4647_v29 = vsel %vm915_vm8, %v1434_v41, -1e+30 }
 0x609   : > { %1490 = vmax.xlane.f32.xlu2 %v4647_v29 }
 0x60f   : > { %v1436_v47 = vpop.f32.mrf.mxu2 }
 0x610   : > { %v4652_v24 = vsel %vm915_vm8, %v1436_v47, -1e+30 }
 0x611   : > { %1492 = vmax.xlane.f32.xlu1 %v4652_v24 }
 0x614   : > { %3253 = vmatmul.msk.bf16.gmra.mxu2 %vm973_vm7, %v4527_v59 }
 0x617   : > { %v1439_v53 = vpop.f32.mrf.mxu2  ;;  %v4659_v52 = vpop.xlane.xlu2 %1582 }
 0x618   : > { %v4688_v7 = vsel %vm915_vm8, %v1439_v53, -1e+30 }
 0x61a   : > { %v4661_v31 = vpop.xlane.xlu0 %1586 }
 0x61d   : > { %v4669_v13 = vpop.xlane.xlu1 %1588 }
 0x61f   : > { %v1441_v28 = vpop.f32.mrf.mxu2  ;;  %v1521_v35 = vpop.xlane.xlu2 %1520 }
 0x620   : > { %v1537_v20 = vsub.f32 %v4563_v9, %v1521_v35  ;;  %v4666_v17 = vsel %vm915_vm8, %v1441_v28, -1e+30 }
 0x621   : > { %1496 = vmax.xlane.f32.xlu2 %v4666_v17 }
 0x622   : > { %v1568_v23 = vmul.f32 1.442695, %v1537_v20  ;;  %v4671_v57 = vpop.xlane.xlu0 %1979  ;;  %v3674_v20 = vld [vmem:[#allocation2 + $0x20] sm:$0xff] }
 0x624   : > { %3500 = vpow2.f32 %v1568_v23  ;;  %3254 = vmatmul.msk.bf16.gmra.mxu2 %vm973_vm7, %v2371_v60 }
 0x627   : > { %v1444_v59 = vpop.f32.mrf.mxu2  ;;  %v4674_v8 = vpop.xlane.xlu2 %1977 }
 0x62a   : > { %v4676_v19 = vpop.eup %3500  ;;  %v1591_v9 = vpop.xlane.xlu0 %1590 }
 0x62b   : > { %v1593_v6 = vpop.xlane.xlu1 %1592  ;;  %3502 = vrcp.f32 %v1591_v9  ;;  %1600 = vadd.xlane.f32.xlu0 %v4676_v19 }
 0x62c   : > { %3504 = vrcp.f32 %v1593_v6  ;;  %v3675_v6 = vld [vmem:[#allocation2 + $0x18] sm:$0xff] }
 0x62f   : > { %v1446_v42 = vpop.f32.mrf.mxu2  ;;  %v4679_v37 = vpop.xlane.xlu2 %1981 }
 0x630   : > { %v4683_v33 = vsel %vm915_vm8, %v1446_v42, -1e+30 }
 0x631   : > { %v3503_v14 = vpop.eup %3502  ;;  %1500 = vmax.xlane.f32.xlu1 %v4683_v33 }
 0x632   : > { %v4690_v30 = vpop.xlane.xlu0 %1983  ;;  %v4693_v16 = vmul.f32 %v3503_v14, %v4581_v12  ;;  %v3505_v49 = vpop.eup %3504  ;;  %v4710_v12 = vsel %vm915_vm8, %v1444_v59, -1e+30 }
 0x633   : > { %1494 = vmax.xlane.f32.xlu0 %v4688_v7  ;;  %v4697_v5 = vmul.f32 %v3505_v49, %v4584_v39  ;;  %v1597_v56 = vpop.xlane.xlu1 %1596 }
 0x634   : > { %3506 = vrcp.f32 %v1597_v56 }
 0x635   : > { %v5396_v63 = vpack.c.bf16 %v4697_v5, %v4693_v16 }
 0x637   : > { %v2408_v0 = vpop.f32.mrf.mxu2  ;;  %v4701_v38 = vpop.xlane.xlu2 %1985 }
 0x638   : > { %v4705_v18 = vsel %vm915_vm8, %v2408_v0, -1e+30 }
 0x639   : > { %2464 = vmax.xlane.f32.xlu1 %v4705_v18 }
 0x63a   : > { %v1595_v39 = vpop.xlane.xlu0 %1594  ;;  %v3507_v44 = vpop.eup %3506 }
 0x63b   : > { %3508 = vrcp.f32 %v1595_v39  ;;  %1498 = vmax.xlane.f32.xlu0 %v4710_v12  ;;  %v4722_v11 = vmul.f32 %v3507_v44, %v4595_v4  ;;  %v3676_v44 = vld [vmem:[#allocation2 + $0x20] sm:$0xff] }
 0x63f   : > { %v2410_v61 = vpop.f32.mrf.mxu2  ;;  %v2631_v32 = vpop.permute.xlu2 %2630 }
 0x640   : > { %v4715_v26 = vsel %vm915_vm8, %v2410_v61, -1e+30  ;;  %2640 = vmatpush.bf16.msra.mxu1 %v2631_v32 }
 0x641   : > { %v3509_v55 = vpop.eup %3508  ;;  %2466 = vmax.xlane.f32.xlu2 %v4715_v26 }
 0x642   : > { %v4719_v15 = vmul.f32 %v3509_v55, %v4611_v46  ;;  %v4758_v0 = vpop.xlane.xlu0 %1987 }
 0x647   : > { %v2413_v43 = vpop.f32.mrf.mxu2 }
 0x648   : > { %v4728_v62 = vsel %vm915_vm8, %v2413_v43, -1e+30  ;;  %v1936_v43 = vpop.f32.mrf.mxu3 }
 0x649   : > { %2468 = vmax.xlane.f32.xlu1 %v4728_v62 }
 0x64a   : > { %v2144_v41 = vpop.permute.xlu1 %2143  ;;  %v4771_v32 = vpop.xlane.xlu0 %1598 }
 0x64b   : > { %2153 = vmatpush.bf16.msra.mxu0 %v2144_v41 }
 0x64f   : > { %v2415_v60 = vpop.f32.mrf.mxu2 }
 0x650   : > { %v4733_v46 = vsel %vm915_vm8, %v2415_v60, -1e+30  ;;  %v3677_v60 = vld [vmem:[#allocation2 + $0x8] sm:$0xff] }
 0x651   : > { %2470 = vmax.xlane.f32.xlu2 %v4733_v46 }
 0x652   : > { %v2142_v4 = vpop.permute.xlu1 %2141 }
 0x653   : > { %2154 = vmatpush.bf16.msra.mxu0 %v2142_v4 }
 0x657   : > { %v2418_v47 = vpop.f32.mrf.mxu2 }
 0x658   : > { %v4738_v53 = vsel %vm915_vm8, %v2418_v47, -1e+30 }
 0x659   : > { %2472 = vmax.xlane.f32.xlu2 %v4738_v53 }
 0x65f   : > { %v2420_v28 = vpop.f32.mrf.mxu2 }
 0x660   : > { %v4743_v35 = vsel %vm915_vm8, %v2420_v28, -1e+30  ;;  %v1938_v28 = vpop.f32.mrf.mxu3 }
 0x661   : > { %2474 = vmax.xlane.f32.xlu0 %v4743_v35 }
 0x671   : > { %2626 = vrot.lane.b32.xlu2 %v4391_v50, %s3716_s18 }
 0x679   : > { %2624 = vrot.lane.b32.xlu2 %v3674_v20, %s3716_s18 }
 0x67c   : > { %v1491_v23 = vpop.xlane.xlu2 %1490 }
 0x67d   : > { %v1522_v59 = vsub.f32 %v4647_v29, %v1491_v23  ;;  %v2010_v29 = vsub.f32 %v4569_v25, %v4671_v57 }
 0x67f   : > { %v1538_v9 = vmul.f32 1.442695, %v1522_v59  ;;  %v2027_v39 = vmul.f32 1.442695, %v2010_v29  ;;  %v4787_v59 = vsel %vm915_vm8, %v1938_v28, -1e+30 }
 0x681   : > { %3510 = vpow2.f32 %v1538_v9  ;;  %2135 = vrot.lane.b32.xlu2 %v3675_v6, %s3715_s17  ;;  %v4793_v9 = vsel %vm915_vm8, %v1936_v43, -1e+30 }
 0x684   : > { %v1493_v42 = vpop.xlane.xlu1 %1492 }
 0x685   : > { %v1523_v14 = vsub.f32 %v4652_v24, %v1493_v42  ;;  %v2423_v24 = vpop.f32.mrf.mxu2 }
 0x686   : > { %v4769_v61 = vsel %vm915_vm8, %v2423_v24, -1e+30 }
 0x687   : > { %v4752_v49 = vpop.eup %3510  ;;  %v1540_v56 = vmul.f32 1.442695, %v1523_v14 }
 0x688   : > { %1570 = vadd.xlane.f32.xlu1 %v4752_v49 }
 0x689   : > { %3512 = vpow2.f32 %v1540_v56  ;;  %v4800_v56 = vpop.f32.mrf.mxu3 }
 0x68a   : > { %3514 = vpow2.f32 %v2027_v39 }
 0x68d   : > { %v2425_v29 = vpop.f32.mrf.mxu2 }
 0x68e   : > { %v4806_v39 = vsel %vm915_vm8, %v2425_v29, -1e+30 }
 0x68f   : > { %v4755_v50 = vpop.eup %3512 }
 0x690   : > { %1572 = vadd.xlane.f32.xlu0 %v4755_v50 }
 0x694   : > { %v1497_v41 = vpop.xlane.xlu2 %1496 }
 0x695   : > { %v1525_v4 = vsub.f32 %v4666_v17, %v1497_v41  ;;  %v2009_v17 = vsub.f32 %v4575_v1, %v4674_v8 }
 0x697   : > { %v1544_v20 = vmul.f32 1.442695, %v1525_v4  ;;  %v2025_v24 = vmul.f32 1.442695, %v2009_v17 }
 0x69e   : > { %v4776_v25 = vpop.xlane.xlu0 %1600 }
 0x6a1   : > { %2139 = vrot.lane.b32.xlu1 %v4405_v27, %s3715_s17  ;;  %v4774_v27 = vpop.eup %3514 }
 0x6a4   : > { %2628 = vrot.lane.b32.xlu0 %v4415_v34, %s3716_s18  ;;  %v1501_v42 = vpop.xlane.xlu1 %1500 }
 0x6a6   : > { %v1495_v34 = vpop.xlane.xlu0 %1494 }
 0x6a7   : > { %v1524_v57 = vsub.f32 %v4688_v7, %v1495_v34 }
 0x6a9   : > { %2137 = vrot.lane.b32.xlu1 %v3676_v44, %s3715_s17  ;;  %v1542_v55 = vmul.f32 1.442695, %v1524_v57  ;;  %v4812_v44 = vpop.f32.mrf.mxu3 }
 0x6aa   : > { %2476 = vmax.xlane.f32.xlu2 %v4769_v61 }
 0x6ab   : > { %3516 = vpow2.f32 %v1542_v55  ;;  %v2428_v55 = vpop.f32.mrf.mxu2 }
 0x6ac   : > { %3518 = vpow2.f32 %v1544_v20  ;;  %v2465_v43 = vpop.xlane.xlu1 %2464 }
 0x6ad   : > { %v2496_v4 = vsub.f32 %v4705_v18, %v2465_v43  ;;  %v3679_v43 = vld [vmem:[#allocation2 + $0x8] sm:$0xff] }
 0x6ae   : > { %v1499_v23 = vpop.xlane.xlu0 %1498 }
 0x6af   : > { %v1526_v7 = vsub.f32 %v4710_v12, %v1499_v23  ;;  %v1527_v12 = vsub.f32 %v4683_v33, %v1501_v42 }
 0x6b1   : > { %v4782_v47 = vpop.eup %3516  ;;  %v1546_v6 = vmul.f32 1.442695, %v1526_v7  ;;  %v1548_v1 = vmul.f32 1.442695, %v1527_v12  ;;  %v4820_v57 = vpop.f32.mrf.mxu3  ;;  %v2512_v7 = vmul.f32 1.442695, %v2496_v4 }
 0x6b2   : > { %2059 = vadd.xlane.f32.xlu2 %v4774_v27  ;;  %v4798_v14 = vpop.eup %3518  ;;  %v3680_v4 = vld [vmem:[#allocation2 + $0x18] sm:$0xff] }
 0x6b3   : > { %3520 = vpow2.f32 %v1546_v6  ;;  %v3678_v6 = vld [vmem:[#allocation2 + $0x10] sm:$0xff]  ;;  %v4837_v12 = vpop.f32.mrf.mxu2 }
 0x6b4   : > { %3522 = vpow2.f32 %v2025_v24  ;;  %v2467_v41 = vpop.xlane.xlu2 %2466 }
 0x6b5   : > { %3524 = vpow2.f32 %v1548_v1  ;;  %v2497_v42 = vsub.f32 %v4715_v26, %v2467_v41  ;;  %v2013_v41 = vsub.f32 %v4606_v40, %v4701_v38 }
 0x6b6   : > { %3526 = vpow2.f32 %v2512_v7 }
 0x6b7   : > { %v2514_v24 = vmul.f32 1.442695, %v2497_v42  ;;  %v2033_v7 = vmul.f32 1.442695, %v2013_v41 }
 0x6b9   : > { %v4809_v8 = vpop.eup %3520  ;;  %v1948_v28 = vpop.f32.mrf.mxu3 }
 0x6ba   : > { %v4814_v34 = vpop.eup %3522  ;;  %v4832_v17 = vsel %vm915_vm8, %v1948_v28, -1e+30 }
 0x6bb   : > { %v4817_v33 = vpop.eup %3524 }
 0x6bc   : > { %v2469_v20 = vpop.xlane.xlu1 %2468 }
 0x6bd   : > { %v2498_v38 = vsub.f32 %v4728_v62, %v2469_v20 }
 0x6c4   : > { %v4828_v23 = vpop.xlane.xlu2 %2470 }
 0x6ca   : > { %2131 = vrot.lane.b32.xlu2 %v3677_v60, %s3715_s17  ;;  %v4824_v60 = vsel %vm915_vm8, %v2428_v55, -1e+30  ;;  %v4841_v55 = vpop.eup %3526 }
 0x6cb   : > { %5391 = vst [vmem:[#allocation5_spill] sm:$0xff] %v4841_v55 }
 0x6cc   : > { %v4839_v1 = vpop.xlane.xlu2 %2472 }
 0x6ce   : > { %1574 = vadd.xlane.f32.xlu0 %v4782_v47 }
 0x6d3   : > { %1991 = vmax.xlane.f32.xlu1 %v4787_v59 }
 0x6d4   : > { %v2475_v29 = vpop.xlane.xlu0 %2474 }
 0x6d6   : > { %1989 = vmax.xlane.f32.xlu0 %v4793_v9 }
 0x6db   : > { %1576 = vadd.xlane.f32.xlu1 %v4798_v14 }
 0x6de   : > { %2478 = vmax.xlane.f32.xlu0 %v4806_v39 }
 0x6e3   : > { %1578 = vadd.xlane.f32.xlu1 %v4809_v8 }
 0x6e6   : > { %2057 = vadd.xlane.f32.xlu0 %v4814_v34 }
 0x6eb   : > { %1580 = vadd.xlane.f32.xlu1 %v4817_v33 }
 0x6f3   : > { %2480 = vmax.xlane.f32.xlu2 %v4824_v60 }
 0x6fa   : > { %2133 = vrot.lane.b32.xlu0 %v3678_v6, %s3715_s17 }
 0x6fb   : > { %1999 = vmax.xlane.f32.xlu2 %v4832_v17  ;;  %v1571_v18 = vpop.xlane.xlu1 %1570 }
 0x6fc   : > { %3528 = vrcp.f32 %v1571_v18  ;;  %v3681_v18 = vld [vmem:[#allocation2] sm:$0xff] }
 0x6fd   : > { %3530 = vpow2.f32 %v2514_v24  ;;  %v2627_v24 = vpop.permute.xlu2 %2626 }
 0x702   : > { %2618 = vrot.lane.b32.xlu0 %v3679_v43, %s3716_s18  ;;  %v3529_v28 = vpop.eup %3528  ;;  %v2433_v43 = vpop.f32.mrf.mxu2 }
 0x703   : > { %2544 = vadd.xlane.f32.xlu2 %v4841_v55  ;;  %v1573_v26 = vpop.xlane.xlu0 %1572  ;;  %v4848_v6 = vpop.eup %3530  ;;  %v1618_v58 = vmul.f32 %v3529_v28, %v4752_v49  ;;  %v3683_v55 = vld [vmem:[#allocation2] sm:$0xff]  ;;  %v2501_v28 = vsub.f32 %v4743_v35, %v2475_v29  ;;  %v2011_v35 = vsub.f32 %v4592_v2, %v4679_v37  ;;  %v2014_v2 = vsub.f32 %v4618_v36, %v4758_v0 }
 0x704   : > { %3532 = vrcp.f32 %v1573_v26  ;;  %2622 = vrot.lane.b32.xlu1 %v3680_v4, %s3716_s18  ;;  %v3682_v26 = vld [vmem:[#allocation2 + $0x10] sm:$0xff]  ;;  %v2516_v4 = vmul.f32 1.442695, %v2498_v38  ;;  %v2012_v37 = vsub.f32 %v4599_v45, %v4690_v30  ;;  %v4905_v36 = vsel %vm915_vm8, %v4837_v12, -1e+30 }
 0x705   : > { %3534 = vpow2.f32 %v2033_v7  ;;  %v2029_v29 = vmul.f32 1.442695, %v2011_v35 }
 0x706   : > { %3536 = vpow2.f32 %v2516_v4  ;;  %v2031_v4 = vmul.f32 1.442695, %v2012_v37 }
 0x70a   : > { %v3533_v42 = vpop.eup %3532  ;;  %2616 = vrot.lane.b32.xlu0 %v3681_v18, %s3716_s18  ;;  %v4860_v49 = vpop.f32.mrf.mxu2 }
 0x70b   : > { %2546 = vadd.xlane.f32.xlu2 %v4848_v6  ;;  %v1619_v40 = vmul.f32 %v3533_v42, %v4755_v50  ;;  %v4856_v21 = vpop.eup %3534  ;;  %v2625_v50 = vpop.permute.xlu2 %2624 }
 0x70c   : > { %2620 = vrot.lane.b32.xlu1 %v3682_v26, %s3716_s18  ;;  %v4862_v20 = vpop.eup %3536 }
 0x70d   : > { %v1634_v41 = vpack.c.bf16 %v1619_v40, %v1618_v58  ;;  %v2522_v40 = vmul.f32 1.442695, %v2501_v28 }
 0x70f   : > { %1674 = vmatmul.bf16.vlgmr.msrb.gmra.mxu1 %v1634_v41  ;;  %3538 = vpow2.f32 %v2522_v40  ;;  %v4888_v41 = vsel %vm915_vm8, %v4800_v56, -1e+30 }
 0x710   : > { %3540 = vpow2.f32 %v2029_v29 }
 0x712   : > { %v2438_v7 = vpop.f32.mrf.mxu2 }
 0x713   : > { %v2140_v18 = vpop.permute.xlu1 %2139  ;;  %2065 = vadd.xlane.f32.xlu2 %v4856_v21  ;;  %v2136_v42 = vpop.permute.xlu2 %2135 }
 0x714   : > { %2155 = vmatpush.bf16.msra.mxu0 %v2140_v18  ;;  %2129 = vrot.lane.b32.xlu1 %v3683_v55, %s3715_s17  ;;  %v4868_v55 = vsel %vm915_vm8, %v2438_v7, -1e+30  ;;  %v4897_v18 = vsel %vm915_vm8, %v2433_v43, -1e+30 }
 0x715   : > { %v4871_v38 = vpop.eup %3538 }
 0x716   : > { %v2629_v62 = vpop.permute.xlu0 %2628  ;;  %5392 = vst [vmem:[#allocation6_spill] sm:$0xff] %v4871_v38  ;;  %v4882_v26 = vpop.eup %3540 }
 0x717   : > { %2641 = vmatpush.bf16.msra.mxu1 %v2629_v62  ;;  %v2499_v62 = vsub.f32 %v4733_v46, %v4828_v23 }
 0x719   : > { %v2518_v56 = vmul.f32 1.442695, %v2499_v62 }
 0x71a   : > { %v2440_v43 = vpop.f32.mrf.mxu2 }
 0x71b   : > { %v2138_v58 = vpop.permute.xlu1 %2137  ;;  %2548 = vadd.xlane.f32.xlu2 %v4862_v20  ;;  %2642 = vmatpush.bf16.msra.mxu1 %v2627_v24  ;;  %v4879_v24 = vsel %vm915_vm8, %v4812_v44, -1e+30  ;;  %v2035_v44 = vmul.f32 1.442695, %v2014_v2 }
 0x71c   : > { %2156 = vmatpush.bf16.msra.mxu0 %v2138_v58 }
 0x71d   : > { %3542 = vpow2.f32 %v2035_v44  ;;  %v2477_v28 = vpop.xlane.xlu2 %2476  ;;  %v4928_v44 = vsel %vm915_vm8, %v4820_v57, -1e+30 }
 0x71e   : > { %3544 = vpow2.f32 %v2031_v4 }
 0x71f   : > { %2643 = vmatpush.bf16.msra.mxu1 %v2625_v50  ;;  %v1951_v50 = vpop.f32.mrf.mxu3 }
 0x720   : > { %2157 = vmatpush.bf16.msra.mxu0 %v2136_v42  ;;  %v4940_v57 = vsel %vm915_vm8, %v1951_v50, -1e+30 }
 0x722   : > { %v4920_v29 = vpop.f32.mrf.mxu2 }
 0x723   : > { %2488 = vmax.xlane.f32.xlu2 %v4868_v55  ;;  %v4909_v46 = vpop.eup %3542 }
 0x724   : > { %v4912_v23 = vpop.eup %3544 }
 0x725   : > { %v4922_v2 = vpop.xlane.xlu2 %2059 }
 0x727   : > { %v1953_v12 = vpop.f32.mrf.mxu3 }
 0x72b   : > { %2554 = vadd.xlane.f32.xlu2 %v4871_v38 }
 0x72f   : > { %v1956_v4 = vpop.f32.mrf.mxu3 }
 0x734   : > { %1995 = vmax.xlane.f32.xlu0 %v4879_v24 }
 0x73c   : > { %2061 = vadd.xlane.f32.xlu0 %v4882_v26 }
 0x73e   : > { %1993 = vmax.xlane.f32.xlu1 %v4888_v41 }
 0x741   : > { %v1575_v0 = vpop.xlane.xlu0 %1574 }
 0x744   : > { %2484 = vmax.xlane.f32.xlu0 %v4897_v18 }
 0x746   : > { %v1992_v45 = vpop.xlane.xlu1 %1991  ;;  %2482 = vmax.xlane.f32.xlu1 %v4905_v36 }
 0x747   : > { %v2016_v30 = vsub.f32 %v4787_v59, %v1992_v45 }
 0x749   : > { %v2039_v58 = vmul.f32 1.442695, %v2016_v30  ;;  %v1990_v42 = vpop.xlane.xlu0 %1989 }
 0x74b   : > { %3546 = vpow2.f32 %v2039_v58 }
 0x74c   : > { %3548 = vpow2.f32 %v2518_v56  ;;  %2067 = vadd.xlane.f32.xlu0 %v4909_v46  ;;  %v4935_v56 = vsel %vm915_vm8, %v1956_v4, -1e+30 }
 0x74d   : > { %3550 = vrcp.f32 %v1575_v0  ;;  %5394 = vst [vmem:[#allocation8_spill] sm:$0xff] %v4935_v56 }
 0x74e   : > { %2063 = vadd.xlane.f32.xlu1 %v4912_v23  ;;  %v1577_v7 = vpop.xlane.xlu1 %1576 }
 0x74f   : > { %3552 = vrcp.f32 %v1577_v7  ;;  %v2132_v7 = vpop.permute.xlu2 %2131 }
 0x751   : > { %v4915_v59 = vpop.eup %3546  ;;  %v2479_v58 = vpop.xlane.xlu0 %2478 }
 0x752   : > { %5393 = vst [vmem:[#allocation7_spill] sm:$0xff] %v4915_v59  ;;  %v4917_v40 = vpop.eup %3548  ;;  %2071 = vadd.xlane.f32.xlu2 %v4915_v59  ;;  %v1958_v59 = vpop.f32.mrf.mxu3 }
 0x753   : > { %v3551_v35 = vpop.eup %3550 }
 0x754   : > { %2550 = vadd.xlane.f32.xlu0 %v4917_v40  ;;  %v1620_v0 = vmul.f32 %v3551_v35, %v4782_v47  ;;  %v4946_v47 = vsel %vm915_vm8, %v4860_v49, -1e+30  ;;  %v4958_v49 = vsel %vm915_vm8, %v2440_v43, -1e+30  ;;  %v2015_v43 = vsub.f32 %v4793_v9, %v1990_v42 }
 0x755   : > { %v3553_v37 = vpop.eup %3552 }
 0x756   : > { %1997 = vmax.xlane.f32.xlu1 %v4928_v44  ;;  %v1579_v62 = vpop.xlane.xlu1 %1578  ;;  %v1621_v45 = vmul.f32 %v3553_v37, %v4798_v14  ;;  %v2445_v14 = vpop.f32.mrf.mxu2  ;;  %v2500_v37 = vsub.f32 %v4738_v53, %v4839_v1  ;;  %v4963_v53 = vsel %vm915_vm8, %v1953_v12, -1e+30  ;;  %v2502_v1 = vsub.f32 %v4769_v61, %v2477_v28 }
 0x757   : > { %3554 = vrcp.f32 %v1579_v62  ;;  %v4953_v50 = vsel %vm915_vm8, %v2445_v14, -1e+30  ;;  %v4974_v61 = vsel %vm915_vm8, %v1958_v59, -1e+30  ;;  %v2037_v28 = vmul.f32 1.442695, %v2015_v43 }
 0x758   : > { %v1635_v30 = vpack.c.bf16 %v1621_v45, %v1620_v0  ;;  %5395 = vst [vmem:[#allocation9_spill] sm:$0xff] %v4953_v50  ;;  %v2520_v62 = vmul.f32 1.442695, %v2500_v37 }
 0x759   : > { %v2058_v0 = vpop.xlane.xlu0 %2057 }
 0x75a   : > { %1679 = vmatmul.bf16.gmra.mxu1 %v1635_v30  ;;  %2005 = vmax.xlane.f32.xlu2 %v4935_v56 }
 0x75c   : > { %2001 = vmax.xlane.f32.xlu0 %v4940_v57 }
 0x75d   : > { %v3555_v4 = vpop.eup %3554 }
 0x75e   : > { %2486 = vmax.xlane.f32.xlu1 %v4946_v47  ;;  %v1581_v35 = vpop.xlane.xlu1 %1580  ;;  %v1622_v14 = vmul.f32 %v3555_v4, %v4809_v8 }
 0x75f   : > { %3556 = vrcp.f32 %v1581_v35 }
 0x760   : > { %3558 = vpow2.f32 %v2520_v62 }
 0x761   : > { %3560 = vrcp.f32 %v4659_v52  ;;  %v2503_v52 = vsub.f32 %v4806_v39, %v2479_v58 }
 0x762   : > { %2494 = vmax.xlane.f32.xlu2 %v4953_v50  ;;  %v2524_v50 = vmul.f32 1.442695, %v2502_v1 }
 0x764   : > { %2490 = vmax.xlane.f32.xlu0 %v4958_v49 }
 0x765   : > { %v3557_v45 = vpop.eup %3556 }
 0x766   : > { %2003 = vmax.xlane.f32.xlu1 %v4963_v53  ;;  %v2481_v30 = vpop.xlane.xlu2 %2480  ;;  %v1623_v35 = vmul.f32 %v3557_v45, %v4817_v33  ;;  %v4978_v9 = vpop.eup %3558 }
 0x767   : > { %v2504_v37 = vsub.f32 %v4824_v60, %v2481_v30 }
 0x768   : > { %v1636_v38 = vpack.c.bf16 %v1623_v35, %v1622_v14 }
 0x769   : > { %v2528_v56 = vmul.f32 1.442695, %v2504_v37 }
 0x76a   : > { %1684 = vmatmul.bf16.gmra.mxu1 %v1636_v38  ;;  %v3561_v38 = vpop.eup %3560 }
 0x76b   : > { %3562 = vpow2.f32 %v2528_v56  ;;  %v2526_v56 = vmul.f32 1.442695, %v2503_v52 }
 0x76c   : > { %3564 = vrcp.f32 %v4655_v48  ;;  %v2134_v8 = vpop.permute.xlu0 %2133  ;;  %2007 = vmax.xlane.f32.xlu0 %v4974_v61 }
 0x76d   : > { %3566 = vpow2.f32 %v2524_v50  ;;  %2158 = vmatpush.bf16.msra.mxu0 %v2134_v8  ;;  %v1624_v50 = vmul.f32 %v3561_v38, %v4548_v10 }
 0x76e   : > { %2552 = vadd.xlane.f32.xlu1 %v4978_v9  ;;  %v2000_v33 = vpop.xlane.xlu2 %1999  ;;  %3568 = vpow2.f32 %v2037_v28 }
 0x76f   : > { %v2020_v60 = vsub.f32 %v4832_v17, %v2000_v33 }
 0x771   : > { %v4983_v12 = vpop.eup %3562  ;;  %v2047_v42 = vmul.f32 1.442695, %v2020_v60  ;;  %2159 = vmatpush.bf16.msra.mxu0 %v2132_v7 }
 0x772   : > { %v3565_v48 = vpop.eup %3564  ;;  %2560 = vadd.xlane.f32.xlu2 %v4983_v12 }
 0x773   : > { %v4986_v59 = vpop.eup %3566  ;;  %3570 = vpow2.f32 %v2047_v42  ;;  %v1625_v17 = vmul.f32 %v3565_v48, %v4534_v51 }
 0x774   : > { %2556 = vadd.xlane.f32.xlu0 %v4986_v59  ;;  %v4990_v4 = vpop.eup %3568  ;;  %3572 = vpow2.f32 %v2526_v56  ;;  %v2619_v10 = vpop.permute.xlu0 %2618 }
 0x775   : > { %v1637_v58 = vpack.c.bf16 %v1625_v17, %v1624_v50  ;;  %3574 = vrcp.f32 %v4669_v13 }
 0x776   : > { %v2623_v39 = vpop.permute.xlu1 %2622  ;;  %2069 = vadd.xlane.f32.xlu1 %v4990_v4  ;;  %3576 = vrcp.f32 %v2058_v0 }
 0x777   : > { %2644 = vmatpush.bf16.msra.mxu1 %v2623_v39  ;;  %3578 = vrcp.f32 %v4661_v31  ;;  %v5008_v31 = vsel %vm915_vm8, %v4920_v29, -1e+30 }
 0x778   : > { %3580 = vrcp.f32 %v4922_v2 }
 0x779   : > { %v4994_v7 = vpop.eup %3570  ;;  %3582 = vrcp.f32 %v4776_v25 }
 0x77a   : > { %1689 = vmatmul.bf16.gmra.mxu1 %v1637_v58  ;;  %2079 = vadd.xlane.f32.xlu2 %v4994_v7  ;;  %v4999_v62 = vpop.eup %3572 }
 0x77b   : > { %v3575_v51 = vpop.eup %3574 }
 0x77c   : > { %v3577_v1 = vpop.eup %3576  ;;  %v1627_v0 = vmul.f32 %v3575_v51, %v4558_v3  ;;  %v2617_v35 = vpop.permute.xlu0 %2616 }
 0x77d   : > { %v3579_v30 = vpop.eup %3578  ;;  %v2105_v13 = vmul.f32 %v3577_v1, %v4814_v34  ;;  %v2545_v3 = vpop.xlane.xlu2 %2544 }
 0x77e   : > { %v2621_v45 = vpop.permute.xlu1 %2620  ;;  %2558 = vadd.xlane.f32.xlu1 %v4999_v62  ;;  %v3581_v14 = vpop.eup %3580  ;;  %v1626_v37 = vmul.f32 %v3579_v30, %v4553_v54  ;;  %v5397_v54 = vpack.c.bf16 %v4722_v11, %v4719_v15 }
 0x77f   : > { %2645 = vmatpush.bf16.msra.mxu1 %v2621_v45  ;;  %v2106_v2 = vmul.f32 %v3581_v14, %v4774_v27  ;;  %v3583_v38 = vpop.eup %3582 }
 0x780   : > { %v1638_v28 = vpack.c.bf16 %v1627_v0, %v1626_v37  ;;  %v1633_v15 = vmul.f32 %v3583_v38, %v4676_v19  ;;  %v5398_v0 = vld [vmem:[#allocation5_spill] sm:$0xff] }
 0x781   : > { %v2121_v8 = vpack.c.bf16 %v2106_v2, %v2105_v13 }
 0x783   : > { %2646 = vmatpush.bf16.msra.mxu1 %v2619_v10 }
 0x785   : > { %v2547_v34 = vpop.xlane.xlu2 %2546 }
 0x786   : > { %v2130_v43 = vpop.permute.xlu1 %2129  ;;  %2492 = vmax.xlane.f32.xlu1 %v5008_v31 }
 0x787   : > { %2160 = vmatpush.bf16.msra.mxu0 %v2130_v43  ;;  %2647 = vmatpush.bf16.msra.mxu1 %v2617_v35 }
 0x78a   : > { %1694 = vmatmul.bf16.gmra.mxu1 %v1638_v28  ;;  %2161 = vmatmul.bf16.vlgmr.msra.gmra.mxu0 %v2121_v8 }
 0x78c   : > { %v5038_v14 = vpop.f32.mrf.mxu1 }
 0x78d   : > { %v5017_v33 = vpop.xlane.xlu2 %2065 }
 0x795   : > { %v2549_v48 = vpop.xlane.xlu2 %2548 }
 0x79a   : > { %1699 = vmatmul.bf16.gmra.mxu1 %v5396_v63 }
 0x79d   : > { %v2489_v58 = vpop.xlane.xlu2 %2488 }
 0x7a5   : > { %v2555_v37 = vpop.xlane.xlu2 %2554 }
 0x7a7   : > { %v1996_v29 = vpop.xlane.xlu0 %1995 }
 0x7a8   : > { %v2018_v27 = vsub.f32 %v4879_v24, %v1996_v29 }
 0x7aa   : > { %v2043_v52 = vmul.f32 1.442695, %v2018_v27  ;;  %1704 = vmatmul.bf16.gmra.mxu1 %v5397_v54  ;;  %v5048_v27 = vpop.f32.mrf.mxu1 }
 0x7ac   : > { %3584 = vpow2.f32 %v2043_v52 }
 0x7ad   : > { %3586 = vrcp.f32 %v4771_v32 }
 0x7af   : > { %v2062_v60 = vpop.xlane.xlu0 %2061 }
 0x7b1   : > { %v1994_v16 = vpop.xlane.xlu1 %1993 }
 0x7b2   : > { %v5024_v5 = vpop.eup %3584  ;;  %v2017_v42 = vsub.f32 %v4888_v41, %v1994_v16 }
 0x7b3   : > { %v3587_v24 = vpop.eup %3586  ;;  %2075 = vadd.xlane.f32.xlu1 %v5024_v5 }
 0x7b4   : > { %v2041_v56 = vmul.f32 1.442695, %v2017_v42  ;;  %v1632_v11 = vmul.f32 %v3587_v24, %v4624_v22 }
 0x7b6   : > { %3588 = vpow2.f32 %v2041_v56  ;;  %v1641_v50 = vpack.c.bf16 %v1633_v15, %v1632_v11  ;;  %v2508_v15 = vsub.f32 %v4868_v55, %v2489_v58 }
 0x7b7   : > { %v2485_v25 = vpop.xlane.xlu0 %2484  ;;  %3590 = vrcp.f32 %v2547_v34 }
 0x7b8   : > { %3592 = vrcp.f32 %v2545_v3  ;;  %v2506_v10 = vsub.f32 %v4897_v18, %v2485_v25 }
 0x7b9   : > { %v2483_v32 = vpop.xlane.xlu1 %2482 }
 0x7ba   : > { %v2505_v39 = vsub.f32 %v4905_v36, %v2483_v32  ;;  %1709 = vmatmul.bf16.gmra.mxu1 %v1641_v50  ;;  %v2532_v51 = vmul.f32 1.442695, %v2506_v10 }
 0x7bc   : > { %v5031_v17 = vpop.eup %3588  ;;  %v2530_v41 = vmul.f32 1.442695, %v2505_v39  ;;  %v2536_v39 = vmul.f32 1.442695, %v2508_v15 }
 0x7bd   : > { %2073 = vadd.xlane.f32.xlu0 %v5031_v17  ;;  %v3591_v22 = vpop.eup %3590 }
 0x7be   : > { %3594 = vpow2.f32 %v2530_v41  ;;  %v3593_v1 = vpop.eup %3592  ;;  %v2593_v30 = vmul.f32 %v3591_v22, %v4848_v6 }
 0x7bf   : > { %v2068_v19 = vpop.xlane.xlu0 %2067  ;;  %3596 = vrcp.f32 %v2062_v60  ;;  %v2592_v2 = vmul.f32 %v3593_v1, %v5398_v0 }
 0x7c1   : > { %v2064_v45 = vpop.xlane.xlu1 %2063  ;;  %v2608_v43 = vpack.c.bf16 %v2593_v30, %v2592_v2 }
 0x7c2   : > { %3598 = vrcp.f32 %v2064_v45 }
 0x7c3   : > { %3600 = vpow2.f32 %v2532_v51 }
 0x7c4   : > { %v5035_v36 = vpop.eup %3594 }
 0x7c5   : > { %2562 = vadd.xlane.f32.xlu0 %v5035_v36  ;;  %v3597_v13 = vpop.eup %3596 }
 0x7c6   : > { %v2107_v8 = vmul.f32 %v3597_v13, %v4882_v26  ;;  %v2072_v26 = vpop.xlane.xlu2 %2071 }
 0x7c7   : > { %v2551_v18 = vpop.xlane.xlu0 %2550 }
 0x7c8   : > { %v3599_v35 = vpop.eup %3598  ;;  %3602 = vrcp.f32 %v2551_v18 }
 0x7c9   : > { %v1998_v28 = vpop.xlane.xlu1 %1997  ;;  %v2108_v3 = vmul.f32 %v3599_v35, %v4912_v23  ;;  %v5045_v34 = vpop.eup %3600  ;;  %3604 = vrcp.f32 %v2549_v48 }
 0x7ca   : > { %v2019_v63 = vsub.f32 %v4928_v44, %v1998_v28  ;;  %2648 = vmatmul.bf16.vlgmr.msra.gmra.mxu1 %v2608_v43  ;;  %3606 = vrcp.f32 %v2068_v19 }
 0x7cb   : > { %v2122_v6 = vpack.c.bf16 %v2108_v3, %v2107_v8 }
 0x7cc   : > { %v2045_v29 = vmul.f32 1.442695, %v2019_v63 }
 0x7cd   : > { %2564 = vadd.xlane.f32.xlu0 %v5045_v34  ;;  %2166 = vmatmul.bf16.gmra.mxu0 %v2122_v6  ;;  %v5401_v6 = vld [vmem:[#allocation6_spill] sm:$0xff] }
 0x7ce   : > { %3608 = vpow2.f32 %v2045_v29  ;;  %v3603_v44 = vpop.eup %3602  ;;  %v2006_v55 = vpop.xlane.xlu2 %2005 }
 0x7cf   : > { %v2002_v52 = vpop.xlane.xlu0 %2001  ;;  %3610 = vrcp.f32 %v5017_v33  ;;  %v3605_v60 = vpop.eup %3604  ;;  %v2595_v56 = vmul.f32 %v3603_v44, %v4917_v40 }
 0x7d0   : > { %v2021_v23 = vsub.f32 %v4940_v57, %v2002_v52  ;;  %v3607_v42 = vpop.eup %3606  ;;  %v2594_v57 = vmul.f32 %v3605_v60, %v4862_v20 }
 0x7d1   : > { %v2487_v54 = vpop.xlane.xlu1 %2486 }
 0x7d2   : > { %v2049_v38 = vmul.f32 1.442695, %v2021_v23  ;;  %v2507_v16 = vsub.f32 %v4946_v47, %v2487_v54  ;;  %v2110_v47 = vmul.f32 %v3607_v42, %v4909_v46  ;;  %v2609_v32 = vpack.c.bf16 %v2595_v56, %v2594_v57 }
 0x7d4   : > { %v5053_v24 = vpop.eup %3608  ;;  %3612 = vpow2.f32 %v2049_v38  ;;  %v2534_v48 = vmul.f32 1.442695, %v2507_v16 }
 0x7d5   : > { %2077 = vadd.xlane.f32.xlu1 %v5053_v24  ;;  %v3611_v33 = vpop.eup %3610 }
 0x7d6   : > { %3614 = vpow2.f32 %v2534_v48  ;;  %v2109_v40 = vmul.f32 %v3611_v33, %v4856_v21  ;;  %v5399_v21 = vld [vmem:[#allocation8_spill] sm:$0xff]  ;;  %v2495_v35 = vpop.xlane.xlu2 %2494  ;;  %v5402_v48 = vld [vmem:[#allocation7_spill] sm:$0xff] }
 0x7d7   : > { %v5059_v11 = vpop.f32.mrf.mxu1  ;;  %v2491_v25 = vpop.xlane.xlu0 %2490 }
 0x7d8   : > { %v2509_v50 = vsub.f32 %v4958_v49, %v2491_v25  ;;  %v2123_v20 = vpack.c.bf16 %v2110_v47, %v2109_v40  ;;  %v2023_v49 = vsub.f32 %v5399_v21, %v2006_v55 }
 0x7d9   : > { %v2004_v41 = vpop.xlane.xlu1 %2003 }
 0x7da   : > { %v5064_v10 = vpop.eup %3612  ;;  %v2538_v58 = vmul.f32 1.442695, %v2509_v50  ;;  %v2022_v19 = vsub.f32 %v4963_v53, %v2004_v41  ;;  %2653 = vmatmul.bf16.gmra.mxu1 %v2609_v32  ;;  %v2053_v2 = vmul.f32 1.442695, %v2023_v49 }
 0x7db   : > { %2081 = vadd.xlane.f32.xlu2 %v5064_v10 }
 0x7dc   : > { %v5068_v22 = vpop.eup %3614  ;;  %3616 = vpow2.f32 %v2538_v58  ;;  %v2051_v46 = vmul.f32 1.442695, %v2022_v19  ;;  %v1715_v19 = vpack.c.bf16 %v5038_v14, %v5038_v14  ;;  %v1717_v14 = vpack.c.bf16 %v5059_v11, %v5059_v11 }
 0x7dd   : > { %3618 = vpow2.f32 %v2536_v39  ;;  %2566 = vadd.xlane.f32.xlu1 %v5068_v22  ;;  %2171 = vmatmul.bf16.gmra.mxu0 %v2123_v20 }
 0x7de   : > { %3620 = vpow2.f32 %v2051_v46 }
 0x7df   : > { %v5072_v45 = vpop.f32.mrf.mxu1  ;;  %v2008_v51 = vpop.xlane.xlu0 %2007  ;;  %3622 = vrcp.f32 %v2555_v37 }
 0x7e0   : > { %v2024_v53 = vsub.f32 %v4974_v61, %v2008_v51  ;;  %v5400_v61 = vld [vmem:[#allocation9_spill] sm:$0xff]  ;;  %v1716_v51 = vpack.c.bf16 %v5048_v27, %v5048_v27 }
 0x7e1   : > { %v2553_v1 = vpop.xlane.xlu1 %2552  ;;  %v2511_v37 = vsub.f32 %v5400_v61, %v2495_v35 }
 0x7e2   : > { %v5075_v30 = vpop.eup %3616  ;;  %v2055_v13 = vmul.f32 1.442695, %v2024_v53  ;;  %3624 = vrcp.f32 %v2553_v1 }
 0x7e3   : > { %v5077_v0 = vpop.eup %3618  ;;  %2570 = vadd.xlane.f32.xlu2 %v5075_v30  ;;  %v2542_v52 = vmul.f32 1.442695, %v2511_v37 }
 0x7e4   : > { %v5080_v18 = vpop.eup %3620  ;;  %3626 = vpow2.f32 %v2055_v13 }
 0x7e5   : > { %2083 = vadd.xlane.f32.xlu0 %v5080_v18  ;;  %2568 = vadd.xlane.f32.xlu1 %v5077_v0  ;;  %v3623_v43 = vpop.eup %3622  ;;  %3628 = vpow2.f32 %v2053_v2 }
 0x7e6   : > { %3630 = vrcp.f32 %v2072_v26  ;;  %v2597_v29 = vmul.f32 %v3623_v43, %v5401_v6  ;;  %v2561_v43 = vpop.xlane.xlu2 %2560 }
 0x7e7   : > { %v5085_v28 = vpop.f32.mrf.mxu1  ;;  %v2557_v60 = vpop.xlane.xlu0 %2556 }
 0x7e8   : > { %v3625_v8 = vpop.eup %3624 }
 0x7e9   : > { %v2070_v3 = vpop.xlane.xlu1 %2069  ;;  %v2596_v63 = vmul.f32 %v3625_v8, %v4978_v9 }
 0x7ea   : > { %3632 = vrcp.f32 %v2070_v3  ;;  %v5089_v44 = vpop.eup %3626 }
 0x7eb   : > { %v2610_v23 = vpack.c.bf16 %v2597_v29, %v2596_v63  ;;  %v5091_v54 = vpop.eup %3628  ;;  %3634 = vpow2.f32 %v2542_v52 }
 0x7ec   : > { %v3631_v38 = vpop.eup %3630  ;;  %3636 = vrcp.f32 %v2557_v60 }
 0x7ed   : > { %2087 = vadd.xlane.f32.xlu1 %v5089_v44  ;;  %2658 = vmatmul.bf16.gmra.mxu1 %v2610_v23  ;;  %v2112_v56 = vmul.f32 %v3631_v38, %v5402_v48 }
 0x7ee   : > { %2085 = vadd.xlane.f32.xlu0 %v5091_v54 }
 0x7ef   : > { %v5095_v26 = vpop.f32.mrf.mxu1 }
 0x7f0   : > { %v3633_v9 = vpop.eup %3632 }
 0x7f1   : > { %v2559_v16 = vpop.xlane.xlu1 %2558  ;;  %v2111_v42 = vmul.f32 %v3633_v9, %v4990_v4  ;;  %v5099_v33 = vpop.eup %3634 }
 0x7f2   : > { %3638 = vrcp.f32 %v2559_v16  ;;  %v3637_v57 = vpop.eup %3636  ;;  %v2080_v9 = vpop.xlane.xlu2 %2079 }
 0x7f3   : > { %v2124_v15 = vpack.c.bf16 %v2112_v56, %v2111_v42  ;;  %v2598_v32 = vmul.f32 %v3637_v57, %v4986_v59 }
 0x7f5   : > { %2176 = vmatmul.bf16.gmra.mxu0 %v2124_v15 }
 0x7f6   : > { %2574 = vadd.xlane.f32.xlu0 %v5099_v33 }
 0x7f7   : > { %v5102_v25 = vpop.f32.mrf.mxu1 }
 0x7f8   : > { %v3639_v47 = vpop.eup %3638 }
 0x7f9   : > { %v2493_v50 = vpop.xlane.xlu1 %2492  ;;  %v2599_v39 = vmul.f32 %v3639_v47, %v4999_v62 }
 0x7fa   : > { %v2510_v4 = vsub.f32 %v5008_v31, %v2493_v50 }
 0x7fb   : > { %v2611_v41 = vpack.c.bf16 %v2599_v39, %v2598_v32 }
 0x7fc   : > { %v2540_v40 = vmul.f32 1.442695, %v2510_v4 }
 0x7fd   : > { %2663 = vmatmul.bf16.gmra.mxu1 %v2611_v41 }
 0x7fe   : > { %3640 = vpow2.f32 %v2540_v40 }
 0x7ff   : > { %v5107_v55 = vpop.f32.mrf.mxu1 }
 0x804   : > { %v5109_v58 = vpop.eup %3640 }
 0x805   : > { %2572 = vadd.xlane.f32.xlu2 %v5109_v58 }
 0x806   : > { %1747 = vrot.lane.b32.xlu1 %v1715_v19, %s3717_s19 }
 0x807   : > { %v5115_v59 = vpop.f32.mrf.mxu1  ;;  %v2162_v62 = vpop.f32.mrf.mxu0 }
 0x808   : > { %v2202_v31 = vpack.c.bf16 %v2162_v62, %v2162_v62 }
 0x80a   : > { %2234 = vrot.lane.b32.xlu0 %v2202_v31, %s3718_s20 }
 0x80f   : > { %v5118_v20 = vpop.f32.mrf.mxu1  ;;  %v2164_v46 = vpop.f32.mrf.mxu0 }
 0x810   : > { %v2203_v21 = vpack.c.bf16 %v2164_v46, %v2164_v46 }
 0x812   : > { %2236 = vrot.lane.b32.xlu1 %v2203_v21, %s3718_s20 }
 0x817   : > { %v5121_v49 = vpop.f32.mrf.mxu1 }
 0x81a   : > { %1751 = vrot.lane.b32.xlu1 %v1717_v14, %s3717_s19 }
 0x81d   : > { %1749 = vrot.lane.b32.xlu2 %v1716_v51, %s3717_s19 }
 0x81f   : > { %v5129_v53 = vpop.f32.mrf.mxu1 }
 0x826   : > { %v2076_v13 = vpop.xlane.xlu1 %2075 }
 0x827   : > { %v5131_v1 = vpop.f32.mrf.mxu1  ;;  %3642 = vrcp.f32 %v2076_v13 }
 0x82d   : > { %v3643_v61 = vpop.eup %3642 }
 0x82e   : > { %v2114_v3 = vmul.f32 %v3643_v61, %v5024_v5 }
 0x82f   : > { %v5133_v2 = vpop.f32.mrf.mxu1 }
 0x830   : > { %v2074_v35 = vpop.xlane.xlu0 %2073 }
 0x831   : > { %3644 = vrcp.f32 %v2074_v35  ;;  %v1719_v35 = vpack.c.bf16 %v5085_v28, %v5085_v28 }
 0x832   : > { %3646 = vrcp.f32 %v2561_v43 }
 0x837   : > { %v3645_v11 = vpop.eup %3644  ;;  %v5135_v37 = vpop.f32.mrf.mxu1 }
 0x838   : > { %v2563_v8 = vpop.xlane.xlu0 %2562  ;;  %v2113_v27 = vmul.f32 %v3645_v11, %v5031_v17  ;;  %v3647_v6 = vpop.eup %3646 }
 0x839   : > { %3648 = vrcp.f32 %v2563_v8  ;;  %v2600_v23 = vmul.f32 %v3647_v6, %v4983_v12  ;;  %v1718_v12 = vpack.c.bf16 %v5072_v45, %v5072_v45 }
 0x83a   : > { %v2125_v63 = vpack.c.bf16 %v2114_v3, %v2113_v27  ;;  %3650 = vrcp.f32 %v2080_v9 }
 0x83c   : > { %2181 = vmatmul.bf16.gmra.mxu0 %v2125_v63 }
 0x83f   : > { %v3649_v29 = vpop.eup %3648  ;;  %v5139_v52 = vpop.f32.mrf.mxu1 }
 0x840   : > { %v2601_v60 = vmul.f32 %v3649_v29, %v5035_v36  ;;  %v2565_v48 = vpop.xlane.xlu0 %2564  ;;  %v3651_v56 = vpop.eup %3650 }
 0x841   : > { %v2116_v32 = vmul.f32 %v3651_v56, %v4994_v7 }
 0x842   : > { %v2612_v38 = vpack.c.bf16 %v2601_v60, %v2600_v23 }
 0x844   : > { %2668 = vmatmul.bf16.gmra.mxu1 %v2612_v38 }
 0x847   : > { %v2649_v16 = vpop.f32.mrf.mxu1 }
 0x848   : > { %v2689_v42 = vpack.c.bf16 %v2649_v16, %v2649_v16  ;;  %v2078_v17 = vpop.xlane.xlu1 %2077 }
 0x849   : > { %3652 = vrcp.f32 %v2078_v17 }
 0x84a   : > { %v2167_v5 = vpop.f32.mrf.mxu0  ;;  %2721 = vrot.lane.b32.xlu0 %v2689_v42, %s3719_s24  ;;  %3654 = vrcp.f32 %v2565_v48 }
 0x84b   : > { %v2204_v31 = vpack.c.bf16 %v2167_v5, %v2167_v5  ;;  %v1721_v5 = vpack.c.bf16 %v5102_v25, %v5102_v25 }
 0x84e   : > { %v2082_v39 = vpop.xlane.xlu2 %2081 }
 0x84f   : > { %v3653_v15 = vpop.eup %3652  ;;  %v2651_v57 = vpop.f32.mrf.mxu1 }
 0x850   : > { %v2690_v36 = vpack.c.bf16 %v2651_v57, %v2651_v57  ;;  %v2567_v47 = vpop.xlane.xlu1 %2566  ;;  %v2115_v50 = vmul.f32 %v3653_v15, %v5053_v24  ;;  %v3655_v19 = vpop.eup %3654 }
 0x851   : > { %3656 = vrcp.f32 %v2567_v47  ;;  %v2602_v21 = vmul.f32 %v3655_v19, %v5045_v34 }
 0x852   : > { %v2169_v4 = vpop.f32.mrf.mxu0  ;;  %2723 = vrot.lane.b32.xlu2 %v2690_v36, %s3719_s24  ;;  %1753 = vrot.lane.b32.xlu0 %v1718_v12, %s3717_s19  ;;  %v2126_v41 = vpack.c.bf16 %v2116_v32, %v2115_v50  ;;  %3658 = vrcp.f32 %v2082_v39  ;;  %v1722_v12 = vpack.c.bf16 %v5107_v55, %v5107_v55 }
 0x853   : > { %v2205_v40 = vpack.c.bf16 %v2169_v4, %v2169_v4 }
 0x854   : > { %2186 = vmatmul.bf16.gmra.mxu0 %v2126_v41 }
 0x855   : > { %2240 = vrot.lane.b32.xlu1 %v2205_v40, %s3718_s20 }
 0x856   : > { %v2571_v43 = vpop.xlane.xlu2 %2570 }
 0x857   : > { %v3657_v45 = vpop.eup %3656  ;;  %v2654_v62 = vpop.f32.mrf.mxu1 }
 0x858   : > { %v2691_v24 = vpack.c.bf16 %v2654_v62, %v2654_v62  ;;  %v2084_v46 = vpop.xlane.xlu0 %2083  ;;  %v2569_v7 = vpop.xlane.xlu1 %2568  ;;  %v2603_v14 = vmul.f32 %v3657_v45, %v5068_v22  ;;  %v1720_v22 = vpack.c.bf16 %v5095_v26, %v5095_v26 }
 0x859   : > { %3660 = vrcp.f32 %v2084_v46  ;;  %v3659_v61 = vpop.eup %3658  ;;  %v1723_v46 = vpack.c.bf16 %v5115_v59, %v5115_v59  ;;  %v3357_v59 = vld [vmem:[%s5369_s4] sm:$0xff] }
 0x85a   : > { %2238 = vrot.lane.b32.xlu2 %v2204_v31, %s3718_s20  ;;  %v2172_v51 = vpop.f32.mrf.mxu0  ;;  %2725 = vrot.lane.b32.xlu0 %v2691_v24, %s3719_s24  ;;  %v2613_v13 = vpack.c.bf16 %v2603_v14, %v2602_v21  ;;  %3662 = vrcp.f32 %v2569_v7  ;;  %v2117_v27 = vmul.f32 %v3659_v61, %v5064_v10  ;;  %v1724_v21 = vpack.c.bf16 %v5118_v20, %v5118_v20 }
 0x85b   : > { %3664 = vrcp.f32 %v2571_v43  ;;  %v2206_v26 = vpack.c.bf16 %v2172_v51, %v2172_v51 }
 0x85c   : > { %2673 = vmatmul.bf16.gmra.mxu1 %v2613_v13 }
 0x85d   : > { %1755 = vrot.lane.b32.xlu1 %v1719_v35, %s3717_s19 }
 0x85f   : > { %v3661_v11 = vpop.eup %3660  ;;  %v2656_v34 = vpop.f32.mrf.mxu1 }
 0x860   : > { %v2692_v8 = vpack.c.bf16 %v2656_v34, %v2656_v34  ;;  %v2118_v3 = vmul.f32 %v3661_v11, %v5080_v18  ;;  %v2088_v63 = vpop.xlane.xlu1 %2087  ;;  %v3663_v23 = vpop.eup %3662 }
 0x861   : > { %v2086_v6 = vpop.xlane.xlu0 %2085  ;;  %3666 = vrcp.f32 %v2088_v63  ;;  %v3665_v38 = vpop.eup %3664  ;;  %v2604_v10 = vmul.f32 %v3663_v23, %v5077_v0 }
 0x862   : > { %v2174_v28 = vpop.f32.mrf.mxu0  ;;  %2727 = vrot.lane.b32.xlu2 %v2692_v8, %s3719_s24  ;;  %1757 = vrot.lane.b32.xlu0 %v1720_v22, %s3717_s19  ;;  %v2127_v29 = vpack.c.bf16 %v2118_v3, %v2117_v27  ;;  %3668 = vrcp.f32 %v2086_v6  ;;  %v2605_v18 = vmul.f32 %v3665_v38, %v5075_v30 }
 0x863   : > { %v2207_v60 = vpack.c.bf16 %v2174_v28, %v2174_v28  ;;  %v1725_v28 = vpack.c.bf16 %v5121_v49, %v5121_v49 }
 0x864   : > { %2191 = vmatmul.bf16.gmra.mxu0 %v2127_v29  ;;  %v2614_v42 = vpack.c.bf16 %v2605_v18, %v2604_v10  ;;  %v1726_v29 = vpack.c.bf16 %v5129_v53, %v5129_v53 }
 0x865   : > { %2244 = vrot.lane.b32.xlu1 %v2207_v60, %s3718_s20 }
 0x867   : > { %v3667_v9 = vpop.eup %3666 }
 0x868   : > { %v3669_v17 = vpop.eup %3668  ;;  %v2120_v56 = vmul.f32 %v3667_v9, %v5089_v44 }
 0x869   : > { %v2119_v0 = vmul.f32 %v3669_v17, %v5091_v54  ;;  %v2575_v47 = vpop.xlane.xlu0 %2574 }
 0x86a   : > { %2242 = vrot.lane.b32.xlu2 %v2206_v26, %s3718_s20  ;;  %v2659_v16 = vpop.f32.mrf.mxu1  ;;  %3670 = vrcp.f32 %v2575_v47  ;;  %v1727_v47 = vpack.c.bf16 %v5131_v1, %v5131_v1 }
 0x86b   : > { %v2693_v48 = vpack.c.bf16 %v2659_v16, %v2659_v16  ;;  %v2128_v57 = vpack.c.bf16 %v2120_v56, %v2119_v0 }
 0x86c   : > { %2678 = vmatmul.bf16.gmra.mxu1 %v2614_v42 }
 0x86d   : > { %1759 = vrot.lane.b32.xlu1 %v1721_v5, %s3717_s19  ;;  %2729 = vrot.lane.b32.xlu0 %v2693_v48, %s3719_s24 }
 0x870   : > { %v3671_v41 = vpop.eup %3670 }
 0x871   : > { %v2607_v62 = vmul.f32 %v3671_v41, %v5099_v33 }
 0x872   : > { %v2177_v30 = vpop.f32.mrf.mxu0  ;;  %v2661_v15 = vpop.f32.mrf.mxu1 }
 0x873   : > { %v2694_v36 = vpack.c.bf16 %v2661_v15, %v2661_v15  ;;  %v2208_v32 = vpack.c.bf16 %v2177_v30, %v2177_v30 }
 0x874   : > { %2196 = vmatmul.bf16.gmra.mxu0 %v2128_v57 }
 0x875   : > { %2731 = vrot.lane.b32.xlu2 %v2694_v36, %s3719_s24  ;;  %1761 = vrot.lane.b32.xlu0 %v1722_v12, %s3717_s19  ;;  %v1728_v12 = vpack.c.bf16 %v5133_v2, %v5133_v2 }
 0x878   : > { %v1748_v25 = vpop.permute.xlu1 %1747  ;;  %v2573_v50 = vpop.xlane.xlu2 %2572 }
 0x879   : > { %1796 = vst.msk [vmem:[#allocation4] sm:$0xf] %vm1795_vm10, %v1748_v25  ;;  %3672 = vrcp.f32 %v2573_v50 }
 0x87a   : > { %v2179_v44 = vpop.f32.mrf.mxu0  ;;  %v2664_v54 = vpop.f32.mrf.mxu1 }
 0x87b   : > { %v2209_v39 = vpack.c.bf16 %v2179_v44, %v2179_v44  ;;  %v2695_v55 = vpack.c.bf16 %v2664_v54, %v2664_v54 }
 0x87c   : > { %v2235_v4 = vpop.permute.xlu0 %2234 }
 0x87d   : > { %2283 = vst.msk [vmem:[#allocation4] sm:$0xf] %vm2282_vm11, %v2235_v4  ;;  %2246 = vrot.lane.b32.xlu2 %v2208_v32, %s3718_s20  ;;  %2248 = vrot.lane.b32.xlu1 %v2209_v39, %s3718_s20 }
 0x87e   : > { %2733 = vrot.lane.b32.xlu0 %v2695_v55, %s3719_s24 }
 0x87f   : > { %v3673_v40 = vpop.eup %3672 }
 0x880   : > { %v1750_v19 = vpop.permute.xlu2 %1749  ;;  %v2606_v45 = vmul.f32 %v3673_v40, %v5109_v58  ;;  %v3358_v58 = vld [vmem:[%s5369_s4 + $0x8] sm:$0xff] }
 0x881   : > { %1797 = vst.msk [vmem:[#allocation4 + $0x4] sm:$0xf] %vm1795_vm10, %v1750_v19  ;;  %2908 = vmatpush.bf16.msra.mxu3 %v3358_v58  ;;  %v1730_v19 = vpack.c.bf16 %v5139_v52, %v5139_v52 }
 0x882   : > { %v2666_v31 = vpop.f32.mrf.mxu1  ;;  %v2615_v24 = vpack.c.bf16 %v2607_v62, %v2606_v45  ;;  %v1729_v62 = vpack.c.bf16 %v5135_v37, %v5135_v37 }
 0x883   : > { %v2696_v7 = vpack.c.bf16 %v2666_v31, %v2666_v31 }
 0x884   : > { %v2237_v14 = vpop.permute.xlu1 %2236  ;;  %2683 = vmatmul.bf16.gmra.mxu1 %v2615_v24 }
 0x885   : > { %2284 = vst.msk [vmem:[#allocation4 + $0x4] sm:$0xf] %vm2282_vm11, %v2237_v14  ;;  %2735 = vrot.lane.b32.xlu2 %v2696_v7, %s3719_s24  ;;  %1763 = vrot.lane.b32.xlu1 %v1723_v46, %s3717_s19 }
 0x886   : > { %1765 = vrot.lane.b32.xlu0 %v1724_v21, %s3717_s19  ;;  %2909 = vmatpush.bf16.msra.mxu3 %v3357_v59 }
 0x88c   : > { %v1752_v33 = vpop.permute.xlu1 %1751 }
 0x88d   : > { %1798 = vst.msk [vmem:[#allocation4 + $0x8] sm:$0xf] %vm1795_vm10, %v1752_v33 }
 0x8ac   : > { %v2724_v20 = vpop.permute.xlu2 %2723 }
 0x8ad   : > { %2771 = vst.msk [vmem:[#allocation4 + $0x4] sm:$0xf] %vm2769_vm12, %v2724_v20 }
 0x8b4   : > { %v2239_v51 = vpop.permute.xlu2 %2238 }
 0x8b5   : > { %2285 = vst.msk [vmem:[#allocation4 + $0x8] sm:$0xf] %vm2282_vm11, %v2239_v51 }
 0x8b9   : > { %v2182_v13 = vpop.f32.mrf.mxu0 }
 0x8ba   : > { %v2210_v35 = vpack.c.bf16 %v2182_v13, %v2182_v13 }
 0x8bc   : > { %2250 = vrot.lane.b32.xlu2 %v2210_v35, %s3718_s20  ;;  %v2722_v43 = vpop.permute.xlu0 %2721  ;;  %v2728_v8 = vpop.permute.xlu2 %2727 }
 0x8bd   : > { %2770 = vst.msk [vmem:[#allocation4] sm:$0xf] %vm2769_vm12, %v2722_v43 }
 0x8c1   : > { %v2184_v61 = vpop.f32.mrf.mxu0  ;;  %v2669_v11 = vpop.f32.mrf.mxu1 }
 0x8c2   : > { %v2211_v34 = vpack.c.bf16 %v2184_v61, %v2184_v61  ;;  %v2697_v22 = vpack.c.bf16 %v2669_v11, %v2669_v11 }
 0x8c4   : > { %2252 = vrot.lane.b32.xlu1 %v2211_v34, %s3718_s20  ;;  %v1754_v27 = vpop.permute.xlu0 %1753  ;;  %2737 = vrot.lane.b32.xlu0 %v2697_v22, %s3719_s24  ;;  %v3349_v3 = vld [vmem:[#allocation4] sm:$0xff]  ;;  %v2243_v38 = vpop.permute.xlu2 %2242  ;;  %v5271_v34 = vld [vmem:[%s5370_s5] ss:$0 sm:$0xff] }
 0x8c5   : > { %1799 = vst.msk [vmem:[#allocation4 + $0xc] sm:$0xf] %vm1795_vm10, %v1754_v27  ;;  %3295 = vmatmul.msk.bf16.vlgmr.msra.gmra.mxu3 %vm271_vm0, %v3349_v3  ;;  %v3684_v22 = vld [vmem:[%s3771_s26] sm:$0xff] }
 0x8c7   : > { %v2241_v63 = vpop.permute.xlu1 %2240 }
 0x8c8   : > { %2286 = vst.msk [vmem:[#allocation4 + $0xc] sm:$0xf] %vm2282_vm11, %v2241_v63 }
 0x8c9   : > { %2773 = vst.msk [vmem:[#allocation4 + $0xc] sm:$0xf] %vm2769_vm12, %v2728_v8  ;;  %v2671_v6 = vpop.f32.mrf.mxu1  ;;  %v2790_v8 = vadd.f32 %v3684_v22, %v5271_v34 }
 0x8ca   : > { %v2698_v23 = vpack.c.bf16 %v2671_v6, %v2671_v6 }
 0x8cc   : > { %1767 = vrot.lane.b32.xlu1 %v1725_v28, %s3717_s19  ;;  %v2726_v60 = vpop.permute.xlu0 %2725  ;;  %1769 = vrot.lane.b32.xlu0 %v1726_v29, %s3717_s19  ;;  %v3685_v29 = vld [vmem:[%s3771_s26 + $0x8] sm:$0xff] }
 0x8cd   : > { %2772 = vst.msk [vmem:[#allocation4 + $0x8] sm:$0xf] %vm2769_vm12, %v2726_v60  ;;  %2739 = vrot.lane.b32.xlu2 %v2698_v23, %s3719_s24  ;;  %v2791_v23 = vadd.f32 %v3685_v29, %v5271_v34  ;;  %v3697_v29 = vld [vmem:[%s3771_s26 + $0x68] sm:$0xff] }
 0x8cf   : > { %v1756_v10 = vpop.permute.xlu1 %1755  ;;  %v2732_v9 = vpop.permute.xlu2 %2731 }
 0x8d0   : > { %1800 = vst.msk [vmem:[#allocation4 + $0x10] sm:$0xf] %vm1795_vm10, %v1756_v10 }
 0x8d1   : > { %2287 = vst.msk [vmem:[#allocation4 + $0x10] sm:$0xf] %vm2282_vm11, %v2243_v38  ;;  %v2187_v49 = vpop.f32.mrf.mxu0 }
 0x8d2   : > { %v2212_v26 = vpack.c.bf16 %v2187_v49, %v2187_v49 }
 0x8d4   : > { %v1758_v18 = vpop.permute.xlu0 %1757  ;;  %v3350_v53 = vld [vmem:[#allocation4 + $0x8] sm:$0xff] }
 0x8d5   : > { %1801 = vst.msk [vmem:[#allocation4 + $0x14] sm:$0xf] %vm1795_vm10, %v1758_v18  ;;  %2254 = vrot.lane.b32.xlu2 %v2212_v26, %s3718_s20  ;;  %3296 = vmatmul.msk.bf16.gmra.mxu3 %vm271_vm0, %v3350_v53  ;;  %v3686_v26 = vld [vmem:[%s3771_s26 + $0x10] sm:$0xff] }
 0x8d6   : > { %v2792_v18 = vadd.f32 %v3686_v26, %v5271_v34 }
 0x8d7   : > { %v2245_v16 = vpop.permute.xlu1 %2244  ;;  %v2247_v30 = vpop.permute.xlu2 %2246 }
 0x8d8   : > { %2288 = vst.msk [vmem:[#allocation4 + $0x14] sm:$0xf] %vm2282_vm11, %v2245_v16 }
 0x8d9   : > { %2775 = vst.msk [vmem:[#allocation4 + $0x14] sm:$0xf] %vm2769_vm12, %v2732_v9  ;;  %v2189_v42 = vpop.f32.mrf.mxu0  ;;  %v2674_v17 = vpop.f32.mrf.mxu1 }
 0x8da   : > { %v2213_v5 = vpack.c.bf16 %v2189_v42, %v2189_v42  ;;  %v2699_v48 = vpack.c.bf16 %v2674_v17, %v2674_v17 }
 0x8dc   : > { %2741 = vrot.lane.b32.xlu0 %v2699_v48, %s3719_s24  ;;  %2256 = vrot.lane.b32.xlu1 %v2213_v5, %s3718_s20  ;;  %v3687_v48 = vld [vmem:[%s3771_s26 + $0x18] sm:$0xff] }
 0x8df   : > { %v1760_v0 = vpop.permute.xlu1 %1759  ;;  %v2730_v56 = vpop.permute.xlu0 %2729 }
 0x8e0   : > { %1802 = vst.msk [vmem:[#allocation4 + $0x18] sm:$0xf] %vm1795_vm10, %v1760_v0  ;;  %v2736_v55 = vpop.permute.xlu2 %2735  ;;  %v2793_v0 = vadd.f32 %v3687_v48, %v5271_v34 }
 0x8e1   : > { %2289 = vst.msk [vmem:[#allocation4 + $0x18] sm:$0xf] %vm2282_vm11, %v2247_v30  ;;  %v2192_v15 = vpop.f32.mrf.mxu0  ;;  %v2676_v57 = vpop.f32.mrf.mxu1 }
 0x8e2   : > { %2774 = vst.msk [vmem:[#allocation4 + $0x10] sm:$0xf] %vm2769_vm12, %v2730_v56  ;;  %v2700_v36 = vpack.c.bf16 %v2676_v57, %v2676_v57  ;;  %v2214_v32 = vpack.c.bf16 %v2192_v15, %v2192_v15 }
 0x8e4   : > { %1773 = vrot.lane.b32.xlu0 %v1728_v12, %s3717_s19  ;;  %2743 = vrot.lane.b32.xlu2 %v2700_v36, %s3719_s24 }
 0x8e5   : > { %1771 = vrot.lane.b32.xlu1 %v1727_v47, %s3717_s19 }
 0x8e7   : > { %v1762_v25 = vpop.permute.xlu0 %1761 }
 0x8e8   : > { %1803 = vst.msk [vmem:[#allocation4 + $0x1c] sm:$0xf] %vm1795_vm10, %v1762_v25  ;;  %v3688_v25 = vld [vmem:[%s3771_s26 + $0x20] sm:$0xff] }
 0x8e9   : > { %v2194_v50 = vpop.f32.mrf.mxu0  ;;  %v2679_v44 = vpop.f32.mrf.mxu1  ;;  %v3351_v54 = vld [vmem:[#allocation4 + $0x10] sm:$0xff] }
 0x8ea   : > { %v2215_v2 = vpack.c.bf16 %v2194_v50, %v2194_v50  ;;  %v2701_v39 = vpack.c.bf16 %v2679_v44, %v2679_v44  ;;  %3297 = vmatmul.msk.bf16.gmra.mxu3 %vm271_vm0, %v3351_v54  ;;  %v2794_v50 = vadd.f32 %v3688_v25, %v5271_v34 }
 0x8ec   : > { %2258 = vrot.lane.b32.xlu2 %v2214_v32, %s3718_s20  ;;  %2745 = vrot.lane.b32.xlu0 %v2701_v39, %s3719_s24  ;;  %v3689_v39 = vld [vmem:[%s3771_s26 + $0x28] sm:$0xff] }
 0x8ed   : > { %2260 = vrot.lane.b32.xlu1 %v2215_v2, %s3718_s20 }
 0x8ef   : > { %v2249_v1 = vpop.permute.xlu1 %2248 }
 0x8f0   : > { %2290 = vst.msk [vmem:[#allocation4 + $0x1c] sm:$0xf] %vm2282_vm11, %v2249_v1  ;;  %v2734_v4 = vpop.permute.xlu0 %2733  ;;  %v2795_v1 = vadd.f32 %v3689_v39, %v5271_v34 }
 0x8f1   : > { %2777 = vst.msk [vmem:[#allocation4 + $0x1c] sm:$0xf] %vm2769_vm12, %v2736_v55  ;;  %v2197_v41 = vpop.f32.mrf.mxu0  ;;  %v2681_v40 = vpop.f32.mrf.mxu1 }
 0x8f2   : > { %2776 = vst.msk [vmem:[#allocation4 + $0x18] sm:$0xf] %vm2769_vm12, %v2734_v4  ;;  %v2702_v45 = vpack.c.bf16 %v2681_v40, %v2681_v40  ;;  %v2216_v7 = vpack.c.bf16 %v2197_v41, %v2197_v41  ;;  %v3690_v40 = vld [vmem:[%s3771_s26 + $0x30] sm:$0xff] }
 0x8f4   : > { %1777 = vrot.lane.b32.xlu0 %v1730_v19, %s3717_s19  ;;  %2747 = vrot.lane.b32.xlu2 %v2702_v45, %s3719_s24  ;;  %v2796_v19 = vadd.f32 %v3690_v40, %v5271_v34 }
 0x8f5   : > { %1775 = vrot.lane.b32.xlu1 %v1729_v62, %s3717_s19 }
 0x8f7   : > { %v1764_v31 = vpop.permute.xlu1 %1763 }
 0x8f8   : > { %1804 = vst.msk [vmem:[#allocation4 + $0x20] sm:$0xf] %vm1795_vm10, %v1764_v31  ;;  %v1766_v24 = vpop.permute.xlu0 %1765 }
 0x8f9   : > { %1805 = vst.msk [vmem:[#allocation4 + $0x24] sm:$0xf] %vm1795_vm10, %v1766_v24  ;;  %v2199_v46 = vpop.f32.mrf.mxu0  ;;  %v3352_v52 = vld [vmem:[#allocation4 + $0x18] sm:$0xff]  ;;  %v3691_v24 = vld [vmem:[%s3771_s26 + $0x38] sm:$0xff] }
 0x8fa   : > { %v2217_v21 = vpack.c.bf16 %v2199_v46, %v2199_v46  ;;  %3298 = vmatmul.msk.bf16.gmra.mxu3 %vm271_vm0, %v3352_v52  ;;  %v2797_v46 = vadd.f32 %v3691_v24, %v5271_v34 }
 0x8fc   : > { %2262 = vrot.lane.b32.xlu2 %v2216_v7, %s3718_s20 }
 0x8fd   : > { %2264 = vrot.lane.b32.xlu1 %v2217_v21, %s3718_s20  ;;  %v3692_v21 = vld [vmem:[%s3771_s26 + $0x40] sm:$0xff] }
 0x901   : > { %v2684_v37 = vpop.f32.mrf.mxu1 }
 0x902   : > { %v2703_v14 = vpack.c.bf16 %v2684_v37, %v2684_v37  ;;  %v2798_v37 = vadd.f32 %v3692_v21, %v5271_v34 }
 0x904   : > { %2749 = vrot.lane.b32.xlu0 %v2703_v14, %s3719_s24 }
 0x909   : > { %v2686_v33 = vpop.f32.mrf.mxu1 }
 0x90a   : > { %v2704_v58 = vpack.c.bf16 %v2686_v33, %v2686_v33 }
 0x90c   : > { %2751 = vrot.lane.b32.xlu2 %v2704_v58, %s3719_s24  ;;  %v3693_v58 = vld [vmem:[%s3771_s26 + $0x48] sm:$0xff] }
 0x916   : > { %v2251_v59 = vpop.permute.xlu2 %2250 }
 0x917   : > { %2291 = vst.msk [vmem:[#allocation4 + $0x20] sm:$0xf] %vm2282_vm11, %v2251_v59  ;;  %v2799_v59 = vadd.f32 %v3693_v58, %v5271_v34 }
 0x927   : > { %v2740_v20 = vpop.permute.xlu2 %2739 }
 0x92f   : > { %v2255_v61 = vpop.permute.xlu2 %2254 }
 0x936   : > { %v2253_v51 = vpop.permute.xlu1 %2252  ;;  %v2738_v13 = vpop.permute.xlu0 %2737 }
 0x937   : > { %2292 = vst.msk [vmem:[#allocation4 + $0x24] sm:$0xf] %vm2282_vm11, %v2253_v51 }
 0x938   : > { %2779 = vst.msk [vmem:[#allocation4 + $0x24] sm:$0xf] %vm2769_vm12, %v2740_v20 }
 0x939   : > { %2778 = vst.msk [vmem:[#allocation4 + $0x20] sm:$0xf] %vm2769_vm12, %v2738_v13  ;;  %v3694_v13 = vld [vmem:[%s3771_s26 + $0x50] sm:$0xff] }
 0x93e   : > { %v1768_v35 = vpop.permute.xlu1 %1767  ;;  %v1770_v43 = vpop.permute.xlu0 %1769 }
 0x93f   : > { %1806 = vst.msk [vmem:[#allocation4 + $0x28] sm:$0xf] %vm1795_vm10, %v1768_v35  ;;  %v2744_v3 = vpop.permute.xlu2 %2743  ;;  %v2800_v35 = vadd.f32 %v3694_v13, %v5271_v34 }
 0x940   : > { %2293 = vst.msk [vmem:[#allocation4 + $0x28] sm:$0xf] %vm2282_vm11, %v2255_v61  ;;  %v3353_v11 = vld [vmem:[#allocation4 + $0x20] sm:$0xff] }
 0x941   : > { %1807 = vst.msk [vmem:[#allocation4 + $0x2c] sm:$0xf] %vm1795_vm10, %v1770_v43  ;;  %3299 = vmatmul.msk.bf16.gmra.mxu3 %vm271_vm0, %v3353_v11  ;;  %v3695_v11 = vld [vmem:[%s3771_s26 + $0x58] sm:$0xff] }
 0x942   : > { %v2801_v22 = vadd.f32 %v3695_v11, %v5271_v34 }
 0x947   : > { %v2259_v10 = vpop.permute.xlu2 %2258 }
 0x948   : > { %v2911_v27 = vpop.f32.mrf.mxu3 }
 0x949   : > { %v2951_v63 = vadd.f32 %v2911_v27, %v2790_v8 }
 0x94b   : > { %2967 = vst.msk [vmem:[%s5280_s10] sm:$0xff] %vm271_vm0, %v2951_v63 }
 0x94e   : > { %v2742_v6 = vpop.permute.xlu0 %2741  ;;  %v2257_v28 = vpop.permute.xlu1 %2256 }
 0x94f   : > { %2780 = vst.msk [vmem:[#allocation4 + $0x28] sm:$0xf] %vm2769_vm12, %v2742_v6  ;;  %v2748_v17 = vpop.permute.xlu2 %2747 }
 0x950   : > { %2294 = vst.msk [vmem:[#allocation4 + $0x2c] sm:$0xf] %vm2282_vm11, %v2257_v28  ;;  %v2913_v60 = vpop.f32.mrf.mxu3 }
 0x951   : > { %2781 = vst.msk [vmem:[#allocation4 + $0x2c] sm:$0xf] %vm2769_vm12, %v2744_v3  ;;  %v2952_v38 = vadd.f32 %v2913_v60, %v2791_v23  ;;  %v3696_v3 = vld [vmem:[%s3771_s26 + $0x60] sm:$0xff]  ;;  %v2803_v23 = vadd.f32 %v3697_v29, %v5271_v34 }
 0x952   : > { %v2802_v63 = vadd.f32 %v3696_v3, %v5271_v34 }
 0x953   : > { %2968 = vst.msk [vmem:[%s5280_s10 + $0x8] sm:$0xff] %vm271_vm0, %v2952_v38 }
 0x956   : > { %v1774_v49 = vpop.permute.xlu0 %1773 }
 0x957   : > { %1809 = vst.msk [vmem:[#allocation4 + $0x34] sm:$0xf] %vm1795_vm10, %v1774_v49  ;;  %v1772_v53 = vpop.permute.xlu1 %1771  ;;  %v2263_v36 = vpop.permute.xlu2 %2262 }
 0x958   : > { %1808 = vst.msk [vmem:[#allocation4 + $0x30] sm:$0xf] %vm1795_vm10, %v1772_v53  ;;  %v3354_v9 = vld [vmem:[#allocation4 + $0x28] sm:$0xff]  ;;  %v2916_v16 = vpop.f32.mrf.mxu3 }
 0x959   : > { %2295 = vst.msk [vmem:[#allocation4 + $0x30] sm:$0xf] %vm2282_vm11, %v2259_v10  ;;  %v2953_v42 = vadd.f32 %v2916_v16, %v2792_v18  ;;  %3300 = vmatmul.msk.bf16.gmra.mxu3 %vm271_vm0, %v3354_v9  ;;  %v3698_v10 = vld [vmem:[%s3771_s26 + $0x70] sm:$0xff]  ;;  %v3699_v53 = vld [vmem:[%s3771_s26 + $0x78] sm:$0xff] }
 0x95a   : > { %v2804_v49 = vadd.f32 %v3698_v10, %v5271_v34  ;;  %v2805_v9 = vadd.f32 %v3699_v53, %v5271_v34 }
 0x95b   : > { %2969 = vst.msk [vmem:[%s5280_s10 + $0x10] sm:$0xff] %vm271_vm0, %v2953_v42 }
 0x95e   : > { %v2746_v5 = vpop.permute.xlu0 %2745 }
 0x95f   : > { %v2261_v56 = vpop.permute.xlu1 %2260  ;;  %2782 = vst.msk [vmem:[#allocation4 + $0x30] sm:$0xf] %vm2769_vm12, %v2746_v5 }
 0x960   : > { %2296 = vst.msk [vmem:[#allocation4 + $0x34] sm:$0xf] %vm2282_vm11, %v2261_v56  ;;  %v2918_v30 = vpop.f32.mrf.mxu3 }
 0x961   : > { %2783 = vst.msk [vmem:[#allocation4 + $0x34] sm:$0xf] %vm2769_vm12, %v2748_v17  ;;  %v2954_v15 = vadd.f32 %v2918_v30, %v2793_v0 }
 0x963   : > { %2970 = vst.msk [vmem:[%s5280_s10 + $0x18] sm:$0xff] %vm271_vm0, %v2954_v15 }
 0x966   : > { %v1778_v57 = vpop.permute.xlu0 %1777  ;;  %v2752_v2 = vpop.permute.xlu2 %2751 }
 0x967   : > { %v1776_v12 = vpop.permute.xlu1 %1775  ;;  %1811 = vst.msk [vmem:[#allocation4 + $0x3c] sm:$0xf] %vm1795_vm10, %v1778_v57 }
 0x968   : > { %1810 = vst.msk [vmem:[#allocation4 + $0x38] sm:$0xf] %vm1795_vm10, %v1776_v12  ;;  %v3355_v47 = vld [vmem:[#allocation4 + $0x30] sm:$0xff] }
 0x969   : > { %2297 = vst.msk [vmem:[#allocation4 + $0x38] sm:$0xf] %vm2282_vm11, %v2263_v36  ;;  %3301 = vmatmul.msk.bf16.gmra.mxu3 %vm271_vm0, %v3355_v47 }
 0x96d   : > { %v2921_v44 = vpop.f32.mrf.mxu3 }
 0x96e   : > { %v2955_v54 = vadd.f32 %v2921_v44, %v2794_v50 }
 0x96f   : > { %v2265_v32 = vpop.permute.xlu1 %2264 }
 0x970   : > { %2298 = vst.msk [vmem:[#allocation4 + $0x3c] sm:$0xf] %vm2282_vm11, %v2265_v32 }
 0x971   : > { %2971 = vst.msk [vmem:[%s5280_s10 + $0x20] sm:$0xff] %vm271_vm0, %v2955_v54 }
 0x972   : > { %2785 = vst.msk [vmem:[#allocation4 + $0x3c] sm:$0xf] %vm2769_vm12, %v2752_v2 }
 0x975   : > { %v2923_v55 = vpop.f32.mrf.mxu3 }
 0x976   : > { %v2750_v4 = vpop.permute.xlu0 %2749  ;;  %v2956_v41 = vadd.f32 %v2923_v55, %v2795_v1 }
 0x977   : > { %2784 = vst.msk [vmem:[#allocation4 + $0x38] sm:$0xf] %vm2769_vm12, %v2750_v4 }
 0x978   : > { %2972 = vst.msk [vmem:[%s5280_s10 + $0x28] sm:$0xff] %vm271_vm0, %v2956_v41 }
 0x97d   : > { %v2926_v45 = vpop.f32.mrf.mxu3 }
 0x97e   : > { %v3356_v62 = vld [vmem:[#allocation4 + $0x38] sm:$0xff]  ;;  %v2957_v31 = vadd.f32 %v2926_v45, %v2796_v19 }
 0x97f   : > { %3302 = vmatmul.msk.bf16.gmra.mxu3 %vm271_vm0, %v3356_v62 }
 0x980   : > { %2973 = vst.msk [vmem:[%s5280_s10 + $0x30] sm:$0xff] %vm271_vm0, %v2957_v31 }
 0x985   : > { %v2928_v52 = vpop.f32.mrf.mxu3 }
 0x986   : > { %v2958_v7 = vadd.f32 %v2928_v52, %v2797_v46 }
 0x988   : > { %2974 = vst.msk [vmem:[%s5280_s10 + $0x38] sm:$0xff] %vm271_vm0, %v2958_v7 }
 0x9c4   : > { %v2931_v14 = vpop.f32.mrf.mxu3 }
 0x9c5   : > { %v2959_v33 = vadd.f32 %v2931_v14, %v2798_v37 }
 0x9c7   : > { %2975 = vst.msk [vmem:[%s5280_s10 + $0x40] sm:$0xff] %vm271_vm0, %v2959_v33 }
 0x9cc   : > { %v2933_v20 = vpop.f32.mrf.mxu3 }
 0x9cd   : > { %v2960_v51 = vadd.f32 %v2933_v20, %v2799_v59 }
 0x9cf   : > { %2976 = vst.msk [vmem:[%s5280_s10 + $0x48] sm:$0xff] %vm271_vm0, %v2960_v51 }
 0x9dc   : > { %v2936_v43 = vpop.f32.mrf.mxu3 }
 0x9dd   : > { %v2961_v61 = vadd.f32 %v2936_v43, %v2800_v35 }
 0x9df   : > { %2977 = vst.msk [vmem:[%s5280_s10 + $0x50] sm:$0xff] %vm271_vm0, %v2961_v61 }
 0x9e4   : > { %v2938_v8 = vpop.f32.mrf.mxu3 }
 0x9e5   : > { %v2962_v27 = vadd.f32 %v2938_v8, %v2801_v22 }
 0x9e7   : > { %2978 = vst.msk [vmem:[%s5280_s10 + $0x58] sm:$0xff] %vm271_vm0, %v2962_v27 }
 0x9ec   : > { %v2941_v6 = vpop.f32.mrf.mxu3 }
 0x9ed   : > { %v2963_v28 = vadd.f32 %v2941_v6, %v2802_v63 }
 0x9ef   : > { %2979 = vst.msk [vmem:[%s5280_s10 + $0x60] sm:$0xff] %vm271_vm0, %v2963_v28 }
 0x9f4   : > { %v2943_v60 = vpop.f32.mrf.mxu3 }
 0x9f5   : > { %v2964_v38 = vadd.f32 %v2943_v60, %v2803_v23 }
 0x9f7   : > { %2980 = vst.msk [vmem:[%s5280_s10 + $0x68] sm:$0xff] %vm271_vm0, %v2964_v38 }
 0xa02   : > { %v2946_v26 = vpop.f32.mrf.mxu3 }
 0xa03   : > { %v2965_v18 = vadd.f32 %v2946_v26, %v2804_v49 }
 0xa05   : > { %2981 = vst.msk [vmem:[%s5280_s10 + $0x70] sm:$0xff] %vm271_vm0, %v2965_v18 }
 0xa0a   : > { %v2948_v16 = vpop.f32.mrf.mxu3 }
 0xa0b   : > { %v2966_v42 = vadd.f32 %v2948_v16, %v2805_v9 }
 0xa0d   : > { %2982 = vst.msk [vmem:[%s5280_s10 + $0x78] sm:$0xff] %vm271_vm0, %v2966_v42 }
 0xa0e PF: > { %s16_s21 = sadd.s32 1, %s3706_s21  }
 0xa0f   : > { %p13_p4 = scmp.ge.s32.totalorder %s16_s21, 4  }
 0xa11   :  { %15 = sbr.rel (!%p13_p4) target bundleno = 1 (0x1), region = 74 }

// kernel: tpu_custom_call.1
= control target key start
LH: loop header
LB: loop body
LE: loop exit
PB: predicated region body
PF: predicated region fallthrough
CT: control target
= control target key end

     0   :  { %s3755_s21 = smov 0   ;;  %s5365_s0 = inlined_call_operand.vmem [shape: f32[2,128,32], index: 0, kind: input, shape index: {}]   ;;  %s5366_s1 = inlined_call_operand.vmem [shape: f32[1,32], index: 1, kind: input, shape index: {}]   ;;  %s5367_s2 = inlined_call_operand.vmem [shape: f32[1,32], index: 2, kind: input, shape index: {}]   ;;  %s5368_s3 = inlined_call_operand.vmem [shape: bf16[32,96], index: 3, kind: input, shape index: {}]   ;;  %s5369_s4 = inlined_call_operand.vmem [shape: bf16[32,32], index: 4, kind: input, shape index: {}]   ;;  %s5370_s5 = inlined_call_operand.vmem [shape: f32[1,32], index: 5, kind: input, shape index: {}]   ;;  %s5371_s6 = inlined_call_operand.vmem [shape: f32[2,128,32], index: 6, kind: output, shape index: {}]  }
   0x1 LB: > { %s3038_s22 = sadd.s32 4294967295, %s3706_s21   ;;  %p3042_p0 = scmp.ge.s32.totalorder %s3706_s21, 1  ;;  %s3706_s21 = sphi %s3755_s21, %s16_s21  }
   0x2   : > { %p212_p1 = scmp.lt.s32.totalorder %s3706_s21, 3 }
   0x4   : > { %p213_p2 = pnand %p3042_p0, %p212_p1 }
   0x6   : > { %216 = sbr.rel (%p213_p2) target bundleno = 2574 (0xa0e), region = 44 }
   0xb   : > { %p242_p3 = scmp.lt.s32.totalorder %s3038_s22, 1  ;;  %vm271_vm0 = vcmask 261120   ;;  %v3708_v14 = vmov 32.0   ;;  %s3709_s11 = smov 96  }
   0xc   : > { %3384 = vrcp.f32 %v3708_v14  ;;  %s3710_s12 = smov 64   ;;  %s3711_s13 = smov 120  }
   0xd   : > { %s5404_s22 = smov (!%p242_p3, %s3038_s22), 1  ;;  %s3712_s14 = smov 112  }
   0xe   : > { %s3305_s23 = sshll.u32 %s5404_s22, 7  ;;  %s3713_s15 = smov 104  }
   0xf   : > { %s3771_s26 = scalar_lea.vmem %s5365_s0, %s3305_s23  ;;  %s3714_s16 = smov 56  }
  0x10   : > { %v255_v0 = vld [vmem:[%s3771_s26 + $0x10] sm:$0xff]  ;;  %v253_v1 = vld [vmem:[%s3771_s26] sm:$0xff]  ;;  %v256_v6 = vld [vmem:[%s3771_s26 + $0x18] sm:$0xff]  ;;  %s3715_s17 = smov 48   ;;  %s3716_s18 = smov 40  }
  0x11   : > { %v278_v2 = vsel %vm271_vm0, %v255_v0, 0.0  ;;  %v272_v3 = vsel %vm271_vm0, %v253_v1, 0.0  ;;  %v257_v4 = vld [vmem:[%s3771_s26 + $0x20] sm:$0xff]  ;;  %v254_v7 = vld [vmem:[%s3771_s26 + $0x8] sm:$0xff]  ;;  %v281_v9 = vsel %vm271_vm0, %v256_v6, 0.0  ;;  %v259_v12 = vld [vmem:[%s3771_s26 + $0x30] sm:$0xff]  ;;  %s5280_s10 = scalar_lea.vmem %s5371_s6, %s3305_s23 }
  0x12   : > { %279 = vadd.xlane.f32.xlu1 %v278_v2  ;;  %273 = vadd.xlane.f32.xlu0 %v272_v3  ;;  %v284_v5 = vsel %vm271_vm0, %v257_v4, 0.0  ;;  %v258_v8 = vld [vmem:[%s3771_s26 + $0x28] sm:$0xff]  ;;  %v275_v10 = vsel %vm271_vm0, %v254_v7, 0.0  ;;  %v290_v13 = vsel %vm271_vm0, %v259_v12, 0.0  ;;  %v3385_v15 = vpop.eup %3384  ;;  %v3800_v34 = vld [vmem:[%s3771_s26 + $0x38] sm:$0xff]  ;;  %v3822_v47 = vld [vmem:[%s3771_s26 + $0x40] sm:$0xff] }
  0x13   : > { %285 = vadd.xlane.f32.xlu2 %v284_v5  ;;  %v287_v11 = vsel %vm271_vm0, %v258_v8, 0.0  ;;  %v321_v16 = vmul.f32 32.0, %v3385_v15  ;;  %vm325_vm1 = vweird.f32 %v3385_v15  ;;  %v293_v40 = vsel %vm271_vm0, %v3800_v34, 0.0  ;;  %v3836_v56 = vld [vmem:[%s3771_s26 + $0x58] sm:$0xff]  ;;  %v3839_v57 = vld [vmem:[%s3771_s26 + $0x48] sm:$0xff]  ;;  %v3851_v63 = vld [vmem:[%s3771_s26 + $0x60] sm:$0xff] }
  0x14   : > { %v296_v51 = vsel %vm271_vm0, %v3822_v47, 0.0  ;;  %v305_v59 = vsel %vm271_vm0, %v3836_v56, 0.0  ;;  %v299_v61 = vsel %vm271_vm0, %v3839_v57, 0.0  ;;  %s3717_s19 = smov 8   ;;  %s3718_s20 = smov 16  }
  0x15   : > { %v322_v17 = vsub.f32 1.0, %v321_v16  ;;  %s3719_s24 = smov 24  }
  0x17   : > { %v323_v18 = vmul.f32 %v3385_v15, %v322_v17 }
  0x19   : > { %v324_v19 = vadd.f32 %v3385_v15, %v323_v18 }
  0x1a   : > { %282 = vadd.xlane.f32.xlu1 %v281_v9  ;;  %276 = vadd.xlane.f32.xlu0 %v275_v10  ;;  %v3308_v9 = vld [vmem:[%s5368_s3 + $0x8] sm:$0xff] }
  0x1b   : > { %288 = vadd.xlane.f32.xlu2 %v287_v11  ;;  %v3787_v20 = vsel %vm325_vm1, %v3385_v15, %v324_v19  ;;  %723 = vmatpush.bf16.msra.mxu0 %v3308_v9 }
  0x23   : > { %291 = vadd.xlane.f32.xlu2 %v290_v13 }
  0x85   : > { %v280_v21 = vpop.xlane.xlu1 %279  ;;  %v274_v22 = vpop.xlane.xlu0 %273 }
  0x86   : > { %v327_v23 = vmul.f32 %v3787_v20, %v274_v22  ;;  %v286_v24 = vpop.xlane.xlu2 %285  ;;  %v329_v33 = vmul.f32 %v3787_v20, %v280_v21 }
  0x87   : > { %v331_v32 = vmul.f32 %v3787_v20, %v286_v24 }
  0x88   : > { %v3790_v25 = vsub.f32 %v253_v1, %v327_v23  ;;  %v3814_v42 = vsub.f32 %v255_v0, %v329_v33  ;;  %v3854_v0 = vld [vmem:[%s3771_s26 + $0x50] sm:$0xff]  ;;  %v308_v1 = vsel %vm271_vm0, %v3851_v63, 0.0 }
  0x89   : > { %v3806_v38 = vsub.f32 %v257_v4, %v331_v32  ;;  %v302_v3 = vsel %vm271_vm0, %v3854_v0, 0.0  ;;  %v3862_v4 = vld [vmem:[%s3771_s26 + $0x68] sm:$0xff] }
  0x8a   : > { %v359_v26 = vmul.f32 %v3790_v25, %v3790_v25  ;;  %v361_v48 = vmul.f32 %v3814_v42, %v3814_v42  ;;  %v311_v5 = vsel %vm271_vm0, %v3862_v4, 0.0 }
  0x8b   : > { %v363_v46 = vmul.f32 %v3806_v38, %v3806_v38 }
  0x8c   : > { %v375_v27 = vsel %vm271_vm0, %v359_v26, 0.0  ;;  %v381_v52 = vsel %vm271_vm0, %v361_v48, 0.0 }
  0x8d   : > { %v283_v28 = vpop.xlane.xlu1 %282  ;;  %376 = vadd.xlane.f32.xlu0 %v375_v27  ;;  %v277_v29 = vpop.xlane.xlu0 %276  ;;  %v387_v50 = vsel %vm271_vm0, %v363_v46, 0.0 }
  0x8e   : > { %v330_v30 = vmul.f32 %v3787_v20, %v283_v28  ;;  %v328_v31 = vmul.f32 %v3787_v20, %v277_v29  ;;  %v289_v37 = vpop.xlane.xlu2 %288 }
  0x8f   : > { %v332_v45 = vmul.f32 %v3787_v20, %v289_v37 }
  0x90   : > { %v3802_v35 = vsub.f32 %v256_v6, %v330_v30  ;;  %v3804_v36 = vsub.f32 %v254_v7, %v328_v31  ;;  %v3867_v6 = vld [vmem:[%s3771_s26 + $0x70] sm:$0xff] }
  0x91   : > { %v3826_v49 = vsub.f32 %v258_v8, %v332_v45  ;;  %v314_v7 = vsel %vm271_vm0, %v3867_v6, 0.0 }
  0x92   : > { %v362_v39 = vmul.f32 %v3802_v35, %v3802_v35  ;;  %v360_v41 = vmul.f32 %v3804_v36, %v3804_v36 }
  0x93   : > { %v364_v55 = vmul.f32 %v3826_v49, %v3826_v49 }
  0x94   : > { %v384_v43 = vsel %vm271_vm0, %v362_v39, 0.0  ;;  %v378_v44 = vsel %vm271_vm0, %v360_v41, 0.0 }
  0x95   : > { %385 = vadd.xlane.f32.xlu2 %v384_v43  ;;  %294 = vadd.xlane.f32.xlu0 %v293_v40  ;;  %v390_v60 = vsel %vm271_vm0, %v364_v55, 0.0 }
  0x96   : > { %379 = vadd.xlane.f32.xlu1 %v378_v44  ;;  %v292_v53 = vpop.xlane.xlu2 %291 }
  0x97   : > { %v333_v54 = vmul.f32 %v3787_v20, %v292_v53 }
  0x99   : > { %v3841_v58 = vsub.f32 %v259_v12, %v333_v54  ;;  %v3307_v12 = vld [vmem:[%s5368_s3] sm:$0xff] }
  0x9a   : > { %724 = vmatpush.bf16.msra.mxu0 %v3307_v12  ;;  %v3936_v12 = vld [vmem:[%s3771_s26 + $0x78] sm:$0xff] }
  0x9b   : > { %v365_v62 = vmul.f32 %v3841_v58, %v3841_v58 }
  0x9d   : > { %388 = vadd.xlane.f32.xlu2 %v387_v50  ;;  %297 = vadd.xlane.f32.xlu0 %v296_v51  ;;  %v393_v2 = vsel %vm271_vm0, %v365_v62, 0.0 }
  0x9e   : > { %382 = vadd.xlane.f32.xlu1 %v381_v52 }
  0xa5   : > { %306 = vadd.xlane.f32.xlu2 %v305_v59  ;;  %391 = vadd.xlane.f32.xlu0 %v390_v60 }
  0xa6   : > { %300 = vadd.xlane.f32.xlu1 %v299_v61 }
  0xad   : > { %309 = vadd.xlane.f32.xlu2 %v308_v1  ;;  %394 = vadd.xlane.f32.xlu0 %v393_v2 }
  0xae   : > { %303 = vadd.xlane.f32.xlu1 %v302_v3 }
  0xb5   : > { %312 = vadd.xlane.f32.xlu0 %v311_v5 }
  0xbd   : > { %315 = vadd.xlane.f32.xlu0 %v314_v7 }
 0x100   : > { %v377_v8 = vpop.xlane.xlu0 %376 }
 0x101   : > { %v423_v10 = vmul.f32 %v377_v8, %v3787_v20 }
 0x103   : > { %v439_v11 = vadd.f32 1e-05, %v423_v10 }
 0x105   : > { %3386 = vrsqrt.f32 %v439_v11  ;;  %vm461_vm3 = vweird.f32 %v439_v11 }
 0x108   : > { %v386_v13 = vpop.xlane.xlu2 %385  ;;  %v295_v14 = vpop.xlane.xlu0 %294 }
 0x109   : > { %v426_v15 = vmul.f32 %v386_v13, %v3787_v20  ;;  %v380_v16 = vpop.xlane.xlu1 %379  ;;  %v334_v17 = vmul.f32 %v3787_v20, %v295_v14 }
 0x10a   : > { %v424_v18 = vmul.f32 %v380_v16, %v3787_v20 }
 0x10b   : > { %v3387_v19 = vpop.eup %3386  ;;  %v3881_v21 = vadd.f32 1e-05, %v426_v15  ;;  %v3884_v22 = vsub.f32 %v3800_v34, %v334_v17  ;;  %v3945_v15 = vld [vmem:[%s5366_s1] ss:$0 sm:$0xff] }
 0x10c   : > { %v456_v23 = vmul.f32 %v3387_v19, %v439_v11  ;;  %v440_v24 = vadd.f32 1e-05, %v424_v18  ;;  %vm462_vm2 = vweird.f32 %v3387_v19 }
 0x10d   : > { %3388 = vrsqrt.f32 %v3881_v21  ;;  %v366_v26 = vmul.f32 %v3884_v22, %v3884_v22  ;;  %vm3907_vm6 = vmor %vm461_vm3, %vm462_vm2  ;;  %vm491_vm10 = vweird.f32 %v3881_v21 }
 0x10e   : > { %v457_v27 = vmul.f32 %v3387_v19, %v456_v23  ;;  %3390 = vrsqrt.f32 %v440_v24  ;;  %vm471_vm4 = vweird.f32 %v440_v24 }
 0x10f   : > { %v396_v28 = vsel %vm271_vm0, %v366_v26, 0.0 }
 0x110   : > { %v458_v29 = vmul.f32 0.5, %v457_v27  ;;  %v389_v30 = vpop.xlane.xlu2 %388  ;;  %397 = vadd.xlane.f32.xlu1 %v396_v28  ;;  %v298_v31 = vpop.xlane.xlu0 %297 }
 0x111   : > { %v383_v32 = vpop.xlane.xlu1 %382  ;;  %v335_v33 = vmul.f32 %v3787_v20, %v298_v31  ;;  %v427_v43 = vmul.f32 %v389_v30, %v3787_v20 }
 0x112   : > { %v459_v34 = vsub.f32 1.5, %v458_v29  ;;  %v425_v37 = vmul.f32 %v383_v32, %v3787_v20 }
 0x113   : > { %v3892_v39 = vpop.eup %3388  ;;  %v3895_v40 = vsub.f32 %v3822_v47, %v335_v33  ;;  %v3905_v47 = vadd.f32 1e-05, %v427_v43  ;;  %v3967_v33 = vld [vmem:[%s5367_s2] ss:$0 sm:$0xff] }
 0x114   : > { %v3391_v41 = vpop.eup %3390  ;;  %v3898_v44 = vadd.f32 1e-05, %v425_v37  ;;  %v460_v46 = vmul.f32 %v3387_v19, %v459_v34  ;;  %v486_v48 = vmul.f32 %v3892_v39, %v3881_v21  ;;  %vm492_vm11 = vweird.f32 %v3892_v39 }
 0x115   : > { %v466_v45 = vmul.f32 %v3391_v41, %v440_v24  ;;  %v367_v51 = vmul.f32 %v3895_v40, %v3895_v40  ;;  %vm472_vm5 = vweird.f32 %v3391_v41  ;;  %vm3999_vm13 = vmor %vm491_vm10, %vm492_vm11  ;;  %vm501_vm1 = vweird.f32 %v3905_v47 }
 0x116   : > { %3392 = vrsqrt.f32 %v3898_v44  ;;  %v464_v1 = vsel %vm3907_vm6, %v3387_v19, %v460_v46  ;;  %v487_v2 = vmul.f32 %v3892_v39, %v486_v48  ;;  %vm3927_vm7 = vmor %vm471_vm4, %vm472_vm5  ;;  %vm481_vm8 = vweird.f32 %v3898_v44 }
 0x117   : > { %v467_v50 = vmul.f32 %v3391_v41, %v466_v45  ;;  %v399_v61 = vsel %vm271_vm0, %v367_v51, 0.0  ;;  %3394 = vrsqrt.f32 %v3905_v47  ;;  %v615_v14 = vmul.f32 %v464_v1, %v3790_v25 }
 0x118   : > { %v307_v52 = vpop.xlane.xlu2 %306  ;;  %v392_v53 = vpop.xlane.xlu0 %391  ;;  %400 = vadd.xlane.f32.xlu1 %v399_v61  ;;  %v488_v16 = vmul.f32 0.5, %v487_v2  ;;  %v317_v25 = vsel %vm271_vm0, %v3936_v12, 0.0 }
 0x119   : > { %v468_v55 = vmul.f32 0.5, %v467_v50  ;;  %v338_v59 = vmul.f32 %v3787_v20, %v307_v52  ;;  %v301_v60 = vpop.xlane.xlu1 %300  ;;  %v428_v62 = vmul.f32 %v392_v53, %v3787_v20  ;;  %v634_v32 = vmul.f32 %v3945_v15, %v615_v14 }
 0x11a   : > { %v336_v3 = vmul.f32 %v3787_v20, %v301_v60  ;;  %v489_v37 = vsub.f32 1.5, %v488_v16 }
 0x11b   : > { %v469_v5 = vsub.f32 1.5, %v468_v55  ;;  %v3919_v7 = vsub.f32 %v3836_v56, %v338_v59  ;;  %v3921_v8 = vadd.f32 1e-05, %v428_v62 }
 0x11c   : > { %v3923_v9 = vpop.eup %3392  ;;  %v3933_v11 = vsub.f32 %v3839_v57, %v336_v3  ;;  %v490_v21 = vmul.f32 %v3892_v39, %v489_v37 }
 0x11d   : > { %v470_v13 = vmul.f32 %v3391_v41, %v469_v5  ;;  %v476_v56 = vmul.f32 %v3923_v9, %v3898_v44  ;;  %3396 = vrsqrt.f32 %v3921_v8  ;;  %v370_v57 = vmul.f32 %v3919_v7, %v3919_v7  ;;  %v3969_v34 = vpop.eup %3394 }
 0x11e   : > { %v368_v19 = vmul.f32 %v3933_v11, %v3933_v11  ;;  %vm482_vm9 = vweird.f32 %v3923_v9  ;;  %v496_v54 = vmul.f32 %v3969_v34, %v3905_v47  ;;  %v494_v5 = vsel %vm3999_vm13, %v3892_v39, %v490_v21 }
 0x11f   : > { %v474_v17 = vsel %vm3927_vm7, %v3391_v41, %v470_v13  ;;  %v477_v18 = vmul.f32 %v3923_v9, %v476_v56  ;;  %v408_v24 = vsel %vm271_vm0, %v370_v57, 0.0  ;;  %vm3986_vm12 = vmor %vm481_vm8, %vm482_vm9  ;;  %v618_v16 = vmul.f32 %v494_v5, %v3802_v35 }
 0x120   : > { %v310_v23 = vpop.xlane.xlu2 %309  ;;  %v3958_v26 = vpop.xlane.xlu0 %394  ;;  %v616_v27 = vmul.f32 %v474_v17, %v3804_v36  ;;  %409 = vadd.xlane.f32.xlu0 %v408_v24  ;;  %v402_v30 = vsel %vm271_vm0, %v368_v19, 0.0  ;;  %318 = vadd.xlane.f32.xlu1 %v317_v25  ;;  %v497_v10 = vmul.f32 %v3969_v34, %v496_v54  ;;  %vm511_vm14 = vweird.f32 %v3921_v8 }
 0x121   : > { %v478_v28 = vmul.f32 0.5, %v477_v18  ;;  %v339_v29 = vmul.f32 %v3787_v20, %v310_v23  ;;  %v304_v31 = vpop.xlane.xlu1 %303  ;;  %403 = vadd.xlane.f32.xlu2 %v402_v30  ;;  %vm502_vm2 = vweird.f32 %v3969_v34 }
 0x122   : > { %v337_v36 = vmul.f32 %v3787_v20, %v304_v31  ;;  %v635_v41 = vmul.f32 %v3945_v15, %v616_v27  ;;  %v498_v57 = vmul.f32 0.5, %v497_v10  ;;  %vm503_vm4 = vmor %vm501_vm1, %vm502_vm2  ;;  %vm782_vm1 = vcmask 781312  }
 0x123   : > { %v3397_v43 = vpop.eup %3396  ;;  %v479_v45 = vsub.f32 1.5, %v478_v28  ;;  %v3975_v46 = vsub.f32 %v3851_v63, %v339_v29  ;;  %v653_v63 = vadd.f32 %v3967_v33, %v634_v32 }
 0x124   : > { %v506_v48 = vmul.f32 %v3397_v43, %v3921_v8  ;;  %v3981_v50 = vsub.f32 %v3854_v0, %v337_v36  ;;  %v654_v53 = vadd.f32 %v3967_v33, %v635_v41  ;;  %v499_v23 = vsub.f32 1.5, %v498_v57 }
 0x125   : > { %v480_v51 = vmul.f32 %v3923_v9, %v479_v45  ;;  %v371_v55 = vmul.f32 %v3975_v46, %v3975_v46  ;;  %vm512_vm15 = vweird.f32 %v3397_v43 }
 0x126   : > { %v369_v0 = vmul.f32 %v3981_v50, %v3981_v50  ;;  %v669_v59 = vpack.c.bf16 %v654_v53, %v653_v63  ;;  %v507_v61 = vmul.f32 %v3397_v43, %v506_v48  ;;  %vm513_vm3 = vmor %vm511_vm14, %vm512_vm15  ;;  %v500_v8 = vmul.f32 %v3969_v34, %v499_v23 }
 0x127   : > { %v484_v60 = vsel %vm3986_vm12, %v3923_v9, %v480_v51  ;;  %v411_v1 = vsel %vm271_vm0, %v371_v55, 0.0 }
 0x128   : > { %v405_v62 = vsel %vm271_vm0, %v369_v0, 0.0  ;;  %v313_v2 = vpop.xlane.xlu0 %312  ;;  %3055 = vmatmul.msk.bf16.vlgmr.msra.gmra.mxu0 %vm271_vm0, %v669_v59  ;;  %412 = vadd.xlane.f32.xlu1 %v411_v1  ;;  %v617_v13 = vmul.f32 %v484_v60, %v3814_v42  ;;  %v508_v56 = vmul.f32 0.5, %v507_v61  ;;  %v504_v47 = vsel %vm503_vm4, %v3969_v34, %v500_v8 }
 0x129   : > { %v340_v3 = vmul.f32 %v3787_v20, %v313_v2  ;;  %406 = vadd.xlane.f32.xlu2 %v405_v62  ;;  %v619_v32 = vmul.f32 %v504_v47, %v3806_v38 }
 0x12a   : > { %v636_v39 = vmul.f32 %v3945_v15, %v617_v13  ;;  %v509_v18 = vsub.f32 1.5, %v508_v56 }
 0x12b   : > { %v4015_v9 = vsub.f32 %v3862_v4, %v340_v3  ;;  %v637_v4 = vmul.f32 %v3945_v15, %v618_v16  ;;  %v638_v36 = vmul.f32 %v3945_v15, %v619_v32 }
 0x12c   : > { %v655_v35 = vadd.f32 %v3967_v33, %v636_v39  ;;  %v510_v24 = vmul.f32 %v3397_v43, %v509_v18 }
 0x12d   : > { %v372_v14 = vmul.f32 %v4015_v9, %v4015_v9  ;;  %v656_v27 = vadd.f32 %v3967_v33, %v637_v4  ;;  %v657_v45 = vadd.f32 %v3967_v33, %v638_v36 }
 0x12e   : > { %v514_v30 = vsel %vm513_vm3, %v3397_v43, %v510_v24  ;;  %v429_v43 = vmul.f32 %v3958_v26, %v3787_v20 }
 0x12f   : > { %v414_v17 = vsel %vm271_vm0, %v372_v14, 0.0  ;;  %v670_v29 = vpack.c.bf16 %v656_v27, %v655_v35  ;;  %v620_v31 = vmul.f32 %v514_v30, %v3826_v49 }
 0x130   : > { %v316_v19 = vpop.xlane.xlu0 %315  ;;  %v445_v51 = vadd.f32 1e-05, %v429_v43 }
 0x131   : > { %v341_v25 = vmul.f32 %v3787_v20, %v316_v19  ;;  %415 = vadd.xlane.f32.xlu2 %v414_v17  ;;  %v639_v37 = vmul.f32 %v3945_v15, %v620_v31 }
 0x132   : > { %3398 = vrsqrt.f32 %v445_v51  ;;  %vm521_vm5 = vweird.f32 %v445_v51 }
 0x133   : > { %v4027_v42 = vsub.f32 %v3867_v6, %v341_v25  ;;  %v658_v41 = vadd.f32 %v3967_v33, %v639_v37 }
 0x135   : > { %v373_v28 = vmul.f32 %v4027_v42, %v4027_v42  ;;  %v671_v48 = vpack.c.bf16 %v658_v41, %v657_v45 }
 0x137   : > { %v417_v6 = vsel %vm271_vm0, %v373_v28, 0.0 }
 0x138   : > { %418 = vadd.xlane.f32.xlu0 %v417_v6  ;;  %3056 = vmatmul.msk.bf16.gmra.mxu0 %vm271_vm0, %v670_v29  ;;  %v3399_v34 = vpop.eup %3398 }
 0x139   : > { %v516_v49 = vmul.f32 %v3399_v34, %v445_v51  ;;  %vm522_vm6 = vweird.f32 %v3399_v34 }
 0x13a   : > { %vm4050_vm7 = vmor %vm521_vm5, %vm522_vm6 }
 0x13b   : > { %v517_v38 = vmul.f32 %v3399_v34, %v516_v49 }
 0x13d   : > { %v518_v21 = vmul.f32 0.5, %v517_v38 }
 0x13f   : > { %v519_v54 = vsub.f32 1.5, %v518_v21 }
 0x141   : > { %v520_v26 = vmul.f32 %v3399_v34, %v519_v54 }
 0x143   : > { %v524_v2 = vsel %vm4050_vm7, %v3399_v34, %v520_v26 }
 0x144   : > { %v621_v39 = vmul.f32 %v524_v2, %v3841_v58 }
 0x146   : > { %v640_v28 = vmul.f32 %v3945_v15, %v621_v39 }
 0x148   : > { %3057 = vmatmul.msk.bf16.gmra.mxu0 %vm271_vm0, %v671_v48  ;;  %v659_v32 = vadd.f32 %v3967_v33, %v640_v28 }
 0x183   : > { %v398_v52 = vpop.xlane.xlu1 %397 }
 0x184   : > { %v430_v63 = vmul.f32 %v398_v52, %v3787_v20 }
 0x186   : > { %v446_v53 = vadd.f32 1e-05, %v430_v63 }
 0x188   : > { %3400 = vrsqrt.f32 %v446_v53  ;;  %vm531_vm9 = vweird.f32 %v446_v53 }
 0x18b   : > { %v401_v0 = vpop.xlane.xlu1 %400 }
 0x18c   : > { %v431_v44 = vmul.f32 %v401_v0, %v3787_v20 }
 0x18e   : > { %v3401_v55 = vpop.eup %3400  ;;  %v447_v60 = vadd.f32 1e-05, %v431_v44 }
 0x18f   : > { %v526_v59 = vmul.f32 %v3401_v55, %v446_v53  ;;  %vm532_vm8 = vweird.f32 %v3401_v55 }
 0x190   : > { %3402 = vrsqrt.f32 %v447_v60  ;;  %vm533_vm10 = vmor %vm531_vm9, %vm532_vm8  ;;  %vm541_vm12 = vweird.f32 %v447_v60 }
 0x191   : > { %v527_v62 = vmul.f32 %v3401_v55, %v526_v59 }
 0x193   : > { %v528_v1 = vmul.f32 0.5, %v527_v62  ;;  %v410_v3 = vpop.xlane.xlu0 %409  ;;  %v319_v13 = vpop.xlane.xlu1 %318 }
 0x194   : > { %v404_v10 = vpop.xlane.xlu2 %403  ;;  %v434_v56 = vmul.f32 %v410_v3, %v3787_v20  ;;  %v342_v16 = vmul.f32 %v3787_v20, %v319_v13 }
 0x195   : > { %v529_v5 = vsub.f32 1.5, %v528_v1  ;;  %v432_v14 = vmul.f32 %v404_v10, %v3787_v20 }
 0x196   : > { %v4059_v17 = vadd.f32 1e-05, %v434_v56  ;;  %v3403_v18 = vpop.eup %3402  ;;  %v4063_v25 = vsub.f32 %v3936_v12, %v342_v16 }
 0x197   : > { %v530_v57 = vmul.f32 %v3401_v55, %v529_v5  ;;  %v448_v19 = vadd.f32 1e-05, %v432_v14  ;;  %v536_v23 = vmul.f32 %v3403_v18, %v447_v60  ;;  %vm542_vm11 = vweird.f32 %v3403_v18 }
 0x198   : > { %3404 = vrsqrt.f32 %v4059_v17  ;;  %v374_v35 = vmul.f32 %v4063_v25, %v4063_v25  ;;  %vm4081_vm13 = vmor %vm541_vm12, %vm542_vm11  ;;  %vm571_vm5 = vweird.f32 %v4059_v17 }
 0x199   : > { %v534_v4 = vsel %vm533_vm10, %v3401_v55, %v530_v57  ;;  %3406 = vrsqrt.f32 %v448_v19  ;;  %v537_v24 = vmul.f32 %v3403_v18, %v536_v23  ;;  %vm551_vm14 = vweird.f32 %v448_v19 }
 0x19a   : > { %v622_v27 = vmul.f32 %v534_v4, %v3884_v22  ;;  %v420_v58 = vsel %vm271_vm0, %v374_v35, 0.0 }
 0x19b   : > { %v538_v8 = vmul.f32 0.5, %v537_v24  ;;  %421 = vadd.xlane.f32.xlu1 %v420_v58  ;;  %v413_v12 = vpop.xlane.xlu1 %412 }
 0x19c   : > { %v407_v29 = vpop.xlane.xlu2 %406  ;;  %v641_v6 = vmul.f32 %v3945_v15, %v622_v27  ;;  %v435_v41 = vmul.f32 %v413_v12, %v3787_v20 }
 0x19d   : > { %v433_v30 = vmul.f32 %v407_v29, %v3787_v20  ;;  %v539_v31 = vsub.f32 1.5, %v538_v8 }
 0x19e   : > { %v4073_v47 = vpop.eup %3404  ;;  %v660_v37 = vadd.f32 %v3967_v33, %v641_v6  ;;  %v4085_v52 = vadd.f32 1e-05, %v435_v41 }
 0x19f   : > { %v3407_v22 = vpop.eup %3406  ;;  %v449_v36 = vadd.f32 1e-05, %v433_v30  ;;  %v540_v45 = vmul.f32 %v3403_v18, %v539_v31  ;;  %v566_v43 = vmul.f32 %v4073_v47, %v4059_v17  ;;  %vm572_vm6 = vweird.f32 %v4073_v47 }
 0x1a0   : > { %v546_v48 = vmul.f32 %v3407_v22, %v448_v19  ;;  %v672_v51 = vpack.c.bf16 %v660_v37, %v659_v32  ;;  %vm552_vm15 = vweird.f32 %v3407_v22  ;;  %vm573_vm8 = vmor %vm571_vm5, %vm572_vm6  ;;  %vm581_vm11 = vweird.f32 %v4085_v52 }
 0x1a1   : > { %3408 = vrsqrt.f32 %v449_v36  ;;  %v544_v38 = vsel %vm4081_vm13, %v3403_v18, %v540_v45  ;;  %v567_v53 = vmul.f32 %v4073_v47, %v566_v43  ;;  %vm553_vm2 = vmor %vm551_vm14, %vm552_vm15  ;;  %vm561_vm3 = vweird.f32 %v449_v36 }
 0x1a2   : > { %v547_v34 = vmul.f32 %v3407_v22, %v546_v48  ;;  %3058 = vmatmul.msk.bf16.gmra.mxu0 %vm271_vm0, %v672_v51  ;;  %3410 = vrsqrt.f32 %v4085_v52  ;;  %v623_v60 = vmul.f32 %v544_v38, %v3895_v40 }
 0x1a3   : > { %v568_v62 = vmul.f32 0.5, %v567_v53 }
 0x1a4   : > { %v548_v63 = vmul.f32 0.5, %v547_v34  ;;  %v416_v21 = vpop.xlane.xlu2 %415  ;;  %v642_v10 = vmul.f32 %v3945_v15, %v623_v60 }
 0x1a5   : > { %v436_v54 = vmul.f32 %v416_v21, %v3787_v20  ;;  %v726_v0 = vpop.f32.mrf.mxu0  ;;  %v569_v13 = vsub.f32 1.5, %v568_v62 }
 0x1a6   : > { %v549_v55 = vsub.f32 1.5, %v548_v63  ;;  %v766_v44 = vpack.c.bf16 %v726_v0, %v726_v0 }
 0x1a7   : > { %v3409_v59 = vpop.eup %3408  ;;  %v452_v26 = vadd.f32 1e-05, %v436_v54  ;;  %v570_v23 = vmul.f32 %v4073_v47, %v569_v13 }
 0x1a8   : > { %v550_v61 = vmul.f32 %v3407_v22, %v549_v55  ;;  %v556_v1 = vmul.f32 %v3409_v59, %v449_v36  ;;  %783 = vst.msk [vmem:[#allocation2] sm:$0xf] %vm782_vm1, %v766_v44  ;;  %vm562_vm4 = vweird.f32 %v3409_v59  ;;  %v3411_v14 = vpop.eup %3410 }
 0x1a9   : > { %3412 = vrsqrt.f32 %v452_v26  ;;  %vm4099_vm7 = vmor %vm561_vm3, %vm562_vm4  ;;  %v576_v24 = vmul.f32 %v3411_v14, %v4085_v52  ;;  %v574_v8 = vsel %vm573_vm8, %v4073_v47, %v570_v23  ;;  %vm591_vm9 = vweird.f32 %v452_v26 }
 0x1aa   : > { %v554_v2 = vsel %vm553_vm2, %v3407_v22, %v550_v61  ;;  %v557_v3 = vmul.f32 %v3409_v59, %v556_v1  ;;  %v626_v37 = vmul.f32 %v574_v8, %v3919_v7  ;;  %vm582_vm12 = vweird.f32 %v3411_v14 }
 0x1ab   : > { %v624_v5 = vmul.f32 %v554_v2, %v3933_v11  ;;  %v661_v11 = vadd.f32 %v3967_v33, %v642_v10  ;;  %v577_v29 = vmul.f32 %v3411_v14, %v576_v24  ;;  %vm583_vm14 = vmor %vm581_vm11, %vm582_vm12  ;;  %v419_v62 = vpop.xlane.xlu0 %418  ;;  %vm2282_vm11 = vcmask 191616  }
 0x1ac   : > { %v558_v56 = vmul.f32 0.5, %v557_v3  ;;  %v645_v47 = vmul.f32 %v3945_v15, %v626_v37  ;;  %v437_v1 = vmul.f32 %v419_v62, %v3787_v20  ;;  %vm2769_vm12 = vcmask 257216  }
 0x1ad   : > { %v728_v16 = vpop.f32.mrf.mxu0  ;;  %v643_v40 = vmul.f32 %v3945_v15, %v624_v5  ;;  %v578_v22 = vmul.f32 0.5, %v577_v29 }
 0x1ae   : > { %v559_v57 = vsub.f32 1.5, %v558_v56  ;;  %v767_v39 = vpack.c.bf16 %v728_v16, %v728_v16  ;;  %v664_v51 = vadd.f32 %v3967_v33, %v645_v47  ;;  %v453_v2 = vadd.f32 1e-05, %v437_v1 }
 0x1af   : > { %v3413_v18 = vpop.eup %3412  ;;  %v662_v4 = vadd.f32 %v3967_v33, %v643_v40  ;;  %v579_v45 = vsub.f32 1.5, %v578_v22 }
 0x1b0   : > { %v560_v35 = vmul.f32 %v3409_v59, %v559_v57  ;;  %v586_v27 = vmul.f32 %v3413_v18, %v452_v26  ;;  %784 = vst.msk [vmem:[#allocation2 + $0x4] sm:$0xf] %vm782_vm1, %v767_v39  ;;  %vm592_vm10 = vweird.f32 %v3413_v18  ;;  %3414 = vrsqrt.f32 %v453_v2 }
 0x1b1   : > { %v673_v17 = vpack.c.bf16 %v662_v4, %v661_v11  ;;  %vm593_vm13 = vmor %vm591_vm9, %vm592_vm10  ;;  %v580_v34 = vmul.f32 %v3411_v14, %v579_v45  ;;  %vm601_vm15 = vweird.f32 %v453_v2  ;;  %vm1308_vm9 = vcmask 60416  }
 0x1b2   : > { %v564_v28 = vsel %vm4099_vm7, %v3409_v59, %v560_v35  ;;  %v587_v58 = vmul.f32 %v3413_v18, %v586_v27  ;;  %vm973_vm7 = vcmask 64512   ;;  %vm1795_vm10 = vcmask 126016  }
 0x1b3   : > { %3059 = vmatmul.msk.bf16.gmra.mxu0 %vm271_vm0, %v673_v17  ;;  %v625_v6 = vmul.f32 %v564_v28, %v3981_v50  ;;  %v584_v63 = vsel %vm583_vm14, %v3411_v14, %v580_v34 }
 0x1b4   : > { %v588_v30 = vmul.f32 0.5, %v587_v58  ;;  %v627_v0 = vmul.f32 %v584_v63, %v3975_v46 }
 0x1b5   : > { %v731_v12 = vpop.f32.mrf.mxu0  ;;  %v644_v36 = vmul.f32 %v3945_v15, %v625_v6 }
 0x1b6   : > { %v768_v31 = vpack.c.bf16 %v731_v12, %v731_v12  ;;  %v589_v41 = vsub.f32 1.5, %v588_v30  ;;  %v646_v44 = vmul.f32 %v3945_v15, %v627_v0  ;;  %v3415_v3 = vpop.eup %3414 }
 0x1b7   : > { %v3309_v32 = vld [vmem:[#allocation2] sm:$0xff]  ;;  %v663_v48 = vadd.f32 %v3967_v33, %v644_v36  ;;  %v596_v5 = vmul.f32 %v3415_v3, %v453_v2  ;;  %vm602_vm2 = vweird.f32 %v3415_v3 }
 0x1b8   : > { %785 = vst.msk [vmem:[#allocation2 + $0x8] sm:$0xf] %vm782_vm1, %v768_v31  ;;  %855 = vrot.lane.b32.xlu2 %v3309_v32, %s3709_s11  ;;  %v590_v7 = vmul.f32 %v3413_v18, %v589_v41  ;;  %v665_v61 = vadd.f32 %v3967_v33, %v646_v44  ;;  %vm603_vm3 = vmor %vm601_vm15, %vm602_vm2 }
 0x1b9   : > { %v674_v49 = vpack.c.bf16 %v664_v51, %v663_v48  ;;  %v597_v10 = vmul.f32 %v3415_v3, %v596_v5  ;;  %v3333_v5 = vld [vmem:[#allocation2] sm:$0xff] }
 0x1ba   : > { %v594_v38 = vsel %vm593_vm13, %v3413_v18, %v590_v7 }
 0x1bb   : > { %v628_v21 = vmul.f32 %v594_v38, %v4015_v9  ;;  %v598_v16 = vmul.f32 0.5, %v597_v10  ;;  %v4191_v10 = vld [vmem:[#allocation2] sm:$0xff] }
 0x1bd   : > { %v733_v50 = vpop.f32.mrf.mxu0  ;;  %v647_v55 = vmul.f32 %v3945_v15, %v628_v21  ;;  %v599_v40 = vsub.f32 1.5, %v598_v16 }
 0x1be   : > { %v769_v43 = vpack.c.bf16 %v733_v50, %v733_v50 }
 0x1bf   : > { %v666_v26 = vadd.f32 %v3967_v33, %v647_v55  ;;  %v600_v39 = vmul.f32 %v3415_v3, %v599_v40 }
 0x1c0   : > { %786 = vst.msk [vmem:[#allocation2 + $0xc] sm:$0xf] %vm782_vm1, %v769_v43 }
 0x1c1   : > { %v675_v9 = vpack.c.bf16 %v666_v26, %v665_v61  ;;  %v604_v11 = vsel %vm603_vm3, %v3415_v3, %v600_v39  ;;  %v3317_v3 = vld [vmem:[#allocation2] sm:$0xff] }
 0x1c3   : > { %3060 = vmatmul.msk.bf16.gmra.mxu0 %vm271_vm0, %v674_v49 }
 0x1c5   : > { %v736_v53 = vpop.f32.mrf.mxu0 }
 0x1c6   : > { %v770_v54 = vpack.c.bf16 %v736_v53, %v736_v53 }
 0x1c7   : > { %v3310_v52 = vld [vmem:[#allocation2 + $0x8] sm:$0xff] }
 0x1c8   : > { %787 = vst.msk [vmem:[#allocation2 + $0x10] sm:$0xf] %vm782_vm1, %v770_v54  ;;  %857 = vrot.lane.b32.xlu0 %v3310_v52, %s3709_s11 }
 0x1cd   : > { %v738_v59 = vpop.f32.mrf.mxu0 }
 0x1ce   : > { %v771_v60 = vpack.c.bf16 %v738_v59, %v738_v59 }
 0x1d0   : > { %788 = vst.msk [vmem:[#allocation2 + $0x14] sm:$0xf] %vm782_vm1, %v771_v60 }
 0x1d3   : > { %3061 = vmatmul.msk.bf16.gmra.mxu0 %vm271_vm0, %v675_v9 }
 0x1d7   : > { %v3311_v46 = vld [vmem:[#allocation2 + $0x10] sm:$0xff] }
 0x1d8   : > { %859 = vrot.lane.b32.xlu1 %v3311_v46, %s3709_s11  ;;  %v4170_v61 = vld [vmem:[#allocation2 + $0x10] sm:$0xff]  ;;  %v4178_v46 = vld [vmem:[#allocation2 + $0x8] sm:$0xff] }
 0x1d9   : > { %v3335_v39 = vld [vmem:[#allocation2 + $0x10] sm:$0xff] }
 0x20e   : > { %v422_v13 = vpop.xlane.xlu1 %421 }
 0x20f   : > { %v438_v56 = vmul.f32 %v422_v13, %v3787_v20  ;;  %v629_v20 = vmul.f32 %v604_v11, %v4027_v42  ;;  %v3342_v13 = vld [vmem:[#allocation2 + $0x8] sm:$0xff] }
 0x211   : > { %v454_v14 = vadd.f32 1e-05, %v438_v56  ;;  %v648_v58 = vmul.f32 %v3945_v15, %v629_v20 }
 0x212   : > { %v856_v34 = vpop.permute.xlu2 %855 }
 0x213   : > { %3416 = vrsqrt.f32 %v454_v14  ;;  %vm611_vm5 = vweird.f32 %v454_v14  ;;  %v667_v6 = vadd.f32 %v3967_v33, %v648_v58 }
 0x219   : > { %v3417_v57 = vpop.eup %3416 }
 0x21a   : > { %v606_v18 = vmul.f32 %v3417_v57, %v454_v14  ;;  %vm612_vm4 = vweird.f32 %v3417_v57 }
 0x21b   : > { %vm613_vm6 = vmor %vm611_vm5, %vm612_vm4 }
 0x21c   : > { %v607_v19 = vmul.f32 %v3417_v57, %v606_v18 }
 0x21e   : > { %v608_v4 = vmul.f32 0.5, %v607_v19 }
 0x21f   : > { %v741_v23 = vpop.f32.mrf.mxu0 }
 0x220   : > { %v772_v35 = vpack.c.bf16 %v741_v23, %v741_v23  ;;  %v609_v24 = vsub.f32 1.5, %v608_v4 }
 0x222   : > { %789 = vst.msk [vmem:[#allocation2 + $0x18] sm:$0xf] %vm782_vm1, %v772_v35  ;;  %v610_v27 = vmul.f32 %v3417_v57, %v609_v24 }
 0x224   : > { %v614_v17 = vsel %vm613_vm6, %v3417_v57, %v610_v27  ;;  %v3341_v57 = vld [vmem:[#allocation2] sm:$0xff] }
 0x225   : > { %v630_v28 = vmul.f32 %v614_v17, %v4063_v25 }
 0x227   : > { %v743_v8 = vpop.f32.mrf.mxu0  ;;  %v649_v12 = vmul.f32 %v3945_v15, %v630_v28 }
 0x228   : > { %v773_v29 = vpack.c.bf16 %v743_v8, %v743_v8 }
 0x229   : > { %v668_v30 = vadd.f32 %v3967_v33, %v649_v12 }
 0x22a   : > { %790 = vst.msk [vmem:[#allocation2 + $0x1c] sm:$0xf] %vm782_vm1, %v773_v29 }
 0x22b   : > { %v676_v31 = vpack.c.bf16 %v668_v30, %v667_v6 }
 0x22d   : > { %3062 = vmatmul.msk.bf16.gmra.mxu0 %vm271_vm0, %v676_v31 }
 0x230   : > { %v746_v42 = vpop.f32.mrf.mxu0 }
 0x231   : > { %v774_v32 = vpack.c.bf16 %v746_v42, %v746_v42  ;;  %v3312_v37 = vld [vmem:[#allocation2 + $0x18] sm:$0xff] }
 0x232   : > { %861 = vrot.lane.b32.xlu2 %v3312_v37, %s3709_s11  ;;  %v4180_v62 = vld [vmem:[#allocation2 + $0x18] sm:$0xff] }
 0x233   : > { %791 = vst.msk [vmem:[#allocation2 + $0x20] sm:$0xf] %vm782_vm1, %v774_v32  ;;  %v4196_v56 = vld [vmem:[#allocation2 + $0x18] sm:$0xff] }
 0x234   : > { %v3336_v14 = vld [vmem:[#allocation2 + $0x18] sm:$0xff] }
 0x235   : > { %v3344_v18 = vld [vmem:[#allocation2 + $0x18] sm:$0xff] }
 0x238   : > { %v748_v25 = vpop.f32.mrf.mxu0 }
 0x239   : > { %v775_v22 = vpack.c.bf16 %v748_v25, %v748_v25 }
 0x23a   : > { %v858_v49 = vpop.permute.xlu0 %857 }
 0x23b   : > { %792 = vst.msk [vmem:[#allocation2 + $0x24] sm:$0xf] %vm782_vm1, %v775_v22  ;;  %v3318_v22 = vld [vmem:[#allocation2 + $0x8] sm:$0xff] }
 0x240   : > { %v751_v15 = vpop.f32.mrf.mxu0 }
 0x241   : > { %v776_v36 = vpack.c.bf16 %v751_v15, %v751_v15 }
 0x242   : > { %v3313_v41 = vld [vmem:[#allocation2 + $0x20] sm:$0xff] }
 0x243   : > { %793 = vst.msk [vmem:[#allocation2 + $0x28] sm:$0xf] %vm782_vm1, %v776_v36  ;;  %863 = vrot.lane.b32.xlu0 %v3313_v41, %s3709_s11  ;;  %v4162_v59 = vld [vmem:[#allocation2 + $0x20] sm:$0xff] }
 0x244   : > { %v4201_v16 = vld [vmem:[#allocation2 + $0x20] sm:$0xff] }
 0x245   : > { %v3337_v19 = vld [vmem:[#allocation2 + $0x20] sm:$0xff] }
 0x246   : > { %v3345_v11 = vld [vmem:[#allocation2 + $0x20] sm:$0xff] }
 0x248   : > { %v753_v33 = vpop.f32.mrf.mxu0 }
 0x249   : > { %v777_v47 = vpack.c.bf16 %v753_v33, %v753_v33 }
 0x24a   : > { %v860_v38 = vpop.permute.xlu1 %859 }
 0x24b   : > { %794 = vst.msk [vmem:[#allocation2 + $0x2c] sm:$0xf] %vm782_vm1, %v777_v47 }
 0x250   : > { %v756_v45 = vpop.f32.mrf.mxu0 }
 0x251   : > { %v778_v50 = vpack.c.bf16 %v756_v45, %v756_v45 }
 0x252   : > { %v3314_v48 = vld [vmem:[#allocation2 + $0x28] sm:$0xff] }
 0x253   : > { %795 = vst.msk [vmem:[#allocation2 + $0x30] sm:$0xf] %vm782_vm1, %v778_v50  ;;  %865 = vrot.lane.b32.xlu2 %v3314_v48, %s3709_s11  ;;  %v4172_v9 = vld [vmem:[#allocation2 + $0x28] sm:$0xff] }
 0x254   : > { %v4186_v2 = vld [vmem:[#allocation2 + $0x28] sm:$0xff] }
 0x258   : > { %v758_v7 = vpop.f32.mrf.mxu0 }
 0x259   : > { %v779_v43 = vpack.c.bf16 %v758_v7, %v758_v7  ;;  %v4237_v7 = vld [vmem:[#allocation2 + $0x10] sm:$0xff] }
 0x25b   : > { %796 = vst.msk [vmem:[#allocation2 + $0x34] sm:$0xf] %vm782_vm1, %v779_v43 }
 0x262   : > { %v3315_v51 = vld [vmem:[#allocation2 + $0x30] sm:$0xff] }
 0x263   : > { %867 = vrot.lane.b32.xlu1 %v3315_v51, %s3709_s11  ;;  %v4164_v26 = vld [vmem:[#allocation2 + $0x30] sm:$0xff] }
 0x264   : > { %v4206_v40 = vld [vmem:[#allocation2 + $0x30] sm:$0xff] }
 0x279   : > { %879 = vxpose.xlu2.c.b16.start [1/8] (narrow) %v856_v34, 32  ;;  %v3334_v34 = vld [vmem:[#allocation2 + $0x8] sm:$0xff] }
 0x289   : > { %880 = vxpose.xlu2.c.b16.cont [2/8] (narrow) %v858_v49, 32  ;;  %v3343_v49 = vld [vmem:[#allocation2 + $0x10] sm:$0xff] }
 0x28c   : > { %v862_v63 = vpop.permute.xlu2 %861 }
 0x299   : > { %881 = vxpose.xlu2.c.b16.cont [3/8] (narrow) %v860_v38, 32  ;;  %v913_v38 = vlaneseq }
 0x2a9   : > { %882 = vxpose.xlu2.c.b16.cont [4/8] (narrow) %v862_v63, 32  ;;  %v4252_v63 = vand.u32 127, %v913_v38 }
 0x2aa   : > { %v761_v53 = vpop.f32.mrf.mxu0 }
 0x2ab   : > { %v780_v21 = vpack.c.bf16 %v761_v53, %v761_v53  ;;  %vm915_vm8 = vcmp.lt.s32.totalorder %v4252_v63, 8 }
 0x2ad   : > { %797 = vst.msk [vmem:[#allocation2 + $0x38] sm:$0xf] %vm782_vm1, %v780_v21  ;;  %v866_v60 = vpop.permute.xlu2 %865 }
 0x2b2   : > { %v763_v54 = vpop.f32.mrf.mxu0 }
 0x2b3   : > { %v781_v52 = vpack.c.bf16 %v763_v54, %v763_v54 }
 0x2b5   : > { %798 = vst.msk [vmem:[#allocation2 + $0x3c] sm:$0xf] %vm782_vm1, %v781_v52  ;;  %v864_v0 = vpop.permute.xlu0 %863  ;;  %vm998_vm1 = vcmask 1043456  }
 0x2b9   : > { %883 = vxpose.xlu2.c.b16.cont [5/8] (narrow) %v864_v0, 32 }
 0x2bc   : > { %v4157_v55 = vld [vmem:[#allocation2 + $0x38] sm:$0xff] }
 0x2bd   : > { %v3316_v44 = vld [vmem:[#allocation2 + $0x38] sm:$0xff]  ;;  %1233 = vrot.lane.b32.xlu1 %v4157_v55, %s3710_s12 }
 0x2be   : > { %869 = vrot.lane.b32.xlu0 %v3316_v44, %s3709_s11  ;;  %v4244_v51 = vld [vmem:[#allocation2 + $0x38] sm:$0xff] }
 0x2c5   : > { %1227 = vrot.lane.b32.xlu1 %v4162_v59, %s3710_s12 }
 0x2c6   : > { %1231 = vrot.lane.b32.xlu0 %v4164_v26, %s3710_s12 }
 0x2c9   : > { %884 = vxpose.xlu2.c.b16.cont [6/8] (narrow) %v866_v60, 32 }
 0x2cd   : > { %1223 = vrot.lane.b32.xlu1 %v4170_v61, %s3710_s12 }
 0x2ce   : > { %1229 = vrot.lane.b32.xlu0 %v4172_v9, %s3710_s12 }
 0x2d5   : > { %1384 = vrot.lane.b32.xlu1 %v4178_v46, %s3711_s13  ;;  %v868_v1 = vpop.permute.xlu1 %867 }
 0x2d6   : > { %1225 = vrot.lane.b32.xlu0 %v4180_v62, %s3710_s12 }
 0x2d9   : > { %885 = vxpose.xlu2.c.b16.cont [7/8] (narrow) %v868_v1, 32 }
 0x2dd   : > { %1392 = vrot.lane.b32.xlu1 %v4186_v2, %s3711_s13 }
 0x2de   : > { %1219 = vrot.lane.b32.xlu0 %v3317_v3, %s3710_s12 }
 0x2e5   : > { %1869 = vrot.lane.b32.xlu1 %v3333_v5, %s3712_s14 }
 0x2e6   : > { %1382 = vrot.lane.b32.xlu0 %v4191_v10, %s3711_s13 }
 0x2ed   : > { %2358 = vrot.lane.b32.xlu1 %v3342_v13, %s3713_s15 }
 0x2ee   : > { %1388 = vrot.lane.b32.xlu0 %v4196_v56, %s3711_s13 }
 0x2f5   : > { %1875 = vrot.lane.b32.xlu1 %v3336_v14, %s3712_s14 }
 0x2f6   : > { %1390 = vrot.lane.b32.xlu0 %v4201_v16, %s3711_s13 }
 0x2fe   : > { %1394 = vrot.lane.b32.xlu0 %v4206_v40, %s3711_s13 }
 0x306   : > { %2356 = vrot.lane.b32.xlu0 %v3341_v57, %s3713_s15 }
 0x30e   : > { %1873 = vrot.lane.b32.xlu0 %v3335_v39, %s3712_s14 }
 0x316   : > { %2362 = vrot.lane.b32.xlu0 %v3344_v18, %s3713_s15 }
 0x31e   : > { %1877 = vrot.lane.b32.xlu0 %v3337_v19, %s3712_s14 }
 0x326   : > { %2364 = vrot.lane.b32.xlu0 %v3345_v11, %s3713_s15 }
 0x32f   : > { %v1234_v4 = vpop.permute.xlu1 %1233 }
 0x330   : > { %v870_v23 = vpop.permute.xlu0 %869  ;;  %1243 = vmatpush.bf16.msra.mxu2 %v1234_v4 }
 0x331   : > { %886 = vxpose.xlu2.c.b16.end [8/8] (narrow) %v870_v23, 32 }
 0x337   : > { %v1228_v20 = vpop.permute.xlu1 %1227 }
 0x338   : > { %v1232_v35 = vpop.permute.xlu0 %1231 }
 0x339   : > { %1244 = vmatpush.bf16.msra.mxu2 %v1232_v35 }
 0x33f   : > { %v1224_v17 = vpop.permute.xlu1 %1223 }
 0x340   : > { %v1230_v24 = vpop.permute.xlu0 %1229 }
 0x341   : > { %1245 = vmatpush.bf16.msra.mxu2 %v1230_v24 }
 0x345   : > { %1246 = vmatpush.bf16.msra.mxu2 %v1228_v20 }
 0x347   : > { %v4229_v36 = vpop.permute.xlu1 %1384 }
 0x348   : > { %v1226_v27 = vpop.permute.xlu0 %1225 }
 0x349   : > { %1247 = vmatpush.bf16.msra.mxu2 %v1226_v27 }
 0x34d   : > { %1248 = vmatpush.bf16.msra.mxu2 %v1224_v17 }
 0x34f   : > { %v1393_v41 = vpop.permute.xlu1 %1392 }
 0x350   : > { %v4215_v28 = vpop.permute.xlu0 %1219 }
 0x357   : > { %v1870_v23 = vpop.permute.xlu1 %1869 }
 0x358   : > { %v4217_v30 = vpop.permute.xlu0 %1382 }
 0x360   : > { %v1389_v25 = vpop.permute.xlu0 %1388 }
 0x362   : > { %v887_v58 = vpop.trf.xlu2 }
 0x363   : > { %v897_v8 = vunpack.c.l.b16 %v887_v58  ;;  %v898_v29 = vunpack.c.h.b16 %v887_v58 }
 0x365   : > { %v901_v12 = vpack.c.b16 %v897_v8, %v897_v8  ;;  %v902_v6 = vpack.c.b16 %v898_v29, %v898_v29 }
 0x367   : > { %909 = vst [vmem:[#allocation3] sm:$0xf] %v901_v12 }
 0x368   : > { %910 = vst [vmem:[#allocation3 + $0x4] sm:$0xf] %v902_v6  ;;  %v1391_v15 = vpop.permute.xlu0 %1390 }
 0x36e   : > { %v932_v31 = vld [vmem:[#allocation3] sm:$0xf] }
 0x36f   : > { %v1000_v42 = vsel %vm998_vm1, %v932_v31, 0  ;;  %v1341_v32 = vld [vmem:[#allocation3 + $0x4] sm:$0xf] }
 0x370   : > { %1009 = vmatpush.bf16.msrb.mxu0 %v1000_v42  ;;  %3359 = vmatpush.bf16.msra.mxu1 %v1000_v42  ;;  %v1423_v37 = vsel %vm998_vm1, %v1341_v32, 0  ;;  %v1395_v43 = vpop.permute.xlu0 %1394 }
 0x371   : > { %3360 = vmatpush.bf16.msra.mxu3 %v1423_v37 }
 0x372   : > { %v888_v33 = vpop.trf.xlu2 }
 0x373   : > { %3127 = vmatmul.msk.bf16.vlgmr.msrb.gmra.mxu0 %vm973_vm7, %v3317_v3  ;;  %3130 = vmatmul.msk.bf16.vlgmr.msra.gmra.mxu1 %vm973_vm7, %v4180_v62  ;;  %v899_v47 = vunpack.c.l.b16 %v888_v33  ;;  %v900_v45 = vunpack.c.h.b16 %v888_v33 }
 0x374   : > { %3170 = vmatmul.msk.bf16.vlgmr.msra.gmra.mxu3 %vm973_vm7, %v1389_v25 }
 0x375   : > { %v903_v50 = vpack.c.b16 %v899_v47, %v899_v47  ;;  %v904_v48 = vpack.c.b16 %v900_v45, %v900_v45 }
 0x377   : > { %911 = vst [vmem:[#allocation3 + $0x8] sm:$0xf] %v903_v50 }
 0x378   : > { %912 = vst [vmem:[#allocation3 + $0xc] sm:$0xf] %v904_v48  ;;  %v4331_v6 = vpop.permute.xlu0 %2356 }
 0x37e   : > { %v1828_v0 = vld [vmem:[#allocation3 + $0x8] sm:$0xf] }
 0x380   : > { %v1874_v32 = vpop.permute.xlu0 %1873 }
 0x383   : > { %3128 = vmatmul.msk.bf16.gmra.mxu0 %vm973_vm7, %v3318_v22  ;;  %3131 = vmatmul.msk.bf16.gmra.mxu1 %vm973_vm7, %v4162_v59 }
 0x384   : > { %3171 = vmatmul.msk.bf16.gmra.mxu3 %vm973_vm7, %v1391_v15 }
 0x393   : > { %3129 = vmatmul.msk.bf16.gmra.mxu0 %vm973_vm7, %v4170_v61  ;;  %3132 = vmatmul.msk.bf16.gmra.mxu1 %vm973_vm7, %v4172_v9 }
 0x394   : > { %3172 = vmatmul.msk.bf16.gmra.mxu3 %vm973_vm7, %v1393_v41  ;;  %v4348_v41 = vpop.permute.xlu0 %2362 }
 0x39a   : > { %1221 = vrot.lane.b32.xlu2 %v3318_v22, %s3710_s12  ;;  %v4344_v22 = vpop.permute.xlu1 %2358 }
 0x39c   : > { %v1878_v33 = vpop.permute.xlu0 %1877 }
 0x3a2   : > { %1386 = vrot.lane.b32.xlu2 %v4237_v7, %s3711_s13  ;;  %v1876_v15 = vpop.permute.xlu1 %1875 }
 0x3a3   : > { %3133 = vmatmul.msk.bf16.gmra.mxu1 %vm973_vm7, %v4164_v26 }
 0x3a4   : > { %3173 = vmatmul.msk.bf16.gmra.mxu3 %vm973_vm7, %v1395_v43  ;;  %v4351_v47 = vpop.permute.xlu0 %2364 }
 0x3aa   : > { %1396 = vrot.lane.b32.xlu2 %v4244_v51, %s3711_s13 }
 0x3b2   : > { %1871 = vrot.lane.b32.xlu2 %v3334_v34, %s3712_s14 }
 0x3b3   : > { %3134 = vmatmul.msk.bf16.gmra.mxu1 %vm973_vm7, %v4157_v55  ;;  %v1910_v55 = vsel %vm998_vm1, %v1828_v0, 0 }
 0x3b4   : > { %1919 = vmatpush.bf16.msrb.mxu3 %v1910_v55 }
 0x3ba   : > { %2360 = vrot.lane.b32.xlu2 %v3343_v49, %s3713_s15 }
 0x3f0   : > { %v1011_v53 = vpop.f32.mrf.mxu0  ;;  %v1026_v21 = vpop.f32.mrf.mxu1 }
 0x3f1   : > { %v4257_v54 = vsel %vm915_vm8, %v1026_v21, -1e+30  ;;  %v4261_v52 = vsel %vm915_vm8, %v1011_v53, -1e+30 }
 0x3f2   : > { %1079 = vmax.xlane.f32.xlu0 %v4257_v54  ;;  %1067 = vmax.xlane.f32.xlu1 %v4261_v52 }
 0x3f4   : > { %v1222_v44 = vpop.permute.xlu2 %1221 }
 0x3f5   : > { %1249 = vmatpush.bf16.msra.mxu2 %v1222_v44 }
 0x3f8   : > { %v1013_v59 = vpop.f32.mrf.mxu0  ;;  %v1028_v26 = vpop.f32.mrf.mxu1 }
 0x3f9   : > { %1250 = vmatpush.bf16.msra.mxu2 %v4215_v28  ;;  %v4269_v60 = vsel %vm915_vm8, %v1028_v26, -1e+30  ;;  %v4273_v61 = vsel %vm915_vm8, %v1013_v59, -1e+30 }
 0x3fa   : > { %1081 = vmax.xlane.f32.xlu1 %v4269_v60  ;;  %1069 = vmax.xlane.f32.xlu0 %v4273_v61 }
 0x3fc   : > { %v4277_v9 = vpop.permute.xlu2 %1386 }
 0x3fd   : > { %1432 = vmatpush.bf16.msrb.mxu2 %v1423_v37 }
 0x400   : > { %v1016_v62 = vpop.f32.mrf.mxu0  ;;  %v1031_v1 = vpop.f32.mrf.mxu1 }
 0x401   : > { %v4281_v3 = vsel %vm915_vm8, %v1031_v1, -1e+30  ;;  %v4285_v5 = vsel %vm915_vm8, %v1016_v62, -1e+30 }
 0x402   : > { %1083 = vmax.xlane.f32.xlu0 %v4281_v3  ;;  %1071 = vmax.xlane.f32.xlu1 %v4285_v5 }
 0x404   : > { %v1397_v13 = vpop.permute.xlu2 %1396 }
 0x405   : > { %3174 = vmatmul.msk.bf16.gmra.mxu3 %vm973_vm7, %v1397_v13 }
 0x408   : > { %v1018_v14 = vpop.f32.mrf.mxu0  ;;  %v1033_v57 = vpop.f32.mrf.mxu1 }
 0x409   : > { %v4292_v39 = vsel %vm915_vm8, %v1033_v57, -1e+30  ;;  %v4296_v18 = vsel %vm915_vm8, %v1018_v14, -1e+30 }
 0x40a   : > { %1085 = vmax.xlane.f32.xlu1 %v4292_v39  ;;  %1073 = vmax.xlane.f32.xlu0 %v4296_v18 }
 0x40c   : > { %v1872_v8 = vpop.permute.xlu2 %1871 }
 0x410   : > { %v1021_v19 = vpop.f32.mrf.mxu0  ;;  %v1036_v11 = vpop.f32.mrf.mxu1 }
 0x411   : > { %v4302_v4 = vsel %vm915_vm8, %v1021_v19, -1e+30  ;;  %v4308_v20 = vsel %vm915_vm8, %v1036_v11, -1e+30 }
 0x412   : > { %1075 = vmax.xlane.f32.xlu1 %v4302_v4 }
 0x415   : > { %3207 = vmatmul.msk.bf16.vlgmr.msrb.gmra.mxu3 %vm973_vm7, %v1870_v23 }
 0x418   : > { %v1023_v35 = vpop.f32.mrf.mxu0  ;;  %v1038_v24 = vpop.f32.mrf.mxu1 }
 0x419   : > { %v4312_v27 = vsel %vm915_vm8, %v1023_v35, -1e+30  ;;  %v4322_v58 = vsel %vm915_vm8, %v1038_v24, -1e+30 }
 0x41a   : > { %1087 = vmax.xlane.f32.xlu1 %v4308_v20  ;;  %1077 = vmax.xlane.f32.xlu0 %v4312_v27 }
 0x420   : > { %v1041_v17 = vpop.f32.mrf.mxu1 }
 0x421   : > { %v4318_v28 = vsel %vm915_vm8, %v1041_v17, -1e+30 }
 0x422   : > { %1091 = vmax.xlane.f32.xlu1 %v4318_v28  ;;  %1089 = vmax.xlane.f32.xlu0 %v4322_v58 }
 0x425   : > { %3208 = vmatmul.msk.bf16.gmra.mxu3 %vm973_vm7, %v1872_v8 }
 0x428   : > { %v1043_v29 = vpop.f32.mrf.mxu1 }
 0x429   : > { %v4329_v12 = vsel %vm915_vm8, %v1043_v29, -1e+30 }
 0x42a   : > { %1093 = vmax.xlane.f32.xlu0 %v4329_v12 }
 0x430   : > { %v1046_v31 = vpop.f32.mrf.mxu1 }
 0x431   : > { %v4336_v42 = vsel %vm915_vm8, %v1046_v31, -1e+30 }
 0x432   : > { %1095 = vmax.xlane.f32.xlu1 %v4336_v42 }
 0x435   : > { %3209 = vmatmul.msk.bf16.gmra.mxu3 %vm973_vm7, %v1874_v32 }
 0x438   : > { %v1048_v37 = vpop.f32.mrf.mxu1 }
 0x439   : > { %v4342_v25 = vsel %vm915_vm8, %v1048_v37, -1e+30 }
 0x43a   : > { %1097 = vmax.xlane.f32.xlu0 %v4342_v25 }
 0x445   : > { %3210 = vmatmul.msk.bf16.gmra.mxu3 %vm973_vm7, %v1876_v15 }
 0x455   : > { %3211 = vmatmul.msk.bf16.gmra.mxu3 %vm973_vm7, %v1878_v33 }
 0x465   : > { %v1080_v45 = vpop.xlane.xlu0 %1079  ;;  %v1068_v50 = vpop.xlane.xlu1 %1067 }
 0x466   : > { %v1099_v48 = vsub.f32 %v4261_v52, %v1068_v50  ;;  %v1105_v34 = vsub.f32 %v4257_v54, %v1080_v45  ;;  %v4391_v50 = vld [vmem:[#allocation2 + $0x28] sm:$0xff] }
 0x468   : > { %v1115_v43 = vmul.f32 1.442695, %v1099_v48  ;;  %v1127_v21 = vmul.f32 1.442695, %v1105_v34  ;;  %v4415_v34 = vld [vmem:[#allocation2 + $0x30] sm:$0xff] }
 0x46a   : > { %3418 = vpow2.f32 %v1115_v43  ;;  %v4409_v43 = vld [vmem:[#allocation2 + $0x30] sm:$0xff] }
 0x46d   : > { %v1082_v49 = vpop.xlane.xlu1 %1081  ;;  %v1070_v38 = vpop.xlane.xlu0 %1069 }
 0x46e   : > { %v1106_v53 = vsub.f32 %v4269_v60, %v1082_v49  ;;  %v1100_v44 = vsub.f32 %v4273_v61, %v1070_v38 }
 0x470   : > { %v1129_v0 = vmul.f32 1.442695, %v1106_v53  ;;  %v4356_v55 = vpop.eup %3418  ;;  %v1117_v59 = vmul.f32 1.442695, %v1100_v44 }
 0x471   : > { %1147 = vadd.xlane.f32.xlu1 %v4356_v55 }
 0x472   : > { %3420 = vpow2.f32 %v1129_v0 }
 0x473   : > { %3422 = vpow2.f32 %v1127_v21 }
 0x474   : > { %3424 = vpow2.f32 %v1117_v59 }
 0x475   : > { %v1084_v52 = vpop.xlane.xlu0 %1083  ;;  %v1072_v26 = vpop.xlane.xlu1 %1071 }
 0x476   : > { %v1107_v54 = vsub.f32 %v4281_v3, %v1084_v52  ;;  %v1101_v62 = vsub.f32 %v4285_v5, %v1072_v26 }
 0x478   : > { %v4362_v1 = vpop.eup %3420  ;;  %v1131_v60 = vmul.f32 1.442695, %v1107_v54  ;;  %v1119_v13 = vmul.f32 1.442695, %v1101_v62 }
 0x479   : > { %v4364_v14 = vpop.eup %3422  ;;  %1161 = vadd.xlane.f32.xlu0 %v4362_v1 }
 0x47a   : > { %3426 = vpow2.f32 %v1131_v60  ;;  %1159 = vadd.xlane.f32.xlu1 %v4364_v14  ;;  %v4370_v5 = vpop.eup %3424 }
 0x47b   : > { %3428 = vpow2.f32 %v1119_v13 }
 0x47d   : > { %v1086_v61 = vpop.xlane.xlu1 %1085  ;;  %v1074_v57 = vpop.xlane.xlu0 %1073 }
 0x47e   : > { %v1108_v19 = vsub.f32 %v4292_v39, %v1086_v61  ;;  %v1102_v3 = vsub.f32 %v4296_v18, %v1074_v57 }
 0x480   : > { %v4372_v11 = vpop.eup %3426  ;;  %v1133_v23 = vmul.f32 1.442695, %v1108_v19  ;;  %v1121_v35 = vmul.f32 1.442695, %v1102_v3 }
 0x481   : > { %v4374_v24 = vpop.eup %3428  ;;  %1163 = vadd.xlane.f32.xlu2 %v4372_v11 }
 0x482   : > { %3430 = vpow2.f32 %v1133_v23  ;;  %1149 = vadd.xlane.f32.xlu1 %v4370_v5  ;;  %1151 = vadd.xlane.f32.xlu0 %v4374_v24 }
 0x483   : > { %3432 = vpow2.f32 %v1121_v35 }
 0x485   : > { %v1076_v17 = vpop.xlane.xlu1 %1075 }
 0x486   : > { %v1103_v39 = vsub.f32 %v4302_v4, %v1076_v17 }
 0x488   : > { %v4380_v18 = vpop.eup %3430  ;;  %v1123_v8 = vmul.f32 1.442695, %v1103_v39 }
 0x489   : > { %v4382_v29 = vpop.eup %3432 }
 0x48a   : > { %3434 = vpow2.f32 %v1123_v8  ;;  %1165 = vadd.xlane.f32.xlu1 %v4380_v18  ;;  %1153 = vadd.xlane.f32.xlu0 %v4382_v29 }
 0x48d   : > { %v1088_v31 = vpop.xlane.xlu1 %1087  ;;  %v1078_v37 = vpop.xlane.xlu0 %1077 }
 0x48e   : > { %v1109_v32 = vsub.f32 %v4308_v20, %v1088_v31  ;;  %v1104_v4 = vsub.f32 %v4312_v27, %v1078_v37  ;;  %v4405_v27 = vld [vmem:[#allocation2 + $0x28] sm:$0xff] }
 0x48f   : > { %v2315_v31 = vld [vmem:[#allocation3 + $0xc] sm:$0xf] }
 0x490   : > { %v4387_v15 = vpop.eup %3434  ;;  %v1135_v33 = vmul.f32 1.442695, %v1109_v32  ;;  %v1125_v45 = vmul.f32 1.442695, %v1104_v4  ;;  %v4450_v32 = vpop.permute.xlu2 %2360 }
 0x492   : > { %3436 = vpow2.f32 %v1135_v33  ;;  %1155 = vadd.xlane.f32.xlu1 %v4387_v15 }
 0x493   : > { %3438 = vpow2.f32 %v1125_v45 }
 0x495   : > { %v1092_v53 = vpop.xlane.xlu1 %1091 }
 0x496   : > { %v1111_v0 = vsub.f32 %v4318_v28, %v1092_v53 }
 0x498   : > { %v4393_v48 = vpop.eup %3436  ;;  %v1139_v26 = vmul.f32 1.442695, %v1111_v0 }
 0x499   : > { %2366 = vrot.lane.b32.xlu2 %v4391_v50, %s3713_s15  ;;  %1167 = vadd.xlane.f32.xlu0 %v4393_v48  ;;  %v4398_v20 = vpop.eup %3438 }
 0x4a1   : > { %1654 = vrot.lane.b32.xlu2 %v4206_v40, %s3714_s16  ;;  %1157 = vadd.xlane.f32.xlu0 %v4398_v20  ;;  %v1090_v40 = vpop.xlane.xlu0 %1089 }
 0x4a5   : > { %v1096_v54 = vpop.xlane.xlu1 %1095 }
 0x4a6   : > { %v1113_v62 = vsub.f32 %v4336_v42, %v1096_v54 }
 0x4a8   : > { %v1143_v28 = vmul.f32 1.442695, %v1113_v62 }
 0x4a9   : > { %1652 = vrot.lane.b32.xlu2 %v4186_v2, %s3714_s16  ;;  %v1110_v2 = vsub.f32 %v4322_v58, %v1090_v40  ;;  %v1094_v38 = vpop.xlane.xlu0 %1093  ;;  %v2397_v40 = vsel %vm998_vm1, %v2315_v31, 0 }
 0x4aa   : > { %v1112_v21 = vsub.f32 %v4329_v12, %v1094_v38 }
 0x4ab   : > { %1879 = vrot.lane.b32.xlu1 %v4405_v27, %s3712_s14  ;;  %v1137_v49 = vmul.f32 1.442695, %v1110_v2 }
 0x4ac   : > { %v1141_v44 = vmul.f32 1.442695, %v1112_v21 }
 0x4ad   : > { %3440 = vpow2.f32 %v1137_v49 }
 0x4ae   : > { %3442 = vpow2.f32 %v1141_v44 }
 0x4af   : > { %3444 = vpow2.f32 %v1139_v26 }
 0x4b1   : > { %1881 = vrot.lane.b32.xlu2 %v4409_v43, %s3712_s14  ;;  %v1098_v59 = vpop.xlane.xlu0 %1097 }
 0x4b2   : > { %v1114_v58 = vsub.f32 %v4342_v25, %v1098_v59 }
 0x4b3   : > { %v4422_v52 = vpop.eup %3440 }
 0x4b4   : > { %v1145_v60 = vmul.f32 1.442695, %v1114_v58  ;;  %v4429_v12 = vpop.eup %3442 }
 0x4b5   : > { %1656 = vrot.lane.b32.xlu0 %v4244_v51, %s3714_s16  ;;  %v4424_v51 = vpop.f32.mrf.mxu3  ;;  %v4432_v13 = vpop.eup %3444 }
 0x4b6   : > { %3446 = vpow2.f32 %v1145_v60 }
 0x4b7   : > { %3448 = vpow2.f32 %v1143_v28 }
 0x4b9   : > { %2368 = vrot.lane.b32.xlu2 %v4415_v34, %s3713_s15 }
 0x4bc   : > { %v4440_v42 = vpop.eup %3446 }
 0x4bd   : > { %v1451_v61 = vpop.f32.mrf.mxu3  ;;  %v4443_v19 = vpop.eup %3448 }
 0x4be   : > { %v4437_v57 = vsel %vm915_vm8, %v1451_v61, -1e+30  ;;  %v4471_v61 = vsel %vm915_vm8, %v4424_v51, -1e+30 }
 0x4c5   : > { %v1454_v2 = vpop.f32.mrf.mxu3 }
 0x4cd   : > { %v1456_v44 = vpop.f32.mrf.mxu3 }
 0x4d5   : > { %1169 = vadd.xlane.f32.xlu1 %v4422_v52  ;;  %v1459_v58 = vpop.f32.mrf.mxu3 }
 0x4d6   : > { %v4489_v31 = vsel %vm915_vm8, %v1459_v58, -1e+30 }
 0x4dd   : > { %1173 = vadd.xlane.f32.xlu1 %v4429_v12 }
 0x4df   : > { %1171 = vadd.xlane.f32.xlu0 %v4432_v13 }
 0x4e2   : > { %1504 = vmax.xlane.f32.xlu2 %v4437_v57 }
 0x4e4   : > { %v1148_v25 = vpop.xlane.xlu1 %1147 }
 0x4e5   : > { %1177 = vadd.xlane.f32.xlu1 %v4440_v42  ;;  %3450 = vrcp.f32 %v1148_v25  ;;  %v1461_v25 = vpop.f32.mrf.mxu3 }
 0x4e7   : > { %1175 = vadd.xlane.f32.xlu0 %v4443_v19 }
 0x4eb   : > { %v3451_v39 = vpop.eup %3450 }
 0x4ec   : > { %v1162_v3 = vpop.xlane.xlu0 %1161  ;;  %v1195_v37 = vmul.f32 %v3451_v39, %v4356_v55 }
 0x4ed   : > { %v1160_v23 = vpop.xlane.xlu1 %1159 }
 0x4f5   : > { %v1150_v35 = vpop.xlane.xlu1 %1149  ;;  %v1152_v17 = vpop.xlane.xlu0 %1151 }
 0x4f6   : > { %3452 = vrcp.f32 %v1150_v35 }
 0x4fa   : > { %1646 = vrot.lane.b32.xlu2 %v4237_v7, %s3714_s16 }
 0x4fb   : > { %1650 = vrot.lane.b32.xlu0 %v4201_v16, %s3714_s16  ;;  %v1164_v16 = vpop.xlane.xlu2 %1163 }
 0x4fc   : > { %v3453_v8 = vpop.eup %3452 }
 0x4fd   : > { %v1196_v33 = vmul.f32 %v3453_v8, %v4370_v5  ;;  %v1154_v4 = vpop.xlane.xlu0 %1153  ;;  %v1166_v7 = vpop.xlane.xlu1 %1165 }
 0x4fe   : > { %1648 = vrot.lane.b32.xlu1 %v4196_v56, %s3714_s16  ;;  %3454 = vrcp.f32 %v1154_v4  ;;  %v1464_v8 = vpop.f32.mrf.mxu3 }
 0x4ff   : > { %v1211_v45 = vpack.c.bf16 %v1196_v33, %v1195_v37  ;;  %3456 = vrcp.f32 %v1152_v17 }
 0x501   : > { %1251 = vmatmul.bf16.vlgmr.msra.gmra.mxu2 %v1211_v45 }
 0x502   : > { %1642 = vrot.lane.b32.xlu2 %v4191_v10, %s3714_s16  ;;  %2406 = vmatpush.bf16.msra.mxu2 %v2397_v40 }
 0x503   : > { %v4463_v53 = vpop.permute.xlu2 %2366 }
 0x504   : > { %v3455_v55 = vpop.eup %3454 }
 0x505   : > { %v3457_v49 = vpop.eup %3456  ;;  %v1198_v5 = vmul.f32 %v3455_v55, %v4382_v29  ;;  %v1156_v0 = vpop.xlane.xlu1 %1155  ;;  %v4510_v55 = vld [vmem:[#allocation2 + $0x38] sm:$0xff] }
 0x506   : > { %v1197_v56 = vmul.f32 %v3457_v49, %v4374_v24  ;;  %3458 = vrcp.f32 %v1156_v0  ;;  %v1466_v40 = vpop.f32.mrf.mxu3 }
 0x508   : > { %v1212_v21 = vpack.c.bf16 %v1198_v5, %v1197_v56 }
 0x50b   : > { %v1655_v26 = vpop.permute.xlu2 %1654 }
 0x50c   : > { %v4460_v38 = vpop.xlane.xlu0 %1167  ;;  %v3459_v59 = vpop.eup %3458 }
 0x50d   : > { %v1199_v62 = vmul.f32 %v3459_v59, %v4387_v15  ;;  %v4476_v15 = vsel %vm915_vm8, %v1454_v2, -1e+30  ;;  %v4508_v2 = vsel %vm915_vm8, %v1466_v40, -1e+30 }
 0x511   : > { %1256 = vmatmul.bf16.gmra.mxu2 %v1212_v21 }
 0x513   : > { %v1653_v28 = vpop.permute.xlu2 %1652 }
 0x514   : > { %v1158_v10 = vpop.xlane.xlu0 %1157 }
 0x515   : > { %3460 = vrcp.f32 %v1158_v10 }
 0x516   : > { %3462 = vrcp.f32 %v1162_v3  ;;  %v4481_v3 = vsel %vm915_vm8, %v1456_v44, -1e+30 }
 0x517   : > { %3464 = vrcp.f32 %v1160_v23 }
 0x518   : > { %3466 = vrcp.f32 %v1166_v7 }
 0x519   : > { %3468 = vrcp.f32 %v1164_v16 }
 0x51a   : > { %3470 = vrcp.f32 %v4460_v38 }
 0x51b   : > { %v3461_v54 = vpop.eup %3460  ;;  %v1882_v39 = vpop.permute.xlu2 %1881 }
 0x51c   : > { %v1200_v29 = vmul.f32 %v3461_v54, %v4398_v20  ;;  %v3463_v35 = vpop.eup %3462 }
 0x51d   : > { %v1880_v60 = vpop.permute.xlu1 %1879  ;;  %v3465_v17 = vpop.eup %3464  ;;  %v1202_v23 = vmul.f32 %v3463_v35, %v4362_v1  ;;  %v4499_v1 = vsel %vm915_vm8, %v1461_v25, -1e+30 }
 0x51e   : > { %3212 = vmatmul.msk.bf16.gmra.mxu3 %vm973_vm7, %v1880_v60  ;;  %v1213_v24 = vpack.c.bf16 %v1200_v29, %v1199_v62  ;;  %v1201_v51 = vmul.f32 %v3465_v17, %v4364_v14  ;;  %v4494_v14 = vsel %vm915_vm8, %v1464_v8, -1e+30  ;;  %v3467_v33 = vpop.eup %3466 }
 0x51f   : > { %v3469_v4 = vpop.eup %3468  ;;  %v1204_v45 = vmul.f32 %v3467_v33, %v4380_v18 }
 0x520   : > { %v1214_v37 = vpack.c.bf16 %v1202_v23, %v1201_v51  ;;  %v1203_v7 = vmul.f32 %v3469_v4, %v4372_v11  ;;  %v4520_v11 = vld [vmem:[#allocation2 + $0x38] sm:$0xff]  ;;  %v3471_v5 = vpop.eup %3470 }
 0x521   : > { %1261 = vmatmul.bf16.gmra.mxu2 %v1213_v24  ;;  %v1205_v21 = vmul.f32 %v3471_v5, %v4393_v48 }
 0x522   : > { %v1215_v16 = vpack.c.bf16 %v1204_v45, %v1203_v7 }
 0x523   : > { %v4527_v59 = vpop.permute.xlu2 %2368 }
 0x525   : > { %1502 = vmax.xlane.f32.xlu0 %v4471_v61 }
 0x527   : > { %v1657_v20 = vpop.permute.xlu0 %1656 }
 0x528   : > { %1506 = vmax.xlane.f32.xlu1 %v4476_v15  ;;  %1666 = vmatpush.bf16.msrb.mxu1 %v1657_v20 }
 0x52b   : > { %1508 = vmax.xlane.f32.xlu2 %v4481_v3 }
 0x52c   : > { %1667 = vmatpush.bf16.msrb.mxu1 %v1655_v26 }
 0x52e   : > { %3213 = vmatmul.msk.bf16.gmra.mxu3 %vm973_vm7, %v1882_v39 }
 0x530   : > { %1510 = vmax.xlane.f32.xlu1 %v4489_v31  ;;  %1668 = vmatpush.bf16.msrb.mxu1 %v1653_v28 }
 0x531   : > { %1266 = vmatmul.bf16.gmra.mxu2 %v1214_v37 }
 0x533   : > { %1514 = vmax.xlane.f32.xlu2 %v4494_v14 }
 0x538   : > { %1512 = vmax.xlane.f32.xlu1 %v4499_v1 }
 0x539   : > { %1644 = vrot.lane.b32.xlu0 %v4178_v46, %s3714_s16  ;;  %v1469_v46 = vpop.f32.mrf.mxu3 }
 0x53a   : > { %v4518_v18 = vsel %vm915_vm8, %v1469_v46, -1e+30 }
 0x540   : > { %1516 = vmax.xlane.f32.xlu1 %v4508_v2 }
 0x541   : > { %1271 = vmatmul.bf16.gmra.mxu2 %v1215_v16  ;;  %1883 = vrot.lane.b32.xlu0 %v4510_v55, %s3712_s14  ;;  %v1471_v37 = vpop.f32.mrf.mxu3 }
 0x548   : > { %v1170_v49 = vpop.xlane.xlu1 %1169  ;;  %1518 = vmax.xlane.f32.xlu1 %v4518_v18 }
 0x549   : > { %3472 = vrcp.f32 %v1170_v49  ;;  %2370 = vrot.lane.b32.xlu0 %v4520_v11, %s3713_s15  ;;  %v1921_v40 = vpop.f32.mrf.mxu3 }
 0x54f   : > { %v3473_v56 = vpop.eup %3472 }
 0x550   : > { %v1206_v0 = vmul.f32 %v3473_v56, %v4422_v52  ;;  %v1174_v10 = vpop.xlane.xlu1 %1173 }
 0x552   : > { %v1172_v38 = vpop.xlane.xlu0 %1171  ;;  %v1216_v44 = vpack.c.bf16 %v1206_v0, %v1205_v21 }
 0x553   : > { %3474 = vrcp.f32 %v1172_v38 }
 0x554   : > { %1276 = vmatmul.bf16.gmra.mxu2 %v1216_v44  ;;  %3476 = vrcp.f32 %v1174_v10  ;;  %v1923_v44 = vpop.f32.mrf.mxu3 }
 0x555   : > { %v1505_v29 = vpop.xlane.xlu2 %1504 }
 0x556   : > { %v1529_v48 = vsub.f32 %v4437_v57, %v1505_v29 }
 0x558   : > { %v1178_v52 = vpop.xlane.xlu1 %1177  ;;  %v1552_v28 = vmul.f32 1.442695, %v1529_v48 }
 0x559   : > { %v3475_v26 = vpop.eup %3474 }
 0x55a   : > { %v3477_v54 = vpop.eup %3476  ;;  %v1207_v58 = vmul.f32 %v3475_v26, %v4432_v13  ;;  %v1176_v60 = vpop.xlane.xlu0 %1175 }
 0x55b   : > { %v1208_v62 = vmul.f32 %v3477_v54, %v4429_v12  ;;  %3478 = vrcp.f32 %v1176_v60 }
 0x55c   : > { %3480 = vrcp.f32 %v1178_v52 }
 0x55d   : > { %v1217_v24 = vpack.c.bf16 %v1208_v62, %v1207_v58  ;;  %3482 = vpow2.f32 %v1552_v28  ;;  %v1647_v57 = vpop.permute.xlu2 %1646 }
 0x561   : > { %v3479_v25 = vpop.eup %3478 }
 0x562   : > { %v3481_v35 = vpop.eup %3480  ;;  %v1209_v17 = vmul.f32 %v3479_v25, %v4443_v19  ;;  %v4569_v25 = vsel %vm915_vm8, %v1923_v44, -1e+30 }
 0x563   : > { %v1210_v13 = vmul.f32 %v3481_v35, %v4440_v42  ;;  %v4534_v51 = vpop.eup %3482 }
 0x564   : > { %1281 = vmatmul.bf16.gmra.mxu2 %v1217_v24  ;;  %v1926_v24 = vpop.f32.mrf.mxu3 }
 0x565   : > { %v1218_v23 = vpack.c.bf16 %v1210_v13, %v1209_v17  ;;  %v1643_v45 = vpop.permute.xlu2 %1642 }
 0x56d   : > { %v1651_v20 = vpop.permute.xlu0 %1650 }
 0x56e   : > { %1669 = vmatpush.bf16.msrb.mxu1 %v1651_v20 }
 0x570   : > { %v1649_v12 = vpop.permute.xlu1 %1648 }
 0x572   : > { %1670 = vmatpush.bf16.msrb.mxu1 %v1649_v12 }
 0x573   : > { %1584 = vadd.xlane.f32.xlu0 %v4534_v51 }
 0x574   : > { %1286 = vmatmul.bf16.gmra.mxu2 %v1218_v23 }
 0x576   : > { %1671 = vmatpush.bf16.msrb.mxu1 %v1647_v57 }
 0x584   : > { %v1252_v39 = vpop.f32.mrf.mxu2  ;;  %3167 = vmatmul.msk.bf16.vlgmr.msrb.gmra.mxu2 %vm973_vm7, %v4217_v30 }
 0x585   : > { %v1292_v8 = vpack.c.bf16 %v1252_v39, %v1252_v39 }
 0x587   : > { %1309 = vst.msk [vmem:[#allocation4] sm:$0xf] %vm1308_vm9, %v1292_v8  ;;  %v1928_v8 = vpop.f32.mrf.mxu3 }
 0x58c   : > { %v1254_v19 = vpop.f32.mrf.mxu2 }
 0x58d   : > { %v1293_v42 = vpack.c.bf16 %v1254_v19, %v1254_v19 }
 0x58f   : > { %1310 = vst.msk [vmem:[#allocation4 + $0x4] sm:$0xf] %vm1308_vm9, %v1293_v42 }
 0x594   : > { %v1257_v33 = vpop.f32.mrf.mxu2  ;;  %3168 = vmatmul.msk.bf16.gmra.mxu2 %vm973_vm7, %v4229_v36 }
 0x595   : > { %v1294_v4 = vpack.c.bf16 %v1257_v33, %v1257_v33 }
 0x597   : > { %1311 = vst.msk [vmem:[#allocation4 + $0x8] sm:$0xf] %vm1308_vm9, %v1294_v4 }
 0x598   : > { %v1503_v7 = vpop.xlane.xlu0 %1502 }
 0x599   : > { %v1528_v30 = vsub.f32 %v4471_v61, %v1503_v7 }
 0x59b   : > { %v1550_v16 = vmul.f32 1.442695, %v1528_v30  ;;  %v1507_v46 = vpop.xlane.xlu1 %1506 }
 0x59c   : > { %v1530_v49 = vsub.f32 %v4476_v15, %v1507_v46  ;;  %v1259_v5 = vpop.f32.mrf.mxu2 }
 0x59d   : > { %3484 = vpow2.f32 %v1550_v16  ;;  %v1295_v56 = vpack.c.bf16 %v1259_v5, %v1259_v5 }
 0x59e   : > { %v1554_v21 = vmul.f32 1.442695, %v1530_v49  ;;  %v1509_v0 = vpop.xlane.xlu2 %1508 }
 0x59f   : > { %1312 = vst.msk [vmem:[#allocation4 + $0xc] sm:$0xf] %vm1308_vm9, %v1295_v56  ;;  %v1531_v36 = vsub.f32 %v4481_v3, %v1509_v0 }
 0x5a0   : > { %3486 = vpow2.f32 %v1554_v21 }
 0x5a1   : > { %v1556_v38 = vmul.f32 1.442695, %v1531_v36 }
 0x5a3   : > { %v4548_v10 = vpop.eup %3484  ;;  %3488 = vpow2.f32 %v1556_v38  ;;  %v1511_v61 = vpop.xlane.xlu1 %1510 }
 0x5a4   : > { %v1262_v26 = vpop.f32.mrf.mxu2  ;;  %3169 = vmatmul.msk.bf16.gmra.mxu2 %vm973_vm7, %v4277_v9  ;;  %1582 = vadd.xlane.f32.xlu2 %v4548_v10  ;;  %v1532_v58 = vsub.f32 %v4489_v31, %v1511_v61  ;;  %v4563_v9 = vsel %vm915_vm8, %v1471_v37, -1e+30 }
 0x5a5   : > { %v1296_v15 = vpack.c.bf16 %v1262_v26, %v1262_v26 }
 0x5a6   : > { %v4553_v54 = vpop.eup %3486  ;;  %v1558_v62 = vmul.f32 1.442695, %v1532_v58  ;;  %v1515_v23 = vpop.xlane.xlu2 %1514 }
 0x5a7   : > { %1313 = vst.msk [vmem:[#allocation4 + $0x10] sm:$0xf] %vm1308_vm9, %v1296_v15  ;;  %1586 = vadd.xlane.f32.xlu0 %v4553_v54 }
 0x5a8   : > { %3490 = vpow2.f32 %v1558_v62 }
 0x5a9   : > { %v4558_v3 = vpop.eup %3488 }
 0x5aa   : > { %1588 = vadd.xlane.f32.xlu1 %v4558_v3 }
 0x5ab   : > { %v1513_v29 = vpop.xlane.xlu1 %1512  ;;  %v1645_v60 = vpop.permute.xlu0 %1644 }
 0x5ac   : > { %v1533_v48 = vsub.f32 %v4499_v1, %v1513_v29  ;;  %v1264_v52 = vpop.f32.mrf.mxu2  ;;  %1520 = vmax.xlane.f32.xlu2 %v4563_v9  ;;  %1672 = vmatpush.bf16.msrb.mxu1 %v1645_v60  ;;  %v4575_v1 = vsel %vm915_vm8, %v1921_v40, -1e+30 }
 0x5ad   : > { %v1297_v31 = vpack.c.bf16 %v1264_v52, %v1264_v52 }
 0x5ae   : > { %v1560_v28 = vmul.f32 1.442695, %v1533_v48  ;;  %v4581_v12 = vpop.eup %3490 }
 0x5af   : > { %1314 = vst.msk [vmem:[#allocation4 + $0x14] sm:$0xf] %vm1308_vm9, %v1297_v31  ;;  %1979 = vmax.xlane.f32.xlu0 %v4569_v25 }
 0x5b0   : > { %3492 = vpow2.f32 %v1560_v28  ;;  %1673 = vmatpush.bf16.msrb.mxu1 %v1643_v45  ;;  %v4599_v45 = vsel %vm915_vm8, %v1928_v8, -1e+30 }
 0x5b3   : > { %v1517_v35 = vpop.xlane.xlu1 %1516  ;;  %v1884_v20 = vpop.permute.xlu0 %1883 }
 0x5b4   : > { %v1535_v17 = vsub.f32 %v4508_v2, %v1517_v35  ;;  %v1267_v13 = vpop.f32.mrf.mxu2  ;;  %3247 = vmatmul.msk.bf16.vlgmr.msra.gmra.mxu2 %vm973_vm7, %v4331_v6  ;;  %1977 = vmax.xlane.f32.xlu2 %v4575_v1  ;;  %v1534_v6 = vsub.f32 %v4494_v14, %v1515_v23  ;;  %v4592_v2 = vsel %vm915_vm8, %v1926_v24, -1e+30  ;;  %v1931_v14 = vpop.f32.mrf.mxu3 }
 0x5b5   : > { %v1298_v57 = vpack.c.bf16 %v1267_v13, %v1267_v13  ;;  %3214 = vmatmul.msk.bf16.gmra.mxu3 %vm973_vm7, %v1884_v20  ;;  %v4606_v40 = vsel %vm915_vm8, %v1931_v14, -1e+30 }
 0x5b6   : > { %v4584_v39 = vpop.eup %3492  ;;  %v1564_v19 = vmul.f32 1.442695, %v1535_v17  ;;  %v1562_v42 = vmul.f32 1.442695, %v1534_v6 }
 0x5b7   : > { %1315 = vst.msk [vmem:[#allocation4 + $0x18] sm:$0xf] %vm1308_vm9, %v1298_v57  ;;  %1590 = vadd.xlane.f32.xlu0 %v4581_v12  ;;  %1592 = vadd.xlane.f32.xlu1 %v4584_v39 }
 0x5b8   : > { %3494 = vpow2.f32 %v1564_v19 }
 0x5b9   : > { %3496 = vpow2.f32 %v1562_v42 }
 0x5bb   : > { %v1519_v30 = vpop.xlane.xlu1 %1518  ;;  %v2371_v60 = vpop.permute.xlu0 %2370 }
 0x5bc   : > { %v1269_v37 = vpop.f32.mrf.mxu2  ;;  %1981 = vmax.xlane.f32.xlu2 %v4592_v2  ;;  %v1536_v49 = vsub.f32 %v4518_v18, %v1519_v30  ;;  %v1933_v5 = vpop.f32.mrf.mxu3 }
 0x5bd   : > { %v1299_v33 = vpack.c.bf16 %v1269_v37, %v1269_v37  ;;  %v4618_v36 = vsel %vm915_vm8, %v1933_v5, -1e+30 }
 0x5be   : > { %v4595_v4 = vpop.eup %3494  ;;  %v1566_v56 = vmul.f32 1.442695, %v1536_v49 }
 0x5bf   : > { %1316 = vst.msk [vmem:[#allocation4 + $0x1c] sm:$0xf] %vm1308_vm9, %v1299_v33  ;;  %1983 = vmax.xlane.f32.xlu0 %v4599_v45  ;;  %1596 = vadd.xlane.f32.xlu1 %v4595_v4  ;;  %v4611_v46 = vpop.eup %3496 }
 0x5c0   : > { %3498 = vpow2.f32 %v1566_v56 }
 0x5c4   : > { %v1272_v7 = vpop.f32.mrf.mxu2  ;;  %3248 = vmatmul.msk.bf16.gmra.mxu2 %vm973_vm7, %v4344_v22  ;;  %1985 = vmax.xlane.f32.xlu2 %v4606_v40 }
 0x5c5   : > { %v1300_v16 = vpack.c.bf16 %v1272_v7, %v1272_v7 }
 0x5c6   : > { %v4624_v22 = vpop.eup %3498 }
 0x5c7   : > { %1317 = vst.msk [vmem:[#allocation4 + $0x20] sm:$0xf] %vm1308_vm9, %v1300_v16  ;;  %1594 = vadd.xlane.f32.xlu0 %v4611_v46 }
 0x5cc   : > { %v1274_v21 = vpop.f32.mrf.mxu2 }
 0x5cd   : > { %v1301_v0 = vpack.c.bf16 %v1274_v21, %v1274_v21 }
 0x5cf   : > { %1318 = vst.msk [vmem:[#allocation4 + $0x24] sm:$0xf] %vm1308_vm9, %v1301_v0  ;;  %1987 = vmax.xlane.f32.xlu0 %v4618_v36 }
 0x5d4   : > { %3249 = vmatmul.msk.bf16.gmra.mxu2 %vm973_vm7, %v4450_v32 }
 0x5d7   : > { %v1277_v38 = vpop.f32.mrf.mxu2  ;;  %1598 = vadd.xlane.f32.xlu0 %v4624_v22 }
 0x5d8   : > { %v1302_v18 = vpack.c.bf16 %v1277_v38, %v1277_v38  ;;  %2143 = vrot.lane.b32.xlu1 %v4510_v55, %s3715_s17 }
 0x5da   : > { %1319 = vst.msk [vmem:[#allocation4 + $0x28] sm:$0xf] %vm1308_vm9, %v1302_v18 }
 0x5dc   : > { %2630 = vrot.lane.b32.xlu2 %v4520_v11, %s3716_s18 }
 0x5df   : > { %v1279_v44 = vpop.f32.mrf.mxu2 }
 0x5e0   : > { %v1303_v61 = vpack.c.bf16 %v1279_v44, %v1279_v44  ;;  %2141 = vrot.lane.b32.xlu1 %v4409_v43, %s3715_s17 }
 0x5e2   : > { %1320 = vst.msk [vmem:[#allocation4 + $0x2c] sm:$0xf] %vm1308_vm9, %v1303_v61 }
 0x5e4   : > { %3250 = vmatmul.msk.bf16.gmra.mxu2 %vm973_vm7, %v4348_v41 }
 0x5e6   : > { %v4655_v48 = vpop.xlane.xlu0 %1584 }
 0x5e7   : > { %v1282_v32 = vpop.f32.mrf.mxu2 }
 0x5e8   : > { %v1304_v26 = vpack.c.bf16 %v1282_v32, %v1282_v32 }
 0x5ea   : > { %1321 = vst.msk [vmem:[#allocation4 + $0x30] sm:$0xf] %vm1308_vm9, %v1304_v26 }
 0x5ef   : > { %v1284_v55 = vpop.f32.mrf.mxu2 }
 0x5f0   : > { %v1305_v15 = vpack.c.bf16 %v1284_v55, %v1284_v55 }
 0x5f2   : > { %1322 = vst.msk [vmem:[#allocation4 + $0x34] sm:$0xf] %vm1308_vm9, %v1305_v15 }
 0x5f4   : > { %3251 = vmatmul.msk.bf16.gmra.mxu2 %vm973_vm7, %v4351_v47 }
 0x5f7   : > { %v1287_v11 = vpop.f32.mrf.mxu2 }
 0x5f8   : > { %v1306_v58 = vpack.c.bf16 %v1287_v11, %v1287_v11 }
 0x5fa   : > { %1323 = vst.msk [vmem:[#allocation4 + $0x38] sm:$0xf] %vm1308_vm9, %v1306_v58 }
 0x5ff   : > { %v1289_v43 = vpop.f32.mrf.mxu2 }
 0x600   : > { %v1307_v62 = vpack.c.bf16 %v1289_v43, %v1289_v43 }
 0x602   : > { %1324 = vst.msk [vmem:[#allocation4 + $0x3c] sm:$0xf] %vm1308_vm9, %v1307_v62 }
 0x604   : > { %3252 = vmatmul.msk.bf16.gmra.mxu2 %vm973_vm7, %v4463_v53 }
 0x607   : > { %v1434_v41 = vpop.f32.mrf.mxu2 }
 0x608   : > { %v4647_v29 = vsel %vm915_vm8, %v1434_v41, -1e+30 }
 0x609   : > { %1490 = vmax.xlane.f32.xlu2 %v4647_v29 }
 0x60f   : > { %v1436_v47 = vpop.f32.mrf.mxu2 }
 0x610   : > { %v4652_v24 = vsel %vm915_vm8, %v1436_v47, -1e+30 }
 0x611   : > { %1492 = vmax.xlane.f32.xlu1 %v4652_v24 }
 0x614   : > { %3253 = vmatmul.msk.bf16.gmra.mxu2 %vm973_vm7, %v4527_v59 }
 0x617   : > { %v1439_v53 = vpop.f32.mrf.mxu2  ;;  %v4659_v52 = vpop.xlane.xlu2 %1582 }
 0x618   : > { %v4688_v7 = vsel %vm915_vm8, %v1439_v53, -1e+30 }
 0x61a   : > { %v4661_v31 = vpop.xlane.xlu0 %1586 }
 0x61d   : > { %v4669_v13 = vpop.xlane.xlu1 %1588 }
 0x61f   : > { %v1441_v28 = vpop.f32.mrf.mxu2  ;;  %v1521_v35 = vpop.xlane.xlu2 %1520 }
 0x620   : > { %v1537_v20 = vsub.f32 %v4563_v9, %v1521_v35  ;;  %v4666_v17 = vsel %vm915_vm8, %v1441_v28, -1e+30 }
 0x621   : > { %1496 = vmax.xlane.f32.xlu2 %v4666_v17 }
 0x622   : > { %v1568_v23 = vmul.f32 1.442695, %v1537_v20  ;;  %v4671_v57 = vpop.xlane.xlu0 %1979  ;;  %v3674_v20 = vld [vmem:[#allocation2 + $0x20] sm:$0xff] }
 0x624   : > { %3500 = vpow2.f32 %v1568_v23  ;;  %3254 = vmatmul.msk.bf16.gmra.mxu2 %vm973_vm7, %v2371_v60 }
 0x627   : > { %v1444_v59 = vpop.f32.mrf.mxu2  ;;  %v4674_v8 = vpop.xlane.xlu2 %1977 }
 0x62a   : > { %v4676_v19 = vpop.eup %3500  ;;  %v1591_v9 = vpop.xlane.xlu0 %1590 }
 0x62b   : > { %v1593_v6 = vpop.xlane.xlu1 %1592  ;;  %3502 = vrcp.f32 %v1591_v9  ;;  %1600 = vadd.xlane.f32.xlu0 %v4676_v19 }
 0x62c   : > { %3504 = vrcp.f32 %v1593_v6  ;;  %v3675_v6 = vld [vmem:[#allocation2 + $0x18] sm:$0xff] }
 0x62f   : > { %v1446_v42 = vpop.f32.mrf.mxu2  ;;  %v4679_v37 = vpop.xlane.xlu2 %1981 }
 0x630   : > { %v4683_v33 = vsel %vm915_vm8, %v1446_v42, -1e+30 }
 0x631   : > { %v3503_v14 = vpop.eup %3502  ;;  %1500 = vmax.xlane.f32.xlu1 %v4683_v33 }
 0x632   : > { %v4690_v30 = vpop.xlane.xlu0 %1983  ;;  %v4693_v16 = vmul.f32 %v3503_v14, %v4581_v12  ;;  %v3505_v49 = vpop.eup %3504  ;;  %v4710_v12 = vsel %vm915_vm8, %v1444_v59, -1e+30 }
 0x633   : > { %1494 = vmax.xlane.f32.xlu0 %v4688_v7  ;;  %v4697_v5 = vmul.f32 %v3505_v49, %v4584_v39  ;;  %v1597_v56 = vpop.xlane.xlu1 %1596 }
 0x634   : > { %3506 = vrcp.f32 %v1597_v56 }
 0x635   : > { %v5396_v63 = vpack.c.bf16 %v4697_v5, %v4693_v16 }
 0x637   : > { %v2408_v0 = vpop.f32.mrf.mxu2  ;;  %v4701_v38 = vpop.xlane.xlu2 %1985 }
 0x638   : > { %v4705_v18 = vsel %vm915_vm8, %v2408_v0, -1e+30 }
 0x639   : > { %2464 = vmax.xlane.f32.xlu1 %v4705_v18 }
 0x63a   : > { %v1595_v39 = vpop.xlane.xlu0 %1594  ;;  %v3507_v44 = vpop.eup %3506 }
 0x63b   : > { %3508 = vrcp.f32 %v1595_v39  ;;  %1498 = vmax.xlane.f32.xlu0 %v4710_v12  ;;  %v4722_v11 = vmul.f32 %v3507_v44, %v4595_v4  ;;  %v3676_v44 = vld [vmem:[#allocation2 + $0x20] sm:$0xff] }
 0x63f   : > { %v2410_v61 = vpop.f32.mrf.mxu2  ;;  %v2631_v32 = vpop.permute.xlu2 %2630 }
 0x640   : > { %v4715_v26 = vsel %vm915_vm8, %v2410_v61, -1e+30  ;;  %2640 = vmatpush.bf16.msra.mxu1 %v2631_v32 }
 0x641   : > { %v3509_v55 = vpop.eup %3508  ;;  %2466 = vmax.xlane.f32.xlu2 %v4715_v26 }
 0x642   : > { %v4719_v15 = vmul.f32 %v3509_v55, %v4611_v46  ;;  %v4758_v0 = vpop.xlane.xlu0 %1987 }
 0x647   : > { %v2413_v43 = vpop.f32.mrf.mxu2 }
 0x648   : > { %v4728_v62 = vsel %vm915_vm8, %v2413_v43, -1e+30  ;;  %v1936_v43 = vpop.f32.mrf.mxu3 }
 0x649   : > { %2468 = vmax.xlane.f32.xlu1 %v4728_v62 }
 0x64a   : > { %v2144_v41 = vpop.permute.xlu1 %2143  ;;  %v4771_v32 = vpop.xlane.xlu0 %1598 }
 0x64b   : > { %2153 = vmatpush.bf16.msra.mxu0 %v2144_v41 }
 0x64f   : > { %v2415_v60 = vpop.f32.mrf.mxu2 }
 0x650   : > { %v4733_v46 = vsel %vm915_vm8, %v2415_v60, -1e+30  ;;  %v3677_v60 = vld [vmem:[#allocation2 + $0x8] sm:$0xff] }
 0x651   : > { %2470 = vmax.xlane.f32.xlu2 %v4733_v46 }
 0x652   : > { %v2142_v4 = vpop.permute.xlu1 %2141 }
 0x653   : > { %2154 = vmatpush.bf16.msra.mxu0 %v2142_v4 }
 0x657   : > { %v2418_v47 = vpop.f32.mrf.mxu2 }
 0x658   : > { %v4738_v53 = vsel %vm915_vm8, %v2418_v47, -1e+30 }
 0x659   : > { %2472 = vmax.xlane.f32.xlu2 %v4738_v53 }
 0x65f   : > { %v2420_v28 = vpop.f32.mrf.mxu2 }
 0x660   : > { %v4743_v35 = vsel %vm915_vm8, %v2420_v28, -1e+30  ;;  %v1938_v28 = vpop.f32.mrf.mxu3 }
 0x661   : > { %2474 = vmax.xlane.f32.xlu0 %v4743_v35 }
 0x671   : > { %2626 = vrot.lane.b32.xlu2 %v4391_v50, %s3716_s18 }
 0x679   : > { %2624 = vrot.lane.b32.xlu2 %v3674_v20, %s3716_s18 }
 0x67c   : > { %v1491_v23 = vpop.xlane.xlu2 %1490 }
 0x67d   : > { %v1522_v59 = vsub.f32 %v4647_v29, %v1491_v23  ;;  %v2010_v29 = vsub.f32 %v4569_v25, %v4671_v57 }
 0x67f   : > { %v1538_v9 = vmul.f32 1.442695, %v1522_v59  ;;  %v2027_v39 = vmul.f32 1.442695, %v2010_v29  ;;  %v4787_v59 = vsel %vm915_vm8, %v1938_v28, -1e+30 }
 0x681   : > { %3510 = vpow2.f32 %v1538_v9  ;;  %2135 = vrot.lane.b32.xlu2 %v3675_v6, %s3715_s17  ;;  %v4793_v9 = vsel %vm915_vm8, %v1936_v43, -1e+30 }
 0x684   : > { %v1493_v42 = vpop.xlane.xlu1 %1492 }
 0x685   : > { %v1523_v14 = vsub.f32 %v4652_v24, %v1493_v42  ;;  %v2423_v24 = vpop.f32.mrf.mxu2 }
 0x686   : > { %v4769_v61 = vsel %vm915_vm8, %v2423_v24, -1e+30 }
 0x687   : > { %v4752_v49 = vpop.eup %3510  ;;  %v1540_v56 = vmul.f32 1.442695, %v1523_v14 }
 0x688   : > { %1570 = vadd.xlane.f32.xlu1 %v4752_v49 }
 0x689   : > { %3512 = vpow2.f32 %v1540_v56  ;;  %v4800_v56 = vpop.f32.mrf.mxu3 }
 0x68a   : > { %3514 = vpow2.f32 %v2027_v39 }
 0x68d   : > { %v2425_v29 = vpop.f32.mrf.mxu2 }
 0x68e   : > { %v4806_v39 = vsel %vm915_vm8, %v2425_v29, -1e+30 }
 0x68f   : > { %v4755_v50 = vpop.eup %3512 }
 0x690   : > { %1572 = vadd.xlane.f32.xlu0 %v4755_v50 }
 0x694   : > { %v1497_v41 = vpop.xlane.xlu2 %1496 }
 0x695   : > { %v1525_v4 = vsub.f32 %v4666_v17, %v1497_v41  ;;  %v2009_v17 = vsub.f32 %v4575_v1, %v4674_v8 }
 0x697   : > { %v1544_v20 = vmul.f32 1.442695, %v1525_v4  ;;  %v2025_v24 = vmul.f32 1.442695, %v2009_v17 }
 0x69e   : > { %v4776_v25 = vpop.xlane.xlu0 %1600 }
 0x6a1   : > { %2139 = vrot.lane.b32.xlu1 %v4405_v27, %s3715_s17  ;;  %v4774_v27 = vpop.eup %3514 }
 0x6a4   : > { %2628 = vrot.lane.b32.xlu0 %v4415_v34, %s3716_s18  ;;  %v1501_v42 = vpop.xlane.xlu1 %1500 }
 0x6a6   : > { %v1495_v34 = vpop.xlane.xlu0 %1494 }
 0x6a7   : > { %v1524_v57 = vsub.f32 %v4688_v7, %v1495_v34 }
 0x6a9   : > { %2137 = vrot.lane.b32.xlu1 %v3676_v44, %s3715_s17  ;;  %v1542_v55 = vmul.f32 1.442695, %v1524_v57  ;;  %v4812_v44 = vpop.f32.mrf.mxu3 }
 0x6aa   : > { %2476 = vmax.xlane.f32.xlu2 %v4769_v61 }
 0x6ab   : > { %3516 = vpow2.f32 %v1542_v55  ;;  %v2428_v55 = vpop.f32.mrf.mxu2 }
 0x6ac   : > { %3518 = vpow2.f32 %v1544_v20  ;;  %v2465_v43 = vpop.xlane.xlu1 %2464 }
 0x6ad   : > { %v2496_v4 = vsub.f32 %v4705_v18, %v2465_v43  ;;  %v3679_v43 = vld [vmem:[#allocation2 + $0x8] sm:$0xff] }
 0x6ae   : > { %v1499_v23 = vpop.xlane.xlu0 %1498 }
 0x6af   : > { %v1526_v7 = vsub.f32 %v4710_v12, %v1499_v23  ;;  %v1527_v12 = vsub.f32 %v4683_v33, %v1501_v42 }
 0x6b1   : > { %v4782_v47 = vpop.eup %3516  ;;  %v1546_v6 = vmul.f32 1.442695, %v1526_v7  ;;  %v1548_v1 = vmul.f32 1.442695, %v1527_v12  ;;  %v4820_v57 = vpop.f32.mrf.mxu3  ;;  %v2512_v7 = vmul.f32 1.442695, %v2496_v4 }
 0x6b2   : > { %2059 = vadd.xlane.f32.xlu2 %v4774_v27  ;;  %v4798_v14 = vpop.eup %3518  ;;  %v3680_v4 = vld [vmem:[#allocation2 + $0x18] sm:$0xff] }
 0x6b3   : > { %3520 = vpow2.f32 %v1546_v6  ;;  %v3678_v6 = vld [vmem:[#allocation2 + $0x10] sm:$0xff]  ;;  %v4837_v12 = vpop.f32.mrf.mxu2 }
 0x6b4   : > { %3522 = vpow2.f32 %v2025_v24  ;;  %v2467_v41 = vpop.xlane.xlu2 %2466 }
 0x6b5   : > { %3524 = vpow2.f32 %v1548_v1  ;;  %v2497_v42 = vsub.f32 %v4715_v26, %v2467_v41  ;;  %v2013_v41 = vsub.f32 %v4606_v40, %v4701_v38 }
 0x6b6   : > { %3526 = vpow2.f32 %v2512_v7 }
 0x6b7   : > { %v2514_v24 = vmul.f32 1.442695, %v2497_v42  ;;  %v2033_v7 = vmul.f32 1.442695, %v2013_v41 }
 0x6b9   : > { %v4809_v8 = vpop.eup %3520  ;;  %v1948_v28 = vpop.f32.mrf.mxu3 }
 0x6ba   : > { %v4814_v34 = vpop.eup %3522  ;;  %v4832_v17 = vsel %vm915_vm8, %v1948_v28, -1e+30 }
 0x6bb   : > { %v4817_v33 = vpop.eup %3524 }
 0x6bc   : > { %v2469_v20 = vpop.xlane.xlu1 %2468 }
 0x6bd   : > { %v2498_v38 = vsub.f32 %v4728_v62, %v2469_v20 }
 0x6c4   : > { %v4828_v23 = vpop.xlane.xlu2 %2470 }
 0x6ca   : > { %2131 = vrot.lane.b32.xlu2 %v3677_v60, %s3715_s17  ;;  %v4824_v60 = vsel %vm915_vm8, %v2428_v55, -1e+30  ;;  %v4841_v55 = vpop.eup %3526 }
 0x6cb   : > { %5391 = vst [vmem:[#allocation5_spill] sm:$0xff] %v4841_v55 }
 0x6cc   : > { %v4839_v1 = vpop.xlane.xlu2 %2472 }
 0x6ce   : > { %1574 = vadd.xlane.f32.xlu0 %v4782_v47 }
 0x6d3   : > { %1991 = vmax.xlane.f32.xlu1 %v4787_v59 }
 0x6d4   : > { %v2475_v29 = vpop.xlane.xlu0 %2474 }
 0x6d6   : > { %1989 = vmax.xlane.f32.xlu0 %v4793_v9 }
 0x6db   : > { %1576 = vadd.xlane.f32.xlu1 %v4798_v14 }
 0x6de   : > { %2478 = vmax.xlane.f32.xlu0 %v4806_v39 }
 0x6e3   : > { %1578 = vadd.xlane.f32.xlu1 %v4809_v8 }
 0x6e6   : > { %2057 = vadd.xlane.f32.xlu0 %v4814_v34 }
 0x6eb   : > { %1580 = vadd.xlane.f32.xlu1 %v4817_v33 }
 0x6f3   : > { %2480 = vmax.xlane.f32.xlu2 %v4824_v60 }
 0x6fa   : > { %2133 = vrot.lane.b32.xlu0 %v3678_v6, %s3715_s17 }
 0x6fb   : > { %1999 = vmax.xlane.f32.xlu2 %v4832_v17  ;;  %v1571_v18 = vpop.xlane.xlu1 %1570 }
 0x6fc   : > { %3528 = vrcp.f32 %v1571_v18  ;;  %v3681_v18 = vld [vmem:[#allocation2] sm:$0xff] }
 0x6fd   : > { %3530 = vpow2.f32 %v2514_v24  ;;  %v2627_v24 = vpop.permute.xlu2 %2626 }
 0x702   : > { %2618 = vrot.lane.b32.xlu0 %v3679_v43, %s3716_s18  ;;  %v3529_v28 = vpop.eup %3528  ;;  %v2433_v43 = vpop.f32.mrf.mxu2 }
 0x703   : > { %2544 = vadd.xlane.f32.xlu2 %v4841_v55  ;;  %v1573_v26 = vpop.xlane.xlu0 %1572  ;;  %v4848_v6 = vpop.eup %3530  ;;  %v1618_v58 = vmul.f32 %v3529_v28, %v4752_v49  ;;  %v3683_v55 = vld [vmem:[#allocation2] sm:$0xff]  ;;  %v2501_v28 = vsub.f32 %v4743_v35, %v2475_v29  ;;  %v2011_v35 = vsub.f32 %v4592_v2, %v4679_v37  ;;  %v2014_v2 = vsub.f32 %v4618_v36, %v4758_v0 }
 0x704   : > { %3532 = vrcp.f32 %v1573_v26  ;;  %2622 = vrot.lane.b32.xlu1 %v3680_v4, %s3716_s18  ;;  %v3682_v26 = vld [vmem:[#allocation2 + $0x10] sm:$0xff]  ;;  %v2516_v4 = vmul.f32 1.442695, %v2498_v38  ;;  %v2012_v37 = vsub.f32 %v4599_v45, %v4690_v30  ;;  %v4905_v36 = vsel %vm915_vm8, %v4837_v12, -1e+30 }
 0x705   : > { %3534 = vpow2.f32 %v2033_v7  ;;  %v2029_v29 = vmul.f32 1.442695, %v2011_v35 }
 0x706   : > { %3536 = vpow2.f32 %v2516_v4  ;;  %v2031_v4 = vmul.f32 1.442695, %v2012_v37 }
 0x70a   : > { %v3533_v42 = vpop.eup %3532  ;;  %2616 = vrot.lane.b32.xlu0 %v3681_v18, %s3716_s18  ;;  %v4860_v49 = vpop.f32.mrf.mxu2 }
 0x70b   : > { %2546 = vadd.xlane.f32.xlu2 %v4848_v6  ;;  %v1619_v40 = vmul.f32 %v3533_v42, %v4755_v50  ;;  %v4856_v21 = vpop.eup %3534  ;;  %v2625_v50 = vpop.permute.xlu2 %2624 }
 0x70c   : > { %2620 = vrot.lane.b32.xlu1 %v3682_v26, %s3716_s18  ;;  %v4862_v20 = vpop.eup %3536 }
 0x70d   : > { %v1634_v41 = vpack.c.bf16 %v1619_v40, %v1618_v58  ;;  %v2522_v40 = vmul.f32 1.442695, %v2501_v28 }
 0x70f   : > { %1674 = vmatmul.bf16.vlgmr.msrb.gmra.mxu1 %v1634_v41  ;;  %3538 = vpow2.f32 %v2522_v40  ;;  %v4888_v41 = vsel %vm915_vm8, %v4800_v56, -1e+30 }
 0x710   : > { %3540 = vpow2.f32 %v2029_v29 }
 0x712   : > { %v2438_v7 = vpop.f32.mrf.mxu2 }
 0x713   : > { %v2140_v18 = vpop.permute.xlu1 %2139  ;;  %2065 = vadd.xlane.f32.xlu2 %v4856_v21  ;;  %v2136_v42 = vpop.permute.xlu2 %2135 }
 0x714   : > { %2155 = vmatpush.bf16.msra.mxu0 %v2140_v18  ;;  %2129 = vrot.lane.b32.xlu1 %v3683_v55, %s3715_s17  ;;  %v4868_v55 = vsel %vm915_vm8, %v2438_v7, -1e+30  ;;  %v4897_v18 = vsel %vm915_vm8, %v2433_v43, -1e+30 }
 0x715   : > { %v4871_v38 = vpop.eup %3538 }
 0x716   : > { %v2629_v62 = vpop.permute.xlu0 %2628  ;;  %5392 = vst [vmem:[#allocation6_spill] sm:$0xff] %v4871_v38  ;;  %v4882_v26 = vpop.eup %3540 }
 0x717   : > { %2641 = vmatpush.bf16.msra.mxu1 %v2629_v62  ;;  %v2499_v62 = vsub.f32 %v4733_v46, %v4828_v23 }
 0x719   : > { %v2518_v56 = vmul.f32 1.442695, %v2499_v62 }
 0x71a   : > { %v2440_v43 = vpop.f32.mrf.mxu2 }
 0x71b   : > { %v2138_v58 = vpop.permute.xlu1 %2137  ;;  %2548 = vadd.xlane.f32.xlu2 %v4862_v20  ;;  %2642 = vmatpush.bf16.msra.mxu1 %v2627_v24  ;;  %v4879_v24 = vsel %vm915_vm8, %v4812_v44, -1e+30  ;;  %v2035_v44 = vmul.f32 1.442695, %v2014_v2 }
 0x71c   : > { %2156 = vmatpush.bf16.msra.mxu0 %v2138_v58 }
 0x71d   : > { %3542 = vpow2.f32 %v2035_v44  ;;  %v2477_v28 = vpop.xlane.xlu2 %2476  ;;  %v4928_v44 = vsel %vm915_vm8, %v4820_v57, -1e+30 }
 0x71e   : > { %3544 = vpow2.f32 %v2031_v4 }
 0x71f   : > { %2643 = vmatpush.bf16.msra.mxu1 %v2625_v50  ;;  %v1951_v50 = vpop.f32.mrf.mxu3 }
 0x720   : > { %2157 = vmatpush.bf16.msra.mxu0 %v2136_v42  ;;  %v4940_v57 = vsel %vm915_vm8, %v1951_v50, -1e+30 }
 0x722   : > { %v4920_v29 = vpop.f32.mrf.mxu2 }
 0x723   : > { %2488 = vmax.xlane.f32.xlu2 %v4868_v55  ;;  %v4909_v46 = vpop.eup %3542 }
 0x724   : > { %v4912_v23 = vpop.eup %3544 }
 0x725   : > { %v4922_v2 = vpop.xlane.xlu2 %2059 }
 0x727   : > { %v1953_v12 = vpop.f32.mrf.mxu3 }
 0x72b   : > { %2554 = vadd.xlane.f32.xlu2 %v4871_v38 }
 0x72f   : > { %v1956_v4 = vpop.f32.mrf.mxu3 }
 0x734   : > { %1995 = vmax.xlane.f32.xlu0 %v4879_v24 }
 0x73c   : > { %2061 = vadd.xlane.f32.xlu0 %v4882_v26 }
 0x73e   : > { %1993 = vmax.xlane.f32.xlu1 %v4888_v41 }
 0x741   : > { %v1575_v0 = vpop.xlane.xlu0 %1574 }
 0x744   : > { %2484 = vmax.xlane.f32.xlu0 %v4897_v18 }
 0x746   : > { %v1992_v45 = vpop.xlane.xlu1 %1991  ;;  %2482 = vmax.xlane.f32.xlu1 %v4905_v36 }
 0x747   : > { %v2016_v30 = vsub.f32 %v4787_v59, %v1992_v45 }
 0x749   : > { %v2039_v58 = vmul.f32 1.442695, %v2016_v30  ;;  %v1990_v42 = vpop.xlane.xlu0 %1989 }
 0x74b   : > { %3546 = vpow2.f32 %v2039_v58 }
 0x74c   : > { %3548 = vpow2.f32 %v2518_v56  ;;  %2067 = vadd.xlane.f32.xlu0 %v4909_v46  ;;  %v4935_v56 = vsel %vm915_vm8, %v1956_v4, -1e+30 }
 0x74d   : > { %3550 = vrcp.f32 %v1575_v0  ;;  %5394 = vst [vmem:[#allocation8_spill] sm:$0xff] %v4935_v56 }
 0x74e   : > { %2063 = vadd.xlane.f32.xlu1 %v4912_v23  ;;  %v1577_v7 = vpop.xlane.xlu1 %1576 }
 0x74f   : > { %3552 = vrcp.f32 %v1577_v7  ;;  %v2132_v7 = vpop.permute.xlu2 %2131 }
 0x751   : > { %v4915_v59 = vpop.eup %3546  ;;  %v2479_v58 = vpop.xlane.xlu0 %2478 }
 0x752   : > { %5393 = vst [vmem:[#allocation7_spill] sm:$0xff] %v4915_v59  ;;  %v4917_v40 = vpop.eup %3548  ;;  %2071 = vadd.xlane.f32.xlu2 %v4915_v59  ;;  %v1958_v59 = vpop.f32.mrf.mxu3 }
 0x753   : > { %v3551_v35 = vpop.eup %3550 }
 0x754   : > { %2550 = vadd.xlane.f32.xlu0 %v4917_v40  ;;  %v1620_v0 = vmul.f32 %v3551_v35, %v4782_v47  ;;  %v4946_v47 = vsel %vm915_vm8, %v4860_v49, -1e+30  ;;  %v4958_v49 = vsel %vm915_vm8, %v2440_v43, -1e+30  ;;  %v2015_v43 = vsub.f32 %v4793_v9, %v1990_v42 }
 0x755   : > { %v3553_v37 = vpop.eup %3552 }
 0x756   : > { %1997 = vmax.xlane.f32.xlu1 %v4928_v44  ;;  %v1579_v62 = vpop.xlane.xlu1 %1578  ;;  %v1621_v45 = vmul.f32 %v3553_v37, %v4798_v14  ;;  %v2445_v14 = vpop.f32.mrf.mxu2  ;;  %v2500_v37 = vsub.f32 %v4738_v53, %v4839_v1  ;;  %v4963_v53 = vsel %vm915_vm8, %v1953_v12, -1e+30  ;;  %v2502_v1 = vsub.f32 %v4769_v61, %v2477_v28 }
 0x757   : > { %3554 = vrcp.f32 %v1579_v62  ;;  %v4953_v50 = vsel %vm915_vm8, %v2445_v14, -1e+30  ;;  %v4974_v61 = vsel %vm915_vm8, %v1958_v59, -1e+30  ;;  %v2037_v28 = vmul.f32 1.442695, %v2015_v43 }
 0x758   : > { %v1635_v30 = vpack.c.bf16 %v1621_v45, %v1620_v0  ;;  %5395 = vst [vmem:[#allocation9_spill] sm:$0xff] %v4953_v50  ;;  %v2520_v62 = vmul.f32 1.442695, %v2500_v37 }
 0x759   : > { %v2058_v0 = vpop.xlane.xlu0 %2057 }
 0x75a   : > { %1679 = vmatmul.bf16.gmra.mxu1 %v1635_v30  ;;  %2005 = vmax.xlane.f32.xlu2 %v4935_v56 }
 0x75c   : > { %2001 = vmax.xlane.f32.xlu0 %v4940_v57 }
 0x75d   : > { %v3555_v4 = vpop.eup %3554 }
 0x75e   : > { %2486 = vmax.xlane.f32.xlu1 %v4946_v47  ;;  %v1581_v35 = vpop.xlane.xlu1 %1580  ;;  %v1622_v14 = vmul.f32 %v3555_v4, %v4809_v8 }
 0x75f   : > { %3556 = vrcp.f32 %v1581_v35 }
 0x760   : > { %3558 = vpow2.f32 %v2520_v62 }
 0x761   : > { %3560 = vrcp.f32 %v4659_v52  ;;  %v2503_v52 = vsub.f32 %v4806_v39, %v2479_v58 }
 0x762   : > { %2494 = vmax.xlane.f32.xlu2 %v4953_v50  ;;  %v2524_v50 = vmul.f32 1.442695, %v2502_v1 }
 0x764   : > { %2490 = vmax.xlane.f32.xlu0 %v4958_v49 }
 0x765   : > { %v3557_v45 = vpop.eup %3556 }
 0x766   : > { %2003 = vmax.xlane.f32.xlu1 %v4963_v53  ;;  %v2481_v30 = vpop.xlane.xlu2 %2480  ;;  %v1623_v35 = vmul.f32 %v3557_v45, %v4817_v33  ;;  %v4978_v9 = vpop.eup %3558 }
 0x767   : > { %v2504_v37 = vsub.f32 %v4824_v60, %v2481_v30 }
 0x768   : > { %v1636_v38 = vpack.c.bf16 %v1623_v35, %v1622_v14 }
 0x769   : > { %v2528_v56 = vmul.f32 1.442695, %v2504_v37 }
 0x76a   : > { %1684 = vmatmul.bf16.gmra.mxu1 %v1636_v38  ;;  %v3561_v38 = vpop.eup %3560 }
 0x76b   : > { %3562 = vpow2.f32 %v2528_v56  ;;  %v2526_v56 = vmul.f32 1.442695, %v2503_v52 }
 0x76c   : > { %3564 = vrcp.f32 %v4655_v48  ;;  %v2134_v8 = vpop.permute.xlu0 %2133  ;;  %2007 = vmax.xlane.f32.xlu0 %v4974_v61 }
 0x76d   : > { %3566 = vpow2.f32 %v2524_v50  ;;  %2158 = vmatpush.bf16.msra.mxu0 %v2134_v8  ;;  %v1624_v50 = vmul.f32 %v3561_v38, %v4548_v10 }
 0x76e   : > { %2552 = vadd.xlane.f32.xlu1 %v4978_v9  ;;  %v2000_v33 = vpop.xlane.xlu2 %1999  ;;  %3568 = vpow2.f32 %v2037_v28 }
 0x76f   : > { %v2020_v60 = vsub.f32 %v4832_v17, %v2000_v33 }
 0x771   : > { %v4983_v12 = vpop.eup %3562  ;;  %v2047_v42 = vmul.f32 1.442695, %v2020_v60  ;;  %2159 = vmatpush.bf16.msra.mxu0 %v2132_v7 }
 0x772   : > { %v3565_v48 = vpop.eup %3564  ;;  %2560 = vadd.xlane.f32.xlu2 %v4983_v12 }
 0x773   : > { %v4986_v59 = vpop.eup %3566  ;;  %3570 = vpow2.f32 %v2047_v42  ;;  %v1625_v17 = vmul.f32 %v3565_v48, %v4534_v51 }
 0x774   : > { %2556 = vadd.xlane.f32.xlu0 %v4986_v59  ;;  %v4990_v4 = vpop.eup %3568  ;;  %3572 = vpow2.f32 %v2526_v56  ;;  %v2619_v10 = vpop.permute.xlu0 %2618 }
 0x775   : > { %v1637_v58 = vpack.c.bf16 %v1625_v17, %v1624_v50  ;;  %3574 = vrcp.f32 %v4669_v13 }
 0x776   : > { %v2623_v39 = vpop.permute.xlu1 %2622  ;;  %2069 = vadd.xlane.f32.xlu1 %v4990_v4  ;;  %3576 = vrcp.f32 %v2058_v0 }
 0x777   : > { %2644 = vmatpush.bf16.msra.mxu1 %v2623_v39  ;;  %3578 = vrcp.f32 %v4661_v31  ;;  %v5008_v31 = vsel %vm915_vm8, %v4920_v29, -1e+30 }
 0x778   : > { %3580 = vrcp.f32 %v4922_v2 }
 0x779   : > { %v4994_v7 = vpop.eup %3570  ;;  %3582 = vrcp.f32 %v4776_v25 }
 0x77a   : > { %1689 = vmatmul.bf16.gmra.mxu1 %v1637_v58  ;;  %2079 = vadd.xlane.f32.xlu2 %v4994_v7  ;;  %v4999_v62 = vpop.eup %3572 }
 0x77b   : > { %v3575_v51 = vpop.eup %3574 }
 0x77c   : > { %v3577_v1 = vpop.eup %3576  ;;  %v1627_v0 = vmul.f32 %v3575_v51, %v4558_v3  ;;  %v2617_v35 = vpop.permute.xlu0 %2616 }
 0x77d   : > { %v3579_v30 = vpop.eup %3578  ;;  %v2105_v13 = vmul.f32 %v3577_v1, %v4814_v34  ;;  %v2545_v3 = vpop.xlane.xlu2 %2544 }
 0x77e   : > { %v2621_v45 = vpop.permute.xlu1 %2620  ;;  %2558 = vadd.xlane.f32.xlu1 %v4999_v62  ;;  %v3581_v14 = vpop.eup %3580  ;;  %v1626_v37 = vmul.f32 %v3579_v30, %v4553_v54  ;;  %v5397_v54 = vpack.c.bf16 %v4722_v11, %v4719_v15 }
 0x77f   : > { %2645 = vmatpush.bf16.msra.mxu1 %v2621_v45  ;;  %v2106_v2 = vmul.f32 %v3581_v14, %v4774_v27  ;;  %v3583_v38 = vpop.eup %3582 }
 0x780   : > { %v1638_v28 = vpack.c.bf16 %v1627_v0, %v1626_v37  ;;  %v1633_v15 = vmul.f32 %v3583_v38, %v4676_v19  ;;  %v5398_v0 = vld [vmem:[#allocation5_spill] sm:$0xff] }
 0x781   : > { %v2121_v8 = vpack.c.bf16 %v2106_v2, %v2105_v13 }
 0x783   : > { %2646 = vmatpush.bf16.msra.mxu1 %v2619_v10 }
 0x785   : > { %v2547_v34 = vpop.xlane.xlu2 %2546 }
 0x786   : > { %v2130_v43 = vpop.permute.xlu1 %2129  ;;  %2492 = vmax.xlane.f32.xlu1 %v5008_v31 }
 0x787   : > { %2160 = vmatpush.bf16.msra.mxu0 %v2130_v43  ;;  %2647 = vmatpush.bf16.msra.mxu1 %v2617_v35 }
 0x78a   : > { %1694 = vmatmul.bf16.gmra.mxu1 %v1638_v28  ;;  %2161 = vmatmul.bf16.vlgmr.msra.gmra.mxu0 %v2121_v8 }
 0x78c   : > { %v5038_v14 = vpop.f32.mrf.mxu1 }
 0x78d   : > { %v5017_v33 = vpop.xlane.xlu2 %2065 }
 0x795   : > { %v2549_v48 = vpop.xlane.xlu2 %2548 }
 0x79a   : > { %1699 = vmatmul.bf16.gmra.mxu1 %v5396_v63 }
 0x79d   : > { %v2489_v58 = vpop.xlane.xlu2 %2488 }
 0x7a5   : > { %v2555_v37 = vpop.xlane.xlu2 %2554 }
 0x7a7   : > { %v1996_v29 = vpop.xlane.xlu0 %1995 }
 0x7a8   : > { %v2018_v27 = vsub.f32 %v4879_v24, %v1996_v29 }
 0x7aa   : > { %v2043_v52 = vmul.f32 1.442695, %v2018_v27  ;;  %1704 = vmatmul.bf16.gmra.mxu1 %v5397_v54  ;;  %v5048_v27 = vpop.f32.mrf.mxu1 }
 0x7ac   : > { %3584 = vpow2.f32 %v2043_v52 }
 0x7ad   : > { %3586 = vrcp.f32 %v4771_v32 }
 0x7af   : > { %v2062_v60 = vpop.xlane.xlu0 %2061 }
 0x7b1   : > { %v1994_v16 = vpop.xlane.xlu1 %1993 }
 0x7b2   : > { %v5024_v5 = vpop.eup %3584  ;;  %v2017_v42 = vsub.f32 %v4888_v41, %v1994_v16 }
 0x7b3   : > { %v3587_v24 = vpop.eup %3586  ;;  %2075 = vadd.xlane.f32.xlu1 %v5024_v5 }
 0x7b4   : > { %v2041_v56 = vmul.f32 1.442695, %v2017_v42  ;;  %v1632_v11 = vmul.f32 %v3587_v24, %v4624_v22 }
 0x7b6   : > { %3588 = vpow2.f32 %v2041_v56  ;;  %v1641_v50 = vpack.c.bf16 %v1633_v15, %v1632_v11  ;;  %v2508_v15 = vsub.f32 %v4868_v55, %v2489_v58 }
 0x7b7   : > { %v2485_v25 = vpop.xlane.xlu0 %2484  ;;  %3590 = vrcp.f32 %v2547_v34 }
 0x7b8   : > { %3592 = vrcp.f32 %v2545_v3  ;;  %v2506_v10 = vsub.f32 %v4897_v18, %v2485_v25 }
 0x7b9   : > { %v2483_v32 = vpop.xlane.xlu1 %2482 }
 0x7ba   : > { %v2505_v39 = vsub.f32 %v4905_v36, %v2483_v32  ;;  %1709 = vmatmul.bf16.gmra.mxu1 %v1641_v50  ;;  %v2532_v51 = vmul.f32 1.442695, %v2506_v10 }
 0x7bc   : > { %v5031_v17 = vpop.eup %3588  ;;  %v2530_v41 = vmul.f32 1.442695, %v2505_v39  ;;  %v2536_v39 = vmul.f32 1.442695, %v2508_v15 }
 0x7bd   : > { %2073 = vadd.xlane.f32.xlu0 %v5031_v17  ;;  %v3591_v22 = vpop.eup %3590 }
 0x7be   : > { %3594 = vpow2.f32 %v2530_v41  ;;  %v3593_v1 = vpop.eup %3592  ;;  %v2593_v30 = vmul.f32 %v3591_v22, %v4848_v6 }
 0x7bf   : > { %v2068_v19 = vpop.xlane.xlu0 %2067  ;;  %3596 = vrcp.f32 %v2062_v60  ;;  %v2592_v2 = vmul.f32 %v3593_v1, %v5398_v0 }
 0x7c1   : > { %v2064_v45 = vpop.xlane.xlu1 %2063  ;;  %v2608_v43 = vpack.c.bf16 %v2593_v30, %v2592_v2 }
 0x7c2   : > { %3598 = vrcp.f32 %v2064_v45 }
 0x7c3   : > { %3600 = vpow2.f32 %v2532_v51 }
 0x7c4   : > { %v5035_v36 = vpop.eup %3594 }
 0x7c5   : > { %2562 = vadd.xlane.f32.xlu0 %v5035_v36  ;;  %v3597_v13 = vpop.eup %3596 }
 0x7c6   : > { %v2107_v8 = vmul.f32 %v3597_v13, %v4882_v26  ;;  %v2072_v26 = vpop.xlane.xlu2 %2071 }
 0x7c7   : > { %v2551_v18 = vpop.xlane.xlu0 %2550 }
 0x7c8   : > { %v3599_v35 = vpop.eup %3598  ;;  %3602 = vrcp.f32 %v2551_v18 }
 0x7c9   : > { %v1998_v28 = vpop.xlane.xlu1 %1997  ;;  %v2108_v3 = vmul.f32 %v3599_v35, %v4912_v23  ;;  %v5045_v34 = vpop.eup %3600  ;;  %3604 = vrcp.f32 %v2549_v48 }
 0x7ca   : > { %v2019_v63 = vsub.f32 %v4928_v44, %v1998_v28  ;;  %2648 = vmatmul.bf16.vlgmr.msra.gmra.mxu1 %v2608_v43  ;;  %3606 = vrcp.f32 %v2068_v19 }
 0x7cb   : > { %v2122_v6 = vpack.c.bf16 %v2108_v3, %v2107_v8 }
 0x7cc   : > { %v2045_v29 = vmul.f32 1.442695, %v2019_v63 }
 0x7cd   : > { %2564 = vadd.xlane.f32.xlu0 %v5045_v34  ;;  %2166 = vmatmul.bf16.gmra.mxu0 %v2122_v6  ;;  %v5401_v6 = vld [vmem:[#allocation6_spill] sm:$0xff] }
 0x7ce   : > { %3608 = vpow2.f32 %v2045_v29  ;;  %v3603_v44 = vpop.eup %3602  ;;  %v2006_v55 = vpop.xlane.xlu2 %2005 }
 0x7cf   : > { %v2002_v52 = vpop.xlane.xlu0 %2001  ;;  %3610 = vrcp.f32 %v5017_v33  ;;  %v3605_v60 = vpop.eup %3604  ;;  %v2595_v56 = vmul.f32 %v3603_v44, %v4917_v40 }
 0x7d0   : > { %v2021_v23 = vsub.f32 %v4940_v57, %v2002_v52  ;;  %v3607_v42 = vpop.eup %3606  ;;  %v2594_v57 = vmul.f32 %v3605_v60, %v4862_v20 }
 0x7d1   : > { %v2487_v54 = vpop.xlane.xlu1 %2486 }
 0x7d2   : > { %v2049_v38 = vmul.f32 1.442695, %v2021_v23  ;;  %v2507_v16 = vsub.f32 %v4946_v47, %v2487_v54  ;;  %v2110_v47 = vmul.f32 %v3607_v42, %v4909_v46  ;;  %v2609_v32 = vpack.c.bf16 %v2595_v56, %v2594_v57 }
 0x7d4   : > { %v5053_v24 = vpop.eup %3608  ;;  %3612 = vpow2.f32 %v2049_v38  ;;  %v2534_v48 = vmul.f32 1.442695, %v2507_v16 }
 0x7d5   : > { %2077 = vadd.xlane.f32.xlu1 %v5053_v24  ;;  %v3611_v33 = vpop.eup %3610 }
 0x7d6   : > { %3614 = vpow2.f32 %v2534_v48  ;;  %v2109_v40 = vmul.f32 %v3611_v33, %v4856_v21  ;;  %v5399_v21 = vld [vmem:[#allocation8_spill] sm:$0xff]  ;;  %v2495_v35 = vpop.xlane.xlu2 %2494  ;;  %v5402_v48 = vld [vmem:[#allocation7_spill] sm:$0xff] }
 0x7d7   : > { %v5059_v11 = vpop.f32.mrf.mxu1  ;;  %v2491_v25 = vpop.xlane.xlu0 %2490 }
 0x7d8   : > { %v2509_v50 = vsub.f32 %v4958_v49, %v2491_v25  ;;  %v2123_v20 = vpack.c.bf16 %v2110_v47, %v2109_v40  ;;  %v2023_v49 = vsub.f32 %v5399_v21, %v2006_v55 }
 0x7d9   : > { %v2004_v41 = vpop.xlane.xlu1 %2003 }
 0x7da   : > { %v5064_v10 = vpop.eup %3612  ;;  %v2538_v58 = vmul.f32 1.442695, %v2509_v50  ;;  %v2022_v19 = vsub.f32 %v4963_v53, %v2004_v41  ;;  %2653 = vmatmul.bf16.gmra.mxu1 %v2609_v32  ;;  %v2053_v2 = vmul.f32 1.442695, %v2023_v49 }
 0x7db   : > { %2081 = vadd.xlane.f32.xlu2 %v5064_v10 }
 0x7dc   : > { %v5068_v22 = vpop.eup %3614  ;;  %3616 = vpow2.f32 %v2538_v58  ;;  %v2051_v46 = vmul.f32 1.442695, %v2022_v19  ;;  %v1715_v19 = vpack.c.bf16 %v5038_v14, %v5038_v14  ;;  %v1717_v14 = vpack.c.bf16 %v5059_v11, %v5059_v11 }
 0x7dd   : > { %3618 = vpow2.f32 %v2536_v39  ;;  %2566 = vadd.xlane.f32.xlu1 %v5068_v22  ;;  %2171 = vmatmul.bf16.gmra.mxu0 %v2123_v20 }
 0x7de   : > { %3620 = vpow2.f32 %v2051_v46 }
 0x7df   : > { %v5072_v45 = vpop.f32.mrf.mxu1  ;;  %v2008_v51 = vpop.xlane.xlu0 %2007  ;;  %3622 = vrcp.f32 %v2555_v37 }
 0x7e0   : > { %v2024_v53 = vsub.f32 %v4974_v61, %v2008_v51  ;;  %v5400_v61 = vld [vmem:[#allocation9_spill] sm:$0xff]  ;;  %v1716_v51 = vpack.c.bf16 %v5048_v27, %v5048_v27 }
 0x7e1   : > { %v2553_v1 = vpop.xlane.xlu1 %2552  ;;  %v2511_v37 = vsub.f32 %v5400_v61, %v2495_v35 }
 0x7e2   : > { %v5075_v30 = vpop.eup %3616  ;;  %v2055_v13 = vmul.f32 1.442695, %v2024_v53  ;;  %3624 = vrcp.f32 %v2553_v1 }
 0x7e3   : > { %v5077_v0 = vpop.eup %3618  ;;  %2570 = vadd.xlane.f32.xlu2 %v5075_v30  ;;  %v2542_v52 = vmul.f32 1.442695, %v2511_v37 }
 0x7e4   : > { %v5080_v18 = vpop.eup %3620  ;;  %3626 = vpow2.f32 %v2055_v13 }
 0x7e5   : > { %2083 = vadd.xlane.f32.xlu0 %v5080_v18  ;;  %2568 = vadd.xlane.f32.xlu1 %v5077_v0  ;;  %v3623_v43 = vpop.eup %3622  ;;  %3628 = vpow2.f32 %v2053_v2 }
 0x7e6   : > { %3630 = vrcp.f32 %v2072_v26  ;;  %v2597_v29 = vmul.f32 %v3623_v43, %v5401_v6  ;;  %v2561_v43 = vpop.xlane.xlu2 %2560 }
 0x7e7   : > { %v5085_v28 = vpop.f32.mrf.mxu1  ;;  %v2557_v60 = vpop.xlane.xlu0 %2556 }
 0x7e8   : > { %v3625_v8 = vpop.eup %3624 }
 0x7e9   : > { %v2070_v3 = vpop.xlane.xlu1 %2069  ;;  %v2596_v63 = vmul.f32 %v3625_v8, %v4978_v9 }
 0x7ea   : > { %3632 = vrcp.f32 %v2070_v3  ;;  %v5089_v44 = vpop.eup %3626 }
 0x7eb   : > { %v2610_v23 = vpack.c.bf16 %v2597_v29, %v2596_v63  ;;  %v5091_v54 = vpop.eup %3628  ;;  %3634 = vpow2.f32 %v2542_v52 }
 0x7ec   : > { %v3631_v38 = vpop.eup %3630  ;;  %3636 = vrcp.f32 %v2557_v60 }
 0x7ed   : > { %2087 = vadd.xlane.f32.xlu1 %v5089_v44  ;;  %2658 = vmatmul.bf16.gmra.mxu1 %v2610_v23  ;;  %v2112_v56 = vmul.f32 %v3631_v38, %v5402_v48 }
 0x7ee   : > { %2085 = vadd.xlane.f32.xlu0 %v5091_v54 }
 0x7ef   : > { %v5095_v26 = vpop.f32.mrf.mxu1 }
 0x7f0   : > { %v3633_v9 = vpop.eup %3632 }
 0x7f1   : > { %v2559_v16 = vpop.xlane.xlu1 %2558  ;;  %v2111_v42 = vmul.f32 %v3633_v9, %v4990_v4  ;;  %v5099_v33 = vpop.eup %3634 }
 0x7f2   : > { %3638 = vrcp.f32 %v2559_v16  ;;  %v3637_v57 = vpop.eup %3636  ;;  %v2080_v9 = vpop.xlane.xlu2 %2079 }
 0x7f3   : > { %v2124_v15 = vpack.c.bf16 %v2112_v56, %v2111_v42  ;;  %v2598_v32 = vmul.f32 %v3637_v57, %v4986_v59 }
 0x7f5   : > { %2176 = vmatmul.bf16.gmra.mxu0 %v2124_v15 }
 0x7f6   : > { %2574 = vadd.xlane.f32.xlu0 %v5099_v33 }
 0x7f7   : > { %v5102_v25 = vpop.f32.mrf.mxu1 }
 0x7f8   : > { %v3639_v47 = vpop.eup %3638 }
 0x7f9   : > { %v2493_v50 = vpop.xlane.xlu1 %2492  ;;  %v2599_v39 = vmul.f32 %v3639_v47, %v4999_v62 }
 0x7fa   : > { %v2510_v4 = vsub.f32 %v5008_v31, %v2493_v50 }
 0x7fb   : > { %v2611_v41 = vpack.c.bf16 %v2599_v39, %v2598_v32 }
 0x7fc   : > { %v2540_v40 = vmul.f32 1.442695, %v2510_v4 }
 0x7fd   : > { %2663 = vmatmul.bf16.gmra.mxu1 %v2611_v41 }
 0x7fe   : > { %3640 = vpow2.f32 %v2540_v40 }
 0x7ff   : > { %v5107_v55 = vpop.f32.mrf.mxu1 }
 0x804   : > { %v5109_v58 = vpop.eup %3640 }
 0x805   : > { %2572 = vadd.xlane.f32.xlu2 %v5109_v58 }
 0x806   : > { %1747 = vrot.lane.b32.xlu1 %v1715_v19, %s3717_s19 }
 0x807   : > { %v5115_v59 = vpop.f32.mrf.mxu1  ;;  %v2162_v62 = vpop.f32.mrf.mxu0 }
 0x808   : > { %v2202_v31 = vpack.c.bf16 %v2162_v62, %v2162_v62 }
 0x80a   : > { %2234 = vrot.lane.b32.xlu0 %v2202_v31, %s3718_s20 }
 0x80f   : > { %v5118_v20 = vpop.f32.mrf.mxu1  ;;  %v2164_v46 = vpop.f32.mrf.mxu0 }
 0x810   : > { %v2203_v21 = vpack.c.bf16 %v2164_v46, %v2164_v46 }
 0x812   : > { %2236 = vrot.lane.b32.xlu1 %v2203_v21, %s3718_s20 }
 0x817   : > { %v5121_v49 = vpop.f32.mrf.mxu1 }
 0x81a   : > { %1751 = vrot.lane.b32.xlu1 %v1717_v14, %s3717_s19 }
 0x81d   : > { %1749 = vrot.lane.b32.xlu2 %v1716_v51, %s3717_s19 }
 0x81f   : > { %v5129_v53 = vpop.f32.mrf.mxu1 }
 0x826   : > { %v2076_v13 = vpop.xlane.xlu1 %2075 }
 0x827   : > { %v5131_v1 = vpop.f32.mrf.mxu1  ;;  %3642 = vrcp.f32 %v2076_v13 }
 0x82d   : > { %v3643_v61 = vpop.eup %3642 }
 0x82e   : > { %v2114_v3 = vmul.f32 %v3643_v61, %v5024_v5 }
 0x82f   : > { %v5133_v2 = vpop.f32.mrf.mxu1 }
 0x830   : > { %v2074_v35 = vpop.xlane.xlu0 %2073 }
 0x831   : > { %3644 = vrcp.f32 %v2074_v35  ;;  %v1719_v35 = vpack.c.bf16 %v5085_v28, %v5085_v28 }
 0x832   : > { %3646 = vrcp.f32 %v2561_v43 }
 0x837   : > { %v3645_v11 = vpop.eup %3644  ;;  %v5135_v37 = vpop.f32.mrf.mxu1 }
 0x838   : > { %v2563_v8 = vpop.xlane.xlu0 %2562  ;;  %v2113_v27 = vmul.f32 %v3645_v11, %v5031_v17  ;;  %v3647_v6 = vpop.eup %3646 }
 0x839   : > { %3648 = vrcp.f32 %v2563_v8  ;;  %v2600_v23 = vmul.f32 %v3647_v6, %v4983_v12  ;;  %v1718_v12 = vpack.c.bf16 %v5072_v45, %v5072_v45 }
 0x83a   : > { %v2125_v63 = vpack.c.bf16 %v2114_v3, %v2113_v27  ;;  %3650 = vrcp.f32 %v2080_v9 }
 0x83c   : > { %2181 = vmatmul.bf16.gmra.mxu0 %v2125_v63 }
 0x83f   : > { %v3649_v29 = vpop.eup %3648  ;;  %v5139_v52 = vpop.f32.mrf.mxu1 }
 0x840   : > { %v2601_v60 = vmul.f32 %v3649_v29, %v5035_v36  ;;  %v2565_v48 = vpop.xlane.xlu0 %2564  ;;  %v3651_v56 = vpop.eup %3650 }
 0x841   : > { %v2116_v32 = vmul.f32 %v3651_v56, %v4994_v7 }
 0x842   : > { %v2612_v38 = vpack.c.bf16 %v2601_v60, %v2600_v23 }
 0x844   : > { %2668 = vmatmul.bf16.gmra.mxu1 %v2612_v38 }
 0x847   : > { %v2649_v16 = vpop.f32.mrf.mxu1 }
 0x848   : > { %v2689_v42 = vpack.c.bf16 %v2649_v16, %v2649_v16  ;;  %v2078_v17 = vpop.xlane.xlu1 %2077 }
 0x849   : > { %3652 = vrcp.f32 %v2078_v17 }
 0x84a   : > { %v2167_v5 = vpop.f32.mrf.mxu0  ;;  %2721 = vrot.lane.b32.xlu0 %v2689_v42, %s3719_s24  ;;  %3654 = vrcp.f32 %v2565_v48 }
 0x84b   : > { %v2204_v31 = vpack.c.bf16 %v2167_v5, %v2167_v5  ;;  %v1721_v5 = vpack.c.bf16 %v5102_v25, %v5102_v25 }
 0x84e   : > { %v2082_v39 = vpop.xlane.xlu2 %2081 }
 0x84f   : > { %v3653_v15 = vpop.eup %3652  ;;  %v2651_v57 = vpop.f32.mrf.mxu1 }
 0x850   : > { %v2690_v36 = vpack.c.bf16 %v2651_v57, %v2651_v57  ;;  %v2567_v47 = vpop.xlane.xlu1 %2566  ;;  %v2115_v50 = vmul.f32 %v3653_v15, %v5053_v24  ;;  %v3655_v19 = vpop.eup %3654 }
 0x851   : > { %3656 = vrcp.f32 %v2567_v47  ;;  %v2602_v21 = vmul.f32 %v3655_v19, %v5045_v34 }
 0x852   : > { %v2169_v4 = vpop.f32.mrf.mxu0  ;;  %2723 = vrot.lane.b32.xlu2 %v2690_v36, %s3719_s24  ;;  %1753 = vrot.lane.b32.xlu0 %v1718_v12, %s3717_s19  ;;  %v2126_v41 = vpack.c.bf16 %v2116_v32, %v2115_v50  ;;  %3658 = vrcp.f32 %v2082_v39  ;;  %v1722_v12 = vpack.c.bf16 %v5107_v55, %v5107_v55 }
 0x853   : > { %v2205_v40 = vpack.c.bf16 %v2169_v4, %v2169_v4 }
 0x854   : > { %2186 = vmatmul.bf16.gmra.mxu0 %v2126_v41 }
 0x855   : > { %2240 = vrot.lane.b32.xlu1 %v2205_v40, %s3718_s20 }
 0x856   : > { %v2571_v43 = vpop.xlane.xlu2 %2570 }
 0x857   : > { %v3657_v45 = vpop.eup %3656  ;;  %v2654_v62 = vpop.f32.mrf.mxu1 }
 0x858   : > { %v2691_v24 = vpack.c.bf16 %v2654_v62, %v2654_v62  ;;  %v2084_v46 = vpop.xlane.xlu0 %2083  ;;  %v2569_v7 = vpop.xlane.xlu1 %2568  ;;  %v2603_v14 = vmul.f32 %v3657_v45, %v5068_v22  ;;  %v1720_v22 = vpack.c.bf16 %v5095_v26, %v5095_v26 }
 0x859   : > { %3660 = vrcp.f32 %v2084_v46  ;;  %v3659_v61 = vpop.eup %3658  ;;  %v1723_v46 = vpack.c.bf16 %v5115_v59, %v5115_v59  ;;  %v3357_v59 = vld [vmem:[%s5369_s4] sm:$0xff] }
 0x85a   : > { %2238 = vrot.lane.b32.xlu2 %v2204_v31, %s3718_s20  ;;  %v2172_v51 = vpop.f32.mrf.mxu0  ;;  %2725 = vrot.lane.b32.xlu0 %v2691_v24, %s3719_s24  ;;  %v2613_v13 = vpack.c.bf16 %v2603_v14, %v2602_v21  ;;  %3662 = vrcp.f32 %v2569_v7  ;;  %v2117_v27 = vmul.f32 %v3659_v61, %v5064_v10  ;;  %v1724_v21 = vpack.c.bf16 %v5118_v20, %v5118_v20 }
 0x85b   : > { %3664 = vrcp.f32 %v2571_v43  ;;  %v2206_v26 = vpack.c.bf16 %v2172_v51, %v2172_v51 }
 0x85c   : > { %2673 = vmatmul.bf16.gmra.mxu1 %v2613_v13 }
 0x85d   : > { %1755 = vrot.lane.b32.xlu1 %v1719_v35, %s3717_s19 }
 0x85f   : > { %v3661_v11 = vpop.eup %3660  ;;  %v2656_v34 = vpop.f32.mrf.mxu1 }
 0x860   : > { %v2692_v8 = vpack.c.bf16 %v2656_v34, %v2656_v34  ;;  %v2118_v3 = vmul.f32 %v3661_v11, %v5080_v18  ;;  %v2088_v63 = vpop.xlane.xlu1 %2087  ;;  %v3663_v23 = vpop.eup %3662 }
 0x861   : > { %v2086_v6 = vpop.xlane.xlu0 %2085  ;;  %3666 = vrcp.f32 %v2088_v63  ;;  %v3665_v38 = vpop.eup %3664  ;;  %v2604_v10 = vmul.f32 %v3663_v23, %v5077_v0 }
 0x862   : > { %v2174_v28 = vpop.f32.mrf.mxu0  ;;  %2727 = vrot.lane.b32.xlu2 %v2692_v8, %s3719_s24  ;;  %1757 = vrot.lane.b32.xlu0 %v1720_v22, %s3717_s19  ;;  %v2127_v29 = vpack.c.bf16 %v2118_v3, %v2117_v27  ;;  %3668 = vrcp.f32 %v2086_v6  ;;  %v2605_v18 = vmul.f32 %v3665_v38, %v5075_v30 }
 0x863   : > { %v2207_v60 = vpack.c.bf16 %v2174_v28, %v2174_v28  ;;  %v1725_v28 = vpack.c.bf16 %v5121_v49, %v5121_v49 }
 0x864   : > { %2191 = vmatmul.bf16.gmra.mxu0 %v2127_v29  ;;  %v2614_v42 = vpack.c.bf16 %v2605_v18, %v2604_v10  ;;  %v1726_v29 = vpack.c.bf16 %v5129_v53, %v5129_v53 }
 0x865   : > { %2244 = vrot.lane.b32.xlu1 %v2207_v60, %s3718_s20 }
 0x867   : > { %v3667_v9 = vpop.eup %3666 }
 0x868   : > { %v3669_v17 = vpop.eup %3668  ;;  %v2120_v56 = vmul.f32 %v3667_v9, %v5089_v44 }
 0x869   : > { %v2119_v0 = vmul.f32 %v3669_v17, %v5091_v54  ;;  %v2575_v47 = vpop.xlane.xlu0 %2574 }
 0x86a   : > { %2242 = vrot.lane.b32.xlu2 %v2206_v26, %s3718_s20  ;;  %v2659_v16 = vpop.f32.mrf.mxu1  ;;  %3670 = vrcp.f32 %v2575_v47  ;;  %v1727_v47 = vpack.c.bf16 %v5131_v1, %v5131_v1 }
 0x86b   : > { %v2693_v48 = vpack.c.bf16 %v2659_v16, %v2659_v16  ;;  %v2128_v57 = vpack.c.bf16 %v2120_v56, %v2119_v0 }
 0x86c   : > { %2678 = vmatmul.bf16.gmra.mxu1 %v2614_v42 }
 0x86d   : > { %1759 = vrot.lane.b32.xlu1 %v1721_v5, %s3717_s19  ;;  %2729 = vrot.lane.b32.xlu0 %v2693_v48, %s3719_s24 }
 0x870   : > { %v3671_v41 = vpop.eup %3670 }
 0x871   : > { %v2607_v62 = vmul.f32 %v3671_v41, %v5099_v33 }
 0x872   : > { %v2177_v30 = vpop.f32.mrf.mxu0  ;;  %v2661_v15 = vpop.f32.mrf.mxu1 }
 0x873   : > { %v2694_v36 = vpack.c.bf16 %v2661_v15, %v2661_v15  ;;  %v2208_v32 = vpack.c.bf16 %v2177_v30, %v2177_v30 }
 0x874   : > { %2196 = vmatmul.bf16.gmra.mxu0 %v2128_v57 }
 0x875   : > { %2731 = vrot.lane.b32.xlu2 %v2694_v36, %s3719_s24  ;;  %1761 = vrot.lane.b32.xlu0 %v1722_v12, %s3717_s19  ;;  %v1728_v12 = vpack.c.bf16 %v5133_v2, %v5133_v2 }
 0x878   : > { %v1748_v25 = vpop.permute.xlu1 %1747  ;;  %v2573_v50 = vpop.xlane.xlu2 %2572 }
 0x879   : > { %1796 = vst.msk [vmem:[#allocation4] sm:$0xf] %vm1795_vm10, %v1748_v25  ;;  %3672 = vrcp.f32 %v2573_v50 }
 0x87a   : > { %v2179_v44 = vpop.f32.mrf.mxu0  ;;  %v2664_v54 = vpop.f32.mrf.mxu1 }
 0x87b   : > { %v2209_v39 = vpack.c.bf16 %v2179_v44, %v2179_v44  ;;  %v2695_v55 = vpack.c.bf16 %v2664_v54, %v2664_v54 }
 0x87c   : > { %v2235_v4 = vpop.permute.xlu0 %2234 }
 0x87d   : > { %2283 = vst.msk [vmem:[#allocation4] sm:$0xf] %vm2282_vm11, %v2235_v4  ;;  %2246 = vrot.lane.b32.xlu2 %v2208_v32, %s3718_s20  ;;  %2248 = vrot.lane.b32.xlu1 %v2209_v39, %s3718_s20 }
 0x87e   : > { %2733 = vrot.lane.b32.xlu0 %v2695_v55, %s3719_s24 }
 0x87f   : > { %v3673_v40 = vpop.eup %3672 }
 0x880   : > { %v1750_v19 = vpop.permute.xlu2 %1749  ;;  %v2606_v45 = vmul.f32 %v3673_v40, %v5109_v58  ;;  %v3358_v58 = vld [vmem:[%s5369_s4 + $0x8] sm:$0xff] }
 0x881   : > { %1797 = vst.msk [vmem:[#allocation4 + $0x4] sm:$0xf] %vm1795_vm10, %v1750_v19  ;;  %2908 = vmatpush.bf16.msra.mxu3 %v3358_v58  ;;  %v1730_v19 = vpack.c.bf16 %v5139_v52, %v5139_v52 }
 0x882   : > { %v2666_v31 = vpop.f32.mrf.mxu1  ;;  %v2615_v24 = vpack.c.bf16 %v2607_v62, %v2606_v45  ;;  %v1729_v62 = vpack.c.bf16 %v5135_v37, %v5135_v37 }
 0x883   : > { %v2696_v7 = vpack.c.bf16 %v2666_v31, %v2666_v31 }
 0x884   : > { %v2237_v14 = vpop.permute.xlu1 %2236  ;;  %2683 = vmatmul.bf16.gmra.mxu1 %v2615_v24 }
 0x885   : > { %2284 = vst.msk [vmem:[#allocation4 + $0x4] sm:$0xf] %vm2282_vm11, %v2237_v14  ;;  %2735 = vrot.lane.b32.xlu2 %v2696_v7, %s3719_s24  ;;  %1763 = vrot.lane.b32.xlu1 %v1723_v46, %s3717_s19 }
 0x886   : > { %1765 = vrot.lane.b32.xlu0 %v1724_v21, %s3717_s19  ;;  %2909 = vmatpush.bf16.msra.mxu3 %v3357_v59 }
 0x88c   : > { %v1752_v33 = vpop.permute.xlu1 %1751 }
 0x88d   : > { %1798 = vst.msk [vmem:[#allocation4 + $0x8] sm:$0xf] %vm1795_vm10, %v1752_v33 }
 0x8ac   : > { %v2724_v20 = vpop.permute.xlu2 %2723 }
 0x8ad   : > { %2771 = vst.msk [vmem:[#allocation4 + $0x4] sm:$0xf] %vm2769_vm12, %v2724_v20 }
 0x8b4   : > { %v2239_v51 = vpop.permute.xlu2 %2238 }
 0x8b5   : > { %2285 = vst.msk [vmem:[#allocation4 + $0x8] sm:$0xf] %vm2282_vm11, %v2239_v51 }
 0x8b9   : > { %v2182_v13 = vpop.f32.mrf.mxu0 }
 0x8ba   : > { %v2210_v35 = vpack.c.bf16 %v2182_v13, %v2182_v13 }
 0x8bc   : > { %2250 = vrot.lane.b32.xlu2 %v2210_v35, %s3718_s20  ;;  %v2722_v43 = vpop.permute.xlu0 %2721  ;;  %v2728_v8 = vpop.permute.xlu2 %2727 }
 0x8bd   : > { %2770 = vst.msk [vmem:[#allocation4] sm:$0xf] %vm2769_vm12, %v2722_v43 }
 0x8c1   : > { %v2184_v61 = vpop.f32.mrf.mxu0  ;;  %v2669_v11 = vpop.f32.mrf.mxu1 }
 0x8c2   : > { %v2211_v34 = vpack.c.bf16 %v2184_v61, %v2184_v61  ;;  %v2697_v22 = vpack.c.bf16 %v2669_v11, %v2669_v11 }
 0x8c4   : > { %2252 = vrot.lane.b32.xlu1 %v2211_v34, %s3718_s20  ;;  %v1754_v27 = vpop.permute.xlu0 %1753  ;;  %2737 = vrot.lane.b32.xlu0 %v2697_v22, %s3719_s24  ;;  %v3349_v3 = vld [vmem:[#allocation4] sm:$0xff]  ;;  %v2243_v38 = vpop.permute.xlu2 %2242  ;;  %v5271_v34 = vld [vmem:[%s5370_s5] ss:$0 sm:$0xff] }
 0x8c5   : > { %1799 = vst.msk [vmem:[#allocation4 + $0xc] sm:$0xf] %vm1795_vm10, %v1754_v27  ;;  %3295 = vmatmul.msk.bf16.vlgmr.msra.gmra.mxu3 %vm271_vm0, %v3349_v3  ;;  %v3684_v22 = vld [vmem:[%s3771_s26] sm:$0xff] }
 0x8c7   : > { %v2241_v63 = vpop.permute.xlu1 %2240 }
 0x8c8   : > { %2286 = vst.msk [vmem:[#allocation4 + $0xc] sm:$0xf] %vm2282_vm11, %v2241_v63 }
 0x8c9   : > { %2773 = vst.msk [vmem:[#allocation4 + $0xc] sm:$0xf] %vm2769_vm12, %v2728_v8  ;;  %v2671_v6 = vpop.f32.mrf.mxu1  ;;  %v2790_v8 = vadd.f32 %v3684_v22, %v5271_v34 }
 0x8ca   : > { %v2698_v23 = vpack.c.bf16 %v2671_v6, %v2671_v6 }
 0x8cc   : > { %1767 = vrot.lane.b32.xlu1 %v1725_v28, %s3717_s19  ;;  %v2726_v60 = vpop.permute.xlu0 %2725  ;;  %1769 = vrot.lane.b32.xlu0 %v1726_v29, %s3717_s19  ;;  %v3685_v29 = vld [vmem:[%s3771_s26 + $0x8] sm:$0xff] }
 0x8cd   : > { %2772 = vst.msk [vmem:[#allocation4 + $0x8] sm:$0xf] %vm2769_vm12, %v2726_v60  ;;  %2739 = vrot.lane.b32.xlu2 %v2698_v23, %s3719_s24  ;;  %v2791_v23 = vadd.f32 %v3685_v29, %v5271_v34  ;;  %v3697_v29 = vld [vmem:[%s3771_s26 + $0x68] sm:$0xff] }
 0x8cf   : > { %v1756_v10 = vpop.permute.xlu1 %1755  ;;  %v2732_v9 = vpop.permute.xlu2 %2731 }
 0x8d0   : > { %1800 = vst.msk [vmem:[#allocation4 + $0x10] sm:$0xf] %vm1795_vm10, %v1756_v10 }
 0x8d1   : > { %2287 = vst.msk [vmem:[#allocation4 + $0x10] sm:$0xf] %vm2282_vm11, %v2243_v38  ;;  %v2187_v49 = vpop.f32.mrf.mxu0 }
 0x8d2   : > { %v2212_v26 = vpack.c.bf16 %v2187_v49, %v2187_v49 }
 0x8d4   : > { %v1758_v18 = vpop.permute.xlu0 %1757  ;;  %v3350_v53 = vld [vmem:[#allocation4 + $0x8] sm:$0xff] }
 0x8d5   : > { %1801 = vst.msk [vmem:[#allocation4 + $0x14] sm:$0xf] %vm1795_vm10, %v1758_v18  ;;  %2254 = vrot.lane.b32.xlu2 %v2212_v26, %s3718_s20  ;;  %3296 = vmatmul.msk.bf16.gmra.mxu3 %vm271_vm0, %v3350_v53  ;;  %v3686_v26 = vld [vmem:[%s3771_s26 + $0x10] sm:$0xff] }
 0x8d6   : > { %v2792_v18 = vadd.f32 %v3686_v26, %v5271_v34 }
 0x8d7   : > { %v2245_v16 = vpop.permute.xlu1 %2244  ;;  %v2247_v30 = vpop.permute.xlu2 %2246 }
 0x8d8   : > { %2288 = vst.msk [vmem:[#allocation4 + $0x14] sm:$0xf] %vm2282_vm11, %v2245_v16 }
 0x8d9   : > { %2775 = vst.msk [vmem:[#allocation4 + $0x14] sm:$0xf] %vm2769_vm12, %v2732_v9  ;;  %v2189_v42 = vpop.f32.mrf.mxu0  ;;  %v2674_v17 = vpop.f32.mrf.mxu1 }
 0x8da   : > { %v2213_v5 = vpack.c.bf16 %v2189_v42, %v2189_v42  ;;  %v2699_v48 = vpack.c.bf16 %v2674_v17, %v2674_v17 }
 0x8dc   : > { %2741 = vrot.lane.b32.xlu0 %v2699_v48, %s3719_s24  ;;  %2256 = vrot.lane.b32.xlu1 %v2213_v5, %s3718_s20  ;;  %v3687_v48 = vld [vmem:[%s3771_s26 + $0x18] sm:$0xff] }
 0x8df   : > { %v1760_v0 = vpop.permute.xlu1 %1759  ;;  %v2730_v56 = vpop.permute.xlu0 %2729 }
 0x8e0   : > { %1802 = vst.msk [vmem:[#allocation4 + $0x18] sm:$0xf] %vm1795_vm10, %v1760_v0  ;;  %v2736_v55 = vpop.permute.xlu2 %2735  ;;  %v2793_v0 = vadd.f32 %v3687_v48, %v5271_v34 }
 0x8e1   : > { %2289 = vst.msk [vmem:[#allocation4 + $0x18] sm:$0xf] %vm2282_vm11, %v2247_v30  ;;  %v2192_v15 = vpop.f32.mrf.mxu0  ;;  %v2676_v57 = vpop.f32.mrf.mxu1 }
 0x8e2   : > { %2774 = vst.msk [vmem:[#allocation4 + $0x10] sm:$0xf] %vm2769_vm12, %v2730_v56  ;;  %v2700_v36 = vpack.c.bf16 %v2676_v57, %v2676_v57  ;;  %v2214_v32 = vpack.c.bf16 %v2192_v15, %v2192_v15 }
 0x8e4   : > { %1773 = vrot.lane.b32.xlu0 %v1728_v12, %s3717_s19  ;;  %2743 = vrot.lane.b32.xlu2 %v2700_v36, %s3719_s24 }
 0x8e5   : > { %1771 = vrot.lane.b32.xlu1 %v1727_v47, %s3717_s19 }
 0x8e7   : > { %v1762_v25 = vpop.permute.xlu0 %1761 }
 0x8e8   : > { %1803 = vst.msk [vmem:[#allocation4 + $0x1c] sm:$0xf] %vm1795_vm10, %v1762_v25  ;;  %v3688_v25 = vld [vmem:[%s3771_s26 + $0x20] sm:$0xff] }
 0x8e9   : > { %v2194_v50 = vpop.f32.mrf.mxu0  ;;  %v2679_v44 = vpop.f32.mrf.mxu1  ;;  %v3351_v54 = vld [vmem:[#allocation4 + $0x10] sm:$0xff] }
 0x8ea   : > { %v2215_v2 = vpack.c.bf16 %v2194_v50, %v2194_v50  ;;  %v2701_v39 = vpack.c.bf16 %v2679_v44, %v2679_v44  ;;  %3297 = vmatmul.msk.bf16.gmra.mxu3 %vm271_vm0, %v3351_v54  ;;  %v2794_v50 = vadd.f32 %v3688_v25, %v5271_v34 }
 0x8ec   : > { %2258 = vrot.lane.b32.xlu2 %v2214_v32, %s3718_s20  ;;  %2745 = vrot.lane.b32.xlu0 %v2701_v39, %s3719_s24  ;;  %v3689_v39 = vld [vmem:[%s3771_s26 + $0x28] sm:$0xff] }
 0x8ed   : > { %2260 = vrot.lane.b32.xlu1 %v2215_v2, %s3718_s20 }
 0x8ef   : > { %v2249_v1 = vpop.permute.xlu1 %2248 }
 0x8f0   : > { %2290 = vst.msk [vmem:[#allocation4 + $0x1c] sm:$0xf] %vm2282_vm11, %v2249_v1  ;;  %v2734_v4 = vpop.permute.xlu0 %2733  ;;  %v2795_v1 = vadd.f32 %v3689_v39, %v5271_v34 }
 0x8f1   : > { %2777 = vst.msk [vmem:[#allocation4 + $0x1c] sm:$0xf] %vm2769_vm12, %v2736_v55  ;;  %v2197_v41 = vpop.f32.mrf.mxu0  ;;  %v2681_v40 = vpop.f32.mrf.mxu1 }
 0x8f2   : > { %2776 = vst.msk [vmem:[#allocation4 + $0x18] sm:$0xf] %vm2769_vm12, %v2734_v4  ;;  %v2702_v45 = vpack.c.bf16 %v2681_v40, %v2681_v40  ;;  %v2216_v7 = vpack.c.bf16 %v2197_v41, %v2197_v41  ;;  %v3690_v40 = vld [vmem:[%s3771_s26 + $0x30] sm:$0xff] }
 0x8f4   : > { %1777 = vrot.lane.b32.xlu0 %v1730_v19, %s3717_s19  ;;  %2747 = vrot.lane.b32.xlu2 %v2702_v45, %s3719_s24  ;;  %v2796_v19 = vadd.f32 %v3690_v40, %v5271_v34 }
 0x8f5   : > { %1775 = vrot.lane.b32.xlu1 %v1729_v62, %s3717_s19 }
 0x8f7   : > { %v1764_v31 = vpop.permute.xlu1 %1763 }
 0x8f8   : > { %1804 = vst.msk [vmem:[#allocation4 + $0x20] sm:$0xf] %vm1795_vm10, %v1764_v31  ;;  %v1766_v24 = vpop.permute.xlu0 %1765 }
 0x8f9   : > { %1805 = vst.msk [vmem:[#allocation4 + $0x24] sm:$0xf] %vm1795_vm10, %v1766_v24  ;;  %v2199_v46 = vpop.f32.mrf.mxu0  ;;  %v3352_v52 = vld [vmem:[#allocation4 + $0x18] sm:$0xff]  ;;  %v3691_v24 = vld [vmem:[%s3771_s26 + $0x38] sm:$0xff] }
 0x8fa   : > { %v2217_v21 = vpack.c.bf16 %v2199_v46, %v2199_v46  ;;  %3298 = vmatmul.msk.bf16.gmra.mxu3 %vm271_vm0, %v3352_v52  ;;  %v2797_v46 = vadd.f32 %v3691_v24, %v5271_v34 }
 0x8fc   : > { %2262 = vrot.lane.b32.xlu2 %v2216_v7, %s3718_s20 }
 0x8fd   : > { %2264 = vrot.lane.b32.xlu1 %v2217_v21, %s3718_s20  ;;  %v3692_v21 = vld [vmem:[%s3771_s26 + $0x40] sm:$0xff] }
 0x901   : > { %v2684_v37 = vpop.f32.mrf.mxu1 }
 0x902   : > { %v2703_v14 = vpack.c.bf16 %v2684_v37, %v2684_v37  ;;  %v2798_v37 = vadd.f32 %v3692_v21, %v5271_v34 }
 0x904   : > { %2749 = vrot.lane.b32.xlu0 %v2703_v14, %s3719_s24 }
 0x909   : > { %v2686_v33 = vpop.f32.mrf.mxu1 }
 0x90a   : > { %v2704_v58 = vpack.c.bf16 %v2686_v33, %v2686_v33 }
 0x90c   : > { %2751 = vrot.lane.b32.xlu2 %v2704_v58, %s3719_s24  ;;  %v3693_v58 = vld [vmem:[%s3771_s26 + $0x48] sm:$0xff] }
 0x916   : > { %v2251_v59 = vpop.permute.xlu2 %2250 }
 0x917   : > { %2291 = vst.msk [vmem:[#allocation4 + $0x20] sm:$0xf] %vm2282_vm11, %v2251_v59  ;;  %v2799_v59 = vadd.f32 %v3693_v58, %v5271_v34 }
 0x927   : > { %v2740_v20 = vpop.permute.xlu2 %2739 }
 0x92f   : > { %v2255_v61 = vpop.permute.xlu2 %2254 }
 0x936   : > { %v2253_v51 = vpop.permute.xlu1 %2252  ;;  %v2738_v13 = vpop.permute.xlu0 %2737 }
 0x937   : > { %2292 = vst.msk [vmem:[#allocation4 + $0x24] sm:$0xf] %vm2282_vm11, %v2253_v51 }
 0x938   : > { %2779 = vst.msk [vmem:[#allocation4 + $0x24] sm:$0xf] %vm2769_vm12, %v2740_v20 }
 0x939   : > { %2778 = vst.msk [vmem:[#allocation4 + $0x20] sm:$0xf] %vm2769_vm12, %v2738_v13  ;;  %v3694_v13 = vld [vmem:[%s3771_s26 + $0x50] sm:$0xff] }
 0x93e   : > { %v1768_v35 = vpop.permute.xlu1 %1767  ;;  %v1770_v43 = vpop.permute.xlu0 %1769 }
 0x93f   : > { %1806 = vst.msk [vmem:[#allocation4 + $0x28] sm:$0xf] %vm1795_vm10, %v1768_v35  ;;  %v2744_v3 = vpop.permute.xlu2 %2743  ;;  %v2800_v35 = vadd.f32 %v3694_v13, %v5271_v34 }
 0x940   : > { %2293 = vst.msk [vmem:[#allocation4 + $0x28] sm:$0xf] %vm2282_vm11, %v2255_v61  ;;  %v3353_v11 = vld [vmem:[#allocation4 + $0x20] sm:$0xff] }
 0x941   : > { %1807 = vst.msk [vmem:[#allocation4 + $0x2c] sm:$0xf] %vm1795_vm10, %v1770_v43  ;;  %3299 = vmatmul.msk.bf16.gmra.mxu3 %vm271_vm0, %v3353_v11  ;;  %v3695_v11 = vld [vmem:[%s3771_s26 + $0x58] sm:$0xff] }
 0x942   : > { %v2801_v22 = vadd.f32 %v3695_v11, %v5271_v34 }
 0x947   : > { %v2259_v10 = vpop.permute.xlu2 %2258 }
 0x948   : > { %v2911_v27 = vpop.f32.mrf.mxu3 }
 0x949   : > { %v2951_v63 = vadd.f32 %v2911_v27, %v2790_v8 }
 0x94b   : > { %2967 = vst.msk [vmem:[%s5280_s10] sm:$0xff] %vm271_vm0, %v2951_v63 }
 0x94e   : > { %v2742_v6 = vpop.permute.xlu0 %2741  ;;  %v2257_v28 = vpop.permute.xlu1 %2256 }
 0x94f   : > { %2780 = vst.msk [vmem:[#allocation4 + $0x28] sm:$0xf] %vm2769_vm12, %v2742_v6  ;;  %v2748_v17 = vpop.permute.xlu2 %2747 }
 0x950   : > { %2294 = vst.msk [vmem:[#allocation4 + $0x2c] sm:$0xf] %vm2282_vm11, %v2257_v28  ;;  %v2913_v60 = vpop.f32.mrf.mxu3 }
 0x951   : > { %2781 = vst.msk [vmem:[#allocation4 + $0x2c] sm:$0xf] %vm2769_vm12, %v2744_v3  ;;  %v2952_v38 = vadd.f32 %v2913_v60, %v2791_v23  ;;  %v3696_v3 = vld [vmem:[%s3771_s26 + $0x60] sm:$0xff]  ;;  %v2803_v23 = vadd.f32 %v3697_v29, %v5271_v34 }
 0x952   : > { %v2802_v63 = vadd.f32 %v3696_v3, %v5271_v34 }
 0x953   : > { %2968 = vst.msk [vmem:[%s5280_s10 + $0x8] sm:$0xff] %vm271_vm0, %v2952_v38 }
 0x956   : > { %v1774_v49 = vpop.permute.xlu0 %1773 }
 0x957   : > { %1809 = vst.msk [vmem:[#allocation4 + $0x34] sm:$0xf] %vm1795_vm10, %v1774_v49  ;;  %v1772_v53 = vpop.permute.xlu1 %1771  ;;  %v2263_v36 = vpop.permute.xlu2 %2262 }
 0x958   : > { %1808 = vst.msk [vmem:[#allocation4 + $0x30] sm:$0xf] %vm1795_vm10, %v1772_v53  ;;  %v3354_v9 = vld [vmem:[#allocation4 + $0x28] sm:$0xff]  ;;  %v2916_v16 = vpop.f32.mrf.mxu3 }
 0x959   : > { %2295 = vst.msk [vmem:[#allocation4 + $0x30] sm:$0xf] %vm2282_vm11, %v2259_v10  ;;  %v2953_v42 = vadd.f32 %v2916_v16, %v2792_v18  ;;  %3300 = vmatmul.msk.bf16.gmra.mxu3 %vm271_vm0, %v3354_v9  ;;  %v3698_v10 = vld [vmem:[%s3771_s26 + $0x70] sm:$0xff]  ;;  %v3699_v53 = vld [vmem:[%s3771_s26 + $0x78] sm:$0xff] }
 0x95a   : > { %v2804_v49 = vadd.f32 %v3698_v10, %v5271_v34  ;;  %v2805_v9 = vadd.f32 %v3699_v53, %v5271_v34 }
 0x95b   : > { %2969 = vst.msk [vmem:[%s5280_s10 + $0x10] sm:$0xff] %vm271_vm0, %v2953_v42 }
 0x95e   : > { %v2746_v5 = vpop.permute.xlu0 %2745 }
 0x95f   : > { %v2261_v56 = vpop.permute.xlu1 %2260  ;;  %2782 = vst.msk [vmem:[#allocation4 + $0x30] sm:$0xf] %vm2769_vm12, %v2746_v5 }
 0x960   : > { %2296 = vst.msk [vmem:[#allocation4 + $0x34] sm:$0xf] %vm2282_vm11, %v2261_v56  ;;  %v2918_v30 = vpop.f32.mrf.mxu3 }
 0x961   : > { %2783 = vst.msk [vmem:[#allocation4 + $0x34] sm:$0xf] %vm2769_vm12, %v2748_v17  ;;  %v2954_v15 = vadd.f32 %v2918_v30, %v2793_v0 }
 0x963   : > { %2970 = vst.msk [vmem:[%s5280_s10 + $0x18] sm:$0xff] %vm271_vm0, %v2954_v15 }
 0x966   : > { %v1778_v57 = vpop.permute.xlu0 %1777  ;;  %v2752_v2 = vpop.permute.xlu2 %2751 }
 0x967   : > { %v1776_v12 = vpop.permute.xlu1 %1775  ;;  %1811 = vst.msk [vmem:[#allocation4 + $0x3c] sm:$0xf] %vm1795_vm10, %v1778_v57 }
 0x968   : > { %1810 = vst.msk [vmem:[#allocation4 + $0x38] sm:$0xf] %vm1795_vm10, %v1776_v12  ;;  %v3355_v47 = vld [vmem:[#allocation4 + $0x30] sm:$0xff] }
 0x969   : > { %2297 = vst.msk [vmem:[#allocation4 + $0x38] sm:$0xf] %vm2282_vm11, %v2263_v36  ;;  %3301 = vmatmul.msk.bf16.gmra.mxu3 %vm271_vm0, %v3355_v47 }
 0x96d   : > { %v2921_v44 = vpop.f32.mrf.mxu3 }
 0x96e   : > { %v2955_v54 = vadd.f32 %v2921_v44, %v2794_v50 }
 0x96f   : > { %v2265_v32 = vpop.permute.xlu1 %2264 }
 0x970   : > { %2298 = vst.msk [vmem:[#allocation4 + $0x3c] sm:$0xf] %vm2282_vm11, %v2265_v32 }
 0x971   : > { %2971 = vst.msk [vmem:[%s5280_s10 + $0x20] sm:$0xff] %vm271_vm0, %v2955_v54 }
 0x972   : > { %2785 = vst.msk [vmem:[#allocation4 + $0x3c] sm:$0xf] %vm2769_vm12, %v2752_v2 }
 0x975   : > { %v2923_v55 = vpop.f32.mrf.mxu3 }
 0x976   : > { %v2750_v4 = vpop.permute.xlu0 %2749  ;;  %v2956_v41 = vadd.f32 %v2923_v55, %v2795_v1 }
 0x977   : > { %2784 = vst.msk [vmem:[#allocation4 + $0x38] sm:$0xf] %vm2769_vm12, %v2750_v4 }
 0x978   : > { %2972 = vst.msk [vmem:[%s5280_s10 + $0x28] sm:$0xff] %vm271_vm0, %v2956_v41 }
 0x97d   : > { %v2926_v45 = vpop.f32.mrf.mxu3 }
 0x97e   : > { %v3356_v62 = vld [vmem:[#allocation4 + $0x38] sm:$0xff]  ;;  %v2957_v31 = vadd.f32 %v2926_v45, %v2796_v19 }
 0x97f   : > { %3302 = vmatmul.msk.bf16.gmra.mxu3 %vm271_vm0, %v3356_v62 }
 0x980   : > { %2973 = vst.msk [vmem:[%s5280_s10 + $0x30] sm:$0xff] %vm271_vm0, %v2957_v31 }
 0x985   : > { %v2928_v52 = vpop.f32.mrf.mxu3 }
 0x986   : > { %v2958_v7 = vadd.f32 %v2928_v52, %v2797_v46 }
 0x988   : > { %2974 = vst.msk [vmem:[%s5280_s10 + $0x38] sm:$0xff] %vm271_vm0, %v2958_v7 }
 0x9c4   : > { %v2931_v14 = vpop.f32.mrf.mxu3 }
 0x9c5   : > { %v2959_v33 = vadd.f32 %v2931_v14, %v2798_v37 }
 0x9c7   : > { %2975 = vst.msk [vmem:[%s5280_s10 + $0x40] sm:$0xff] %vm271_vm0, %v2959_v33 }
 0x9cc   : > { %v2933_v20 = vpop.f32.mrf.mxu3 }
 0x9cd   : > { %v2960_v51 = vadd.f32 %v2933_v20, %v2799_v59 }
 0x9cf   : > { %2976 = vst.msk [vmem:[%s5280_s10 + $0x48] sm:$0xff] %vm271_vm0, %v2960_v51 }
 0x9dc   : > { %v2936_v43 = vpop.f32.mrf.mxu3 }
 0x9dd   : > { %v2961_v61 = vadd.f32 %v2936_v43, %v2800_v35 }
 0x9df   : > { %2977 = vst.msk [vmem:[%s5280_s10 + $0x50] sm:$0xff] %vm271_vm0, %v2961_v61 }
 0x9e4   : > { %v2938_v8 = vpop.f32.mrf.mxu3 }
 0x9e5   : > { %v2962_v27 = vadd.f32 %v2938_v8, %v2801_v22 }
 0x9e7   : > { %2978 = vst.msk [vmem:[%s5280_s10 + $0x58] sm:$0xff] %vm271_vm0, %v2962_v27 }
 0x9ec   : > { %v2941_v6 = vpop.f32.mrf.mxu3 }
 0x9ed   : > { %v2963_v28 = vadd.f32 %v2941_v6, %v2802_v63 }
 0x9ef   : > { %2979 = vst.msk [vmem:[%s5280_s10 + $0x60] sm:$0xff] %vm271_vm0, %v2963_v28 }
 0x9f4   : > { %v2943_v60 = vpop.f32.mrf.mxu3 }
 0x9f5   : > { %v2964_v38 = vadd.f32 %v2943_v60, %v2803_v23 }
 0x9f7   : > { %2980 = vst.msk [vmem:[%s5280_s10 + $0x68] sm:$0xff] %vm271_vm0, %v2964_v38 }
 0xa02   : > { %v2946_v26 = vpop.f32.mrf.mxu3 }
 0xa03   : > { %v2965_v18 = vadd.f32 %v2946_v26, %v2804_v49 }
 0xa05   : > { %2981 = vst.msk [vmem:[%s5280_s10 + $0x70] sm:$0xff] %vm271_vm0, %v2965_v18 }
 0xa0a   : > { %v2948_v16 = vpop.f32.mrf.mxu3 }
 0xa0b   : > { %v2966_v42 = vadd.f32 %v2948_v16, %v2805_v9 }
 0xa0d   : > { %2982 = vst.msk [vmem:[%s5280_s10 + $0x78] sm:$0xff] %vm271_vm0, %v2966_v42 }
 0xa0e PF: > { %s16_s21 = sadd.s32 1, %s3706_s21  }
 0xa0f   : > { %p13_p4 = scmp.ge.s32.totalorder %s16_s21, 4  }
 0xa11   :  { %15 = sbr.rel (!%p13_p4) target bundleno = 1 (0x1), region = 74 }

</bundles_post_ra>
